<compile_context>
chip_gen: v6e
topology: v6e:2x2x1
jax: 0.10.0
libtpu: 0.0.40
codegen_flags: <defaults>
</compile_context>

<pallas_src>
import math

import numpy as np
import jax
import jax.numpy as jnp
from jax.experimental import pallas as pl
from jax.experimental.pallas import tpu as pltpu


_TAPS = tuple((dy, dx) for dy in range(3) for dx in range(3))


# ----------------------------------------------------------------------------
# In-kernel helpers (operate on VMEM-resident values / scratch refs)
# ----------------------------------------------------------------------------

def _stage_into(sbuf, x, W, pad):
    """Write a feature map into the zero-bordered shift buffer center.

    sbuf: VMEM scratch (Cmax, H*W + 2*(W+1)); border columns are kept zero so
    shifted-window loads see the conv's zero padding.
    x: (Ci, H*W) flat, or (Ci, H, W).
    """
    Ci = x.shape[0]
    if x.ndim == 2:
        HW = x.shape[1]
        sbuf[0:Ci, pad:pad + HW] = x
    else:
        H = x.shape[1]
        for h in range(H):
            sbuf[0:Ci, pad + h * W: pad + (h + 1) * W] = x[:, h, :]


def _conv3x3_bn(inputs, w_ref, b_ref, mask, sbuf, patches, H, W):
    """3x3 same-padding conv + folded BatchNorm over the channel-concatenation
    of `inputs` (list of (Ci, H*W) or (Ci, H, W) values).

    Single im2col matmul: patches (9*sum(Ci), H*W) @ folded weights.
    Returns (Cout, H*W) float32 (channels on sublanes, spatial on lanes).
    """
    HW = H * W
    pad = W + 1
    row = 0
    for x in inputs:
        Ci = x.shape[0]
        _stage_into(sbuf, x, W, pad)
        for t, (dy, dx) in enumerate(_TAPS):
            s = (dy - 1) * W + (dx - 1)
            win = sbuf[0:Ci, pad + s: pad + s + HW]            # (Ci, HW)
            patches[row + t * Ci: row + (t + 1) * Ci, 0:HW] = (
                win * mask[t:t + 1, :])
        row += 9 * Ci
    out = jnp.dot(w_ref[...], patches[0:row, 0:HW],
                  preferred_element_type=jnp.float32)          # (Cout, HW)
    return out + b_ref[...]                                    # bias (Cout,1)


def _upsample2x(x, uh_ref, uwT_ref):
    """Separable bilinear (align_corners=True) 2x upsample.

    x: (C, H, W) -> (C, Ho, Wo), float32.  uh_ref: (Ho, H), uwT_ref: (W, Wo).
    """
    C, H, W = x.shape
    uh = uh_ref[...]
    uwT = uwT_ref[...]
    Ho, Wo = uh.shape[0], uwT.shape[1]
    # W axis: one 2D matmul (C*H, W) @ (W, Wo)
    y = jnp.dot(x.reshape(C * H, W), uwT,
                preferred_element_type=jnp.float32).reshape(C, H, Wo)
    # H axis: batched over channels (C, Ho, H) x (C, H, Wo) -> (C, Ho, Wo)
    uh_b = jnp.broadcast_to(uh[None, :, :], (C, Ho, H))
    z = jax.lax.dot_general(uh_b, y,
                            dimension_numbers=(((2,), (1,)), ((0,), (0,))),
                            preferred_element_type=jnp.float32)
    return z


def _unflatten(scratch, x_flat, H, W):
    """(C, H*W) flat value -> (C, H, W) value via a small VMEM staging ref."""
    C = x_flat.shape[0]
    for h in range(H):
        scratch[0:C, h, 0:W] = x_flat[:, h * W:(h + 1) * W]
    return scratch[0:C, 0:H, 0:W]


# ----------------------------------------------------------------------------
# Fused kernel
# ----------------------------------------------------------------------------

def _make_cfm_kernel(C, H1, W1, H2, W2, H3, W3):
    del H1, W1  # only needed implicitly via x1's block shape
    HW2, HW3 = H2 * W2, H3 * W3

    def kernel(*args):
        (x1_ref, x2s_ref, x2f_ref, x3f_ref,
         uh1_ref, uwT1_ref, uh2_ref, uwT2_ref,
         m2_ref, m3_ref, *rest) = args
        wb = rest[:16]                 # (w_flat, bias) pairs for the 8 convs
        o_ref = rest[16]
        sbuf2, sbuf3, patches, stage3d = rest[17:]

        # Zero the shift buffers once per grid step: their (never re-written)
        # border columns provide the conv's zero padding.
        sbuf2[...] = jnp.zeros(sbuf2.shape, jnp.float32)
        sbuf3[...] = jnp.zeros(sbuf3.shape, jnp.float32)

        x1 = x1_ref[0]                 # (C, H1, W1)
        x2s = x2s_ref[0]               # (C, H2, W2)
        x2 = x2f_ref[0]                # (C, HW2)
        x3 = x3f_ref[0]                # (C, HW3)
        m2 = m2_ref[...]               # (9, HW2)
        m3 = m3_ref[...]               # (9, HW3)

        def conv(idx, inputs, level):
            w_ref, b_ref = wb[2 * idx], wb[2 * idx + 1]
            if level == 2:
                return _conv3x3_bn(inputs, w_ref, b_ref, m2, sbuf2, patches,
                                   H2, W2)
            return _conv3x3_bn(inputs, w_ref, b_ref, m3, sbuf3, patches,
                               H3, W3)

        def up12(t):
            return _upsample2x(t, uh1_ref, uwT1_ref)

        def up23(t):
            return _upsample2x(t, uh2_ref, uwT2_ref)

        # conv index: 0 conv_upsample1, 1 conv_upsample2, 2 conv_upsample3,
        #             3 conv_upsample4, 4 conv_upsample5, 5 conv_concat2,
        #             6 conv_concat3, 7 conv4
        # ---- CFM dataflow (BasicConv2d = 3x3 conv + folded BN, no ReLU) ----
        x1_up = up12(x1)                                         # (C, H2, W2)
        x2_1 = conv(0, [x1_up], 2) * x2                          # (C, HW2)
        x1_upup = up23(x1_up)                                    # (C, H3, W3)
        x3_1 = conv(1, [x1_upup], 3) * conv(2, [up23(x2s)], 3) * x3
        # conv_concat2 over [x2_1, conv_upsample4(up(x1))]; weight pre-split
        x2_2 = conv(5, [x2_1, conv(3, [x1_up], 2)], 2)           # (2C, HW2)
        x2_2_3d = _unflatten(stage3d, x2_2, H2, W2)              # (2C, H2, W2)
        # conv_concat3 over [x3_1, conv_upsample5(up(x2_2))]
        x3_2 = conv(6, [x3_1, conv(4, [up23(x2_2_3d)], 3)], 3)   # (3C, HW3)
        out = conv(7, [x3_2], 3)                                 # (C, HW3)
        o_ref[0] = out.astype(o_ref.dtype)

    return kernel


# ----------------------------------------------------------------------------
# Host-side constant / parameter preparation
# ----------------------------------------------------------------------------

def _bilinear_matrix(n_in, n_out):
    """PyTorch bilinear, align_corners=True interpolation matrix (n_out, n_in)."""
    if n_in == 1:
        return jnp.ones((n_out, 1), jnp.float32)
    src = np.arange(n_out, dtype=np.float64) * (n_in - 1) / (n_out - 1)
    i0 = np.clip(np.floor(src).astype(np.int64), 0, n_in - 2)
    frac = (src - i0).astype(np.float32)
    m = np.zeros((n_out, n_in), np.float32)
    r = np.arange(n_out)
    m[r, i0] += 1.0 - frac
    m[r, i0 + 1] += frac
    return jnp.asarray(m)


def _conv_mask(H, W):
    """(9, H*W) validity mask per 3x3 tap (zero where the tap reads padding)."""
    m = np.zeros((9, H * W), np.float32)
    ys, xs = np.meshgrid(np.arange(H), np.arange(W), indexing="ij")
    ys, xs = ys.reshape(-1), xs.reshape(-1)
    for t, (dy, dx) in enumerate(_TAPS):
        oy, ox = dy - 1, dx - 1
        valid = ((ys + oy >= 0) & (ys + oy < H) &
                 (xs + ox >= 0) & (xs + ox < W))
        m[t] = valid.astype(np.float32)
    return jnp.asarray(m)


def _fold_flatten(w_hwio, scale, bias, splits):
    """Fold BN scale into the conv weight and flatten it for the im2col matmul.

    Returns (Cout, 9*Cin) weight (split along Cin into per-input blocks,
    tap-major / channel-minor within each block) and (Cout, 1) bias.
    """
    cout = w_hwio.shape[-1]
    w = w_hwio * scale[None, None, None, :]
    blocks, s = [], 0
    for ci in splits:
        blk = w[:, :, s:s + ci, :].reshape(9 * ci, cout)   # tap-major, ci-minor
        blocks.append(blk.T)                               # (Cout, 9*ci)
        s += ci
    return jnp.concatenate(blocks, axis=1), bias.reshape(cout, 1)


def init_basic_conv(key, cin, cout):
    """Synthetic BasicConv2d params: 3x3 conv (HWIO, no bias) + BN stats."""
    k_w, k_g, k_b, k_m, k_v = jax.random.split(key, 5)
    fan_in = cin * 9
    w = jax.random.normal(k_w, (3, 3, cin, cout), jnp.float32) / math.sqrt(fan_in)
    gamma = 1.0 + 0.1 * jax.random.normal(k_g, (cout,), jnp.float32)
    beta = 0.1 * jax.random.normal(k_b, (cout,), jnp.float32)
    running_mean = 0.1 * jax.random.normal(k_m, (cout,), jnp.float32)
    running_var = 1.0 + 0.1 * jax.random.uniform(k_v, (cout,), jnp.float32)
    eps = 1e-5
    scale = gamma / jnp.sqrt(running_var + eps)
    bias = beta - running_mean * scale
    return {"w": w, "scale": scale, "bias": bias}


def init_cfm_params(key, channel):
    names_io = [
        ("conv_upsample1", channel, channel),
        ("conv_upsample2", channel, channel),
        ("conv_upsample3", channel, channel),
        ("conv_upsample4", channel, channel),
        ("conv_upsample5", 2 * channel, 2 * channel),
        ("conv_concat2", 2 * channel, 2 * channel),
        ("conv_concat3", 3 * channel, 3 * channel),
        ("conv4", 3 * channel, channel),
    ]
    keys = jax.random.split(key, len(names_io))
    return {name: init_basic_conv(k, cin, cout)
            for k, (name, cin, cout) in zip(keys, names_io)}


# ----------------------------------------------------------------------------
# Forward (single fused pallas_call)
# ----------------------------------------------------------------------------

def cfm_forward(params, x1_nchw, x2_nchw, x3_nchw):
    """CFM forward. Inputs/outputs are NCHW (PyTorch layout)."""
    N, C, H1, W1 = x1_nchw.shape
    _, _, H2, W2 = x2_nchw.shape
    _, _, H3, W3 = x3_nchw.shape
    HW2, HW3 = H2 * W2, H3 * W3
    f32 = jnp.float32

    x1 = x1_nchw.astype(f32)                           # (N, C, H1, W1)
    x2s = x2_nchw.astype(f32)                          # (N, C, H2, W2)
    x2f = x2_nchw.reshape(N, C, HW2).astype(f32)       # lane-dense flat view
    x3f = x3_nchw.reshape(N, C, HW3).astype(f32)

    # Separable bilinear (align_corners=True) interpolation matrices.
    uh1 = _bilinear_matrix(H1, H2)                     # (H2, H1)
    uwT1 = _bilinear_matrix(W1, W2).T                  # (W1, W2)
    uh2 = _bilinear_matrix(H2, H3)                     # (H3, H2)
    uwT2 = _bilinear_matrix(W2, W3).T                  # (W2, W3)

    m2 = _conv_mask(H2, W2)                            # (9, HW2)
    m3 = _conv_mask(H3, W3)                            # (9, HW3)

    conv_defs = [
        ("conv_upsample1", (C,)),
        ("conv_upsample2", (C,)),
        ("conv_upsample3", (C,)),
        ("conv_upsample4", (C,)),
        ("conv_upsample5", (2 * C,)),
        ("conv_concat2", (C, C)),
        ("conv_concat3", (C, 2 * C)),
        ("conv4", (3 * C,)),
    ]
    wb = []
    for name, splits in conv_defs:
        p = params[name]
        w_flat, bias = _fold_flatten(p["w"], p["scale"], p["bias"], splits)
        wb += [w_flat, bias]

    inputs = [x1, x2s, x2f, x3f, uh1, uwT1, uh2, uwT2, m2, m3] + wb

    def batch_spec(tail):
        nd = len(tail)
        return pl.BlockSpec((1,) + tuple(tail),
                            lambda n, _nd=nd: (n,) + (0,) * _nd)

    def rep_spec(shape):
        nd = len(shape)
        return pl.BlockSpec(tuple(shape), lambda n, _nd=nd: (0,) * _nd)

    in_specs = [batch_spec((C, H1, W1)), batch_spec((C, H2, W2)),
                batch_spec((C, HW2)), batch_spec((C, HW3))]
    in_specs += [rep_spec(a.shape) for a in inputs[4:]]

    kernel = _make_cfm_kernel(C, H1, W1, H2, W2, H3, W3)

    out_flat = pl.pallas_call(
        kernel,
        out_shape=jax.ShapeDtypeStruct((N, C, HW3), f32),
        grid=(N,),
        in_specs=in_specs,
        out_specs=pl.BlockSpec((1, C, HW3), lambda n: (n, 0, 0)),
        scratch_shapes=[
            pltpu.VMEM((C, HW2 + 2 * (W2 + 1)), f32),        # level-2 shift buf
            pltpu.VMEM((3 * C, HW3 + 2 * (W3 + 1)), f32),    # level-3 shift buf
            pltpu.VMEM((9 * 3 * C, HW3), f32),               # im2col patches
            pltpu.VMEM((2 * C, H2, W2), f32),                # flat->3D staging
        ],
        compiler_params=pltpu.CompilerParams(
            dimension_semantics=("parallel",)),
    )(*inputs)
    return out_flat.reshape(N, C, H3, W3)


# ----------------------------------------------------------------------------
# Main
# ----------------------------------------------------------------------------

if __name__ == "__main__":
    channel = 4
    N = 2
    H1 = W1 = 4          # x1 lowest-resolution feature map
    key = jax.random.PRNGKey(0)
    k_p, k1, k2, k3 = jax.random.split(key, 4)

    params = init_cfm_params(k_p, channel)

    x1 = jax.random.normal(k1, (N, channel, H1, W1), jnp.float32)
    x2 = jax.random.normal(k2, (N, channel, 2 * H1, 2 * W1), jnp.float32)
    x3 = jax.random.normal(k3, (N, channel, 4 * H1, 4 * W1), jnp.float32)

    out = jax.jit(cfm_forward)(params, x1, x2, x3)
    out = jax.block_until_ready(out)

    assert out.shape == (N, channel, 4 * H1, 4 * W1), out.shape
    assert bool(jnp.all(jnp.isfinite(out)))
    print("KERNEL_OK")
</pallas_src>

<mosaic_0001>
module attributes {stable_mosaic.version = 11 : i64} {
  func.func @kernel(%arg0: i32, %arg1: memref<1x4x4x4xf32, #tpu.memory_space<vmem>>, %arg2: memref<1x4x8x8xf32, #tpu.memory_space<vmem>>, %arg3: memref<1x4x64xf32, #tpu.memory_space<vmem>>, %arg4: memref<1x4x256xf32, #tpu.memory_space<vmem>>, %arg5: memref<8x4xf32, #tpu.memory_space<vmem>>, %arg6: memref<4x8xf32, #tpu.memory_space<vmem>>, %arg7: memref<16x8xf32, #tpu.memory_space<vmem>>, %arg8: memref<8x16xf32, #tpu.memory_space<vmem>>, %arg9: memref<9x64xf32, #tpu.memory_space<vmem>>, %arg10: memref<9x256xf32, #tpu.memory_space<vmem>>, %arg11: memref<4x36xf32, #tpu.memory_space<vmem>>, %arg12: memref<4x1xf32, #tpu.memory_space<vmem>>, %arg13: memref<4x36xf32, #tpu.memory_space<vmem>>, %arg14: memref<4x1xf32, #tpu.memory_space<vmem>>, %arg15: memref<4x36xf32, #tpu.memory_space<vmem>>, %arg16: memref<4x1xf32, #tpu.memory_space<vmem>>, %arg17: memref<4x36xf32, #tpu.memory_space<vmem>>, %arg18: memref<4x1xf32, #tpu.memory_space<vmem>>, %arg19: memref<8x72xf32, #tpu.memory_space<vmem>>, %arg20: memref<8x1xf32, #tpu.memory_space<vmem>>, %arg21: memref<8x72xf32, #tpu.memory_space<vmem>>, %arg22: memref<8x1xf32, #tpu.memory_space<vmem>>, %arg23: memref<12x108xf32, #tpu.memory_space<vmem>>, %arg24: memref<12x1xf32, #tpu.memory_space<vmem>>, %arg25: memref<4x108xf32, #tpu.memory_space<vmem>>, %arg26: memref<4x1xf32, #tpu.memory_space<vmem>>, %arg27: memref<1x4x256xf32, #tpu.memory_space<vmem>>, %arg28: memref<4x82xf32, #tpu.memory_space<vmem>>, %arg29: memref<12x290xf32, #tpu.memory_space<vmem>>, %arg30: memref<108x256xf32, #tpu.memory_space<vmem>>, %arg31: memref<8x8x8xf32, #tpu.memory_space<vmem>>) attributes {dimension_semantics = [#tpu.dimension_semantics<parallel>], iteration_bounds = array<i64: 2>, scalar_prefetch = 0 : i64, scratch_operands = 4 : i64, tpu.core_type = #tpu.core_type<tc>, window_params = [{transform_indices = @transform_0, window_bounds = array<i64: 1, 4, 4, 4>}, {transform_indices = @transform_1, window_bounds = array<i64: 1, 4, 8, 8>}, {transform_indices = @transform_2, window_bounds = array<i64: 1, 4, 64>}, {transform_indices = @transform_3, window_bounds = array<i64: 1, 4, 256>}, {pipeline_mode = #tpu.pipeline_mode<synchronous>, transform_indices = @transform_4, window_bounds = array<i64: 8, 4>}, {pipeline_mode = #tpu.pipeline_mode<synchronous>, transform_indices = @transform_5, window_bounds = array<i64: 4, 8>}, {pipeline_mode = #tpu.pipeline_mode<synchronous>, transform_indices = @transform_6, window_bounds = array<i64: 16, 8>}, {pipeline_mode = #tpu.pipeline_mode<synchronous>, transform_indices = @transform_7, window_bounds = array<i64: 8, 16>}, {pipeline_mode = #tpu.pipeline_mode<synchronous>, transform_indices = @transform_8, window_bounds = array<i64: 9, 64>}, {pipeline_mode = #tpu.pipeline_mode<synchronous>, transform_indices = @transform_9, window_bounds = array<i64: 9, 256>}, {pipeline_mode = #tpu.pipeline_mode<synchronous>, transform_indices = @transform_10, window_bounds = array<i64: 4, 36>}, {pipeline_mode = #tpu.pipeline_mode<synchronous>, transform_indices = @transform_11, window_bounds = array<i64: 4, 1>}, {pipeline_mode = #tpu.pipeline_mode<synchronous>, transform_indices = @transform_12, window_bounds = array<i64: 4, 36>}, {pipeline_mode = #tpu.pipeline_mode<synchronous>, transform_indices = @transform_13, window_bounds = array<i64: 4, 1>}, {pipeline_mode = #tpu.pipeline_mode<synchronous>, transform_indices = @transform_14, window_bounds = array<i64: 4, 36>}, {pipeline_mode = #tpu.pipeline_mode<synchronous>, transform_indices = @transform_15, window_bounds = array<i64: 4, 1>}, {pipeline_mode = #tpu.pipeline_mode<synchronous>, transform_indices = @transform_16, window_bounds = array<i64: 4, 36>}, {pipeline_mode = #tpu.pipeline_mode<synchronous>, transform_indices = @transform_17, window_bounds = array<i64: 4, 1>}, {pipeline_mode = #tpu.pipeline_mode<synchronous>, transform_indices = @transform_18, window_bounds = array<i64: 8, 72>}, {pipeline_mode = #tpu.pipeline_mode<synchronous>, transform_indices = @transform_19, window_bounds = array<i64: 8, 1>}, {pipeline_mode = #tpu.pipeline_mode<synchronous>, transform_indices = @transform_20, window_bounds = array<i64: 8, 72>}, {pipeline_mode = #tpu.pipeline_mode<synchronous>, transform_indices = @transform_21, window_bounds = array<i64: 8, 1>}, {pipeline_mode = #tpu.pipeline_mode<synchronous>, transform_indices = @transform_22, window_bounds = array<i64: 12, 108>}, {pipeline_mode = #tpu.pipeline_mode<synchronous>, transform_indices = @transform_23, window_bounds = array<i64: 12, 1>}, {pipeline_mode = #tpu.pipeline_mode<synchronous>, transform_indices = @transform_24, window_bounds = array<i64: 4, 108>}, {pipeline_mode = #tpu.pipeline_mode<synchronous>, transform_indices = @transform_25, window_bounds = array<i64: 4, 1>}, {transform_indices = @transform_26, window_bounds = array<i64: 1, 4, 256>}]} {
    %cst = arith.constant 0.000000e+00 : f32
    %0 = vector.broadcast %cst : f32 to vector<4x82xf32>
    %c0 = arith.constant 0 : index
    %c0_0 = arith.constant 0 : index
    %1 = vector.load %arg28[%c0, %c0_0] : memref<4x82xf32, #tpu.memory_space<vmem>>, vector<4x82xf32>
    tpu.vector_store %arg28[%c0, %c0_0], %0 {strides = array<i32>} : memref<4x82xf32, #tpu.memory_space<vmem>>, vector<4x82xf32>,
    %cst_1 = arith.constant 0.000000e+00 : f32
    %2 = vector.broadcast %cst_1 : f32 to vector<12x290xf32>
    %c0_2 = arith.constant 0 : index
    %c0_3 = arith.constant 0 : index
    %3 = vector.load %arg29[%c0_2, %c0_3] : memref<12x290xf32, #tpu.memory_space<vmem>>, vector<12x290xf32>
    tpu.vector_store %arg29[%c0_2, %c0_3], %2 {strides = array<i32>} : memref<12x290xf32, #tpu.memory_space<vmem>>, vector<12x290xf32>,
    %c0_4 = arith.constant 0 : index
    %c0_5 = arith.constant 0 : index
    %c0_6 = arith.constant 0 : index
    %c0_7 = arith.constant 0 : index
    %4 = vector.load %arg1[%c0_4, %c0_5, %c0_6, %c0_7] : memref<1x4x4x4xf32, #tpu.memory_space<vmem>>, vector<1x4x4x4xf32>
    %5 = vector.shape_cast %4 : vector<1x4x4x4xf32> to vector<4x4x4xf32>
    %c0_8 = arith.constant 0 : index
    %c0_9 = arith.constant 0 : index
    %c0_10 = arith.constant 0 : index
    %c0_11 = arith.constant 0 : index
    %6 = vector.load %arg2[%c0_8, %c0_9, %c0_10, %c0_11] : memref<1x4x8x8xf32, #tpu.memory_space<vmem>>, vector<1x4x8x8xf32>
    %7 = vector.shape_cast %6 : vector<1x4x8x8xf32> to vector<4x8x8xf32>
    %c0_12 = arith.constant 0 : index
    %c0_13 = arith.constant 0 : index
    %c0_14 = arith.constant 0 : index
    %8 = vector.load %arg3[%c0_12, %c0_13, %c0_14] : memref<1x4x64xf32, #tpu.memory_space<vmem>>, vector<1x4x64xf32>
    %9 = vector.shape_cast %8 : vector<1x4x64xf32> to vector<4x64xf32>
    %c0_15 = arith.constant 0 : index
    %c0_16 = arith.constant 0 : index
    %c0_17 = arith.constant 0 : index
    %10 = vector.load %arg4[%c0_15, %c0_16, %c0_17] : memref<1x4x256xf32, #tpu.memory_space<vmem>>, vector<1x4x256xf32>
    %11 = vector.shape_cast %10 : vector<1x4x256xf32> to vector<4x256xf32>
    %c0_18 = arith.constant 0 : index
    %c0_19 = arith.constant 0 : index
    %12 = vector.load %arg9[%c0_18, %c0_19] : memref<9x64xf32, #tpu.memory_space<vmem>>, vector<9x64xf32>
    %c0_20 = arith.constant 0 : index
    %c0_21 = arith.constant 0 : index
    %13 = vector.load %arg10[%c0_20, %c0_21] : memref<9x256xf32, #tpu.memory_space<vmem>>, vector<9x256xf32>
    %c0_22 = arith.constant 0 : index
    %c0_23 = arith.constant 0 : index
    %14 = vector.load %arg5[%c0_22, %c0_23] : memref<8x4xf32, #tpu.memory_space<vmem>>, vector<8x4xf32>
    %c0_24 = arith.constant 0 : index
    %c0_25 = arith.constant 0 : index
    %15 = vector.load %arg6[%c0_24, %c0_25] : memref<4x8xf32, #tpu.memory_space<vmem>>, vector<4x8xf32>
    %16 = vector.shape_cast %5 : vector<4x4x4xf32> to vector<16x4xf32>
    %cst_26 = arith.constant dense<0.000000e+00> : vector<16x8xf32>
    %17 = tpu.matmul %16, %15, %cst_26 {dimension_numbers = #tpu.dot_dimension_numbers<[1], [0], [0], [1], [0, 0, 1, 1], [], []>} : vector<16x4xf32>, vector<4x8xf32>, vector<16x8xf32> -> vector<16x8xf32>
    %18 = vector.shape_cast %17 : vector<16x8xf32> to vector<4x4x8xf32>
    %19 = vector.shape_cast %14 : vector<8x4xf32> to vector<1x8x4xf32>
    %20 = vector.shape_cast %19 : vector<1x8x4xf32> to vector<1x8x4xf32>
    %21 = vector.broadcast %20 : vector<1x8x4xf32> to vector<4x8x4xf32>
    %cst_27 = arith.constant dense<0.000000e+00> : vector<4x8x8xf32>
    %22 = tpu.matmul %21, %18, %cst_27 {dimension_numbers = #tpu.dot_dimension_numbers<[2], [1], [1], [2], [0, 0, 0, 1, 1, 2], [0], [0]>} : vector<4x8x4xf32>, vector<4x4x8xf32>, vector<4x8x8xf32> -> vector<4x8x8xf32>
    %23 = vector.extract_strided_slice %22 {offsets = [0, 0, 0], sizes = [4, 1, 8], strides = [1, 1, 1]} : vector<4x8x8xf32> to vector<4x1x8xf32>
    %24 = vector.shape_cast %23 : vector<4x1x8xf32> to vector<4x8xf32>
    %c0_28 = arith.constant 0 : index
    %c9 = arith.constant 9 : index
    %25 = vector.load %arg28[%c0_28, %c9] : memref<4x82xf32, #tpu.memory_space<vmem>>, vector<4x8xf32>
    tpu.vector_store %arg28[%c0_28, %c9], %24 {strides = array<i32>} : memref<4x82xf32, #tpu.memory_space<vmem>>, vector<4x8xf32>,
    %26 = vector.extract_strided_slice %22 {offsets = [0, 1, 0], sizes = [4, 1, 8], strides = [1, 1, 1]} : vector<4x8x8xf32> to vector<4x1x8xf32>
    %27 = vector.shape_cast %26 : vector<4x1x8xf32> to vector<4x8xf32>
    %c0_29 = arith.constant 0 : index
    %c17 = arith.constant 17 : index
    %28 = vector.load %arg28[%c0_29, %c17] : memref<4x82xf32, #tpu.memory_space<vmem>>, vector<4x8xf32>
    tpu.vector_store %arg28[%c0_29, %c17], %27 {strides = array<i32>} : memref<4x82xf32, #tpu.memory_space<vmem>>, vector<4x8xf32>,
    %29 = vector.extract_strided_slice %22 {offsets = [0, 2, 0], sizes = [4, 1, 8], strides = [1, 1, 1]} : vector<4x8x8xf32> to vector<4x1x8xf32>
    %30 = vector.shape_cast %29 : vector<4x1x8xf32> to vector<4x8xf32>
    %c0_30 = arith.constant 0 : index
    %c25 = arith.constant 25 : index
    %31 = vector.load %arg28[%c0_30, %c25] : memref<4x82xf32, #tpu.memory_space<vmem>>, vector<4x8xf32>
    tpu.vector_store %arg28[%c0_30, %c25], %30 {strides = array<i32>} : memref<4x82xf32, #tpu.memory_space<vmem>>, vector<4x8xf32>,
    %32 = vector.extract_strided_slice %22 {offsets = [0, 3, 0], sizes = [4, 1, 8], strides = [1, 1, 1]} : vector<4x8x8xf32> to vector<4x1x8xf32>
    %33 = vector.shape_cast %32 : vector<4x1x8xf32> to vector<4x8xf32>
    %c0_31 = arith.constant 0 : index
    %c33 = arith.constant 33 : index
    %34 = vector.load %arg28[%c0_31, %c33] : memref<4x82xf32, #tpu.memory_space<vmem>>, vector<4x8xf32>
    tpu.vector_store %arg28[%c0_31, %c33], %33 {strides = array<i32>} : memref<4x82xf32, #tpu.memory_space<vmem>>, vector<4x8xf32>,
    %35 = vector.extract_strided_slice %22 {offsets = [0, 4, 0], sizes = [4, 1, 8], strides = [1, 1, 1]} : vector<4x8x8xf32> to vector<4x1x8xf32>
    %36 = vector.shape_cast %35 : vector<4x1x8xf32> to vector<4x8xf32>
    %c0_32 = arith.constant 0 : index
    %c41 = arith.constant 41 : index
    %37 = vector.load %arg28[%c0_32, %c41] : memref<4x82xf32, #tpu.memory_space<vmem>>, vector<4x8xf32>
    tpu.vector_store %arg28[%c0_32, %c41], %36 {strides = array<i32>} : memref<4x82xf32, #tpu.memory_space<vmem>>, vector<4x8xf32>,
    %38 = vector.extract_strided_slice %22 {offsets = [0, 5, 0], sizes = [4, 1, 8], strides = [1, 1, 1]} : vector<4x8x8xf32> to vector<4x1x8xf32>
    %39 = vector.shape_cast %38 : vector<4x1x8xf32> to vector<4x8xf32>
    %c0_33 = arith.constant 0 : index
    %c49 = arith.constant 49 : index
    %40 = vector.load %arg28[%c0_33, %c49] : memref<4x82xf32, #tpu.memory_space<vmem>>, vector<4x8xf32>
    tpu.vector_store %arg28[%c0_33, %c49], %39 {strides = array<i32>} : memref<4x82xf32, #tpu.memory_space<vmem>>, vector<4x8xf32>,
    %41 = vector.extract_strided_slice %22 {offsets = [0, 6, 0], sizes = [4, 1, 8], strides = [1, 1, 1]} : vector<4x8x8xf32> to vector<4x1x8xf32>
    %42 = vector.shape_cast %41 : vector<4x1x8xf32> to vector<4x8xf32>
    %c0_34 = arith.constant 0 : index
    %c57 = arith.constant 57 : index
    %43 = vector.load %arg28[%c0_34, %c57] : memref<4x82xf32, #tpu.memory_space<vmem>>, vector<4x8xf32>
    tpu.vector_store %arg28[%c0_34, %c57], %42 {strides = array<i32>} : memref<4x82xf32, #tpu.memory_space<vmem>>, vector<4x8xf32>,
    %44 = vector.extract_strided_slice %22 {offsets = [0, 7, 0], sizes = [4, 1, 8], strides = [1, 1, 1]} : vector<4x8x8xf32> to vector<4x1x8xf32>
    %45 = vector.shape_cast %44 : vector<4x1x8xf32> to vector<4x8xf32>
    %c0_35 = arith.constant 0 : index
    %c65 = arith.constant 65 : index
    %46 = vector.load %arg28[%c0_35, %c65] : memref<4x82xf32, #tpu.memory_space<vmem>>, vector<4x8xf32>
    tpu.vector_store %arg28[%c0_35, %c65], %45 {strides = array<i32>} : memref<4x82xf32, #tpu.memory_space<vmem>>, vector<4x8xf32>,
    %c0_36 = arith.constant 0 : index
    %c0_37 = arith.constant 0 : index
    %47 = vector.load %arg28[%c0_36, %c0_37] : memref<4x82xf32, #tpu.memory_space<vmem>>, vector<4x64xf32>
    %48 = vector.extract_strided_slice %12 {offsets = [0, 0], sizes = [1, 64], strides = [1, 1]} : vector<9x64xf32> to vector<1x64xf32>
    %49 = vector.broadcast %48 : vector<1x64xf32> to vector<4x64xf32>
    %50 = arith.mulf %47, %49 : vector<4x64xf32>
    %c0_38 = arith.constant 0 : index
    %c0_39 = arith.constant 0 : index
    %51 = vector.load %arg30[%c0_38, %c0_39] : memref<108x256xf32, #tpu.memory_space<vmem>>, vector<4x64xf32>
    tpu.vector_store %arg30[%c0_38, %c0_39], %50 {strides = array<i32>} : memref<108x256xf32, #tpu.memory_space<vmem>>, vector<4x64xf32>,
    %c0_40 = arith.constant 0 : index
    %c1 = arith.constant 1 : index
    %52 = vector.load %arg28[%c0_40, %c1] : memref<4x82xf32, #tpu.memory_space<vmem>>, vector<4x64xf32>
    %53 = vector.extract_strided_slice %12 {offsets = [1, 0], sizes = [1, 64], strides = [1, 1]} : vector<9x64xf32> to vector<1x64xf32>
    %54 = vector.broadcast %53 : vector<1x64xf32> to vector<4x64xf32>
    %55 = arith.mulf %52, %54 : vector<4x64xf32>
    %c4 = arith.constant 4 : index
    %c0_41 = arith.constant 0 : index
    %56 = vector.load %arg30[%c4, %c0_41] : memref<108x256xf32, #tpu.memory_space<vmem>>, vector<4x64xf32>
    tpu.vector_store %arg30[%c4, %c0_41], %55 {strides = array<i32>} : memref<108x256xf32, #tpu.memory_space<vmem>>, vector<4x64xf32>,
    %c0_42 = arith.constant 0 : index
    %c2 = arith.constant 2 : index
    %57 = vector.load %arg28[%c0_42, %c2] : memref<4x82xf32, #tpu.memory_space<vmem>>, vector<4x64xf32>
    %58 = vector.extract_strided_slice %12 {offsets = [2, 0], sizes = [1, 64], strides = [1, 1]} : vector<9x64xf32> to vector<1x64xf32>
    %59 = vector.broadcast %58 : vector<1x64xf32> to vector<4x64xf32>
    %60 = arith.mulf %57, %59 : vector<4x64xf32>
    %c8 = arith.constant 8 : index
    %c0_43 = arith.constant 0 : index
    %61 = vector.load %arg30[%c8, %c0_43] : memref<108x256xf32, #tpu.memory_space<vmem>>, vector<4x64xf32>
    tpu.vector_store %arg30[%c8, %c0_43], %60 {strides = array<i32>} : memref<108x256xf32, #tpu.memory_space<vmem>>, vector<4x64xf32>,
    %c0_44 = arith.constant 0 : index
    %c8_45 = arith.constant 8 : index
    %62 = vector.load %arg28[%c0_44, %c8_45] : memref<4x82xf32, #tpu.memory_space<vmem>>, vector<4x64xf32>
    %63 = vector.extract_strided_slice %12 {offsets = [3, 0], sizes = [1, 64], strides = [1, 1]} : vector<9x64xf32> to vector<1x64xf32>
    %64 = vector.broadcast %63 : vector<1x64xf32> to vector<4x64xf32>
    %65 = arith.mulf %62, %64 : vector<4x64xf32>
    %c12 = arith.constant 12 : index
    %c0_46 = arith.constant 0 : index
    %66 = vector.load %arg30[%c12, %c0_46] : memref<108x256xf32, #tpu.memory_space<vmem>>, vector<4x64xf32>
    tpu.vector_store %arg30[%c12, %c0_46], %65 {strides = array<i32>} : memref<108x256xf32, #tpu.memory_space<vmem>>, vector<4x64xf32>,
    %c0_47 = arith.constant 0 : index
    %c9_48 = arith.constant 9 : index
    %67 = vector.load %arg28[%c0_47, %c9_48] : memref<4x82xf32, #tpu.memory_space<vmem>>, vector<4x64xf32>
    %68 = vector.extract_strided_slice %12 {offsets = [4, 0], sizes = [1, 64], strides = [1, 1]} : vector<9x64xf32> to vector<1x64xf32>
    %69 = vector.broadcast %68 : vector<1x64xf32> to vector<4x64xf32>
    %70 = arith.mulf %67, %69 : vector<4x64xf32>
    %c16 = arith.constant 16 : index
    %c0_49 = arith.constant 0 : index
    %71 = vector.load %arg30[%c16, %c0_49] : memref<108x256xf32, #tpu.memory_space<vmem>>, vector<4x64xf32>
    tpu.vector_store %arg30[%c16, %c0_49], %70 {strides = array<i32>} : memref<108x256xf32, #tpu.memory_space<vmem>>, vector<4x64xf32>,
    %c0_50 = arith.constant 0 : index
    %c10 = arith.constant 10 : index
    %72 = vector.load %arg28[%c0_50, %c10] : memref<4x82xf32, #tpu.memory_space<vmem>>, vector<4x64xf32>
    %73 = vector.extract_strided_slice %12 {offsets = [5, 0], sizes = [1, 64], strides = [1, 1]} : vector<9x64xf32> to vector<1x64xf32>
    %74 = vector.broadcast %73 : vector<1x64xf32> to vector<4x64xf32>
    %75 = arith.mulf %72, %74 : vector<4x64xf32>
    %c20 = arith.constant 20 : index
    %c0_51 = arith.constant 0 : index
    %76 = vector.load %arg30[%c20, %c0_51] : memref<108x256xf32, #tpu.memory_space<vmem>>, vector<4x64xf32>
    tpu.vector_store %arg30[%c20, %c0_51], %75 {strides = array<i32>} : memref<108x256xf32, #tpu.memory_space<vmem>>, vector<4x64xf32>,
    %c0_52 = arith.constant 0 : index
    %c16_53 = arith.constant 16 : index
    %77 = vector.load %arg28[%c0_52, %c16_53] : memref<4x82xf32, #tpu.memory_space<vmem>>, vector<4x64xf32>
    %78 = vector.extract_strided_slice %12 {offsets = [6, 0], sizes = [1, 64], strides = [1, 1]} : vector<9x64xf32> to vector<1x64xf32>
    %79 = vector.broadcast %78 : vector<1x64xf32> to vector<4x64xf32>
    %80 = arith.mulf %77, %79 : vector<4x64xf32>
    %c24 = arith.constant 24 : index
    %c0_54 = arith.constant 0 : index
    %81 = vector.load %arg30[%c24, %c0_54] : memref<108x256xf32, #tpu.memory_space<vmem>>, vector<4x64xf32>
    tpu.vector_store %arg30[%c24, %c0_54], %80 {strides = array<i32>} : memref<108x256xf32, #tpu.memory_space<vmem>>, vector<4x64xf32>,
    %c0_55 = arith.constant 0 : index
    %c17_56 = arith.constant 17 : index
    %82 = vector.load %arg28[%c0_55, %c17_56] : memref<4x82xf32, #tpu.memory_space<vmem>>, vector<4x64xf32>
    %83 = vector.extract_strided_slice %12 {offsets = [7, 0], sizes = [1, 64], strides = [1, 1]} : vector<9x64xf32> to vector<1x64xf32>
    %84 = vector.broadcast %83 : vector<1x64xf32> to vector<4x64xf32>
    %85 = arith.mulf %82, %84 : vector<4x64xf32>
    %c28 = arith.constant 28 : index
    %c0_57 = arith.constant 0 : index
    %86 = vector.load %arg30[%c28, %c0_57] : memref<108x256xf32, #tpu.memory_space<vmem>>, vector<4x64xf32>
    tpu.vector_store %arg30[%c28, %c0_57], %85 {strides = array<i32>} : memref<108x256xf32, #tpu.memory_space<vmem>>, vector<4x64xf32>,
    %c0_58 = arith.constant 0 : index
    %c18 = arith.constant 18 : index
    %87 = vector.load %arg28[%c0_58, %c18] : memref<4x82xf32, #tpu.memory_space<vmem>>, vector<4x64xf32>
    %88 = vector.extract_strided_slice %12 {offsets = [8, 0], sizes = [1, 64], strides = [1, 1]} : vector<9x64xf32> to vector<1x64xf32>
    %89 = vector.broadcast %88 : vector<1x64xf32> to vector<4x64xf32>
    %90 = arith.mulf %87, %89 : vector<4x64xf32>
    %c32 = arith.constant 32 : index
    %c0_59 = arith.constant 0 : index
    %91 = vector.load %arg30[%c32, %c0_59] : memref<108x256xf32, #tpu.memory_space<vmem>>, vector<4x64xf32>
    tpu.vector_store %arg30[%c32, %c0_59], %90 {strides = array<i32>} : memref<108x256xf32, #tpu.memory_space<vmem>>, vector<4x64xf32>,
    %c0_60 = arith.constant 0 : index
    %c0_61 = arith.constant 0 : index
    %92 = vector.load %arg11[%c0_60, %c0_61] : memref<4x36xf32, #tpu.memory_space<vmem>>, vector<4x36xf32>
    %c0_62 = arith.constant 0 : index
    %c0_63 = arith.constant 0 : index
    %93 = vector.load %arg30[%c0_62, %c0_63] : memref<108x256xf32, #tpu.memory_space<vmem>>, vector<36x64xf32>
    %cst_64 = arith.constant dense<0.000000e+00> : vector<4x64xf32>
    %94 = tpu.matmul %92, %93, %cst_64 {dimension_numbers = #tpu.dot_dimension_numbers<[1], [0], [0], [1], [0, 0, 1, 1], [], []>} : vector<4x36xf32>, vector<36x64xf32>, vector<4x64xf32> -> vector<4x64xf32>
    %c0_65 = arith.constant 0 : index
    %c0_66 = arith.constant 0 : index
    %95 = vector.load %arg12[%c0_65, %c0_66] : memref<4x1xf32, #tpu.memory_space<vmem>>, vector<4x1xf32>
    %96 = vector.broadcast %95 : vector<4x1xf32> to vector<4x64xf32>
    %97 = arith.addf %94, %96 : vector<4x64xf32>
    %98 = arith.mulf %97, %9 : vector<4x64xf32>
    %c0_67 = arith.constant 0 : index
    %c0_68 = arith.constant 0 : index
    %99 = vector.load %arg7[%c0_67, %c0_68] : memref<16x8xf32, #tpu.memory_space<vmem>>, vector<16x8xf32>
    %c0_69 = arith.constant 0 : index
    %c0_70 = arith.constant 0 : index
    %100 = vector.load %arg8[%c0_69, %c0_70] : memref<8x16xf32, #tpu.memory_space<vmem>>, vector<8x16xf32>
    %101 = vector.shape_cast %22 : vector<4x8x8xf32> to vector<32x8xf32>
    %cst_71 = arith.constant dense<0.000000e+00> : vector<32x16xf32>
    %102 = tpu.matmul %101, %100, %cst_71 {dimension_numbers = #tpu.dot_dimension_numbers<[1], [0], [0], [1], [0, 0, 1, 1], [], []>} : vector<32x8xf32>, vector<8x16xf32>, vector<32x16xf32> -> vector<32x16xf32>
    %103 = vector.shape_cast %102 : vector<32x16xf32> to vector<4x8x16xf32>
    %104 = vector.shape_cast %99 : vector<16x8xf32> to vector<1x16x8xf32>
    %105 = vector.shape_cast %104 : vector<1x16x8xf32> to vector<1x16x8xf32>
    %106 = vector.broadcast %105 : vector<1x16x8xf32> to vector<4x16x8xf32>
    %cst_72 = arith.constant dense<0.000000e+00> : vector<4x16x16xf32>
    %107 = tpu.matmul %106, %103, %cst_72 {dimension_numbers = #tpu.dot_dimension_numbers<[2], [1], [1], [2], [0, 0, 0, 1, 1, 2], [0], [0]>} : vector<4x16x8xf32>, vector<4x8x16xf32>, vector<4x16x16xf32> -> vector<4x16x16xf32>
    %108 = vector.extract_strided_slice %107 {offsets = [0, 0, 0], sizes = [4, 1, 16], strides = [1, 1, 1]} : vector<4x16x16xf32> to vector<4x1x16xf32>
    %109 = vector.shape_cast %108 : vector<4x1x16xf32> to vector<4x16xf32>
    %c0_73 = arith.constant 0 : index
    %c17_74 = arith.constant 17 : index
    %110 = vector.load %arg29[%c0_73, %c17_74] : memref<12x290xf32, #tpu.memory_space<vmem>>, vector<4x16xf32>
    tpu.vector_store %arg29[%c0_73, %c17_74], %109 {strides = array<i32>} : memref<12x290xf32, #tpu.memory_space<vmem>>, vector<4x16xf32>,
    %111 = vector.extract_strided_slice %107 {offsets = [0, 1, 0], sizes = [4, 1, 16], strides = [1, 1, 1]} : vector<4x16x16xf32> to vector<4x1x16xf32>
    %112 = vector.shape_cast %111 : vector<4x1x16xf32> to vector<4x16xf32>
    %c0_75 = arith.constant 0 : index
    %c33_76 = arith.constant 33 : index
    %113 = vector.load %arg29[%c0_75, %c33_76] : memref<12x290xf32, #tpu.memory_space<vmem>>, vector<4x16xf32>
    tpu.vector_store %arg29[%c0_75, %c33_76], %112 {strides = array<i32>} : memref<12x290xf32, #tpu.memory_space<vmem>>, vector<4x16xf32>,
    %114 = vector.extract_strided_slice %107 {offsets = [0, 2, 0], sizes = [4, 1, 16], strides = [1, 1, 1]} : vector<4x16x16xf32> to vector<4x1x16xf32>
    %115 = vector.shape_cast %114 : vector<4x1x16xf32> to vector<4x16xf32>
    %c0_77 = arith.constant 0 : index
    %c49_78 = arith.constant 49 : index
    %116 = vector.load %arg29[%c0_77, %c49_78] : memref<12x290xf32, #tpu.memory_space<vmem>>, vector<4x16xf32>
    tpu.vector_store %arg29[%c0_77, %c49_78], %115 {strides = array<i32>} : memref<12x290xf32, #tpu.memory_space<vmem>>, vector<4x16xf32>,
    %117 = vector.extract_strided_slice %107 {offsets = [0, 3, 0], sizes = [4, 1, 16], strides = [1, 1, 1]} : vector<4x16x16xf32> to vector<4x1x16xf32>
    %118 = vector.shape_cast %117 : vector<4x1x16xf32> to vector<4x16xf32>
    %c0_79 = arith.constant 0 : index
    %c65_80 = arith.constant 65 : index
    %119 = vector.load %arg29[%c0_79, %c65_80] : memref<12x290xf32, #tpu.memory_space<vmem>>, vector<4x16xf32>
    tpu.vector_store %arg29[%c0_79, %c65_80], %118 {strides = array<i32>} : memref<12x290xf32, #tpu.memory_space<vmem>>, vector<4x16xf32>,
    %120 = vector.extract_strided_slice %107 {offsets = [0, 4, 0], sizes = [4, 1, 16], strides = [1, 1, 1]} : vector<4x16x16xf32> to vector<4x1x16xf32>
    %121 = vector.shape_cast %120 : vector<4x1x16xf32> to vector<4x16xf32>
    %c0_81 = arith.constant 0 : index
    %c81 = arith.constant 81 : index
    %122 = vector.load %arg29[%c0_81, %c81] : memref<12x290xf32, #tpu.memory_space<vmem>>, vector<4x16xf32>
    tpu.vector_store %arg29[%c0_81, %c81], %121 {strides = array<i32>} : memref<12x290xf32, #tpu.memory_space<vmem>>, vector<4x16xf32>,
    %123 = vector.extract_strided_slice %107 {offsets = [0, 5, 0], sizes = [4, 1, 16], strides = [1, 1, 1]} : vector<4x16x16xf32> to vector<4x1x16xf32>
    %124 = vector.shape_cast %123 : vector<4x1x16xf32> to vector<4x16xf32>
    %c0_82 = arith.constant 0 : index
    %c97 = arith.constant 97 : index
    %125 = vector.load %arg29[%c0_82, %c97] : memref<12x290xf32, #tpu.memory_space<vmem>>, vector<4x16xf32>
    tpu.vector_store %arg29[%c0_82, %c97], %124 {strides = array<i32>} : memref<12x290xf32, #tpu.memory_space<vmem>>, vector<4x16xf32>,
    %126 = vector.extract_strided_slice %107 {offsets = [0, 6, 0], sizes = [4, 1, 16], strides = [1, 1, 1]} : vector<4x16x16xf32> to vector<4x1x16xf32>
    %127 = vector.shape_cast %126 : vector<4x1x16xf32> to vector<4x16xf32>
    %c0_83 = arith.constant 0 : index
    %c113 = arith.constant 113 : index
    %128 = vector.load %arg29[%c0_83, %c113] : memref<12x290xf32, #tpu.memory_space<vmem>>, vector<4x16xf32>
    tpu.vector_store %arg29[%c0_83, %c113], %127 {strides = array<i32>} : memref<12x290xf32, #tpu.memory_space<vmem>>, vector<4x16xf32>,
    %129 = vector.extract_strided_slice %107 {offsets = [0, 7, 0], sizes = [4, 1, 16], strides = [1, 1, 1]} : vector<4x16x16xf32> to vector<4x1x16xf32>
    %130 = vector.shape_cast %129 : vector<4x1x16xf32> to vector<4x16xf32>
    %c0_84 = arith.constant 0 : index
    %c129 = arith.constant 129 : index
    %131 = vector.load %arg29[%c0_84, %c129] : memref<12x290xf32, #tpu.memory_space<vmem>>, vector<4x16xf32>
    tpu.vector_store %arg29[%c0_84, %c129], %130 {strides = array<i32>} : memref<12x290xf32, #tpu.memory_space<vmem>>, vector<4x16xf32>,
    %132 = vector.extract_strided_slice %107 {offsets = [0, 8, 0], sizes = [4, 1, 16], strides = [1, 1, 1]} : vector<4x16x16xf32> to vector<4x1x16xf32>
    %133 = vector.shape_cast %132 : vector<4x1x16xf32> to vector<4x16xf32>
    %c0_85 = arith.constant 0 : index
    %c145 = arith.constant 145 : index
    %134 = vector.load %arg29[%c0_85, %c145] : memref<12x290xf32, #tpu.memory_space<vmem>>, vector<4x16xf32>
    tpu.vector_store %arg29[%c0_85, %c145], %133 {strides = array<i32>} : memref<12x290xf32, #tpu.memory_space<vmem>>, vector<4x16xf32>,
    %135 = vector.extract_strided_slice %107 {offsets = [0, 9, 0], sizes = [4, 1, 16], strides = [1, 1, 1]} : vector<4x16x16xf32> to vector<4x1x16xf32>
    %136 = vector.shape_cast %135 : vector<4x1x16xf32> to vector<4x16xf32>
    %c0_86 = arith.constant 0 : index
    %c161 = arith.constant 161 : index
    %137 = vector.load %arg29[%c0_86, %c161] : memref<12x290xf32, #tpu.memory_space<vmem>>, vector<4x16xf32>
    tpu.vector_store %arg29[%c0_86, %c161], %136 {strides = array<i32>} : memref<12x290xf32, #tpu.memory_space<vmem>>, vector<4x16xf32>,
    %138 = vector.extract_strided_slice %107 {offsets = [0, 10, 0], sizes = [4, 1, 16], strides = [1, 1, 1]} : vector<4x16x16xf32> to vector<4x1x16xf32>
    %139 = vector.shape_cast %138 : vector<4x1x16xf32> to vector<4x16xf32>
    %c0_87 = arith.constant 0 : index
    %c177 = arith.constant 177 : index
    %140 = vector.load %arg29[%c0_87, %c177] : memref<12x290xf32, #tpu.memory_space<vmem>>, vector<4x16xf32>
    tpu.vector_store %arg29[%c0_87, %c177], %139 {strides = array<i32>} : memref<12x290xf32, #tpu.memory_space<vmem>>, vector<4x16xf32>,
    %141 = vector.extract_strided_slice %107 {offsets = [0, 11, 0], sizes = [4, 1, 16], strides = [1, 1, 1]} : vector<4x16x16xf32> to vector<4x1x16xf32>
    %142 = vector.shape_cast %141 : vector<4x1x16xf32> to vector<4x16xf32>
    %c0_88 = arith.constant 0 : index
    %c193 = arith.constant 193 : index
    %143 = vector.load %arg29[%c0_88, %c193] : memref<12x290xf32, #tpu.memory_space<vmem>>, vector<4x16xf32>
    tpu.vector_store %arg29[%c0_88, %c193], %142 {strides = array<i32>} : memref<12x290xf32, #tpu.memory_space<vmem>>, vector<4x16xf32>,
    %144 = vector.extract_strided_slice %107 {offsets = [0, 12, 0], sizes = [4, 1, 16], strides = [1, 1, 1]} : vector<4x16x16xf32> to vector<4x1x16xf32>
    %145 = vector.shape_cast %144 : vector<4x1x16xf32> to vector<4x16xf32>
    %c0_89 = arith.constant 0 : index
    %c209 = arith.constant 209 : index
    %146 = vector.load %arg29[%c0_89, %c209] : memref<12x290xf32, #tpu.memory_space<vmem>>, vector<4x16xf32>
    tpu.vector_store %arg29[%c0_89, %c209], %145 {strides = array<i32>} : memref<12x290xf32, #tpu.memory_space<vmem>>, vector<4x16xf32>,
    %147 = vector.extract_strided_slice %107 {offsets = [0, 13, 0], sizes = [4, 1, 16], strides = [1, 1, 1]} : vector<4x16x16xf32> to vector<4x1x16xf32>
    %148 = vector.shape_cast %147 : vector<4x1x16xf32> to vector<4x16xf32>
    %c0_90 = arith.constant 0 : index
    %c225 = arith.constant 225 : index
    %149 = vector.load %arg29[%c0_90, %c225] : memref<12x290xf32, #tpu.memory_space<vmem>>, vector<4x16xf32>
    tpu.vector_store %arg29[%c0_90, %c225], %148 {strides = array<i32>} : memref<12x290xf32, #tpu.memory_space<vmem>>, vector<4x16xf32>,
    %150 = vector.extract_strided_slice %107 {offsets = [0, 14, 0], sizes = [4, 1, 16], strides = [1, 1, 1]} : vector<4x16x16xf32> to vector<4x1x16xf32>
    %151 = vector.shape_cast %150 : vector<4x1x16xf32> to vector<4x16xf32>
    %c0_91 = arith.constant 0 : index
    %c241 = arith.constant 241 : index
    %152 = vector.load %arg29[%c0_91, %c241] : memref<12x290xf32, #tpu.memory_space<vmem>>, vector<4x16xf32>
    tpu.vector_store %arg29[%c0_91, %c241], %151 {strides = array<i32>} : memref<12x290xf32, #tpu.memory_space<vmem>>, vector<4x16xf32>,
    %153 = vector.extract_strided_slice %107 {offsets = [0, 15, 0], sizes = [4, 1, 16], strides = [1, 1, 1]} : vector<4x16x16xf32> to vector<4x1x16xf32>
    %154 = vector.shape_cast %153 : vector<4x1x16xf32> to vector<4x16xf32>
    %c0_92 = arith.constant 0 : index
    %c257 = arith.constant 257 : index
    %155 = vector.load %arg29[%c0_92, %c257] : memref<12x290xf32, #tpu.memory_space<vmem>>, vector<4x16xf32>
    tpu.vector_store %arg29[%c0_92, %c257], %154 {strides = array<i32>} : memref<12x290xf32, #tpu.memory_space<vmem>>, vector<4x16xf32>,
    %c0_93 = arith.constant 0 : index
    %c0_94 = arith.constant 0 : index
    %156 = vector.load %arg29[%c0_93, %c0_94] : memref<12x290xf32, #tpu.memory_space<vmem>>, vector<4x256xf32>
    %157 = vector.extract_strided_slice %13 {offsets = [0, 0], sizes = [1, 256], strides = [1, 1]} : vector<9x256xf32> to vector<1x256xf32>
    %158 = vector.broadcast %157 : vector<1x256xf32> to vector<4x256xf32>
    %159 = arith.mulf %156, %158 : vector<4x256xf32>
    %c0_95 = arith.constant 0 : index
    %c0_96 = arith.constant 0 : index
    %160 = vector.load %arg30[%c0_95, %c0_96] : memref<108x256xf32, #tpu.memory_space<vmem>>, vector<4x256xf32>
    tpu.vector_store %arg30[%c0_95, %c0_96], %159 {strides = array<i32>} : memref<108x256xf32, #tpu.memory_space<vmem>>, vector<4x256xf32>,
    %c0_97 = arith.constant 0 : index
    %c1_98 = arith.constant 1 : index
    %161 = vector.load %arg29[%c0_97, %c1_98] : memref<12x290xf32, #tpu.memory_space<vmem>>, vector<4x256xf32>
    %162 = vector.extract_strided_slice %13 {offsets = [1, 0], sizes = [1, 256], strides = [1, 1]} : vector<9x256xf32> to vector<1x256xf32>
    %163 = vector.broadcast %162 : vector<1x256xf32> to vector<4x256xf32>
    %164 = arith.mulf %161, %163 : vector<4x256xf32>
    %c4_99 = arith.constant 4 : index
    %c0_100 = arith.constant 0 : index
    %165 = vector.load %arg30[%c4_99, %c0_100] : memref<108x256xf32, #tpu.memory_space<vmem>>, vector<4x256xf32>
    tpu.vector_store %arg30[%c4_99, %c0_100], %164 {strides = array<i32>} : memref<108x256xf32, #tpu.memory_space<vmem>>, vector<4x256xf32>,
    %c0_101 = arith.constant 0 : index
    %c2_102 = arith.constant 2 : index
    %166 = vector.load %arg29[%c0_101, %c2_102] : memref<12x290xf32, #tpu.memory_space<vmem>>, vector<4x256xf32>
    %167 = vector.extract_strided_slice %13 {offsets = [2, 0], sizes = [1, 256], strides = [1, 1]} : vector<9x256xf32> to vector<1x256xf32>
    %168 = vector.broadcast %167 : vector<1x256xf32> to vector<4x256xf32>
    %169 = arith.mulf %166, %168 : vector<4x256xf32>
    %c8_103 = arith.constant 8 : index
    %c0_104 = arith.constant 0 : index
    %170 = vector.load %arg30[%c8_103, %c0_104] : memref<108x256xf32, #tpu.memory_space<vmem>>, vector<4x256xf32>
    tpu.vector_store %arg30[%c8_103, %c0_104], %169 {strides = array<i32>} : memref<108x256xf32, #tpu.memory_space<vmem>>, vector<4x256xf32>,
    %c0_105 = arith.constant 0 : index
    %c16_106 = arith.constant 16 : index
    %171 = vector.load %arg29[%c0_105, %c16_106] : memref<12x290xf32, #tpu.memory_space<vmem>>, vector<4x256xf32>
    %172 = vector.extract_strided_slice %13 {offsets = [3, 0], sizes = [1, 256], strides = [1, 1]} : vector<9x256xf32> to vector<1x256xf32>
    %173 = vector.broadcast %172 : vector<1x256xf32> to vector<4x256xf32>
    %174 = arith.mulf %171, %173 : vector<4x256xf32>
    %c12_107 = arith.constant 12 : index
    %c0_108 = arith.constant 0 : index
    %175 = vector.load %arg30[%c12_107, %c0_108] : memref<108x256xf32, #tpu.memory_space<vmem>>, vector<4x256xf32>
    tpu.vector_store %arg30[%c12_107, %c0_108], %174 {strides = array<i32>} : memref<108x256xf32, #tpu.memory_space<vmem>>, vector<4x256xf32>,
    %c0_109 = arith.constant 0 : index
    %c17_110 = arith.constant 17 : index
    %176 = vector.load %arg29[%c0_109, %c17_110] : memref<12x290xf32, #tpu.memory_space<vmem>>, vector<4x256xf32>
    %177 = vector.extract_strided_slice %13 {offsets = [4, 0], sizes = [1, 256], strides = [1, 1]} : vector<9x256xf32> to vector<1x256xf32>
    %178 = vector.broadcast %177 : vector<1x256xf32> to vector<4x256xf32>
    %179 = arith.mulf %176, %178 : vector<4x256xf32>
    %c16_111 = arith.constant 16 : index
    %c0_112 = arith.constant 0 : index
    %180 = vector.load %arg30[%c16_111, %c0_112] : memref<108x256xf32, #tpu.memory_space<vmem>>, vector<4x256xf32>
    tpu.vector_store %arg30[%c16_111, %c0_112], %179 {strides = array<i32>} : memref<108x256xf32, #tpu.memory_space<vmem>>, vector<4x256xf32>,
    %c0_113 = arith.constant 0 : index
    %c18_114 = arith.constant 18 : index
    %181 = vector.load %arg29[%c0_113, %c18_114] : memref<12x290xf32, #tpu.memory_space<vmem>>, vector<4x256xf32>
    %182 = vector.extract_strided_slice %13 {offsets = [5, 0], sizes = [1, 256], strides = [1, 1]} : vector<9x256xf32> to vector<1x256xf32>
    %183 = vector.broadcast %182 : vector<1x256xf32> to vector<4x256xf32>
    %184 = arith.mulf %181, %183 : vector<4x256xf32>
    %c20_115 = arith.constant 20 : index
    %c0_116 = arith.constant 0 : index
    %185 = vector.load %arg30[%c20_115, %c0_116] : memref<108x256xf32, #tpu.memory_space<vmem>>, vector<4x256xf32>
    tpu.vector_store %arg30[%c20_115, %c0_116], %184 {strides = array<i32>} : memref<108x256xf32, #tpu.memory_space<vmem>>, vector<4x256xf32>,
    %c0_117 = arith.constant 0 : index
    %c32_118 = arith.constant 32 : index
    %186 = vector.load %arg29[%c0_117, %c32_118] : memref<12x290xf32, #tpu.memory_space<vmem>>, vector<4x256xf32>
    %187 = vector.extract_strided_slice %13 {offsets = [6, 0], sizes = [1, 256], strides = [1, 1]} : vector<9x256xf32> to vector<1x256xf32>
    %188 = vector.broadcast %187 : vector<1x256xf32> to vector<4x256xf32>
    %189 = arith.mulf %186, %188 : vector<4x256xf32>
    %c24_119 = arith.constant 24 : index
    %c0_120 = arith.constant 0 : index
    %190 = vector.load %arg30[%c24_119, %c0_120] : memref<108x256xf32, #tpu.memory_space<vmem>>, vector<4x256xf32>
    tpu.vector_store %arg30[%c24_119, %c0_120], %189 {strides = array<i32>} : memref<108x256xf32, #tpu.memory_space<vmem>>, vector<4x256xf32>,
    %c0_121 = arith.constant 0 : index
    %c33_122 = arith.constant 33 : index
    %191 = vector.load %arg29[%c0_121, %c33_122] : memref<12x290xf32, #tpu.memory_space<vmem>>, vector<4x256xf32>
    %192 = vector.extract_strided_slice %13 {offsets = [7, 0], sizes = [1, 256], strides = [1, 1]} : vector<9x256xf32> to vector<1x256xf32>
    %193 = vector.broadcast %192 : vector<1x256xf32> to vector<4x256xf32>
    %194 = arith.mulf %191, %193 : vector<4x256xf32>
    %c28_123 = arith.constant 28 : index
    %c0_124 = arith.constant 0 : index
    %195 = vector.load %arg30[%c28_123, %c0_124] : memref<108x256xf32, #tpu.memory_space<vmem>>, vector<4x256xf32>
    tpu.vector_store %arg30[%c28_123, %c0_124], %194 {strides = array<i32>} : memref<108x256xf32, #tpu.memory_space<vmem>>, vector<4x256xf32>,
    %c0_125 = arith.constant 0 : index
    %c34 = arith.constant 34 : index
    %196 = vector.load %arg29[%c0_125, %c34] : memref<12x290xf32, #tpu.memory_space<vmem>>, vector<4x256xf32>
    %197 = vector.extract_strided_slice %13 {offsets = [8, 0], sizes = [1, 256], strides = [1, 1]} : vector<9x256xf32> to vector<1x256xf32>
    %198 = vector.broadcast %197 : vector<1x256xf32> to vector<4x256xf32>
    %199 = arith.mulf %196, %198 : vector<4x256xf32>
    %c32_126 = arith.constant 32 : index
    %c0_127 = arith.constant 0 : index
    %200 = vector.load %arg30[%c32_126, %c0_127] : memref<108x256xf32, #tpu.memory_space<vmem>>, vector<4x256xf32>
    tpu.vector_store %arg30[%c32_126, %c0_127], %199 {strides = array<i32>} : memref<108x256xf32, #tpu.memory_space<vmem>>, vector<4x256xf32>,
    %c0_128 = arith.constant 0 : index
    %c0_129 = arith.constant 0 : index
    %201 = vector.load %arg13[%c0_128, %c0_129] : memref<4x36xf32, #tpu.memory_space<vmem>>, vector<4x36xf32>
    %c0_130 = arith.constant 0 : index
    %c0_131 = arith.constant 0 : index
    %202 = vector.load %arg30[%c0_130, %c0_131] : memref<108x256xf32, #tpu.memory_space<vmem>>, vector<36x256xf32>
    %cst_132 = arith.constant dense<0.000000e+00> : vector<4x256xf32>
    %203 = tpu.matmul %201, %202, %cst_132 {dimension_numbers = #tpu.dot_dimension_numbers<[1], [0], [0], [1], [0, 0, 1, 1], [], []>} : vector<4x36xf32>, vector<36x256xf32>, vector<4x256xf32> -> vector<4x256xf32>
    %c0_133 = arith.constant 0 : index
    %c0_134 = arith.constant 0 : index
    %204 = vector.load %arg14[%c0_133, %c0_134] : memref<4x1xf32, #tpu.memory_space<vmem>>, vector<4x1xf32>
    %205 = vector.broadcast %204 : vector<4x1xf32> to vector<4x256xf32>
    %206 = arith.addf %203, %205 : vector<4x256xf32>
    %c0_135 = arith.constant 0 : index
    %c0_136 = arith.constant 0 : index
    %207 = vector.load %arg7[%c0_135, %c0_136] : memref<16x8xf32, #tpu.memory_space<vmem>>, vector<16x8xf32>
    %c0_137 = arith.constant 0 : index
    %c0_138 = arith.constant 0 : index
    %208 = vector.load %arg8[%c0_137, %c0_138] : memref<8x16xf32, #tpu.memory_space<vmem>>, vector<8x16xf32>
    %209 = vector.shape_cast %7 : vector<4x8x8xf32> to vector<32x8xf32>
    %cst_139 = arith.constant dense<0.000000e+00> : vector<32x16xf32>
    %210 = tpu.matmul %209, %208, %cst_139 {dimension_numbers = #tpu.dot_dimension_numbers<[1], [0], [0], [1], [0, 0, 1, 1], [], []>} : vector<32x8xf32>, vector<8x16xf32>, vector<32x16xf32> -> vector<32x16xf32>
    %211 = vector.shape_cast %210 : vector<32x16xf32> to vector<4x8x16xf32>
    %212 = vector.shape_cast %207 : vector<16x8xf32> to vector<1x16x8xf32>
    %213 = vector.shape_cast %212 : vector<1x16x8xf32> to vector<1x16x8xf32>
    %214 = vector.broadcast %213 : vector<1x16x8xf32> to vector<4x16x8xf32>
    %cst_140 = arith.constant dense<0.000000e+00> : vector<4x16x16xf32>
    %215 = tpu.matmul %214, %211, %cst_140 {dimension_numbers = #tpu.dot_dimension_numbers<[2], [1], [1], [2], [0, 0, 0, 1, 1, 2], [0], [0]>} : vector<4x16x8xf32>, vector<4x8x16xf32>, vector<4x16x16xf32> -> vector<4x16x16xf32>
    %216 = vector.extract_strided_slice %215 {offsets = [0, 0, 0], sizes = [4, 1, 16], strides = [1, 1, 1]} : vector<4x16x16xf32> to vector<4x1x16xf32>
    %217 = vector.shape_cast %216 : vector<4x1x16xf32> to vector<4x16xf32>
    %c0_141 = arith.constant 0 : index
    %c17_142 = arith.constant 17 : index
    %218 = vector.load %arg29[%c0_141, %c17_142] : memref<12x290xf32, #tpu.memory_space<vmem>>, vector<4x16xf32>
    tpu.vector_store %arg29[%c0_141, %c17_142], %217 {strides = array<i32>} : memref<12x290xf32, #tpu.memory_space<vmem>>, vector<4x16xf32>,
    %219 = vector.extract_strided_slice %215 {offsets = [0, 1, 0], sizes = [4, 1, 16], strides = [1, 1, 1]} : vector<4x16x16xf32> to vector<4x1x16xf32>
    %220 = vector.shape_cast %219 : vector<4x1x16xf32> to vector<4x16xf32>
    %c0_143 = arith.constant 0 : index
    %c33_144 = arith.constant 33 : index
    %221 = vector.load %arg29[%c0_143, %c33_144] : memref<12x290xf32, #tpu.memory_space<vmem>>, vector<4x16xf32>
    tpu.vector_store %arg29[%c0_143, %c33_144], %220 {strides = array<i32>} : memref<12x290xf32, #tpu.memory_space<vmem>>, vector<4x16xf32>,
    %222 = vector.extract_strided_slice %215 {offsets = [0, 2, 0], sizes = [4, 1, 16], strides = [1, 1, 1]} : vector<4x16x16xf32> to vector<4x1x16xf32>
    %223 = vector.shape_cast %222 : vector<4x1x16xf32> to vector<4x16xf32>
    %c0_145 = arith.constant 0 : index
    %c49_146 = arith.constant 49 : index
    %224 = vector.load %arg29[%c0_145, %c49_146] : memref<12x290xf32, #tpu.memory_space<vmem>>, vector<4x16xf32>
    tpu.vector_store %arg29[%c0_145, %c49_146], %223 {strides = array<i32>} : memref<12x290xf32, #tpu.memory_space<vmem>>, vector<4x16xf32>,
    %225 = vector.extract_strided_slice %215 {offsets = [0, 3, 0], sizes = [4, 1, 16], strides = [1, 1, 1]} : vector<4x16x16xf32> to vector<4x1x16xf32>
    %226 = vector.shape_cast %225 : vector<4x1x16xf32> to vector<4x16xf32>
    %c0_147 = arith.constant 0 : index
    %c65_148 = arith.constant 65 : index
    %227 = vector.load %arg29[%c0_147, %c65_148] : memref<12x290xf32, #tpu.memory_space<vmem>>, vector<4x16xf32>
    tpu.vector_store %arg29[%c0_147, %c65_148], %226 {strides = array<i32>} : memref<12x290xf32, #tpu.memory_space<vmem>>, vector<4x16xf32>,
    %228 = vector.extract_strided_slice %215 {offsets = [0, 4, 0], sizes = [4, 1, 16], strides = [1, 1, 1]} : vector<4x16x16xf32> to vector<4x1x16xf32>
    %229 = vector.shape_cast %228 : vector<4x1x16xf32> to vector<4x16xf32>
    %c0_149 = arith.constant 0 : index
    %c81_150 = arith.constant 81 : index
    %230 = vector.load %arg29[%c0_149, %c81_150] : memref<12x290xf32, #tpu.memory_space<vmem>>, vector<4x16xf32>
    tpu.vector_store %arg29[%c0_149, %c81_150], %229 {strides = array<i32>} : memref<12x290xf32, #tpu.memory_space<vmem>>, vector<4x16xf32>,
    %231 = vector.extract_strided_slice %215 {offsets = [0, 5, 0], sizes = [4, 1, 16], strides = [1, 1, 1]} : vector<4x16x16xf32> to vector<4x1x16xf32>
    %232 = vector.shape_cast %231 : vector<4x1x16xf32> to vector<4x16xf32>
    %c0_151 = arith.constant 0 : index
    %c97_152 = arith.constant 97 : index
    %233 = vector.load %arg29[%c0_151, %c97_152] : memref<12x290xf32, #tpu.memory_space<vmem>>, vector<4x16xf32>
    tpu.vector_store %arg29[%c0_151, %c97_152], %232 {strides = array<i32>} : memref<12x290xf32, #tpu.memory_space<vmem>>, vector<4x16xf32>,
    %234 = vector.extract_strided_slice %215 {offsets = [0, 6, 0], sizes = [4, 1, 16], strides = [1, 1, 1]} : vector<4x16x16xf32> to vector<4x1x16xf32>
    %235 = vector.shape_cast %234 : vector<4x1x16xf32> to vector<4x16xf32>
    %c0_153 = arith.constant 0 : index
    %c113_154 = arith.constant 113 : index
    %236 = vector.load %arg29[%c0_153, %c113_154] : memref<12x290xf32, #tpu.memory_space<vmem>>, vector<4x16xf32>
    tpu.vector_store %arg29[%c0_153, %c113_154], %235 {strides = array<i32>} : memref<12x290xf32, #tpu.memory_space<vmem>>, vector<4x16xf32>,
    %237 = vector.extract_strided_slice %215 {offsets = [0, 7, 0], sizes = [4, 1, 16], strides = [1, 1, 1]} : vector<4x16x16xf32> to vector<4x1x16xf32>
    %238 = vector.shape_cast %237 : vector<4x1x16xf32> to vector<4x16xf32>
    %c0_155 = arith.constant 0 : index
    %c129_156 = arith.constant 129 : index
    %239 = vector.load %arg29[%c0_155, %c129_156] : memref<12x290xf32, #tpu.memory_space<vmem>>, vector<4x16xf32>
    tpu.vector_store %arg29[%c0_155, %c129_156], %238 {strides = array<i32>} : memref<12x290xf32, #tpu.memory_space<vmem>>, vector<4x16xf32>,
    %240 = vector.extract_strided_slice %215 {offsets = [0, 8, 0], sizes = [4, 1, 16], strides = [1, 1, 1]} : vector<4x16x16xf32> to vector<4x1x16xf32>
    %241 = vector.shape_cast %240 : vector<4x1x16xf32> to vector<4x16xf32>
    %c0_157 = arith.constant 0 : index
    %c145_158 = arith.constant 145 : index
    %242 = vector.load %arg29[%c0_157, %c145_158] : memref<12x290xf32, #tpu.memory_space<vmem>>, vector<4x16xf32>
    tpu.vector_store %arg29[%c0_157, %c145_158], %241 {strides = array<i32>} : memref<12x290xf32, #tpu.memory_space<vmem>>, vector<4x16xf32>,
    %243 = vector.extract_strided_slice %215 {offsets = [0, 9, 0], sizes = [4, 1, 16], strides = [1, 1, 1]} : vector<4x16x16xf32> to vector<4x1x16xf32>
    %244 = vector.shape_cast %243 : vector<4x1x16xf32> to vector<4x16xf32>
    %c0_159 = arith.constant 0 : index
    %c161_160 = arith.constant 161 : index
    %245 = vector.load %arg29[%c0_159, %c161_160] : memref<12x290xf32, #tpu.memory_space<vmem>>, vector<4x16xf32>
    tpu.vector_store %arg29[%c0_159, %c161_160], %244 {strides = array<i32>} : memref<12x290xf32, #tpu.memory_space<vmem>>, vector<4x16xf32>,
    %246 = vector.extract_strided_slice %215 {offsets = [0, 10, 0], sizes = [4, 1, 16], strides = [1, 1, 1]} : vector<4x16x16xf32> to vector<4x1x16xf32>
    %247 = vector.shape_cast %246 : vector<4x1x16xf32> to vector<4x16xf32>
    %c0_161 = arith.constant 0 : index
    %c177_162 = arith.constant 177 : index
    %248 = vector.load %arg29[%c0_161, %c177_162] : memref<12x290xf32, #tpu.memory_space<vmem>>, vector<4x16xf32>
    tpu.vector_store %arg29[%c0_161, %c177_162], %247 {strides = array<i32>} : memref<12x290xf32, #tpu.memory_space<vmem>>, vector<4x16xf32>,
    %249 = vector.extract_strided_slice %215 {offsets = [0, 11, 0], sizes = [4, 1, 16], strides = [1, 1, 1]} : vector<4x16x16xf32> to vector<4x1x16xf32>
    %250 = vector.shape_cast %249 : vector<4x1x16xf32> to vector<4x16xf32>
    %c0_163 = arith.constant 0 : index
    %c193_164 = arith.constant 193 : index
    %251 = vector.load %arg29[%c0_163, %c193_164] : memref<12x290xf32, #tpu.memory_space<vmem>>, vector<4x16xf32>
    tpu.vector_store %arg29[%c0_163, %c193_164], %250 {strides = array<i32>} : memref<12x290xf32, #tpu.memory_space<vmem>>, vector<4x16xf32>,
    %252 = vector.extract_strided_slice %215 {offsets = [0, 12, 0], sizes = [4, 1, 16], strides = [1, 1, 1]} : vector<4x16x16xf32> to vector<4x1x16xf32>
    %253 = vector.shape_cast %252 : vector<4x1x16xf32> to vector<4x16xf32>
    %c0_165 = arith.constant 0 : index
    %c209_166 = arith.constant 209 : index
    %254 = vector.load %arg29[%c0_165, %c209_166] : memref<12x290xf32, #tpu.memory_space<vmem>>, vector<4x16xf32>
    tpu.vector_store %arg29[%c0_165, %c209_166], %253 {strides = array<i32>} : memref<12x290xf32, #tpu.memory_space<vmem>>, vector<4x16xf32>,
    %255 = vector.extract_strided_slice %215 {offsets = [0, 13, 0], sizes = [4, 1, 16], strides = [1, 1, 1]} : vector<4x16x16xf32> to vector<4x1x16xf32>
    %256 = vector.shape_cast %255 : vector<4x1x16xf32> to vector<4x16xf32>
    %c0_167 = arith.constant 0 : index
    %c225_168 = arith.constant 225 : index
    %257 = vector.load %arg29[%c0_167, %c225_168] : memref<12x290xf32, #tpu.memory_space<vmem>>, vector<4x16xf32>
    tpu.vector_store %arg29[%c0_167, %c225_168], %256 {strides = array<i32>} : memref<12x290xf32, #tpu.memory_space<vmem>>, vector<4x16xf32>,
    %258 = vector.extract_strided_slice %215 {offsets = [0, 14, 0], sizes = [4, 1, 16], strides = [1, 1, 1]} : vector<4x16x16xf32> to vector<4x1x16xf32>
    %259 = vector.shape_cast %258 : vector<4x1x16xf32> to vector<4x16xf32>
    %c0_169 = arith.constant 0 : index
    %c241_170 = arith.constant 241 : index
    %260 = vector.load %arg29[%c0_169, %c241_170] : memref<12x290xf32, #tpu.memory_space<vmem>>, vector<4x16xf32>
    tpu.vector_store %arg29[%c0_169, %c241_170], %259 {strides = array<i32>} : memref<12x290xf32, #tpu.memory_space<vmem>>, vector<4x16xf32>,
    %261 = vector.extract_strided_slice %215 {offsets = [0, 15, 0], sizes = [4, 1, 16], strides = [1, 1, 1]} : vector<4x16x16xf32> to vector<4x1x16xf32>
    %262 = vector.shape_cast %261 : vector<4x1x16xf32> to vector<4x16xf32>
    %c0_171 = arith.constant 0 : index
    %c257_172 = arith.constant 257 : index
    %263 = vector.load %arg29[%c0_171, %c257_172] : memref<12x290xf32, #tpu.memory_space<vmem>>, vector<4x16xf32>
    tpu.vector_store %arg29[%c0_171, %c257_172], %262 {strides = array<i32>} : memref<12x290xf32, #tpu.memory_space<vmem>>, vector<4x16xf32>,
    %c0_173 = arith.constant 0 : index
    %c0_174 = arith.constant 0 : index
    %264 = vector.load %arg29[%c0_173, %c0_174] : memref<12x290xf32, #tpu.memory_space<vmem>>, vector<4x256xf32>
    %265 = vector.extract_strided_slice %13 {offsets = [0, 0], sizes = [1, 256], strides = [1, 1]} : vector<9x256xf32> to vector<1x256xf32>
    %266 = vector.broadcast %265 : vector<1x256xf32> to vector<4x256xf32>
    %267 = arith.mulf %264, %266 : vector<4x256xf32>
    %c0_175 = arith.constant 0 : index
    %c0_176 = arith.constant 0 : index
    %268 = vector.load %arg30[%c0_175, %c0_176] : memref<108x256xf32, #tpu.memory_space<vmem>>, vector<4x256xf32>
    tpu.vector_store %arg30[%c0_175, %c0_176], %267 {strides = array<i32>} : memref<108x256xf32, #tpu.memory_space<vmem>>, vector<4x256xf32>,
    %c0_177 = arith.constant 0 : index
    %c1_178 = arith.constant 1 : index
    %269 = vector.load %arg29[%c0_177, %c1_178] : memref<12x290xf32, #tpu.memory_space<vmem>>, vector<4x256xf32>
    %270 = vector.extract_strided_slice %13 {offsets = [1, 0], sizes = [1, 256], strides = [1, 1]} : vector<9x256xf32> to vector<1x256xf32>
    %271 = vector.broadcast %270 : vector<1x256xf32> to vector<4x256xf32>
    %272 = arith.mulf %269, %271 : vector<4x256xf32>
    %c4_179 = arith.constant 4 : index
    %c0_180 = arith.constant 0 : index
    %273 = vector.load %arg30[%c4_179, %c0_180] : memref<108x256xf32, #tpu.memory_space<vmem>>, vector<4x256xf32>
    tpu.vector_store %arg30[%c4_179, %c0_180], %272 {strides = array<i32>} : memref<108x256xf32, #tpu.memory_space<vmem>>, vector<4x256xf32>,
    %c0_181 = arith.constant 0 : index
    %c2_182 = arith.constant 2 : index
    %274 = vector.load %arg29[%c0_181, %c2_182] : memref<12x290xf32, #tpu.memory_space<vmem>>, vector<4x256xf32>
    %275 = vector.extract_strided_slice %13 {offsets = [2, 0], sizes = [1, 256], strides = [1, 1]} : vector<9x256xf32> to vector<1x256xf32>
    %276 = vector.broadcast %275 : vector<1x256xf32> to vector<4x256xf32>
    %277 = arith.mulf %274, %276 : vector<4x256xf32>
    %c8_183 = arith.constant 8 : index
    %c0_184 = arith.constant 0 : index
    %278 = vector.load %arg30[%c8_183, %c0_184] : memref<108x256xf32, #tpu.memory_space<vmem>>, vector<4x256xf32>
    tpu.vector_store %arg30[%c8_183, %c0_184], %277 {strides = array<i32>} : memref<108x256xf32, #tpu.memory_space<vmem>>, vector<4x256xf32>,
    %c0_185 = arith.constant 0 : index
    %c16_186 = arith.constant 16 : index
    %279 = vector.load %arg29[%c0_185, %c16_186] : memref<12x290xf32, #tpu.memory_space<vmem>>, vector<4x256xf32>
    %280 = vector.extract_strided_slice %13 {offsets = [3, 0], sizes = [1, 256], strides = [1, 1]} : vector<9x256xf32> to vector<1x256xf32>
    %281 = vector.broadcast %280 : vector<1x256xf32> to vector<4x256xf32>
    %282 = arith.mulf %279, %281 : vector<4x256xf32>
    %c12_187 = arith.constant 12 : index
    %c0_188 = arith.constant 0 : index
    %283 = vector.load %arg30[%c12_187, %c0_188] : memref<108x256xf32, #tpu.memory_space<vmem>>, vector<4x256xf32>
    tpu.vector_store %arg30[%c12_187, %c0_188], %282 {strides = array<i32>} : memref<108x256xf32, #tpu.memory_space<vmem>>, vector<4x256xf32>,
    %c0_189 = arith.constant 0 : index
    %c17_190 = arith.constant 17 : index
    %284 = vector.load %arg29[%c0_189, %c17_190] : memref<12x290xf32, #tpu.memory_space<vmem>>, vector<4x256xf32>
    %285 = vector.extract_strided_slice %13 {offsets = [4, 0], sizes = [1, 256], strides = [1, 1]} : vector<9x256xf32> to vector<1x256xf32>
    %286 = vector.broadcast %285 : vector<1x256xf32> to vector<4x256xf32>
    %287 = arith.mulf %284, %286 : vector<4x256xf32>
    %c16_191 = arith.constant 16 : index
    %c0_192 = arith.constant 0 : index
    %288 = vector.load %arg30[%c16_191, %c0_192] : memref<108x256xf32, #tpu.memory_space<vmem>>, vector<4x256xf32>
    tpu.vector_store %arg30[%c16_191, %c0_192], %287 {strides = array<i32>} : memref<108x256xf32, #tpu.memory_space<vmem>>, vector<4x256xf32>,
    %c0_193 = arith.constant 0 : index
    %c18_194 = arith.constant 18 : index
    %289 = vector.load %arg29[%c0_193, %c18_194] : memref<12x290xf32, #tpu.memory_space<vmem>>, vector<4x256xf32>
    %290 = vector.extract_strided_slice %13 {offsets = [5, 0], sizes = [1, 256], strides = [1, 1]} : vector<9x256xf32> to vector<1x256xf32>
    %291 = vector.broadcast %290 : vector<1x256xf32> to vector<4x256xf32>
    %292 = arith.mulf %289, %291 : vector<4x256xf32>
    %c20_195 = arith.constant 20 : index
    %c0_196 = arith.constant 0 : index
    %293 = vector.load %arg30[%c20_195, %c0_196] : memref<108x256xf32, #tpu.memory_space<vmem>>, vector<4x256xf32>
    tpu.vector_store %arg30[%c20_195, %c0_196], %292 {strides = array<i32>} : memref<108x256xf32, #tpu.memory_space<vmem>>, vector<4x256xf32>,
    %c0_197 = arith.constant 0 : index
    %c32_198 = arith.constant 32 : index
    %294 = vector.load %arg29[%c0_197, %c32_198] : memref<12x290xf32, #tpu.memory_space<vmem>>, vector<4x256xf32>
    %295 = vector.extract_strided_slice %13 {offsets = [6, 0], sizes = [1, 256], strides = [1, 1]} : vector<9x256xf32> to vector<1x256xf32>
    %296 = vector.broadcast %295 : vector<1x256xf32> to vector<4x256xf32>
    %297 = arith.mulf %294, %296 : vector<4x256xf32>
    %c24_199 = arith.constant 24 : index
    %c0_200 = arith.constant 0 : index
    %298 = vector.load %arg30[%c24_199, %c0_200] : memref<108x256xf32, #tpu.memory_space<vmem>>, vector<4x256xf32>
    tpu.vector_store %arg30[%c24_199, %c0_200], %297 {strides = array<i32>} : memref<108x256xf32, #tpu.memory_space<vmem>>, vector<4x256xf32>,
    %c0_201 = arith.constant 0 : index
    %c33_202 = arith.constant 33 : index
    %299 = vector.load %arg29[%c0_201, %c33_202] : memref<12x290xf32, #tpu.memory_space<vmem>>, vector<4x256xf32>
    %300 = vector.extract_strided_slice %13 {offsets = [7, 0], sizes = [1, 256], strides = [1, 1]} : vector<9x256xf32> to vector<1x256xf32>
    %301 = vector.broadcast %300 : vector<1x256xf32> to vector<4x256xf32>
    %302 = arith.mulf %299, %301 : vector<4x256xf32>
    %c28_203 = arith.constant 28 : index
    %c0_204 = arith.constant 0 : index
    %303 = vector.load %arg30[%c28_203, %c0_204] : memref<108x256xf32, #tpu.memory_space<vmem>>, vector<4x256xf32>
    tpu.vector_store %arg30[%c28_203, %c0_204], %302 {strides = array<i32>} : memref<108x256xf32, #tpu.memory_space<vmem>>, vector<4x256xf32>,
    %c0_205 = arith.constant 0 : index
    %c34_206 = arith.constant 34 : index
    %304 = vector.load %arg29[%c0_205, %c34_206] : memref<12x290xf32, #tpu.memory_space<vmem>>, vector<4x256xf32>
    %305 = vector.extract_strided_slice %13 {offsets = [8, 0], sizes = [1, 256], strides = [1, 1]} : vector<9x256xf32> to vector<1x256xf32>
    %306 = vector.broadcast %305 : vector<1x256xf32> to vector<4x256xf32>
    %307 = arith.mulf %304, %306 : vector<4x256xf32>
    %c32_207 = arith.constant 32 : index
    %c0_208 = arith.constant 0 : index
    %308 = vector.load %arg30[%c32_207, %c0_208] : memref<108x256xf32, #tpu.memory_space<vmem>>, vector<4x256xf32>
    tpu.vector_store %arg30[%c32_207, %c0_208], %307 {strides = array<i32>} : memref<108x256xf32, #tpu.memory_space<vmem>>, vector<4x256xf32>,
    %c0_209 = arith.constant 0 : index
    %c0_210 = arith.constant 0 : index
    %309 = vector.load %arg15[%c0_209, %c0_210] : memref<4x36xf32, #tpu.memory_space<vmem>>, vector<4x36xf32>
    %c0_211 = arith.constant 0 : index
    %c0_212 = arith.constant 0 : index
    %310 = vector.load %arg30[%c0_211, %c0_212] : memref<108x256xf32, #tpu.memory_space<vmem>>, vector<36x256xf32>
    %cst_213 = arith.constant dense<0.000000e+00> : vector<4x256xf32>
    %311 = tpu.matmul %309, %310, %cst_213 {dimension_numbers = #tpu.dot_dimension_numbers<[1], [0], [0], [1], [0, 0, 1, 1], [], []>} : vector<4x36xf32>, vector<36x256xf32>, vector<4x256xf32> -> vector<4x256xf32>
    %c0_214 = arith.constant 0 : index
    %c0_215 = arith.constant 0 : index
    %312 = vector.load %arg16[%c0_214, %c0_215] : memref<4x1xf32, #tpu.memory_space<vmem>>, vector<4x1xf32>
    %313 = vector.broadcast %312 : vector<4x1xf32> to vector<4x256xf32>
    %314 = arith.addf %311, %313 : vector<4x256xf32>
    %315 = arith.mulf %206, %314 : vector<4x256xf32>
    %316 = arith.mulf %315, %11 : vector<4x256xf32>
    %317 = vector.extract_strided_slice %22 {offsets = [0, 0, 0], sizes = [4, 1, 8], strides = [1, 1, 1]} : vector<4x8x8xf32> to vector<4x1x8xf32>
    %318 = vector.shape_cast %317 : vector<4x1x8xf32> to vector<4x8xf32>
    %c0_216 = arith.constant 0 : index
    %c9_217 = arith.constant 9 : index
    %319 = vector.load %arg28[%c0_216, %c9_217] : memref<4x82xf32, #tpu.memory_space<vmem>>, vector<4x8xf32>
    tpu.vector_store %arg28[%c0_216, %c9_217], %318 {strides = array<i32>} : memref<4x82xf32, #tpu.memory_space<vmem>>, vector<4x8xf32>,
    %320 = vector.extract_strided_slice %22 {offsets = [0, 1, 0], sizes = [4, 1, 8], strides = [1, 1, 1]} : vector<4x8x8xf32> to vector<4x1x8xf32>
    %321 = vector.shape_cast %320 : vector<4x1x8xf32> to vector<4x8xf32>
    %c0_218 = arith.constant 0 : index
    %c17_219 = arith.constant 17 : index
    %322 = vector.load %arg28[%c0_218, %c17_219] : memref<4x82xf32, #tpu.memory_space<vmem>>, vector<4x8xf32>
    tpu.vector_store %arg28[%c0_218, %c17_219], %321 {strides = array<i32>} : memref<4x82xf32, #tpu.memory_space<vmem>>, vector<4x8xf32>,
    %323 = vector.extract_strided_slice %22 {offsets = [0, 2, 0], sizes = [4, 1, 8], strides = [1, 1, 1]} : vector<4x8x8xf32> to vector<4x1x8xf32>
    %324 = vector.shape_cast %323 : vector<4x1x8xf32> to vector<4x8xf32>
    %c0_220 = arith.constant 0 : index
    %c25_221 = arith.constant 25 : index
    %325 = vector.load %arg28[%c0_220, %c25_221] : memref<4x82xf32, #tpu.memory_space<vmem>>, vector<4x8xf32>
    tpu.vector_store %arg28[%c0_220, %c25_221], %324 {strides = array<i32>} : memref<4x82xf32, #tpu.memory_space<vmem>>, vector<4x8xf32>,
    %326 = vector.extract_strided_slice %22 {offsets = [0, 3, 0], sizes = [4, 1, 8], strides = [1, 1, 1]} : vector<4x8x8xf32> to vector<4x1x8xf32>
    %327 = vector.shape_cast %326 : vector<4x1x8xf32> to vector<4x8xf32>
    %c0_222 = arith.constant 0 : index
    %c33_223 = arith.constant 33 : index
    %328 = vector.load %arg28[%c0_222, %c33_223] : memref<4x82xf32, #tpu.memory_space<vmem>>, vector<4x8xf32>
    tpu.vector_store %arg28[%c0_222, %c33_223], %327 {strides = array<i32>} : memref<4x82xf32, #tpu.memory_space<vmem>>, vector<4x8xf32>,
    %329 = vector.extract_strided_slice %22 {offsets = [0, 4, 0], sizes = [4, 1, 8], strides = [1, 1, 1]} : vector<4x8x8xf32> to vector<4x1x8xf32>
    %330 = vector.shape_cast %329 : vector<4x1x8xf32> to vector<4x8xf32>
    %c0_224 = arith.constant 0 : index
    %c41_225 = arith.constant 41 : index
    %331 = vector.load %arg28[%c0_224, %c41_225] : memref<4x82xf32, #tpu.memory_space<vmem>>, vector<4x8xf32>
    tpu.vector_store %arg28[%c0_224, %c41_225], %330 {strides = array<i32>} : memref<4x82xf32, #tpu.memory_space<vmem>>, vector<4x8xf32>,
    %332 = vector.extract_strided_slice %22 {offsets = [0, 5, 0], sizes = [4, 1, 8], strides = [1, 1, 1]} : vector<4x8x8xf32> to vector<4x1x8xf32>
    %333 = vector.shape_cast %332 : vector<4x1x8xf32> to vector<4x8xf32>
    %c0_226 = arith.constant 0 : index
    %c49_227 = arith.constant 49 : index
    %334 = vector.load %arg28[%c0_226, %c49_227] : memref<4x82xf32, #tpu.memory_space<vmem>>, vector<4x8xf32>
    tpu.vector_store %arg28[%c0_226, %c49_227], %333 {strides = array<i32>} : memref<4x82xf32, #tpu.memory_space<vmem>>, vector<4x8xf32>,
    %335 = vector.extract_strided_slice %22 {offsets = [0, 6, 0], sizes = [4, 1, 8], strides = [1, 1, 1]} : vector<4x8x8xf32> to vector<4x1x8xf32>
    %336 = vector.shape_cast %335 : vector<4x1x8xf32> to vector<4x8xf32>
    %c0_228 = arith.constant 0 : index
    %c57_229 = arith.constant 57 : index
    %337 = vector.load %arg28[%c0_228, %c57_229] : memref<4x82xf32, #tpu.memory_space<vmem>>, vector<4x8xf32>
    tpu.vector_store %arg28[%c0_228, %c57_229], %336 {strides = array<i32>} : memref<4x82xf32, #tpu.memory_space<vmem>>, vector<4x8xf32>,
    %338 = vector.extract_strided_slice %22 {offsets = [0, 7, 0], sizes = [4, 1, 8], strides = [1, 1, 1]} : vector<4x8x8xf32> to vector<4x1x8xf32>
    %339 = vector.shape_cast %338 : vector<4x1x8xf32> to vector<4x8xf32>
    %c0_230 = arith.constant 0 : index
    %c65_231 = arith.constant 65 : index
    %340 = vector.load %arg28[%c0_230, %c65_231] : memref<4x82xf32, #tpu.memory_space<vmem>>, vector<4x8xf32>
    tpu.vector_store %arg28[%c0_230, %c65_231], %339 {strides = array<i32>} : memref<4x82xf32, #tpu.memory_space<vmem>>, vector<4x8xf32>,
    %c0_232 = arith.constant 0 : index
    %c0_233 = arith.constant 0 : index
    %341 = vector.load %arg28[%c0_232, %c0_233] : memref<4x82xf32, #tpu.memory_space<vmem>>, vector<4x64xf32>
    %342 = vector.extract_strided_slice %12 {offsets = [0, 0], sizes = [1, 64], strides = [1, 1]} : vector<9x64xf32> to vector<1x64xf32>
    %343 = vector.broadcast %342 : vector<1x64xf32> to vector<4x64xf32>
    %344 = arith.mulf %341, %343 : vector<4x64xf32>
    %c0_234 = arith.constant 0 : index
    %c0_235 = arith.constant 0 : index
    %345 = vector.load %arg30[%c0_234, %c0_235] : memref<108x256xf32, #tpu.memory_space<vmem>>, vector<4x64xf32>
    tpu.vector_store %arg30[%c0_234, %c0_235], %344 {strides = array<i32>} : memref<108x256xf32, #tpu.memory_space<vmem>>, vector<4x64xf32>,
    %c0_236 = arith.constant 0 : index
    %c1_237 = arith.constant 1 : index
    %346 = vector.load %arg28[%c0_236, %c1_237] : memref<4x82xf32, #tpu.memory_space<vmem>>, vector<4x64xf32>
    %347 = vector.extract_strided_slice %12 {offsets = [1, 0], sizes = [1, 64], strides = [1, 1]} : vector<9x64xf32> to vector<1x64xf32>
    %348 = vector.broadcast %347 : vector<1x64xf32> to vector<4x64xf32>
    %349 = arith.mulf %346, %348 : vector<4x64xf32>
    %c4_238 = arith.constant 4 : index
    %c0_239 = arith.constant 0 : index
    %350 = vector.load %arg30[%c4_238, %c0_239] : memref<108x256xf32, #tpu.memory_space<vmem>>, vector<4x64xf32>
    tpu.vector_store %arg30[%c4_238, %c0_239], %349 {strides = array<i32>} : memref<108x256xf32, #tpu.memory_space<vmem>>, vector<4x64xf32>,
    %c0_240 = arith.constant 0 : index
    %c2_241 = arith.constant 2 : index
    %351 = vector.load %arg28[%c0_240, %c2_241] : memref<4x82xf32, #tpu.memory_space<vmem>>, vector<4x64xf32>
    %352 = vector.extract_strided_slice %12 {offsets = [2, 0], sizes = [1, 64], strides = [1, 1]} : vector<9x64xf32> to vector<1x64xf32>
    %353 = vector.broadcast %352 : vector<1x64xf32> to vector<4x64xf32>
    %354 = arith.mulf %351, %353 : vector<4x64xf32>
    %c8_242 = arith.constant 8 : index
    %c0_243 = arith.constant 0 : index
    %355 = vector.load %arg30[%c8_242, %c0_243] : memref<108x256xf32, #tpu.memory_space<vmem>>, vector<4x64xf32>
    tpu.vector_store %arg30[%c8_242, %c0_243], %354 {strides = array<i32>} : memref<108x256xf32, #tpu.memory_space<vmem>>, vector<4x64xf32>,
    %c0_244 = arith.constant 0 : index
    %c8_245 = arith.constant 8 : index
    %356 = vector.load %arg28[%c0_244, %c8_245] : memref<4x82xf32, #tpu.memory_space<vmem>>, vector<4x64xf32>
    %357 = vector.extract_strided_slice %12 {offsets = [3, 0], sizes = [1, 64], strides = [1, 1]} : vector<9x64xf32> to vector<1x64xf32>
    %358 = vector.broadcast %357 : vector<1x64xf32> to vector<4x64xf32>
    %359 = arith.mulf %356, %358 : vector<4x64xf32>
    %c12_246 = arith.constant 12 : index
    %c0_247 = arith.constant 0 : index
    %360 = vector.load %arg30[%c12_246, %c0_247] : memref<108x256xf32, #tpu.memory_space<vmem>>, vector<4x64xf32>
    tpu.vector_store %arg30[%c12_246, %c0_247], %359 {strides = array<i32>} : memref<108x256xf32, #tpu.memory_space<vmem>>, vector<4x64xf32>,
    %c0_248 = arith.constant 0 : index
    %c9_249 = arith.constant 9 : index
    %361 = vector.load %arg28[%c0_248, %c9_249] : memref<4x82xf32, #tpu.memory_space<vmem>>, vector<4x64xf32>
    %362 = vector.extract_strided_slice %12 {offsets = [4, 0], sizes = [1, 64], strides = [1, 1]} : vector<9x64xf32> to vector<1x64xf32>
    %363 = vector.broadcast %362 : vector<1x64xf32> to vector<4x64xf32>
    %364 = arith.mulf %361, %363 : vector<4x64xf32>
    %c16_250 = arith.constant 16 : index
    %c0_251 = arith.constant 0 : index
    %365 = vector.load %arg30[%c16_250, %c0_251] : memref<108x256xf32, #tpu.memory_space<vmem>>, vector<4x64xf32>
    tpu.vector_store %arg30[%c16_250, %c0_251], %364 {strides = array<i32>} : memref<108x256xf32, #tpu.memory_space<vmem>>, vector<4x64xf32>,
    %c0_252 = arith.constant 0 : index
    %c10_253 = arith.constant 10 : index
    %366 = vector.load %arg28[%c0_252, %c10_253] : memref<4x82xf32, #tpu.memory_space<vmem>>, vector<4x64xf32>
    %367 = vector.extract_strided_slice %12 {offsets = [5, 0], sizes = [1, 64], strides = [1, 1]} : vector<9x64xf32> to vector<1x64xf32>
    %368 = vector.broadcast %367 : vector<1x64xf32> to vector<4x64xf32>
    %369 = arith.mulf %366, %368 : vector<4x64xf32>
    %c20_254 = arith.constant 20 : index
    %c0_255 = arith.constant 0 : index
    %370 = vector.load %arg30[%c20_254, %c0_255] : memref<108x256xf32, #tpu.memory_space<vmem>>, vector<4x64xf32>
    tpu.vector_store %arg30[%c20_254, %c0_255], %369 {strides = array<i32>} : memref<108x256xf32, #tpu.memory_space<vmem>>, vector<4x64xf32>,
    %c0_256 = arith.constant 0 : index
    %c16_257 = arith.constant 16 : index
    %371 = vector.load %arg28[%c0_256, %c16_257] : memref<4x82xf32, #tpu.memory_space<vmem>>, vector<4x64xf32>
    %372 = vector.extract_strided_slice %12 {offsets = [6, 0], sizes = [1, 64], strides = [1, 1]} : vector<9x64xf32> to vector<1x64xf32>
    %373 = vector.broadcast %372 : vector<1x64xf32> to vector<4x64xf32>
    %374 = arith.mulf %371, %373 : vector<4x64xf32>
    %c24_258 = arith.constant 24 : index
    %c0_259 = arith.constant 0 : index
    %375 = vector.load %arg30[%c24_258, %c0_259] : memref<108x256xf32, #tpu.memory_space<vmem>>, vector<4x64xf32>
    tpu.vector_store %arg30[%c24_258, %c0_259], %374 {strides = array<i32>} : memref<108x256xf32, #tpu.memory_space<vmem>>, vector<4x64xf32>,
    %c0_260 = arith.constant 0 : index
    %c17_261 = arith.constant 17 : index
    %376 = vector.load %arg28[%c0_260, %c17_261] : memref<4x82xf32, #tpu.memory_space<vmem>>, vector<4x64xf32>
    %377 = vector.extract_strided_slice %12 {offsets = [7, 0], sizes = [1, 64], strides = [1, 1]} : vector<9x64xf32> to vector<1x64xf32>
    %378 = vector.broadcast %377 : vector<1x64xf32> to vector<4x64xf32>
    %379 = arith.mulf %376, %378 : vector<4x64xf32>
    %c28_262 = arith.constant 28 : index
    %c0_263 = arith.constant 0 : index
    %380 = vector.load %arg30[%c28_262, %c0_263] : memref<108x256xf32, #tpu.memory_space<vmem>>, vector<4x64xf32>
    tpu.vector_store %arg30[%c28_262, %c0_263], %379 {strides = array<i32>} : memref<108x256xf32, #tpu.memory_space<vmem>>, vector<4x64xf32>,
    %c0_264 = arith.constant 0 : index
    %c18_265 = arith.constant 18 : index
    %381 = vector.load %arg28[%c0_264, %c18_265] : memref<4x82xf32, #tpu.memory_space<vmem>>, vector<4x64xf32>
    %382 = vector.extract_strided_slice %12 {offsets = [8, 0], sizes = [1, 64], strides = [1, 1]} : vector<9x64xf32> to vector<1x64xf32>
    %383 = vector.broadcast %382 : vector<1x64xf32> to vector<4x64xf32>
    %384 = arith.mulf %381, %383 : vector<4x64xf32>
    %c32_266 = arith.constant 32 : index
    %c0_267 = arith.constant 0 : index
    %385 = vector.load %arg30[%c32_266, %c0_267] : memref<108x256xf32, #tpu.memory_space<vmem>>, vector<4x64xf32>
    tpu.vector_store %arg30[%c32_266, %c0_267], %384 {strides = array<i32>} : memref<108x256xf32, #tpu.memory_space<vmem>>, vector<4x64xf32>,
    %c0_268 = arith.constant 0 : index
    %c0_269 = arith.constant 0 : index
    %386 = vector.load %arg17[%c0_268, %c0_269] : memref<4x36xf32, #tpu.memory_space<vmem>>, vector<4x36xf32>
    %c0_270 = arith.constant 0 : index
    %c0_271 = arith.constant 0 : index
    %387 = vector.load %arg30[%c0_270, %c0_271] : memref<108x256xf32, #tpu.memory_space<vmem>>, vector<36x64xf32>
    %cst_272 = arith.constant dense<0.000000e+00> : vector<4x64xf32>
    %388 = tpu.matmul %386, %387, %cst_272 {dimension_numbers = #tpu.dot_dimension_numbers<[1], [0], [0], [1], [0, 0, 1, 1], [], []>} : vector<4x36xf32>, vector<36x64xf32>, vector<4x64xf32> -> vector<4x64xf32>
    %c0_273 = arith.constant 0 : index
    %c0_274 = arith.constant 0 : index
    %389 = vector.load %arg18[%c0_273, %c0_274] : memref<4x1xf32, #tpu.memory_space<vmem>>, vector<4x1xf32>
    %390 = vector.broadcast %389 : vector<4x1xf32> to vector<4x64xf32>
    %391 = arith.addf %388, %390 : vector<4x64xf32>
    %c0_275 = arith.constant 0 : index
    %c9_276 = arith.constant 9 : index
    %392 = vector.load %arg28[%c0_275, %c9_276] : memref<4x82xf32, #tpu.memory_space<vmem>>, vector<4x64xf32>
    tpu.vector_store %arg28[%c0_275, %c9_276], %98 {strides = array<i32>} : memref<4x82xf32, #tpu.memory_space<vmem>>, vector<4x64xf32>,
    %c0_277 = arith.constant 0 : index
    %c0_278 = arith.constant 0 : index
    %393 = vector.load %arg28[%c0_277, %c0_278] : memref<4x82xf32, #tpu.memory_space<vmem>>, vector<4x64xf32>
    %394 = vector.extract_strided_slice %12 {offsets = [0, 0], sizes = [1, 64], strides = [1, 1]} : vector<9x64xf32> to vector<1x64xf32>
    %395 = vector.broadcast %394 : vector<1x64xf32> to vector<4x64xf32>
    %396 = arith.mulf %393, %395 : vector<4x64xf32>
    %c0_279 = arith.constant 0 : index
    %c0_280 = arith.constant 0 : index
    %397 = vector.load %arg30[%c0_279, %c0_280] : memref<108x256xf32, #tpu.memory_space<vmem>>, vector<4x64xf32>
    tpu.vector_store %arg30[%c0_279, %c0_280], %396 {strides = array<i32>} : memref<108x256xf32, #tpu.memory_space<vmem>>, vector<4x64xf32>,
    %c0_281 = arith.constant 0 : index
    %c1_282 = arith.constant 1 : index
    %398 = vector.load %arg28[%c0_281, %c1_282] : memref<4x82xf32, #tpu.memory_space<vmem>>, vector<4x64xf32>
    %399 = vector.extract_strided_slice %12 {offsets = [1, 0], sizes = [1, 64], strides = [1, 1]} : vector<9x64xf32> to vector<1x64xf32>
    %400 = vector.broadcast %399 : vector<1x64xf32> to vector<4x64xf32>
    %401 = arith.mulf %398, %400 : vector<4x64xf32>
    %c4_283 = arith.constant 4 : index
    %c0_284 = arith.constant 0 : index
    %402 = vector.load %arg30[%c4_283, %c0_284] : memref<108x256xf32, #tpu.memory_space<vmem>>, vector<4x64xf32>
    tpu.vector_store %arg30[%c4_283, %c0_284], %401 {strides = array<i32>} : memref<108x256xf32, #tpu.memory_space<vmem>>, vector<4x64xf32>,
    %c0_285 = arith.constant 0 : index
    %c2_286 = arith.constant 2 : index
    %403 = vector.load %arg28[%c0_285, %c2_286] : memref<4x82xf32, #tpu.memory_space<vmem>>, vector<4x64xf32>
    %404 = vector.extract_strided_slice %12 {offsets = [2, 0], sizes = [1, 64], strides = [1, 1]} : vector<9x64xf32> to vector<1x64xf32>
    %405 = vector.broadcast %404 : vector<1x64xf32> to vector<4x64xf32>
    %406 = arith.mulf %403, %405 : vector<4x64xf32>
    %c8_287 = arith.constant 8 : index
    %c0_288 = arith.constant 0 : index
    %407 = vector.load %arg30[%c8_287, %c0_288] : memref<108x256xf32, #tpu.memory_space<vmem>>, vector<4x64xf32>
    tpu.vector_store %arg30[%c8_287, %c0_288], %406 {strides = array<i32>} : memref<108x256xf32, #tpu.memory_space<vmem>>, vector<4x64xf32>,
    %c0_289 = arith.constant 0 : index
    %c8_290 = arith.constant 8 : index
    %408 = vector.load %arg28[%c0_289, %c8_290] : memref<4x82xf32, #tpu.memory_space<vmem>>, vector<4x64xf32>
    %409 = vector.extract_strided_slice %12 {offsets = [3, 0], sizes = [1, 64], strides = [1, 1]} : vector<9x64xf32> to vector<1x64xf32>
    %410 = vector.broadcast %409 : vector<1x64xf32> to vector<4x64xf32>
    %411 = arith.mulf %408, %410 : vector<4x64xf32>
    %c12_291 = arith.constant 12 : index
    %c0_292 = arith.constant 0 : index
    %412 = vector.load %arg30[%c12_291, %c0_292] : memref<108x256xf32, #tpu.memory_space<vmem>>, vector<4x64xf32>
    tpu.vector_store %arg30[%c12_291, %c0_292], %411 {strides = array<i32>} : memref<108x256xf32, #tpu.memory_space<vmem>>, vector<4x64xf32>,
    %c0_293 = arith.constant 0 : index
    %c9_294 = arith.constant 9 : index
    %413 = vector.load %arg28[%c0_293, %c9_294] : memref<4x82xf32, #tpu.memory_space<vmem>>, vector<4x64xf32>
    %414 = vector.extract_strided_slice %12 {offsets = [4, 0], sizes = [1, 64], strides = [1, 1]} : vector<9x64xf32> to vector<1x64xf32>
    %415 = vector.broadcast %414 : vector<1x64xf32> to vector<4x64xf32>
    %416 = arith.mulf %413, %415 : vector<4x64xf32>
    %c16_295 = arith.constant 16 : index
    %c0_296 = arith.constant 0 : index
    %417 = vector.load %arg30[%c16_295, %c0_296] : memref<108x256xf32, #tpu.memory_space<vmem>>, vector<4x64xf32>
    tpu.vector_store %arg30[%c16_295, %c0_296], %416 {strides = array<i32>} : memref<108x256xf32, #tpu.memory_space<vmem>>, vector<4x64xf32>,
    %c0_297 = arith.constant 0 : index
    %c10_298 = arith.constant 10 : index
    %418 = vector.load %arg28[%c0_297, %c10_298] : memref<4x82xf32, #tpu.memory_space<vmem>>, vector<4x64xf32>
    %419 = vector.extract_strided_slice %12 {offsets = [5, 0], sizes = [1, 64], strides = [1, 1]} : vector<9x64xf32> to vector<1x64xf32>
    %420 = vector.broadcast %419 : vector<1x64xf32> to vector<4x64xf32>
    %421 = arith.mulf %418, %420 : vector<4x64xf32>
    %c20_299 = arith.constant 20 : index
    %c0_300 = arith.constant 0 : index
    %422 = vector.load %arg30[%c20_299, %c0_300] : memref<108x256xf32, #tpu.memory_space<vmem>>, vector<4x64xf32>
    tpu.vector_store %arg30[%c20_299, %c0_300], %421 {strides = array<i32>} : memref<108x256xf32, #tpu.memory_space<vmem>>, vector<4x64xf32>,
    %c0_301 = arith.constant 0 : index
    %c16_302 = arith.constant 16 : index
    %423 = vector.load %arg28[%c0_301, %c16_302] : memref<4x82xf32, #tpu.memory_space<vmem>>, vector<4x64xf32>
    %424 = vector.extract_strided_slice %12 {offsets = [6, 0], sizes = [1, 64], strides = [1, 1]} : vector<9x64xf32> to vector<1x64xf32>
    %425 = vector.broadcast %424 : vector<1x64xf32> to vector<4x64xf32>
    %426 = arith.mulf %423, %425 : vector<4x64xf32>
    %c24_303 = arith.constant 24 : index
    %c0_304 = arith.constant 0 : index
    %427 = vector.load %arg30[%c24_303, %c0_304] : memref<108x256xf32, #tpu.memory_space<vmem>>, vector<4x64xf32>
    tpu.vector_store %arg30[%c24_303, %c0_304], %426 {strides = array<i32>} : memref<108x256xf32, #tpu.memory_space<vmem>>, vector<4x64xf32>,
    %c0_305 = arith.constant 0 : index
    %c17_306 = arith.constant 17 : index
    %428 = vector.load %arg28[%c0_305, %c17_306] : memref<4x82xf32, #tpu.memory_space<vmem>>, vector<4x64xf32>
    %429 = vector.extract_strided_slice %12 {offsets = [7, 0], sizes = [1, 64], strides = [1, 1]} : vector<9x64xf32> to vector<1x64xf32>
    %430 = vector.broadcast %429 : vector<1x64xf32> to vector<4x64xf32>
    %431 = arith.mulf %428, %430 : vector<4x64xf32>
    %c28_307 = arith.constant 28 : index
    %c0_308 = arith.constant 0 : index
    %432 = vector.load %arg30[%c28_307, %c0_308] : memref<108x256xf32, #tpu.memory_space<vmem>>, vector<4x64xf32>
    tpu.vector_store %arg30[%c28_307, %c0_308], %431 {strides = array<i32>} : memref<108x256xf32, #tpu.memory_space<vmem>>, vector<4x64xf32>,
    %c0_309 = arith.constant 0 : index
    %c18_310 = arith.constant 18 : index
    %433 = vector.load %arg28[%c0_309, %c18_310] : memref<4x82xf32, #tpu.memory_space<vmem>>, vector<4x64xf32>
    %434 = vector.extract_strided_slice %12 {offsets = [8, 0], sizes = [1, 64], strides = [1, 1]} : vector<9x64xf32> to vector<1x64xf32>
    %435 = vector.broadcast %434 : vector<1x64xf32> to vector<4x64xf32>
    %436 = arith.mulf %433, %435 : vector<4x64xf32>
    %c32_311 = arith.constant 32 : index
    %c0_312 = arith.constant 0 : index
    %437 = vector.load %arg30[%c32_311, %c0_312] : memref<108x256xf32, #tpu.memory_space<vmem>>, vector<4x64xf32>
    tpu.vector_store %arg30[%c32_311, %c0_312], %436 {strides = array<i32>} : memref<108x256xf32, #tpu.memory_space<vmem>>, vector<4x64xf32>,
    %c0_313 = arith.constant 0 : index
    %c9_314 = arith.constant 9 : index
    %438 = vector.load %arg28[%c0_313, %c9_314] : memref<4x82xf32, #tpu.memory_space<vmem>>, vector<4x64xf32>
    tpu.vector_store %arg28[%c0_313, %c9_314], %391 {strides = array<i32>} : memref<4x82xf32, #tpu.memory_space<vmem>>, vector<4x64xf32>,
    %c0_315 = arith.constant 0 : index
    %c0_316 = arith.constant 0 : index
    %439 = vector.load %arg28[%c0_315, %c0_316] : memref<4x82xf32, #tpu.memory_space<vmem>>, vector<4x64xf32>
    %440 = vector.extract_strided_slice %12 {offsets = [0, 0], sizes = [1, 64], strides = [1, 1]} : vector<9x64xf32> to vector<1x64xf32>
    %441 = vector.broadcast %440 : vector<1x64xf32> to vector<4x64xf32>
    %442 = arith.mulf %439, %441 : vector<4x64xf32>
    %c36 = arith.constant 36 : index
    %c0_317 = arith.constant 0 : index
    %443 = vector.load %arg30[%c36, %c0_317] : memref<108x256xf32, #tpu.memory_space<vmem>>, vector<4x64xf32>
    tpu.vector_store %arg30[%c36, %c0_317], %442 {strides = array<i32>} : memref<108x256xf32, #tpu.memory_space<vmem>>, vector<4x64xf32>,
    %c0_318 = arith.constant 0 : index
    %c1_319 = arith.constant 1 : index
    %444 = vector.load %arg28[%c0_318, %c1_319] : memref<4x82xf32, #tpu.memory_space<vmem>>, vector<4x64xf32>
    %445 = vector.extract_strided_slice %12 {offsets = [1, 0], sizes = [1, 64], strides = [1, 1]} : vector<9x64xf32> to vector<1x64xf32>
    %446 = vector.broadcast %445 : vector<1x64xf32> to vector<4x64xf32>
    %447 = arith.mulf %444, %446 : vector<4x64xf32>
    %c40 = arith.constant 40 : index
    %c0_320 = arith.constant 0 : index
    %448 = vector.load %arg30[%c40, %c0_320] : memref<108x256xf32, #tpu.memory_space<vmem>>, vector<4x64xf32>
    tpu.vector_store %arg30[%c40, %c0_320], %447 {strides = array<i32>} : memref<108x256xf32, #tpu.memory_space<vmem>>, vector<4x64xf32>,
    %c0_321 = arith.constant 0 : index
    %c2_322 = arith.constant 2 : index
    %449 = vector.load %arg28[%c0_321, %c2_322] : memref<4x82xf32, #tpu.memory_space<vmem>>, vector<4x64xf32>
    %450 = vector.extract_strided_slice %12 {offsets = [2, 0], sizes = [1, 64], strides = [1, 1]} : vector<9x64xf32> to vector<1x64xf32>
    %451 = vector.broadcast %450 : vector<1x64xf32> to vector<4x64xf32>
    %452 = arith.mulf %449, %451 : vector<4x64xf32>
    %c44 = arith.constant 44 : index
    %c0_323 = arith.constant 0 : index
    %453 = vector.load %arg30[%c44, %c0_323] : memref<108x256xf32, #tpu.memory_space<vmem>>, vector<4x64xf32>
    tpu.vector_store %arg30[%c44, %c0_323], %452 {strides = array<i32>} : memref<108x256xf32, #tpu.memory_space<vmem>>, vector<4x64xf32>,
    %c0_324 = arith.constant 0 : index
    %c8_325 = arith.constant 8 : index
    %454 = vector.load %arg28[%c0_324, %c8_325] : memref<4x82xf32, #tpu.memory_space<vmem>>, vector<4x64xf32>
    %455 = vector.extract_strided_slice %12 {offsets = [3, 0], sizes = [1, 64], strides = [1, 1]} : vector<9x64xf32> to vector<1x64xf32>
    %456 = vector.broadcast %455 : vector<1x64xf32> to vector<4x64xf32>
    %457 = arith.mulf %454, %456 : vector<4x64xf32>
    %c48 = arith.constant 48 : index
    %c0_326 = arith.constant 0 : index
    %458 = vector.load %arg30[%c48, %c0_326] : memref<108x256xf32, #tpu.memory_space<vmem>>, vector<4x64xf32>
    tpu.vector_store %arg30[%c48, %c0_326], %457 {strides = array<i32>} : memref<108x256xf32, #tpu.memory_space<vmem>>, vector<4x64xf32>,
    %c0_327 = arith.constant 0 : index
    %c9_328 = arith.constant 9 : index
    %459 = vector.load %arg28[%c0_327, %c9_328] : memref<4x82xf32, #tpu.memory_space<vmem>>, vector<4x64xf32>
    %460 = vector.extract_strided_slice %12 {offsets = [4, 0], sizes = [1, 64], strides = [1, 1]} : vector<9x64xf32> to vector<1x64xf32>
    %461 = vector.broadcast %460 : vector<1x64xf32> to vector<4x64xf32>
    %462 = arith.mulf %459, %461 : vector<4x64xf32>
    %c52 = arith.constant 52 : index
    %c0_329 = arith.constant 0 : index
    %463 = vector.load %arg30[%c52, %c0_329] : memref<108x256xf32, #tpu.memory_space<vmem>>, vector<4x64xf32>
    tpu.vector_store %arg30[%c52, %c0_329], %462 {strides = array<i32>} : memref<108x256xf32, #tpu.memory_space<vmem>>, vector<4x64xf32>,
    %c0_330 = arith.constant 0 : index
    %c10_331 = arith.constant 10 : index
    %464 = vector.load %arg28[%c0_330, %c10_331] : memref<4x82xf32, #tpu.memory_space<vmem>>, vector<4x64xf32>
    %465 = vector.extract_strided_slice %12 {offsets = [5, 0], sizes = [1, 64], strides = [1, 1]} : vector<9x64xf32> to vector<1x64xf32>
    %466 = vector.broadcast %465 : vector<1x64xf32> to vector<4x64xf32>
    %467 = arith.mulf %464, %466 : vector<4x64xf32>
    %c56 = arith.constant 56 : index
    %c0_332 = arith.constant 0 : index
    %468 = vector.load %arg30[%c56, %c0_332] : memref<108x256xf32, #tpu.memory_space<vmem>>, vector<4x64xf32>
    tpu.vector_store %arg30[%c56, %c0_332], %467 {strides = array<i32>} : memref<108x256xf32, #tpu.memory_space<vmem>>, vector<4x64xf32>,
    %c0_333 = arith.constant 0 : index
    %c16_334 = arith.constant 16 : index
    %469 = vector.load %arg28[%c0_333, %c16_334] : memref<4x82xf32, #tpu.memory_space<vmem>>, vector<4x64xf32>
    %470 = vector.extract_strided_slice %12 {offsets = [6, 0], sizes = [1, 64], strides = [1, 1]} : vector<9x64xf32> to vector<1x64xf32>
    %471 = vector.broadcast %470 : vector<1x64xf32> to vector<4x64xf32>
    %472 = arith.mulf %469, %471 : vector<4x64xf32>
    %c60 = arith.constant 60 : index
    %c0_335 = arith.constant 0 : index
    %473 = vector.load %arg30[%c60, %c0_335] : memref<108x256xf32, #tpu.memory_space<vmem>>, vector<4x64xf32>
    tpu.vector_store %arg30[%c60, %c0_335], %472 {strides = array<i32>} : memref<108x256xf32, #tpu.memory_space<vmem>>, vector<4x64xf32>,
    %c0_336 = arith.constant 0 : index
    %c17_337 = arith.constant 17 : index
    %474 = vector.load %arg28[%c0_336, %c17_337] : memref<4x82xf32, #tpu.memory_space<vmem>>, vector<4x64xf32>
    %475 = vector.extract_strided_slice %12 {offsets = [7, 0], sizes = [1, 64], strides = [1, 1]} : vector<9x64xf32> to vector<1x64xf32>
    %476 = vector.broadcast %475 : vector<1x64xf32> to vector<4x64xf32>
    %477 = arith.mulf %474, %476 : vector<4x64xf32>
    %c64 = arith.constant 64 : index
    %c0_338 = arith.constant 0 : index
    %478 = vector.load %arg30[%c64, %c0_338] : memref<108x256xf32, #tpu.memory_space<vmem>>, vector<4x64xf32>
    tpu.vector_store %arg30[%c64, %c0_338], %477 {strides = array<i32>} : memref<108x256xf32, #tpu.memory_space<vmem>>, vector<4x64xf32>,
    %c0_339 = arith.constant 0 : index
    %c18_340 = arith.constant 18 : index
    %479 = vector.load %arg28[%c0_339, %c18_340] : memref<4x82xf32, #tpu.memory_space<vmem>>, vector<4x64xf32>
    %480 = vector.extract_strided_slice %12 {offsets = [8, 0], sizes = [1, 64], strides = [1, 1]} : vector<9x64xf32> to vector<1x64xf32>
    %481 = vector.broadcast %480 : vector<1x64xf32> to vector<4x64xf32>
    %482 = arith.mulf %479, %481 : vector<4x64xf32>
    %c68 = arith.constant 68 : index
    %c0_341 = arith.constant 0 : index
    %483 = vector.load %arg30[%c68, %c0_341] : memref<108x256xf32, #tpu.memory_space<vmem>>, vector<4x64xf32>
    tpu.vector_store %arg30[%c68, %c0_341], %482 {strides = array<i32>} : memref<108x256xf32, #tpu.memory_space<vmem>>, vector<4x64xf32>,
    %c0_342 = arith.constant 0 : index
    %c0_343 = arith.constant 0 : index
    %484 = vector.load %arg21[%c0_342, %c0_343] : memref<8x72xf32, #tpu.memory_space<vmem>>, vector<8x72xf32>
    %c0_344 = arith.constant 0 : index
    %c0_345 = arith.constant 0 : index
    %485 = vector.load %arg30[%c0_344, %c0_345] : memref<108x256xf32, #tpu.memory_space<vmem>>, vector<72x64xf32>
    %cst_346 = arith.constant dense<0.000000e+00> : vector<8x64xf32>
    %486 = tpu.matmul %484, %485, %cst_346 {dimension_numbers = #tpu.dot_dimension_numbers<[1], [0], [0], [1], [0, 0, 1, 1], [], []>} : vector<8x72xf32>, vector<72x64xf32>, vector<8x64xf32> -> vector<8x64xf32>
    %c0_347 = arith.constant 0 : index
    %c0_348 = arith.constant 0 : index
    %487 = vector.load %arg22[%c0_347, %c0_348] : memref<8x1xf32, #tpu.memory_space<vmem>>, vector<8x1xf32>
    %488 = vector.broadcast %487 : vector<8x1xf32> to vector<8x64xf32>
    %489 = arith.addf %486, %488 : vector<8x64xf32>
    %490 = vector.extract_strided_slice %489 {offsets = [0, 0], sizes = [8, 8], strides = [1, 1]} : vector<8x64xf32> to vector<8x8xf32>
    %c0_349 = arith.constant 0 : index
    %c0_350 = arith.constant 0 : index
    %c0_351 = arith.constant 0 : index
    %491 = vector.load %arg31[%c0_349, %c0_350, %c0_351] : memref<8x8x8xf32, #tpu.memory_space<vmem>>, vector<8x1x8xf32>
    %492 = vector.shape_cast %491 : vector<8x1x8xf32> to vector<8x8xf32>
    %493 = vector.shape_cast %490 : vector<8x8xf32> to vector<8x1x8xf32>
    tpu.vector_store %arg31[%c0_349, %c0_350, %c0_351], %493 {strides = array<i32>} : memref<8x8x8xf32, #tpu.memory_space<vmem>>, vector<8x1x8xf32>,
    %494 = vector.extract_strided_slice %489 {offsets = [0, 8], sizes = [8, 8], strides = [1, 1]} : vector<8x64xf32> to vector<8x8xf32>
    %c0_352 = arith.constant 0 : index
    %c1_353 = arith.constant 1 : index
    %c0_354 = arith.constant 0 : index
    %495 = vector.load %arg31[%c0_352, %c1_353, %c0_354] : memref<8x8x8xf32, #tpu.memory_space<vmem>>, vector<8x1x8xf32>
    %496 = vector.shape_cast %495 : vector<8x1x8xf32> to vector<8x8xf32>
    %497 = vector.shape_cast %494 : vector<8x8xf32> to vector<8x1x8xf32>
    tpu.vector_store %arg31[%c0_352, %c1_353, %c0_354], %497 {strides = array<i32>} : memref<8x8x8xf32, #tpu.memory_space<vmem>>, vector<8x1x8xf32>,
    %498 = vector.extract_strided_slice %489 {offsets = [0, 16], sizes = [8, 8], strides = [1, 1]} : vector<8x64xf32> to vector<8x8xf32>
    %c0_355 = arith.constant 0 : index
    %c2_356 = arith.constant 2 : index
    %c0_357 = arith.constant 0 : index
    %499 = vector.load %arg31[%c0_355, %c2_356, %c0_357] : memref<8x8x8xf32, #tpu.memory_space<vmem>>, vector<8x1x8xf32>
    %500 = vector.shape_cast %499 : vector<8x1x8xf32> to vector<8x8xf32>
    %501 = vector.shape_cast %498 : vector<8x8xf32> to vector<8x1x8xf32>
    tpu.vector_store %arg31[%c0_355, %c2_356, %c0_357], %501 {strides = array<i32>} : memref<8x8x8xf32, #tpu.memory_space<vmem>>, vector<8x1x8xf32>,
    %502 = vector.extract_strided_slice %489 {offsets = [0, 24], sizes = [8, 8], strides = [1, 1]} : vector<8x64xf32> to vector<8x8xf32>
    %c0_358 = arith.constant 0 : index
    %c3 = arith.constant 3 : index
    %c0_359 = arith.constant 0 : index
    %503 = vector.load %arg31[%c0_358, %c3, %c0_359] : memref<8x8x8xf32, #tpu.memory_space<vmem>>, vector<8x1x8xf32>
    %504 = vector.shape_cast %503 : vector<8x1x8xf32> to vector<8x8xf32>
    %505 = vector.shape_cast %502 : vector<8x8xf32> to vector<8x1x8xf32>
    tpu.vector_store %arg31[%c0_358, %c3, %c0_359], %505 {strides = array<i32>} : memref<8x8x8xf32, #tpu.memory_space<vmem>>, vector<8x1x8xf32>,
    %506 = vector.extract_strided_slice %489 {offsets = [0, 32], sizes = [8, 8], strides = [1, 1]} : vector<8x64xf32> to vector<8x8xf32>
    %c0_360 = arith.constant 0 : index
    %c4_361 = arith.constant 4 : index
    %c0_362 = arith.constant 0 : index
    %507 = vector.load %arg31[%c0_360, %c4_361, %c0_362] : memref<8x8x8xf32, #tpu.memory_space<vmem>>, vector<8x1x8xf32>
    %508 = vector.shape_cast %507 : vector<8x1x8xf32> to vector<8x8xf32>
    %509 = vector.shape_cast %506 : vector<8x8xf32> to vector<8x1x8xf32>
    tpu.vector_store %arg31[%c0_360, %c4_361, %c0_362], %509 {strides = array<i32>} : memref<8x8x8xf32, #tpu.memory_space<vmem>>, vector<8x1x8xf32>,
    %510 = vector.extract_strided_slice %489 {offsets = [0, 40], sizes = [8, 8], strides = [1, 1]} : vector<8x64xf32> to vector<8x8xf32>
    %c0_363 = arith.constant 0 : index
    %c5 = arith.constant 5 : index
    %c0_364 = arith.constant 0 : index
    %511 = vector.load %arg31[%c0_363, %c5, %c0_364] : memref<8x8x8xf32, #tpu.memory_space<vmem>>, vector<8x1x8xf32>
    %512 = vector.shape_cast %511 : vector<8x1x8xf32> to vector<8x8xf32>
    %513 = vector.shape_cast %510 : vector<8x8xf32> to vector<8x1x8xf32>
    tpu.vector_store %arg31[%c0_363, %c5, %c0_364], %513 {strides = array<i32>} : memref<8x8x8xf32, #tpu.memory_space<vmem>>, vector<8x1x8xf32>,
    %514 = vector.extract_strided_slice %489 {offsets = [0, 48], sizes = [8, 8], strides = [1, 1]} : vector<8x64xf32> to vector<8x8xf32>
    %c0_365 = arith.constant 0 : index
    %c6 = arith.constant 6 : index
    %c0_366 = arith.constant 0 : index
    %515 = vector.load %arg31[%c0_365, %c6, %c0_366] : memref<8x8x8xf32, #tpu.memory_space<vmem>>, vector<8x1x8xf32>
    %516 = vector.shape_cast %515 : vector<8x1x8xf32> to vector<8x8xf32>
    %517 = vector.shape_cast %514 : vector<8x8xf32> to vector<8x1x8xf32>
    tpu.vector_store %arg31[%c0_365, %c6, %c0_366], %517 {strides = array<i32>} : memref<8x8x8xf32, #tpu.memory_space<vmem>>, vector<8x1x8xf32>,
    %518 = vector.extract_strided_slice %489 {offsets = [0, 56], sizes = [8, 8], strides = [1, 1]} : vector<8x64xf32> to vector<8x8xf32>
    %c0_367 = arith.constant 0 : index
    %c7 = arith.constant 7 : index
    %c0_368 = arith.constant 0 : index
    %519 = vector.load %arg31[%c0_367, %c7, %c0_368] : memref<8x8x8xf32, #tpu.memory_space<vmem>>, vector<8x1x8xf32>
    %520 = vector.shape_cast %519 : vector<8x1x8xf32> to vector<8x8xf32>
    %521 = vector.shape_cast %518 : vector<8x8xf32> to vector<8x1x8xf32>
    tpu.vector_store %arg31[%c0_367, %c7, %c0_368], %521 {strides = array<i32>} : memref<8x8x8xf32, #tpu.memory_space<vmem>>, vector<8x1x8xf32>,
    %c0_369 = arith.constant 0 : index
    %c0_370 = arith.constant 0 : index
    %c0_371 = arith.constant 0 : index
    %522 = vector.load %arg31[%c0_369, %c0_370, %c0_371] : memref<8x8x8xf32, #tpu.memory_space<vmem>>, vector<8x8x8xf32>
    %c0_372 = arith.constant 0 : index
    %c0_373 = arith.constant 0 : index
    %523 = vector.load %arg7[%c0_372, %c0_373] : memref<16x8xf32, #tpu.memory_space<vmem>>, vector<16x8xf32>
    %c0_374 = arith.constant 0 : index
    %c0_375 = arith.constant 0 : index
    %524 = vector.load %arg8[%c0_374, %c0_375] : memref<8x16xf32, #tpu.memory_space<vmem>>, vector<8x16xf32>
    %525 = vector.shape_cast %522 : vector<8x8x8xf32> to vector<64x8xf32>
    %cst_376 = arith.constant dense<0.000000e+00> : vector<64x16xf32>
    %526 = tpu.matmul %525, %524, %cst_376 {dimension_numbers = #tpu.dot_dimension_numbers<[1], [0], [0], [1], [0, 0, 1, 1], [], []>} : vector<64x8xf32>, vector<8x16xf32>, vector<64x16xf32> -> vector<64x16xf32>
    %527 = vector.shape_cast %526 : vector<64x16xf32> to vector<8x8x16xf32>
    %528 = vector.shape_cast %523 : vector<16x8xf32> to vector<1x16x8xf32>
    %529 = vector.shape_cast %528 : vector<1x16x8xf32> to vector<1x16x8xf32>
    %530 = vector.broadcast %529 : vector<1x16x8xf32> to vector<8x16x8xf32>
    %cst_377 = arith.constant dense<0.000000e+00> : vector<8x16x16xf32>
    %531 = tpu.matmul %530, %527, %cst_377 {dimension_numbers = #tpu.dot_dimension_numbers<[2], [1], [1], [2], [0, 0, 0, 1, 1, 2], [0], [0]>} : vector<8x16x8xf32>, vector<8x8x16xf32>, vector<8x16x16xf32> -> vector<8x16x16xf32>
    %532 = vector.extract_strided_slice %531 {offsets = [0, 0, 0], sizes = [8, 1, 16], strides = [1, 1, 1]} : vector<8x16x16xf32> to vector<8x1x16xf32>
    %533 = vector.shape_cast %532 : vector<8x1x16xf32> to vector<8x16xf32>
    %c0_378 = arith.constant 0 : index
    %c17_379 = arith.constant 17 : index
    %534 = vector.load %arg29[%c0_378, %c17_379] : memref<12x290xf32, #tpu.memory_space<vmem>>, vector<8x16xf32>
    tpu.vector_store %arg29[%c0_378, %c17_379], %533 {strides = array<i32>} : memref<12x290xf32, #tpu.memory_space<vmem>>, vector<8x16xf32>,
    %535 = vector.extract_strided_slice %531 {offsets = [0, 1, 0], sizes = [8, 1, 16], strides = [1, 1, 1]} : vector<8x16x16xf32> to vector<8x1x16xf32>
    %536 = vector.shape_cast %535 : vector<8x1x16xf32> to vector<8x16xf32>
    %c0_380 = arith.constant 0 : index
    %c33_381 = arith.constant 33 : index
    %537 = vector.load %arg29[%c0_380, %c33_381] : memref<12x290xf32, #tpu.memory_space<vmem>>, vector<8x16xf32>
    tpu.vector_store %arg29[%c0_380, %c33_381], %536 {strides = array<i32>} : memref<12x290xf32, #tpu.memory_space<vmem>>, vector<8x16xf32>,
    %538 = vector.extract_strided_slice %531 {offsets = [0, 2, 0], sizes = [8, 1, 16], strides = [1, 1, 1]} : vector<8x16x16xf32> to vector<8x1x16xf32>
    %539 = vector.shape_cast %538 : vector<8x1x16xf32> to vector<8x16xf32>
    %c0_382 = arith.constant 0 : index
    %c49_383 = arith.constant 49 : index
    %540 = vector.load %arg29[%c0_382, %c49_383] : memref<12x290xf32, #tpu.memory_space<vmem>>, vector<8x16xf32>
    tpu.vector_store %arg29[%c0_382, %c49_383], %539 {strides = array<i32>} : memref<12x290xf32, #tpu.memory_space<vmem>>, vector<8x16xf32>,
    %541 = vector.extract_strided_slice %531 {offsets = [0, 3, 0], sizes = [8, 1, 16], strides = [1, 1, 1]} : vector<8x16x16xf32> to vector<8x1x16xf32>
    %542 = vector.shape_cast %541 : vector<8x1x16xf32> to vector<8x16xf32>
    %c0_384 = arith.constant 0 : index
    %c65_385 = arith.constant 65 : index
    %543 = vector.load %arg29[%c0_384, %c65_385] : memref<12x290xf32, #tpu.memory_space<vmem>>, vector<8x16xf32>
    tpu.vector_store %arg29[%c0_384, %c65_385], %542 {strides = array<i32>} : memref<12x290xf32, #tpu.memory_space<vmem>>, vector<8x16xf32>,
    %544 = vector.extract_strided_slice %531 {offsets = [0, 4, 0], sizes = [8, 1, 16], strides = [1, 1, 1]} : vector<8x16x16xf32> to vector<8x1x16xf32>
    %545 = vector.shape_cast %544 : vector<8x1x16xf32> to vector<8x16xf32>
    %c0_386 = arith.constant 0 : index
    %c81_387 = arith.constant 81 : index
    %546 = vector.load %arg29[%c0_386, %c81_387] : memref<12x290xf32, #tpu.memory_space<vmem>>, vector<8x16xf32>
    tpu.vector_store %arg29[%c0_386, %c81_387], %545 {strides = array<i32>} : memref<12x290xf32, #tpu.memory_space<vmem>>, vector<8x16xf32>,
    %547 = vector.extract_strided_slice %531 {offsets = [0, 5, 0], sizes = [8, 1, 16], strides = [1, 1, 1]} : vector<8x16x16xf32> to vector<8x1x16xf32>
    %548 = vector.shape_cast %547 : vector<8x1x16xf32> to vector<8x16xf32>
    %c0_388 = arith.constant 0 : index
    %c97_389 = arith.constant 97 : index
    %549 = vector.load %arg29[%c0_388, %c97_389] : memref<12x290xf32, #tpu.memory_space<vmem>>, vector<8x16xf32>
    tpu.vector_store %arg29[%c0_388, %c97_389], %548 {strides = array<i32>} : memref<12x290xf32, #tpu.memory_space<vmem>>, vector<8x16xf32>,
    %550 = vector.extract_strided_slice %531 {offsets = [0, 6, 0], sizes = [8, 1, 16], strides = [1, 1, 1]} : vector<8x16x16xf32> to vector<8x1x16xf32>
    %551 = vector.shape_cast %550 : vector<8x1x16xf32> to vector<8x16xf32>
    %c0_390 = arith.constant 0 : index
    %c113_391 = arith.constant 113 : index
    %552 = vector.load %arg29[%c0_390, %c113_391] : memref<12x290xf32, #tpu.memory_space<vmem>>, vector<8x16xf32>
    tpu.vector_store %arg29[%c0_390, %c113_391], %551 {strides = array<i32>} : memref<12x290xf32, #tpu.memory_space<vmem>>, vector<8x16xf32>,
    %553 = vector.extract_strided_slice %531 {offsets = [0, 7, 0], sizes = [8, 1, 16], strides = [1, 1, 1]} : vector<8x16x16xf32> to vector<8x1x16xf32>
    %554 = vector.shape_cast %553 : vector<8x1x16xf32> to vector<8x16xf32>
    %c0_392 = arith.constant 0 : index
    %c129_393 = arith.constant 129 : index
    %555 = vector.load %arg29[%c0_392, %c129_393] : memref<12x290xf32, #tpu.memory_space<vmem>>, vector<8x16xf32>
    tpu.vector_store %arg29[%c0_392, %c129_393], %554 {strides = array<i32>} : memref<12x290xf32, #tpu.memory_space<vmem>>, vector<8x16xf32>,
    %556 = vector.extract_strided_slice %531 {offsets = [0, 8, 0], sizes = [8, 1, 16], strides = [1, 1, 1]} : vector<8x16x16xf32> to vector<8x1x16xf32>
    %557 = vector.shape_cast %556 : vector<8x1x16xf32> to vector<8x16xf32>
    %c0_394 = arith.constant 0 : index
    %c145_395 = arith.constant 145 : index
    %558 = vector.load %arg29[%c0_394, %c145_395] : memref<12x290xf32, #tpu.memory_space<vmem>>, vector<8x16xf32>
    tpu.vector_store %arg29[%c0_394, %c145_395], %557 {strides = array<i32>} : memref<12x290xf32, #tpu.memory_space<vmem>>, vector<8x16xf32>,
    %559 = vector.extract_strided_slice %531 {offsets = [0, 9, 0], sizes = [8, 1, 16], strides = [1, 1, 1]} : vector<8x16x16xf32> to vector<8x1x16xf32>
    %560 = vector.shape_cast %559 : vector<8x1x16xf32> to vector<8x16xf32>
    %c0_396 = arith.constant 0 : index
    %c161_397 = arith.constant 161 : index
    %561 = vector.load %arg29[%c0_396, %c161_397] : memref<12x290xf32, #tpu.memory_space<vmem>>, vector<8x16xf32>
    tpu.vector_store %arg29[%c0_396, %c161_397], %560 {strides = array<i32>} : memref<12x290xf32, #tpu.memory_space<vmem>>, vector<8x16xf32>,
    %562 = vector.extract_strided_slice %531 {offsets = [0, 10, 0], sizes = [8, 1, 16], strides = [1, 1, 1]} : vector<8x16x16xf32> to vector<8x1x16xf32>
    %563 = vector.shape_cast %562 : vector<8x1x16xf32> to vector<8x16xf32>
    %c0_398 = arith.constant 0 : index
    %c177_399 = arith.constant 177 : index
    %564 = vector.load %arg29[%c0_398, %c177_399] : memref<12x290xf32, #tpu.memory_space<vmem>>, vector<8x16xf32>
    tpu.vector_store %arg29[%c0_398, %c177_399], %563 {strides = array<i32>} : memref<12x290xf32, #tpu.memory_space<vmem>>, vector<8x16xf32>,
    %565 = vector.extract_strided_slice %531 {offsets = [0, 11, 0], sizes = [8, 1, 16], strides = [1, 1, 1]} : vector<8x16x16xf32> to vector<8x1x16xf32>
    %566 = vector.shape_cast %565 : vector<8x1x16xf32> to vector<8x16xf32>
    %c0_400 = arith.constant 0 : index
    %c193_401 = arith.constant 193 : index
    %567 = vector.load %arg29[%c0_400, %c193_401] : memref<12x290xf32, #tpu.memory_space<vmem>>, vector<8x16xf32>
    tpu.vector_store %arg29[%c0_400, %c193_401], %566 {strides = array<i32>} : memref<12x290xf32, #tpu.memory_space<vmem>>, vector<8x16xf32>,
    %568 = vector.extract_strided_slice %531 {offsets = [0, 12, 0], sizes = [8, 1, 16], strides = [1, 1, 1]} : vector<8x16x16xf32> to vector<8x1x16xf32>
    %569 = vector.shape_cast %568 : vector<8x1x16xf32> to vector<8x16xf32>
    %c0_402 = arith.constant 0 : index
    %c209_403 = arith.constant 209 : index
    %570 = vector.load %arg29[%c0_402, %c209_403] : memref<12x290xf32, #tpu.memory_space<vmem>>, vector<8x16xf32>
    tpu.vector_store %arg29[%c0_402, %c209_403], %569 {strides = array<i32>} : memref<12x290xf32, #tpu.memory_space<vmem>>, vector<8x16xf32>,
    %571 = vector.extract_strided_slice %531 {offsets = [0, 13, 0], sizes = [8, 1, 16], strides = [1, 1, 1]} : vector<8x16x16xf32> to vector<8x1x16xf32>
    %572 = vector.shape_cast %571 : vector<8x1x16xf32> to vector<8x16xf32>
    %c0_404 = arith.constant 0 : index
    %c225_405 = arith.constant 225 : index
    %573 = vector.load %arg29[%c0_404, %c225_405] : memref<12x290xf32, #tpu.memory_space<vmem>>, vector<8x16xf32>
    tpu.vector_store %arg29[%c0_404, %c225_405], %572 {strides = array<i32>} : memref<12x290xf32, #tpu.memory_space<vmem>>, vector<8x16xf32>,
    %574 = vector.extract_strided_slice %531 {offsets = [0, 14, 0], sizes = [8, 1, 16], strides = [1, 1, 1]} : vector<8x16x16xf32> to vector<8x1x16xf32>
    %575 = vector.shape_cast %574 : vector<8x1x16xf32> to vector<8x16xf32>
    %c0_406 = arith.constant 0 : index
    %c241_407 = arith.constant 241 : index
    %576 = vector.load %arg29[%c0_406, %c241_407] : memref<12x290xf32, #tpu.memory_space<vmem>>, vector<8x16xf32>
    tpu.vector_store %arg29[%c0_406, %c241_407], %575 {strides = array<i32>} : memref<12x290xf32, #tpu.memory_space<vmem>>, vector<8x16xf32>,
    %577 = vector.extract_strided_slice %531 {offsets = [0, 15, 0], sizes = [8, 1, 16], strides = [1, 1, 1]} : vector<8x16x16xf32> to vector<8x1x16xf32>
    %578 = vector.shape_cast %577 : vector<8x1x16xf32> to vector<8x16xf32>
    %c0_408 = arith.constant 0 : index
    %c257_409 = arith.constant 257 : index
    %579 = vector.load %arg29[%c0_408, %c257_409] : memref<12x290xf32, #tpu.memory_space<vmem>>, vector<8x16xf32>
    tpu.vector_store %arg29[%c0_408, %c257_409], %578 {strides = array<i32>} : memref<12x290xf32, #tpu.memory_space<vmem>>, vector<8x16xf32>,
    %c0_410 = arith.constant 0 : index
    %c0_411 = arith.constant 0 : index
    %580 = vector.load %arg29[%c0_410, %c0_411] : memref<12x290xf32, #tpu.memory_space<vmem>>, vector<8x256xf32>
    %581 = vector.extract_strided_slice %13 {offsets = [0, 0], sizes = [1, 256], strides = [1, 1]} : vector<9x256xf32> to vector<1x256xf32>
    %582 = vector.broadcast %581 : vector<1x256xf32> to vector<8x256xf32>
    %583 = arith.mulf %580, %582 : vector<8x256xf32>
    %c0_412 = arith.constant 0 : index
    %c0_413 = arith.constant 0 : index
    %584 = vector.load %arg30[%c0_412, %c0_413] : memref<108x256xf32, #tpu.memory_space<vmem>>, vector<8x256xf32>
    tpu.vector_store %arg30[%c0_412, %c0_413], %583 {strides = array<i32>} : memref<108x256xf32, #tpu.memory_space<vmem>>, vector<8x256xf32>,
    %c0_414 = arith.constant 0 : index
    %c1_415 = arith.constant 1 : index
    %585 = vector.load %arg29[%c0_414, %c1_415] : memref<12x290xf32, #tpu.memory_space<vmem>>, vector<8x256xf32>
    %586 = vector.extract_strided_slice %13 {offsets = [1, 0], sizes = [1, 256], strides = [1, 1]} : vector<9x256xf32> to vector<1x256xf32>
    %587 = vector.broadcast %586 : vector<1x256xf32> to vector<8x256xf32>
    %588 = arith.mulf %585, %587 : vector<8x256xf32>
    %c8_416 = arith.constant 8 : index
    %c0_417 = arith.constant 0 : index
    %589 = vector.load %arg30[%c8_416, %c0_417] : memref<108x256xf32, #tpu.memory_space<vmem>>, vector<8x256xf32>
    tpu.vector_store %arg30[%c8_416, %c0_417], %588 {strides = array<i32>} : memref<108x256xf32, #tpu.memory_space<vmem>>, vector<8x256xf32>,
    %c0_418 = arith.constant 0 : index
    %c2_419 = arith.constant 2 : index
    %590 = vector.load %arg29[%c0_418, %c2_419] : memref<12x290xf32, #tpu.memory_space<vmem>>, vector<8x256xf32>
    %591 = vector.extract_strided_slice %13 {offsets = [2, 0], sizes = [1, 256], strides = [1, 1]} : vector<9x256xf32> to vector<1x256xf32>
    %592 = vector.broadcast %591 : vector<1x256xf32> to vector<8x256xf32>
    %593 = arith.mulf %590, %592 : vector<8x256xf32>
    %c16_420 = arith.constant 16 : index
    %c0_421 = arith.constant 0 : index
    %594 = vector.load %arg30[%c16_420, %c0_421] : memref<108x256xf32, #tpu.memory_space<vmem>>, vector<8x256xf32>
    tpu.vector_store %arg30[%c16_420, %c0_421], %593 {strides = array<i32>} : memref<108x256xf32, #tpu.memory_space<vmem>>, vector<8x256xf32>,
    %c0_422 = arith.constant 0 : index
    %c16_423 = arith.constant 16 : index
    %595 = vector.load %arg29[%c0_422, %c16_423] : memref<12x290xf32, #tpu.memory_space<vmem>>, vector<8x256xf32>
    %596 = vector.extract_strided_slice %13 {offsets = [3, 0], sizes = [1, 256], strides = [1, 1]} : vector<9x256xf32> to vector<1x256xf32>
    %597 = vector.broadcast %596 : vector<1x256xf32> to vector<8x256xf32>
    %598 = arith.mulf %595, %597 : vector<8x256xf32>
    %c24_424 = arith.constant 24 : index
    %c0_425 = arith.constant 0 : index
    %599 = vector.load %arg30[%c24_424, %c0_425] : memref<108x256xf32, #tpu.memory_space<vmem>>, vector<8x256xf32>
    tpu.vector_store %arg30[%c24_424, %c0_425], %598 {strides = array<i32>} : memref<108x256xf32, #tpu.memory_space<vmem>>, vector<8x256xf32>,
    %c0_426 = arith.constant 0 : index
    %c17_427 = arith.constant 17 : index
    %600 = vector.load %arg29[%c0_426, %c17_427] : memref<12x290xf32, #tpu.memory_space<vmem>>, vector<8x256xf32>
    %601 = vector.extract_strided_slice %13 {offsets = [4, 0], sizes = [1, 256], strides = [1, 1]} : vector<9x256xf32> to vector<1x256xf32>
    %602 = vector.broadcast %601 : vector<1x256xf32> to vector<8x256xf32>
    %603 = arith.mulf %600, %602 : vector<8x256xf32>
    %c32_428 = arith.constant 32 : index
    %c0_429 = arith.constant 0 : index
    %604 = vector.load %arg30[%c32_428, %c0_429] : memref<108x256xf32, #tpu.memory_space<vmem>>, vector<8x256xf32>
    tpu.vector_store %arg30[%c32_428, %c0_429], %603 {strides = array<i32>} : memref<108x256xf32, #tpu.memory_space<vmem>>, vector<8x256xf32>,
    %c0_430 = arith.constant 0 : index
    %c18_431 = arith.constant 18 : index
    %605 = vector.load %arg29[%c0_430, %c18_431] : memref<12x290xf32, #tpu.memory_space<vmem>>, vector<8x256xf32>
    %606 = vector.extract_strided_slice %13 {offsets = [5, 0], sizes = [1, 256], strides = [1, 1]} : vector<9x256xf32> to vector<1x256xf32>
    %607 = vector.broadcast %606 : vector<1x256xf32> to vector<8x256xf32>
    %608 = arith.mulf %605, %607 : vector<8x256xf32>
    %c40_432 = arith.constant 40 : index
    %c0_433 = arith.constant 0 : index
    %609 = vector.load %arg30[%c40_432, %c0_433] : memref<108x256xf32, #tpu.memory_space<vmem>>, vector<8x256xf32>
    tpu.vector_store %arg30[%c40_432, %c0_433], %608 {strides = array<i32>} : memref<108x256xf32, #tpu.memory_space<vmem>>, vector<8x256xf32>,
    %c0_434 = arith.constant 0 : index
    %c32_435 = arith.constant 32 : index
    %610 = vector.load %arg29[%c0_434, %c32_435] : memref<12x290xf32, #tpu.memory_space<vmem>>, vector<8x256xf32>
    %611 = vector.extract_strided_slice %13 {offsets = [6, 0], sizes = [1, 256], strides = [1, 1]} : vector<9x256xf32> to vector<1x256xf32>
    %612 = vector.broadcast %611 : vector<1x256xf32> to vector<8x256xf32>
    %613 = arith.mulf %610, %612 : vector<8x256xf32>
    %c48_436 = arith.constant 48 : index
    %c0_437 = arith.constant 0 : index
    %614 = vector.load %arg30[%c48_436, %c0_437] : memref<108x256xf32, #tpu.memory_space<vmem>>, vector<8x256xf32>
    tpu.vector_store %arg30[%c48_436, %c0_437], %613 {strides = array<i32>} : memref<108x256xf32, #tpu.memory_space<vmem>>, vector<8x256xf32>,
    %c0_438 = arith.constant 0 : index
    %c33_439 = arith.constant 33 : index
    %615 = vector.load %arg29[%c0_438, %c33_439] : memref<12x290xf32, #tpu.memory_space<vmem>>, vector<8x256xf32>
    %616 = vector.extract_strided_slice %13 {offsets = [7, 0], sizes = [1, 256], strides = [1, 1]} : vector<9x256xf32> to vector<1x256xf32>
    %617 = vector.broadcast %616 : vector<1x256xf32> to vector<8x256xf32>
    %618 = arith.mulf %615, %617 : vector<8x256xf32>
    %c56_440 = arith.constant 56 : index
    %c0_441 = arith.constant 0 : index
    %619 = vector.load %arg30[%c56_440, %c0_441] : memref<108x256xf32, #tpu.memory_space<vmem>>, vector<8x256xf32>
    tpu.vector_store %arg30[%c56_440, %c0_441], %618 {strides = array<i32>} : memref<108x256xf32, #tpu.memory_space<vmem>>, vector<8x256xf32>,
    %c0_442 = arith.constant 0 : index
    %c34_443 = arith.constant 34 : index
    %620 = vector.load %arg29[%c0_442, %c34_443] : memref<12x290xf32, #tpu.memory_space<vmem>>, vector<8x256xf32>
    %621 = vector.extract_strided_slice %13 {offsets = [8, 0], sizes = [1, 256], strides = [1, 1]} : vector<9x256xf32> to vector<1x256xf32>
    %622 = vector.broadcast %621 : vector<1x256xf32> to vector<8x256xf32>
    %623 = arith.mulf %620, %622 : vector<8x256xf32>
    %c64_444 = arith.constant 64 : index
    %c0_445 = arith.constant 0 : index
    %624 = vector.load %arg30[%c64_444, %c0_445] : memref<108x256xf32, #tpu.memory_space<vmem>>, vector<8x256xf32>
    tpu.vector_store %arg30[%c64_444, %c0_445], %623 {strides = array<i32>} : memref<108x256xf32, #tpu.memory_space<vmem>>, vector<8x256xf32>,
    %c0_446 = arith.constant 0 : index
    %c0_447 = arith.constant 0 : index
    %625 = vector.load %arg19[%c0_446, %c0_447] : memref<8x72xf32, #tpu.memory_space<vmem>>, vector<8x72xf32>
    %c0_448 = arith.constant 0 : index
    %c0_449 = arith.constant 0 : index
    %626 = vector.load %arg30[%c0_448, %c0_449] : memref<108x256xf32, #tpu.memory_space<vmem>>, vector<72x256xf32>
    %cst_450 = arith.constant dense<0.000000e+00> : vector<8x256xf32>
    %627 = tpu.matmul %625, %626, %cst_450 {dimension_numbers = #tpu.dot_dimension_numbers<[1], [0], [0], [1], [0, 0, 1, 1], [], []>} : vector<8x72xf32>, vector<72x256xf32>, vector<8x256xf32> -> vector<8x256xf32>
    %c0_451 = arith.constant 0 : index
    %c0_452 = arith.constant 0 : index
    %628 = vector.load %arg20[%c0_451, %c0_452] : memref<8x1xf32, #tpu.memory_space<vmem>>, vector<8x1xf32>
    %629 = vector.broadcast %628 : vector<8x1xf32> to vector<8x256xf32>
    %630 = arith.addf %627, %629 : vector<8x256xf32>
    %c0_453 = arith.constant 0 : index
    %c17_454 = arith.constant 17 : index
    %631 = vector.load %arg29[%c0_453, %c17_454] : memref<12x290xf32, #tpu.memory_space<vmem>>, vector<4x256xf32>
    tpu.vector_store %arg29[%c0_453, %c17_454], %316 {strides = array<i32>} : memref<12x290xf32, #tpu.memory_space<vmem>>, vector<4x256xf32>,
    %c0_455 = arith.constant 0 : index
    %c0_456 = arith.constant 0 : index
    %632 = vector.load %arg29[%c0_455, %c0_456] : memref<12x290xf32, #tpu.memory_space<vmem>>, vector<4x256xf32>
    %633 = vector.extract_strided_slice %13 {offsets = [0, 0], sizes = [1, 256], strides = [1, 1]} : vector<9x256xf32> to vector<1x256xf32>
    %634 = vector.broadcast %633 : vector<1x256xf32> to vector<4x256xf32>
    %635 = arith.mulf %632, %634 : vector<4x256xf32>
    %c0_457 = arith.constant 0 : index
    %c0_458 = arith.constant 0 : index
    %636 = vector.load %arg30[%c0_457, %c0_458] : memref<108x256xf32, #tpu.memory_space<vmem>>, vector<4x256xf32>
    tpu.vector_store %arg30[%c0_457, %c0_458], %635 {strides = array<i32>} : memref<108x256xf32, #tpu.memory_space<vmem>>, vector<4x256xf32>,
    %c0_459 = arith.constant 0 : index
    %c1_460 = arith.constant 1 : index
    %637 = vector.load %arg29[%c0_459, %c1_460] : memref<12x290xf32, #tpu.memory_space<vmem>>, vector<4x256xf32>
    %638 = vector.extract_strided_slice %13 {offsets = [1, 0], sizes = [1, 256], strides = [1, 1]} : vector<9x256xf32> to vector<1x256xf32>
    %639 = vector.broadcast %638 : vector<1x256xf32> to vector<4x256xf32>
    %640 = arith.mulf %637, %639 : vector<4x256xf32>
    %c4_461 = arith.constant 4 : index
    %c0_462 = arith.constant 0 : index
    %641 = vector.load %arg30[%c4_461, %c0_462] : memref<108x256xf32, #tpu.memory_space<vmem>>, vector<4x256xf32>
    tpu.vector_store %arg30[%c4_461, %c0_462], %640 {strides = array<i32>} : memref<108x256xf32, #tpu.memory_space<vmem>>, vector<4x256xf32>,
    %c0_463 = arith.constant 0 : index
    %c2_464 = arith.constant 2 : index
    %642 = vector.load %arg29[%c0_463, %c2_464] : memref<12x290xf32, #tpu.memory_space<vmem>>, vector<4x256xf32>
    %643 = vector.extract_strided_slice %13 {offsets = [2, 0], sizes = [1, 256], strides = [1, 1]} : vector<9x256xf32> to vector<1x256xf32>
    %644 = vector.broadcast %643 : vector<1x256xf32> to vector<4x256xf32>
    %645 = arith.mulf %642, %644 : vector<4x256xf32>
    %c8_465 = arith.constant 8 : index
    %c0_466 = arith.constant 0 : index
    %646 = vector.load %arg30[%c8_465, %c0_466] : memref<108x256xf32, #tpu.memory_space<vmem>>, vector<4x256xf32>
    tpu.vector_store %arg30[%c8_465, %c0_466], %645 {strides = array<i32>} : memref<108x256xf32, #tpu.memory_space<vmem>>, vector<4x256xf32>,
    %c0_467 = arith.constant 0 : index
    %c16_468 = arith.constant 16 : index
    %647 = vector.load %arg29[%c0_467, %c16_468] : memref<12x290xf32, #tpu.memory_space<vmem>>, vector<4x256xf32>
    %648 = vector.extract_strided_slice %13 {offsets = [3, 0], sizes = [1, 256], strides = [1, 1]} : vector<9x256xf32> to vector<1x256xf32>
    %649 = vector.broadcast %648 : vector<1x256xf32> to vector<4x256xf32>
    %650 = arith.mulf %647, %649 : vector<4x256xf32>
    %c12_469 = arith.constant 12 : index
    %c0_470 = arith.constant 0 : index
    %651 = vector.load %arg30[%c12_469, %c0_470] : memref<108x256xf32, #tpu.memory_space<vmem>>, vector<4x256xf32>
    tpu.vector_store %arg30[%c12_469, %c0_470], %650 {strides = array<i32>} : memref<108x256xf32, #tpu.memory_space<vmem>>, vector<4x256xf32>,
    %c0_471 = arith.constant 0 : index
    %c17_472 = arith.constant 17 : index
    %652 = vector.load %arg29[%c0_471, %c17_472] : memref<12x290xf32, #tpu.memory_space<vmem>>, vector<4x256xf32>
    %653 = vector.extract_strided_slice %13 {offsets = [4, 0], sizes = [1, 256], strides = [1, 1]} : vector<9x256xf32> to vector<1x256xf32>
    %654 = vector.broadcast %653 : vector<1x256xf32> to vector<4x256xf32>
    %655 = arith.mulf %652, %654 : vector<4x256xf32>
    %c16_473 = arith.constant 16 : index
    %c0_474 = arith.constant 0 : index
    %656 = vector.load %arg30[%c16_473, %c0_474] : memref<108x256xf32, #tpu.memory_space<vmem>>, vector<4x256xf32>
    tpu.vector_store %arg30[%c16_473, %c0_474], %655 {strides = array<i32>} : memref<108x256xf32, #tpu.memory_space<vmem>>, vector<4x256xf32>,
    %c0_475 = arith.constant 0 : index
    %c18_476 = arith.constant 18 : index
    %657 = vector.load %arg29[%c0_475, %c18_476] : memref<12x290xf32, #tpu.memory_space<vmem>>, vector<4x256xf32>
    %658 = vector.extract_strided_slice %13 {offsets = [5, 0], sizes = [1, 256], strides = [1, 1]} : vector<9x256xf32> to vector<1x256xf32>
    %659 = vector.broadcast %658 : vector<1x256xf32> to vector<4x256xf32>
    %660 = arith.mulf %657, %659 : vector<4x256xf32>
    %c20_477 = arith.constant 20 : index
    %c0_478 = arith.constant 0 : index
    %661 = vector.load %arg30[%c20_477, %c0_478] : memref<108x256xf32, #tpu.memory_space<vmem>>, vector<4x256xf32>
    tpu.vector_store %arg30[%c20_477, %c0_478], %660 {strides = array<i32>} : memref<108x256xf32, #tpu.memory_space<vmem>>, vector<4x256xf32>,
    %c0_479 = arith.constant 0 : index
    %c32_480 = arith.constant 32 : index
    %662 = vector.load %arg29[%c0_479, %c32_480] : memref<12x290xf32, #tpu.memory_space<vmem>>, vector<4x256xf32>
    %663 = vector.extract_strided_slice %13 {offsets = [6, 0], sizes = [1, 256], strides = [1, 1]} : vector<9x256xf32> to vector<1x256xf32>
    %664 = vector.broadcast %663 : vector<1x256xf32> to vector<4x256xf32>
    %665 = arith.mulf %662, %664 : vector<4x256xf32>
    %c24_481 = arith.constant 24 : index
    %c0_482 = arith.constant 0 : index
    %666 = vector.load %arg30[%c24_481, %c0_482] : memref<108x256xf32, #tpu.memory_space<vmem>>, vector<4x256xf32>
    tpu.vector_store %arg30[%c24_481, %c0_482], %665 {strides = array<i32>} : memref<108x256xf32, #tpu.memory_space<vmem>>, vector<4x256xf32>,
    %c0_483 = arith.constant 0 : index
    %c33_484 = arith.constant 33 : index
    %667 = vector.load %arg29[%c0_483, %c33_484] : memref<12x290xf32, #tpu.memory_space<vmem>>, vector<4x256xf32>
    %668 = vector.extract_strided_slice %13 {offsets = [7, 0], sizes = [1, 256], strides = [1, 1]} : vector<9x256xf32> to vector<1x256xf32>
    %669 = vector.broadcast %668 : vector<1x256xf32> to vector<4x256xf32>
    %670 = arith.mulf %667, %669 : vector<4x256xf32>
    %c28_485 = arith.constant 28 : index
    %c0_486 = arith.constant 0 : index
    %671 = vector.load %arg30[%c28_485, %c0_486] : memref<108x256xf32, #tpu.memory_space<vmem>>, vector<4x256xf32>
    tpu.vector_store %arg30[%c28_485, %c0_486], %670 {strides = array<i32>} : memref<108x256xf32, #tpu.memory_space<vmem>>, vector<4x256xf32>,
    %c0_487 = arith.constant 0 : index
    %c34_488 = arith.constant 34 : index
    %672 = vector.load %arg29[%c0_487, %c34_488] : memref<12x290xf32, #tpu.memory_space<vmem>>, vector<4x256xf32>
    %673 = vector.extract_strided_slice %13 {offsets = [8, 0], sizes = [1, 256], strides = [1, 1]} : vector<9x256xf32> to vector<1x256xf32>
    %674 = vector.broadcast %673 : vector<1x256xf32> to vector<4x256xf32>
    %675 = arith.mulf %672, %674 : vector<4x256xf32>
    %c32_489 = arith.constant 32 : index
    %c0_490 = arith.constant 0 : index
    %676 = vector.load %arg30[%c32_489, %c0_490] : memref<108x256xf32, #tpu.memory_space<vmem>>, vector<4x256xf32>
    tpu.vector_store %arg30[%c32_489, %c0_490], %675 {strides = array<i32>} : memref<108x256xf32, #tpu.memory_space<vmem>>, vector<4x256xf32>,
    %c0_491 = arith.constant 0 : index
    %c17_492 = arith.constant 17 : index
    %677 = vector.load %arg29[%c0_491, %c17_492] : memref<12x290xf32, #tpu.memory_space<vmem>>, vector<8x256xf32>
    tpu.vector_store %arg29[%c0_491, %c17_492], %630 {strides = array<i32>} : memref<12x290xf32, #tpu.memory_space<vmem>>, vector<8x256xf32>,
    %c0_493 = arith.constant 0 : index
    %c0_494 = arith.constant 0 : index
    %678 = vector.load %arg29[%c0_493, %c0_494] : memref<12x290xf32, #tpu.memory_space<vmem>>, vector<8x256xf32>
    %679 = vector.extract_strided_slice %13 {offsets = [0, 0], sizes = [1, 256], strides = [1, 1]} : vector<9x256xf32> to vector<1x256xf32>
    %680 = vector.broadcast %679 : vector<1x256xf32> to vector<8x256xf32>
    %681 = arith.mulf %678, %680 : vector<8x256xf32>
    %c36_495 = arith.constant 36 : index
    %c0_496 = arith.constant 0 : index
    %682 = vector.load %arg30[%c36_495, %c0_496] : memref<108x256xf32, #tpu.memory_space<vmem>>, vector<8x256xf32>
    tpu.vector_store %arg30[%c36_495, %c0_496], %681 {strides = array<i32>} : memref<108x256xf32, #tpu.memory_space<vmem>>, vector<8x256xf32>,
    %c0_497 = arith.constant 0 : index
    %c1_498 = arith.constant 1 : index
    %683 = vector.load %arg29[%c0_497, %c1_498] : memref<12x290xf32, #tpu.memory_space<vmem>>, vector<8x256xf32>
    %684 = vector.extract_strided_slice %13 {offsets = [1, 0], sizes = [1, 256], strides = [1, 1]} : vector<9x256xf32> to vector<1x256xf32>
    %685 = vector.broadcast %684 : vector<1x256xf32> to vector<8x256xf32>
    %686 = arith.mulf %683, %685 : vector<8x256xf32>
    %c44_499 = arith.constant 44 : index
    %c0_500 = arith.constant 0 : index
    %687 = vector.load %arg30[%c44_499, %c0_500] : memref<108x256xf32, #tpu.memory_space<vmem>>, vector<8x256xf32>
    tpu.vector_store %arg30[%c44_499, %c0_500], %686 {strides = array<i32>} : memref<108x256xf32, #tpu.memory_space<vmem>>, vector<8x256xf32>,
    %c0_501 = arith.constant 0 : index
    %c2_502 = arith.constant 2 : index
    %688 = vector.load %arg29[%c0_501, %c2_502] : memref<12x290xf32, #tpu.memory_space<vmem>>, vector<8x256xf32>
    %689 = vector.extract_strided_slice %13 {offsets = [2, 0], sizes = [1, 256], strides = [1, 1]} : vector<9x256xf32> to vector<1x256xf32>
    %690 = vector.broadcast %689 : vector<1x256xf32> to vector<8x256xf32>
    %691 = arith.mulf %688, %690 : vector<8x256xf32>
    %c52_503 = arith.constant 52 : index
    %c0_504 = arith.constant 0 : index
    %692 = vector.load %arg30[%c52_503, %c0_504] : memref<108x256xf32, #tpu.memory_space<vmem>>, vector<8x256xf32>
    tpu.vector_store %arg30[%c52_503, %c0_504], %691 {strides = array<i32>} : memref<108x256xf32, #tpu.memory_space<vmem>>, vector<8x256xf32>,
    %c0_505 = arith.constant 0 : index
    %c16_506 = arith.constant 16 : index
    %693 = vector.load %arg29[%c0_505, %c16_506] : memref<12x290xf32, #tpu.memory_space<vmem>>, vector<8x256xf32>
    %694 = vector.extract_strided_slice %13 {offsets = [3, 0], sizes = [1, 256], strides = [1, 1]} : vector<9x256xf32> to vector<1x256xf32>
    %695 = vector.broadcast %694 : vector<1x256xf32> to vector<8x256xf32>
    %696 = arith.mulf %693, %695 : vector<8x256xf32>
    %c60_507 = arith.constant 60 : index
    %c0_508 = arith.constant 0 : index
    %697 = vector.load %arg30[%c60_507, %c0_508] : memref<108x256xf32, #tpu.memory_space<vmem>>, vector<8x256xf32>
    tpu.vector_store %arg30[%c60_507, %c0_508], %696 {strides = array<i32>} : memref<108x256xf32, #tpu.memory_space<vmem>>, vector<8x256xf32>,
    %c0_509 = arith.constant 0 : index
    %c17_510 = arith.constant 17 : index
    %698 = vector.load %arg29[%c0_509, %c17_510] : memref<12x290xf32, #tpu.memory_space<vmem>>, vector<8x256xf32>
    %699 = vector.extract_strided_slice %13 {offsets = [4, 0], sizes = [1, 256], strides = [1, 1]} : vector<9x256xf32> to vector<1x256xf32>
    %700 = vector.broadcast %699 : vector<1x256xf32> to vector<8x256xf32>
    %701 = arith.mulf %698, %700 : vector<8x256xf32>
    %c68_511 = arith.constant 68 : index
    %c0_512 = arith.constant 0 : index
    %702 = vector.load %arg30[%c68_511, %c0_512] : memref<108x256xf32, #tpu.memory_space<vmem>>, vector<8x256xf32>
    tpu.vector_store %arg30[%c68_511, %c0_512], %701 {strides = array<i32>} : memref<108x256xf32, #tpu.memory_space<vmem>>, vector<8x256xf32>,
    %c0_513 = arith.constant 0 : index
    %c18_514 = arith.constant 18 : index
    %703 = vector.load %arg29[%c0_513, %c18_514] : memref<12x290xf32, #tpu.memory_space<vmem>>, vector<8x256xf32>
    %704 = vector.extract_strided_slice %13 {offsets = [5, 0], sizes = [1, 256], strides = [1, 1]} : vector<9x256xf32> to vector<1x256xf32>
    %705 = vector.broadcast %704 : vector<1x256xf32> to vector<8x256xf32>
    %706 = arith.mulf %703, %705 : vector<8x256xf32>
    %c76 = arith.constant 76 : index
    %c0_515 = arith.constant 0 : index
    %707 = vector.load %arg30[%c76, %c0_515] : memref<108x256xf32, #tpu.memory_space<vmem>>, vector<8x256xf32>
    tpu.vector_store %arg30[%c76, %c0_515], %706 {strides = array<i32>} : memref<108x256xf32, #tpu.memory_space<vmem>>, vector<8x256xf32>,
    %c0_516 = arith.constant 0 : index
    %c32_517 = arith.constant 32 : index
    %708 = vector.load %arg29[%c0_516, %c32_517] : memref<12x290xf32, #tpu.memory_space<vmem>>, vector<8x256xf32>
    %709 = vector.extract_strided_slice %13 {offsets = [6, 0], sizes = [1, 256], strides = [1, 1]} : vector<9x256xf32> to vector<1x256xf32>
    %710 = vector.broadcast %709 : vector<1x256xf32> to vector<8x256xf32>
    %711 = arith.mulf %708, %710 : vector<8x256xf32>
    %c84 = arith.constant 84 : index
    %c0_518 = arith.constant 0 : index
    %712 = vector.load %arg30[%c84, %c0_518] : memref<108x256xf32, #tpu.memory_space<vmem>>, vector<8x256xf32>
    tpu.vector_store %arg30[%c84, %c0_518], %711 {strides = array<i32>} : memref<108x256xf32, #tpu.memory_space<vmem>>, vector<8x256xf32>,
    %c0_519 = arith.constant 0 : index
    %c33_520 = arith.constant 33 : index
    %713 = vector.load %arg29[%c0_519, %c33_520] : memref<12x290xf32, #tpu.memory_space<vmem>>, vector<8x256xf32>
    %714 = vector.extract_strided_slice %13 {offsets = [7, 0], sizes = [1, 256], strides = [1, 1]} : vector<9x256xf32> to vector<1x256xf32>
    %715 = vector.broadcast %714 : vector<1x256xf32> to vector<8x256xf32>
    %716 = arith.mulf %713, %715 : vector<8x256xf32>
    %c92 = arith.constant 92 : index
    %c0_521 = arith.constant 0 : index
    %717 = vector.load %arg30[%c92, %c0_521] : memref<108x256xf32, #tpu.memory_space<vmem>>, vector<8x256xf32>
    tpu.vector_store %arg30[%c92, %c0_521], %716 {strides = array<i32>} : memref<108x256xf32, #tpu.memory_space<vmem>>, vector<8x256xf32>,
    %c0_522 = arith.constant 0 : index
    %c34_523 = arith.constant 34 : index
    %718 = vector.load %arg29[%c0_522, %c34_523] : memref<12x290xf32, #tpu.memory_space<vmem>>, vector<8x256xf32>
    %719 = vector.extract_strided_slice %13 {offsets = [8, 0], sizes = [1, 256], strides = [1, 1]} : vector<9x256xf32> to vector<1x256xf32>
    %720 = vector.broadcast %719 : vector<1x256xf32> to vector<8x256xf32>
    %721 = arith.mulf %718, %720 : vector<8x256xf32>
    %c100 = arith.constant 100 : index
    %c0_524 = arith.constant 0 : index
    %722 = vector.load %arg30[%c100, %c0_524] : memref<108x256xf32, #tpu.memory_space<vmem>>, vector<8x256xf32>
    tpu.vector_store %arg30[%c100, %c0_524], %721 {strides = array<i32>} : memref<108x256xf32, #tpu.memory_space<vmem>>, vector<8x256xf32>,
    %c0_525 = arith.constant 0 : index
    %c0_526 = arith.constant 0 : index
    %723 = vector.load %arg23[%c0_525, %c0_526] : memref<12x108xf32, #tpu.memory_space<vmem>>, vector<12x108xf32>
    %c0_527 = arith.constant 0 : index
    %c0_528 = arith.constant 0 : index
    %724 = vector.load %arg30[%c0_527, %c0_528] : memref<108x256xf32, #tpu.memory_space<vmem>>, vector<108x256xf32>
    %cst_529 = arith.constant dense<0.000000e+00> : vector<12x256xf32>
    %725 = tpu.matmul %723, %724, %cst_529 {dimension_numbers = #tpu.dot_dimension_numbers<[1], [0], [0], [1], [0, 0, 1, 1], [], []>} : vector<12x108xf32>, vector<108x256xf32>, vector<12x256xf32> -> vector<12x256xf32>
    %c0_530 = arith.constant 0 : index
    %c0_531 = arith.constant 0 : index
    %726 = vector.load %arg24[%c0_530, %c0_531] : memref<12x1xf32, #tpu.memory_space<vmem>>, vector<12x1xf32>
    %727 = vector.broadcast %726 : vector<12x1xf32> to vector<12x256xf32>
    %728 = arith.addf %725, %727 : vector<12x256xf32>
    %c0_532 = arith.constant 0 : index
    %c17_533 = arith.constant 17 : index
    %729 = vector.load %arg29[%c0_532, %c17_533] : memref<12x290xf32, #tpu.memory_space<vmem>>, vector<12x256xf32>
    tpu.vector_store %arg29[%c0_532, %c17_533], %728 {strides = array<i32>} : memref<12x290xf32, #tpu.memory_space<vmem>>, vector<12x256xf32>,
    %c0_534 = arith.constant 0 : index
    %c0_535 = arith.constant 0 : index
    %730 = vector.load %arg29[%c0_534, %c0_535] : memref<12x290xf32, #tpu.memory_space<vmem>>, vector<12x256xf32>
    %731 = vector.extract_strided_slice %13 {offsets = [0, 0], sizes = [1, 256], strides = [1, 1]} : vector<9x256xf32> to vector<1x256xf32>
    %732 = vector.broadcast %731 : vector<1x256xf32> to vector<12x256xf32>
    %733 = arith.mulf %730, %732 : vector<12x256xf32>
    %c0_536 = arith.constant 0 : index
    %c0_537 = arith.constant 0 : index
    %734 = vector.load %arg30[%c0_536, %c0_537] : memref<108x256xf32, #tpu.memory_space<vmem>>, vector<12x256xf32>
    tpu.vector_store %arg30[%c0_536, %c0_537], %733 {strides = array<i32>} : memref<108x256xf32, #tpu.memory_space<vmem>>, vector<12x256xf32>,
    %c0_538 = arith.constant 0 : index
    %c1_539 = arith.constant 1 : index
    %735 = vector.load %arg29[%c0_538, %c1_539] : memref<12x290xf32, #tpu.memory_space<vmem>>, vector<12x256xf32>
    %736 = vector.extract_strided_slice %13 {offsets = [1, 0], sizes = [1, 256], strides = [1, 1]} : vector<9x256xf32> to vector<1x256xf32>
    %737 = vector.broadcast %736 : vector<1x256xf32> to vector<12x256xf32>
    %738 = arith.mulf %735, %737 : vector<12x256xf32>
    %c12_540 = arith.constant 12 : index
    %c0_541 = arith.constant 0 : index
    %739 = vector.load %arg30[%c12_540, %c0_541] : memref<108x256xf32, #tpu.memory_space<vmem>>, vector<12x256xf32>
    tpu.vector_store %arg30[%c12_540, %c0_541], %738 {strides = array<i32>} : memref<108x256xf32, #tpu.memory_space<vmem>>, vector<12x256xf32>,
    %c0_542 = arith.constant 0 : index
    %c2_543 = arith.constant 2 : index
    %740 = vector.load %arg29[%c0_542, %c2_543] : memref<12x290xf32, #tpu.memory_space<vmem>>, vector<12x256xf32>
    %741 = vector.extract_strided_slice %13 {offsets = [2, 0], sizes = [1, 256], strides = [1, 1]} : vector<9x256xf32> to vector<1x256xf32>
    %742 = vector.broadcast %741 : vector<1x256xf32> to vector<12x256xf32>
    %743 = arith.mulf %740, %742 : vector<12x256xf32>
    %c24_544 = arith.constant 24 : index
    %c0_545 = arith.constant 0 : index
    %744 = vector.load %arg30[%c24_544, %c0_545] : memref<108x256xf32, #tpu.memory_space<vmem>>, vector<12x256xf32>
    tpu.vector_store %arg30[%c24_544, %c0_545], %743 {strides = array<i32>} : memref<108x256xf32, #tpu.memory_space<vmem>>, vector<12x256xf32>,
    %c0_546 = arith.constant 0 : index
    %c16_547 = arith.constant 16 : index
    %745 = vector.load %arg29[%c0_546, %c16_547] : memref<12x290xf32, #tpu.memory_space<vmem>>, vector<12x256xf32>
    %746 = vector.extract_strided_slice %13 {offsets = [3, 0], sizes = [1, 256], strides = [1, 1]} : vector<9x256xf32> to vector<1x256xf32>
    %747 = vector.broadcast %746 : vector<1x256xf32> to vector<12x256xf32>
    %748 = arith.mulf %745, %747 : vector<12x256xf32>
    %c36_548 = arith.constant 36 : index
    %c0_549 = arith.constant 0 : index
    %749 = vector.load %arg30[%c36_548, %c0_549] : memref<108x256xf32, #tpu.memory_space<vmem>>, vector<12x256xf32>
    tpu.vector_store %arg30[%c36_548, %c0_549], %748 {strides = array<i32>} : memref<108x256xf32, #tpu.memory_space<vmem>>, vector<12x256xf32>,
    %c0_550 = arith.constant 0 : index
    %c17_551 = arith.constant 17 : index
    %750 = vector.load %arg29[%c0_550, %c17_551] : memref<12x290xf32, #tpu.memory_space<vmem>>, vector<12x256xf32>
    %751 = vector.extract_strided_slice %13 {offsets = [4, 0], sizes = [1, 256], strides = [1, 1]} : vector<9x256xf32> to vector<1x256xf32>
    %752 = vector.broadcast %751 : vector<1x256xf32> to vector<12x256xf32>
    %753 = arith.mulf %750, %752 : vector<12x256xf32>
    %c48_552 = arith.constant 48 : index
    %c0_553 = arith.constant 0 : index
    %754 = vector.load %arg30[%c48_552, %c0_553] : memref<108x256xf32, #tpu.memory_space<vmem>>, vector<12x256xf32>
    tpu.vector_store %arg30[%c48_552, %c0_553], %753 {strides = array<i32>} : memref<108x256xf32, #tpu.memory_space<vmem>>, vector<12x256xf32>,
    %c0_554 = arith.constant 0 : index
    %c18_555 = arith.constant 18 : index
    %755 = vector.load %arg29[%c0_554, %c18_555] : memref<12x290xf32, #tpu.memory_space<vmem>>, vector<12x256xf32>
    %756 = vector.extract_strided_slice %13 {offsets = [5, 0], sizes = [1, 256], strides = [1, 1]} : vector<9x256xf32> to vector<1x256xf32>
    %757 = vector.broadcast %756 : vector<1x256xf32> to vector<12x256xf32>
    %758 = arith.mulf %755, %757 : vector<12x256xf32>
    %c60_556 = arith.constant 60 : index
    %c0_557 = arith.constant 0 : index
    %759 = vector.load %arg30[%c60_556, %c0_557] : memref<108x256xf32, #tpu.memory_space<vmem>>, vector<12x256xf32>
    tpu.vector_store %arg30[%c60_556, %c0_557], %758 {strides = array<i32>} : memref<108x256xf32, #tpu.memory_space<vmem>>, vector<12x256xf32>,
    %c0_558 = arith.constant 0 : index
    %c32_559 = arith.constant 32 : index
    %760 = vector.load %arg29[%c0_558, %c32_559] : memref<12x290xf32, #tpu.memory_space<vmem>>, vector<12x256xf32>
    %761 = vector.extract_strided_slice %13 {offsets = [6, 0], sizes = [1, 256], strides = [1, 1]} : vector<9x256xf32> to vector<1x256xf32>
    %762 = vector.broadcast %761 : vector<1x256xf32> to vector<12x256xf32>
    %763 = arith.mulf %760, %762 : vector<12x256xf32>
    %c72 = arith.constant 72 : index
    %c0_560 = arith.constant 0 : index
    %764 = vector.load %arg30[%c72, %c0_560] : memref<108x256xf32, #tpu.memory_space<vmem>>, vector<12x256xf32>
    tpu.vector_store %arg30[%c72, %c0_560], %763 {strides = array<i32>} : memref<108x256xf32, #tpu.memory_space<vmem>>, vector<12x256xf32>,
    %c0_561 = arith.constant 0 : index
    %c33_562 = arith.constant 33 : index
    %765 = vector.load %arg29[%c0_561, %c33_562] : memref<12x290xf32, #tpu.memory_space<vmem>>, vector<12x256xf32>
    %766 = vector.extract_strided_slice %13 {offsets = [7, 0], sizes = [1, 256], strides = [1, 1]} : vector<9x256xf32> to vector<1x256xf32>
    %767 = vector.broadcast %766 : vector<1x256xf32> to vector<12x256xf32>
    %768 = arith.mulf %765, %767 : vector<12x256xf32>
    %c84_563 = arith.constant 84 : index
    %c0_564 = arith.constant 0 : index
    %769 = vector.load %arg30[%c84_563, %c0_564] : memref<108x256xf32, #tpu.memory_space<vmem>>, vector<12x256xf32>
    tpu.vector_store %arg30[%c84_563, %c0_564], %768 {strides = array<i32>} : memref<108x256xf32, #tpu.memory_space<vmem>>, vector<12x256xf32>,
    %c0_565 = arith.constant 0 : index
    %c34_566 = arith.constant 34 : index
    %770 = vector.load %arg29[%c0_565, %c34_566] : memref<12x290xf32, #tpu.memory_space<vmem>>, vector<12x256xf32>
    %771 = vector.extract_strided_slice %13 {offsets = [8, 0], sizes = [1, 256], strides = [1, 1]} : vector<9x256xf32> to vector<1x256xf32>
    %772 = vector.broadcast %771 : vector<1x256xf32> to vector<12x256xf32>
    %773 = arith.mulf %770, %772 : vector<12x256xf32>
    %c96 = arith.constant 96 : index
    %c0_567 = arith.constant 0 : index
    %774 = vector.load %arg30[%c96, %c0_567] : memref<108x256xf32, #tpu.memory_space<vmem>>, vector<12x256xf32>
    tpu.vector_store %arg30[%c96, %c0_567], %773 {strides = array<i32>} : memref<108x256xf32, #tpu.memory_space<vmem>>, vector<12x256xf32>,
    %c0_568 = arith.constant 0 : index
    %c0_569 = arith.constant 0 : index
    %775 = vector.load %arg25[%c0_568, %c0_569] : memref<4x108xf32, #tpu.memory_space<vmem>>, vector<4x108xf32>
    %c0_570 = arith.constant 0 : index
    %c0_571 = arith.constant 0 : index
    %776 = vector.load %arg30[%c0_570, %c0_571] : memref<108x256xf32, #tpu.memory_space<vmem>>, vector<108x256xf32>
    %cst_572 = arith.constant dense<0.000000e+00> : vector<4x256xf32>
    %777 = tpu.matmul %775, %776, %cst_572 {dimension_numbers = #tpu.dot_dimension_numbers<[1], [0], [0], [1], [0, 0, 1, 1], [], []>} : vector<4x108xf32>, vector<108x256xf32>, vector<4x256xf32> -> vector<4x256xf32>
    %c0_573 = arith.constant 0 : index
    %c0_574 = arith.constant 0 : index
    %778 = vector.load %arg26[%c0_573, %c0_574] : memref<4x1xf32, #tpu.memory_space<vmem>>, vector<4x1xf32>
    %779 = vector.broadcast %778 : vector<4x1xf32> to vector<4x256xf32>
    %780 = arith.addf %777, %779 : vector<4x256xf32>
    %c0_575 = arith.constant 0 : index
    %c0_576 = arith.constant 0 : index
    %c0_577 = arith.constant 0 : index
    %781 = vector.load %arg27[%c0_575, %c0_576, %c0_577] : memref<1x4x256xf32, #tpu.memory_space<vmem>>, vector<1x4x256xf32>
    %782 = vector.shape_cast %781 : vector<1x4x256xf32> to vector<4x256xf32>
    %783 = vector.shape_cast %780 : vector<4x256xf32> to vector<1x4x256xf32>
    tpu.vector_store %arg27[%c0_575, %c0_576, %c0_577], %783 {strides = array<i32>} : memref<1x4x256xf32, #tpu.memory_space<vmem>>, vector<1x4x256xf32>,
    return
  }
  func.func @transform_0(%arg0: i32) -> (i32, i32, i32, i32) {
    %c0_i32 = arith.constant 0 : i32
    %c0_i32_0 = arith.constant 0 : i32
    %c0_i32_1 = arith.constant 0 : i32
    %c0_i32_2 = arith.constant 0 : i32
    return %arg0, %c0_i32, %c0_i32_0, %c0_i32_1 : i32, i32, i32, i32
  }
  func.func @transform_1(%arg0: i32) -> (i32, i32, i32, i32) {
    %c0_i32 = arith.constant 0 : i32
    %c0_i32_0 = arith.constant 0 : i32
    %c0_i32_1 = arith.constant 0 : i32
    %c0_i32_2 = arith.constant 0 : i32
    return %arg0, %c0_i32, %c0_i32_0, %c0_i32_1 : i32, i32, i32, i32
  }
  func.func @transform_2(%arg0: i32) -> (i32, i32, i32) {
    %c0_i32 = arith.constant 0 : i32
    %c0_i32_0 = arith.constant 0 : i32
    %c0_i32_1 = arith.constant 0 : i32
    return %arg0, %c0_i32, %c0_i32_0 : i32, i32, i32
  }
  func.func @transform_3(%arg0: i32) -> (i32, i32, i32) {
    %c0_i32 = arith.constant 0 : i32
    %c0_i32_0 = arith.constant 0 : i32
    %c0_i32_1 = arith.constant 0 : i32
    return %arg0, %c0_i32, %c0_i32_0 : i32, i32, i32
  }
  func.func @transform_4(%arg0: i32) -> (i32, i32) {
    %c0_i32 = arith.constant 0 : i32
    %c0_i32_0 = arith.constant 0 : i32
    %c0_i32_1 = arith.constant 0 : i32
    return %c0_i32, %c0_i32_0 : i32, i32
  }
  func.func @transform_5(%arg0: i32) -> (i32, i32) {
    %c0_i32 = arith.constant 0 : i32
    %c0_i32_0 = arith.constant 0 : i32
    %c0_i32_1 = arith.constant 0 : i32
    return %c0_i32, %c0_i32_0 : i32, i32
  }
  func.func @transform_6(%arg0: i32) -> (i32, i32) {
    %c0_i32 = arith.constant 0 : i32
    %c0_i32_0 = arith.constant 0 : i32
    %c0_i32_1 = arith.constant 0 : i32
    return %c0_i32, %c0_i32_0 : i32, i32
  }
  func.func @transform_7(%arg0: i32) -> (i32, i32) {
    %c0_i32 = arith.constant 0 : i32
    %c0_i32_0 = arith.constant 0 : i32
    %c0_i32_1 = arith.constant 0 : i32
    return %c0_i32, %c0_i32_0 : i32, i32
  }
  func.func @transform_8(%arg0: i32) -> (i32, i32) {
    %c0_i32 = arith.constant 0 : i32
    %c0_i32_0 = arith.constant 0 : i32
    %c0_i32_1 = arith.constant 0 : i32
    return %c0_i32, %c0_i32_0 : i32, i32
  }
  func.func @transform_9(%arg0: i32) -> (i32, i32) {
    %c0_i32 = arith.constant 0 : i32
    %c0_i32_0 = arith.constant 0 : i32
    %c0_i32_1 = arith.constant 0 : i32
    return %c0_i32, %c0_i32_0 : i32, i32
  }
  func.func @transform_10(%arg0: i32) -> (i32, i32) {
    %c0_i32 = arith.constant 0 : i32
    %c0_i32_0 = arith.constant 0 : i32
    %c0_i32_1 = arith.constant 0 : i32
    return %c0_i32, %c0_i32_0 : i32, i32
  }
  func.func @transform_11(%arg0: i32) -> (i32, i32) {
    %c0_i32 = arith.constant 0 : i32
    %c0_i32_0 = arith.constant 0 : i32
    %c0_i32_1 = arith.constant 0 : i32
    return %c0_i32, %c0_i32_0 : i32, i32
  }
  func.func @transform_12(%arg0: i32) -> (i32, i32) {
    %c0_i32 = arith.constant 0 : i32
    %c0_i32_0 = arith.constant 0 : i32
    %c0_i32_1 = arith.constant 0 : i32
    return %c0_i32, %c0_i32_0 : i32, i32
  }
  func.func @transform_13(%arg0: i32) -> (i32, i32) {
    %c0_i32 = arith.constant 0 : i32
    %c0_i32_0 = arith.constant 0 : i32
    %c0_i32_1 = arith.constant 0 : i32
    return %c0_i32, %c0_i32_0 : i32, i32
  }
  func.func @transform_14(%arg0: i32) -> (i32, i32) {
    %c0_i32 = arith.constant 0 : i32
    %c0_i32_0 = arith.constant 0 : i32
    %c0_i32_1 = arith.constant 0 : i32
    return %c0_i32, %c0_i32_0 : i32, i32
  }
  func.func @transform_15(%arg0: i32) -> (i32, i32) {
    %c0_i32 = arith.constant 0 : i32
    %c0_i32_0 = arith.constant 0 : i32
    %c0_i32_1 = arith.constant 0 : i32
    return %c0_i32, %c0_i32_0 : i32, i32
  }
  func.func @transform_16(%arg0: i32) -> (i32, i32) {
    %c0_i32 = arith.constant 0 : i32
    %c0_i32_0 = arith.constant 0 : i32
    %c0_i32_1 = arith.constant 0 : i32
    return %c0_i32, %c0_i32_0 : i32, i32
  }
  func.func @transform_17(%arg0: i32) -> (i32, i32) {
    %c0_i32 = arith.constant 0 : i32
    %c0_i32_0 = arith.constant 0 : i32
    %c0_i32_1 = arith.constant 0 : i32
    return %c0_i32, %c0_i32_0 : i32, i32
  }
  func.func @transform_18(%arg0: i32) -> (i32, i32) {
    %c0_i32 = arith.constant 0 : i32
    %c0_i32_0 = arith.constant 0 : i32
    %c0_i32_1 = arith.constant 0 : i32
    return %c0_i32, %c0_i32_0 : i32, i32
  }
  func.func @transform_19(%arg0: i32) -> (i32, i32) {
    %c0_i32 = arith.constant 0 : i32
    %c0_i32_0 = arith.constant 0 : i32
    %c0_i32_1 = arith.constant 0 : i32
    return %c0_i32, %c0_i32_0 : i32, i32
  }
  func.func @transform_20(%arg0: i32) -> (i32, i32) {
    %c0_i32 = arith.constant 0 : i32
    %c0_i32_0 = arith.constant 0 : i32
    %c0_i32_1 = arith.constant 0 : i32
    return %c0_i32, %c0_i32_0 : i32, i32
  }
  func.func @transform_21(%arg0: i32) -> (i32, i32) {
    %c0_i32 = arith.constant 0 : i32
    %c0_i32_0 = arith.constant 0 : i32
    %c0_i32_1 = arith.constant 0 : i32
    return %c0_i32, %c0_i32_0 : i32, i32
  }
  func.func @transform_22(%arg0: i32) -> (i32, i32) {
    %c0_i32 = arith.constant 0 : i32
    %c0_i32_0 = arith.constant 0 : i32
    %c0_i32_1 = arith.constant 0 : i32
    return %c0_i32, %c0_i32_0 : i32, i32
  }
  func.func @transform_23(%arg0: i32) -> (i32, i32) {
    %c0_i32 = arith.constant 0 : i32
    %c0_i32_0 = arith.constant 0 : i32
    %c0_i32_1 = arith.constant 0 : i32
    return %c0_i32, %c0_i32_0 : i32, i32
  }
  func.func @transform_24(%arg0: i32) -> (i32, i32) {
    %c0_i32 = arith.constant 0 : i32
    %c0_i32_0 = arith.constant 0 : i32
    %c0_i32_1 = arith.constant 0 : i32
    return %c0_i32, %c0_i32_0 : i32, i32
  }
  func.func @transform_25(%arg0: i32) -> (i32, i32) {
    %c0_i32 = arith.constant 0 : i32
    %c0_i32_0 = arith.constant 0 : i32
    %c0_i32_1 = arith.constant 0 : i32
    return %c0_i32, %c0_i32_0 : i32, i32
  }
  func.func @transform_26(%arg0: i32) -> (i32, i32, i32) {
    %c0_i32 = arith.constant 0 : i32
    %c0_i32_0 = arith.constant 0 : i32
    %c0_i32_1 = arith.constant 0 : i32
    return %arg0, %c0_i32, %c0_i32_0 : i32, i32, i32
  }
}

</mosaic_0001>

<bundles_post_ra>
// kernel: cfm_forward.1
= control target key start
LH: loop header
LB: loop body
LE: loop exit
PB: predicated region body
PF: predicated region fallthrough
CT: control target
= control target key end

     0   :  { %s7343_s27 = smov 0   ;;  %s9507_s0 = inlined_call_operand.vmem [shape: f32[2,4,4,4], index: 0, kind: input, shape index: {}]   ;;  %s9508_s1 = inlined_call_operand.vmem [shape: f32[2,4,8,8], index: 1, kind: input, shape index: {}]   ;;  %s9509_s2 = inlined_call_operand.vmem [shape: f32[2,4,64], index: 2, kind: input, shape index: {}]   ;;  %s9510_s3 = inlined_call_operand.vmem [shape: f32[2,4,256], index: 3, kind: input, shape index: {}]   ;;  %s9511_s4 = inlined_call_operand.vmem [shape: f32[8,4], index: 4, kind: input, shape index: {}]   ;;  %s9512_s5 = inlined_call_operand.vmem [shape: f32[4,8], index: 5, kind: input, shape index: {}]   ;;  %s9513_s6 = inlined_call_operand.vmem [shape: f32[16,8], index: 6, kind: input, shape index: {}]   ;;  %s9514_s7 = inlined_call_operand.vmem [shape: f32[8,16], index: 7, kind: input, shape index: {}]   ;;  %s9515_s8 = inlined_call_operand.vmem [shape: f32[9,64], index: 8, kind: input, shape index: {}]   ;;  %s9516_s9 = inlined_call_operand.vmem [shape: f32[9,256], index: 9, kind: input, shape index: {}]   ;;  %s9517_s10 = inlined_call_operand.vmem [shape: f32[4,36], index: 10, kind: input, shape index: {}]   ;;  %s9518_s11 = inlined_call_operand.vmem [shape: f32[4,1], index: 11, kind: input, shape index: {}]   ;;  %s9519_s12 = inlined_call_operand.vmem [shape: f32[4,36], index: 12, kind: input, shape index: {}]   ;;  %s9520_s13 = inlined_call_operand.vmem [shape: f32[4,1], index: 13, kind: input, shape index: {}]   ;;  %s9521_s14 = inlined_call_operand.vmem [shape: f32[4,36], index: 14, kind: input, shape index: {}]   ;;  %s9522_s15 = inlined_call_operand.vmem [shape: f32[4,1], index: 15, kind: input, shape index: {}]   ;;  %s9523_s16 = inlined_call_operand.vmem [shape: f32[4,36], index: 16, kind: input, shape index: {}]   ;;  %s9524_s17 = inlined_call_operand.vmem [shape: f32[4,1], index: 17, kind: input, shape index: {}]   ;;  %s9525_s18 = inlined_call_operand.vmem [shape: f32[8,72], index: 18, kind: input, shape index: {}]   ;;  %s9526_s19 = inlined_call_operand.vmem [shape: f32[8,1], index: 19, kind: input, shape index: {}]   ;;  %s9527_s20 = inlined_call_operand.vmem [shape: f32[8,72], index: 20, kind: input, shape index: {}]   ;;  %s9528_s21 = inlined_call_operand.vmem [shape: f32[8,1], index: 21, kind: input, shape index: {}]   ;;  %s9529_s22 = inlined_call_operand.vmem [shape: f32[12,108], index: 22, kind: input, shape index: {}]   ;;  %s9530_s23 = inlined_call_operand.vmem [shape: f32[12,1], index: 23, kind: input, shape index: {}]   ;;  %s9531_s24 = inlined_call_operand.vmem [shape: f32[4,108], index: 24, kind: input, shape index: {}]   ;;  %s9532_s25 = inlined_call_operand.vmem [shape: f32[4,1], index: 25, kind: input, shape index: {}]   ;;  %s9533_s26 = inlined_call_operand.vmem [shape: f32[2,4,256], index: 26, kind: output, shape index: {}]  }
   0x1   :  { %9644 = sst [smem:[#allocation25_spill]] %s9507_s0 }
   0x2   :  { %9645 = sst [smem:[#allocation26_spill]] %s9508_s1 }
   0x3   :  { %9646 = sst [smem:[#allocation27_spill]] %s9509_s2 }
   0x4   :  { %9647 = sst [smem:[#allocation28_spill]] %s9510_s3 }
   0x5   :  { %9648 = sst [smem:[#allocation29_spill]] %s9511_s4 }
   0x6   :  { %9649 = sst [smem:[#allocation30_spill]] %s9512_s5 }
   0x7   :  { %9650 = sst [smem:[#allocation31_spill]] %s9513_s6 }
   0x8   :  { %9651 = sst [smem:[#allocation32_spill]] %s9514_s7 }
   0x9   :  { %9652 = sst [smem:[#allocation33_spill]] %s9515_s8 }
   0xa   :  { %9653 = sst [smem:[#allocation34_spill]] %s9516_s9 }
   0xb   :  { %9654 = sst [smem:[#allocation35_spill]] %s9517_s10 }
   0xc   :  { %9655 = sst [smem:[#allocation36_spill]] %s9518_s11 }
   0xd   :  { %9656 = sst [smem:[#allocation37_spill]] %s9519_s12 }
   0xe   :  { %9657 = sst [smem:[#allocation38_spill]] %s9520_s13 }
   0xf   :  { %9658 = sst [smem:[#allocation39_spill]] %s9522_s15 }
  0x10   :  { %9659 = sst [smem:[#allocation40_spill]] %s9524_s17 }
  0x11   :  { %9660 = sst [smem:[#allocation41_spill]] %s9525_s18 }
  0x12   :  { %9661 = sst [smem:[#allocation42_spill]] %s9526_s19 }
  0x13   :  { %9662 = sst [smem:[#allocation43_spill]] %s9529_s22 }
  0x14   :  { %9663 = sst [smem:[#allocation44_spill]] %s9530_s23 }
  0x15   :  { %9664 = sst [smem:[#allocation45_spill]] %s9531_s24 }
  0x16   :  { %9665 = sst [smem:[#allocation46_spill]] %s9532_s25 }
  0x17   :  { %9666 = sst [smem:[#allocation47_spill]] %s9533_s26 }
  0x18 LB: > { %9667 = sst [smem:[#allocation6_spill]] %s7168_s27  ;;  %s6727_s3 = sadd.s32 4294967295, %s7168_s27   ;;  %s7168_s27 = sphi %s7343_s27, %s36_s27  }
  0x19   : > { %p6731_p0 = scmp.ge.s32.totalorder %s7168_s27, 1  ;;  %p741_p1 = scmp.lt.s32.totalorder %s7168_s27, 3 }
  0x1b   : > { %p742_p2 = pnand %p6731_p0, %p741_p1 }
  0x1d   : > { %745 = sbr.rel (%p742_p2) target bundleno = 4661 (0x1235), region = 124 }
  0x22   : > { %s9668_s8 = sld [smem:[#allocation30_spill]]  ;;  %vm888_vm0 = vcmask 1043456   ;;  %p825_p3 = scmp.lt.s32.totalorder %s6727_s3, 1  ;;  %vm883_vm1 = vcmask 31744   ;;  %v9605_v3 = vmov 0.0   ;;  %vm9544_vm2 = vmmov 0  }
  0x23   : > { %s9670_s9 = sld [smem:[#allocation25_spill]]  ;;  %6943 = vmatprep.subr.mxu1 %v9605_v3  ;;  %851 = vst [vmem:[#allocation3] sm:$0xff] %v9605_v3  ;;  %852 = vst [vmem:[#allocation3 + $0x8] sm:$0xff] %v9605_v3  ;;  %6945 = vmatprep.mubr.msk.f32.mxu1 %vm9544_vm2, %v9605_v3  ;;  %vm9603_vm3 = vcmask 64512   ;;  %vm849_vm4 = vcmask 666624   ;;  %vm9540_vm5 = vcmask 1047559   ;;  %v1353_v26 = vlaneseq }
  0x24   : > { %s10003_s3 = smov (!%p825_p3, %s6727_s3), 1  ;;  %855 = vst [vmem:[#allocation3 + $0x18] sm:$0xf] %v9605_v3  ;;  %856 = vst [vmem:[#allocation3 + $0x20] sm:$0xf] %v9605_v3  ;;  %s9671_s10 = sld [smem:[#allocation29_spill]] }
  0x25   : > { %9669 = sst [smem:[#allocation7_spill]] %s10003_s3  ;;  %s6824_s4 = sshll.u32 %s10003_s3, 4  ;;  %850 = vst.msk [vmem:[#allocation2] sm:$0xf] %vm849_vm4, %v9605_v3  ;;  %vm9541_vm6 = vcmask 1046534   ;;  %vm1267_vm7 = vcmask 1041409  }
  0x26   : > { %s9672_s7 = sld [smem:[#allocation32_spill]]  ;;  %s7172_s28 = smov 57   ;;  %vm9546_vm8 = vcmask 1043459   ;;  %vm1270_vm9 = vcmask 1042434   ;;  %vm9543_vm10 = vcmask 1044484   ;;  %vm9542_vm11 = vcmask 1045509  }
  0x27   : > { %s7175_s29 = smov 25   ;;  %v7421_v33 = vshrl.u32 %v1353_v26, 7  ;;  %s9563_s0 = smov 17   ;;  %vm1278_vm12 = vcmask 134216   ;;  %vm1287_vm13 = vcmask 200841   ;;  %vm1296_vm14 = vcmask 267466  }
  0x28   : > { %v876_v0 = vld [vmem:[%s9668_s8] sm:$0xf]  ;;  %s9573_s8 = smov 49   ;;  %s9674_s5 = sld [smem:[#allocation33_spill]]  ;;  %vm1305_vm15 = vcmask 334091   ;;  %vm1324_vm4 = vcmask 466317  }
  0x29   : > { %6928 = vmatprep.subr.msk.mxu0 %vm888_vm0, %v876_v0  ;;  %s829_s30 = scalar_lea.vmem %s9670_s9, %s6824_s4  ;;  %s9547_s4 = smov 9   ;;  %9673 = vst [vmem:[#allocation8_spill] sm:$0xff] %v7421_v33  ;;  %v7431_v39 = vsub.s32 7, %v7421_v33  ;;  %v7444_v44 = vsub.s32 5, %v7421_v33  ;;  %v7452_v47 = vsub.s32 3, %v7421_v33  ;;  %v7458_v50 = vsub.s32 6, %v7421_v33 }
  0x2a   : > { %6929 = vmatpush3.msk.msra.mxu0 %vm888_vm0, %v876_v0  ;;  %v7158_v1 = vld [vmem:[%s829_s30] sm:$0xff]   ;;  %v7159_v2 = vld [vmem:[%s829_s30 + $0x8] sm:$0xff]   ;;  %s9580_s9 = smov 33   ;;  %s9559_s6 = smov 65   ;;  %v7466_v53 = vsub.s32 1, %v7421_v33  ;;  %v7472_v55 = vsub.s32 4, %v7421_v33 }
  0x2b   : > { %6930 = vmatprep.mubr.msk.f32.mxu0 %vm883_vm1, %v7158_v1  ;;  %6933 = vmatprep.subr.mxu0 %v9605_v3  ;;  %v875_v5 = vld [vmem:[%s9671_s10] sm:$0xff]  ;;  %s7178_s10 = smov 41   ;;  %s7180_s1 = smov 10   ;;  %v7480_v58 = vsub.s32 2, %v7421_v33 }
  0x2c   : > { %6931 = vmatmul.mubr.msk.f32.vlgmr.msra.gmra.mxu0 %vm883_vm1, %v7159_v2  ;;  %v7397_v9 = vld [vmem:[%s9672_s7] sm:$0xff]  ;;  %s7181_s30 = smov 18   ;;  %s7182_s2 = smov 8  }
  0x2d   : > { %6935 = vmatprep.mubr.msk.f32.mxu0 %vm9544_vm2, %v9605_v3  ;;  %s9721_s12 = sld [smem:[#allocation37_spill]]  ;;  %s9728_s24 = smov 113  }
  0x2e   : > { %v7437_v41 = vld [vmem:[%s9674_s5] sm:$0xff]  ;;  %v6752_v51 = vld [vmem:[%s9674_s5 + $0x8] ss:$0 sm:$0xff]  ;;  %s9720_s5 = smov 127   ;;  %s9730_s25 = smov 33  }
  0x2f   : > { %v1458_v43 = vrot.slane %v7437_v41, %v7431_v39  ;;  %v1427_v46 = vrot.slane %v7437_v41, %v7444_v44  ;;  %v1396_v52 = vrot.slane %v7437_v41, %v7452_v47  ;;  %v1443_v54 = vrot.slane %v7437_v41, %v7458_v50  ;;  %s9735_s26 = smov 81   ;;  %s9737_s27 = smov 97  }
  0x30   : > { %v1364_v56 = vrot.slane %v7437_v41, %v7466_v53  ;;  %v1412_v57 = vrot.slane %v7437_v41, %v7472_v55  ;;  %v1381_v59 = vrot.slane %v7437_v41, %v7480_v58  ;;  %s9745_s22 = smov 118   ;;  %s9746_s23 = smov 119  }
  0x31   : > { %s9747_s18 = smov 120   ;;  %s9748_s11 = sld [smem:[#allocation36_spill]] }
  0x32   : > { %s9749_s17 = sld [smem:[#allocation40_spill]]  ;;  %s6736_s13 = sshll.u32 %s10003_s3, 2 }
  0x33   : > { %s7205_s15 = smov 80   ;;  %s7206_s19 = smov 88  }
  0xec   : > { %v6932_v4 = vpop.f32.mrf.mxu0 }
  0xed   : > { %6944 = vmatpush3.msk.msra.mxu1 %vm888_vm0, %v6932_v4  ;;  %v970_v8 = vcombine.high %v6932_v4, %v6932_v4 }
  0xee   : > { %v958_v6 = vpop.f32.mrf.mxu0  ;;  %6946 = vmatmul.mubr.msk.f32.vlgmr.msra.gmra.mxu1 %vm883_vm1, %v875_v5  ;;  %6953 = vmatprep.subr.mxu1 %v9605_v3 }
  0xef   : > { %v969_v7 = vcombine.high %v958_v6, %v958_v6  ;;  %6934 = vmatpush3.msk.msra.mxu0 %vm888_vm0, %v958_v6  ;;  %6963 = vmatprep.mubr.msk.f32.mxu1 %vm9544_vm2, %v9605_v3 }
  0xf0   : > { %6936 = vmatmul.mubr.msk.f32.vlgmr.msra.gmra.mxu0 %vm883_vm1, %v875_v5  ;;  %6938 = vmatprep.subr.mxu0 %v9605_v3 }
  0xf1   : > { %6939 = vmatpush3.msk.msra.mxu0 %vm888_vm0, %v969_v7  ;;  %6940 = vmatprep.mubr.msk.f32.mxu0 %vm9544_vm2, %v9605_v3 }
  0xf2   : > { %6948 = vmatprep.subr.mxu0 %v9605_v3 }
  0xf4   : > { %6941 = vmatmul.mubr.msk.f32.vlgmr.msra.gmra.mxu0 %vm883_vm1, %v875_v5 }
  0xf5   : > { %6949 = vmatpush3.msk.msra.mxu0 %vm888_vm0, %v970_v8  ;;  %6950 = vmatprep.mubr.msk.f32.mxu0 %vm9544_vm2, %v9605_v3  ;;  %vm1350_vm2 = vcmask 592392  }
  0xf6   : > { %6966 = vmatprep.subr.mxu0 %v7397_v9 }
  0xf8   : > { %6951 = vmatmul.mubr.msk.f32.vlgmr.msra.gmra.mxu0 %vm883_vm1, %v875_v5  ;;  %vm1314_vm1 = vcmask 400716  }
  0xf9   : > { %6967 = vmatpush3.msra.mxu0 %v7397_v9 }
 0x1ae   : > { %v1186_v10 = vpop.f32.mrf.mxu1 }
 0x1af   : > { %v1269_v17 = vrot.slane %v1186_v10, 6 }
 0x1b0   : > { %v1042_v11 = vpop.f32.mrf.mxu0  ;;  %v6947_v12 = vpop.f32.mrf.mxu1 }
 0x1b1   : > { %6968 = vmatprep.mubr.msk.f32.mxu0 %vm9603_vm3, %v1042_v11 }
 0x1b2   : > { %v6937_v13 = vpop.f32.mrf.mxu0 }
 0x1b4   : > { %v1114_v14 = vpop.f32.mrf.mxu0 }
 0x1b5   : > { %v1266_v15 = vrot.slane %v1114_v14, 7  ;;  %6969 = vmatmul.mubr.msk.f32.vlgmr.msra.gmra.mxu0 %vm9603_vm3, %v1114_v14 }
 0x1b6   : > { %v6942_v16 = vpop.f32.mrf.mxu0  ;;  %6971 = vmatprep.mubr.msk.f32.mxu0 %vm9603_vm3, %v1186_v10 }
 0x1b7   : > { %v1328_v18 = vsel %vm9540_vm5, %v1266_v15, %v1042_v11  ;;  %v1316_v20 = vsel %vm9541_vm6, %v1266_v15, %v1042_v11  ;;  %v1268_v23 = vsel %vm1267_vm7, %v1266_v15, %v1042_v11  ;;  %v1289_v25 = vsel %vm9546_vm8, %v1266_v15, %v1042_v11 }
 0x1b8   : > { %1330 = vrot.lane.b32.xlu1 %v1328_v18, %s7172_s28  ;;  %v1258_v19 = vpop.f32.mrf.mxu0  ;;  %v1317_v24 = vsel %vm9540_vm5, %v1269_v17, %v1316_v20  ;;  %v1271_v27 = vsel %vm1270_vm9, %v1269_v17, %v1268_v23  ;;  %v1290_v29 = vsel %vm9543_vm10, %v1269_v17, %v1289_v25  ;;  %v1280_v30 = vsel %vm1270_vm9, %v1266_v15, %v1042_v11 }
 0x1b9   : > { %v1272_v21 = vrot.slane %v1258_v19, 5  ;;  %6972 = vmatmul.mubr.msk.f32.gmra.mxu0 %vm9603_vm3, %v1258_v19  ;;  %v1298_v32 = vsel %vm9543_vm10, %v1266_v15, %v1042_v11  ;;  %v1281_v34 = vsel %vm9546_vm8, %v1269_v17, %v1280_v30  ;;  %v1307_v37 = vsel %vm9542_vm11, %v1266_v15, %v1042_v11 }
 0x1ba   : > { %v6952_v22 = vpop.f32.mrf.mxu0  ;;  %v1299_v36 = vsel %vm9542_vm11, %v1269_v17, %v1298_v32  ;;  %v1308_v40 = vsel %vm9541_vm6, %v1269_v17, %v1307_v37  ;;  %v1340_v48 = vsel %vm1267_vm7, %v1269_v17, %v1266_v15 }
 0x1bb   : > { %1320 = vrot.lane.b32.xlu0 %v1272_v21, %s9573_s8  ;;  %v1274_v28 = vsel %vm9546_vm8, %v1272_v21, %v1271_v27  ;;  %v1292_v31 = vsel %vm9542_vm11, %v1272_v21, %v1290_v29  ;;  %v1283_v35 = vsel %vm9543_vm10, %v1272_v21, %v1281_v34  ;;  %v1301_v38 = vsel %vm9541_vm6, %v1272_v21, %v1299_v36 }
 0x1bc   : > { %1318 = vrot.lane.b32.xlu1 %v1317_v24, %s9573_s8  ;;  %v1310_v42 = vsel %vm9540_vm5, %v1272_v21, %v1308_v40  ;;  %v1329_v45 = vsel %vm1267_vm7, %v1272_v21, %v1269_v17  ;;  %v1341_v49 = vsel %vm1270_vm9, %v1272_v21, %v1340_v48  ;;  %vm1326_vm5 = vcmask 459144   ;;  %s6825_s8 = sshll.u32 %s10003_s3, 5  ;;  %s9768_s3 = smov 9  }
 0x1bd   : > { %vm1336_vm6 = vcmask 531918   ;;  %vm1348_vm11 = vcmask 597519   ;;  %vm1338_vm10 = vcmask 525768   ;;  %vm9582_vm8 = vcmask 519168  }
 0x1bf   : > { %1275 = vrot.lane.b32.xlu0 %v1274_v28, %s9547_s4 }
 0x1c0   : > { %1293 = vrot.lane.b32.xlu1 %v1292_v31, %s7175_s29  ;;  %s9551_s29 = smov 110  }
 0x1c3   : > { %1284 = vrot.lane.b32.xlu0 %v1283_v35, %s9563_s0 }
 0x1c4   : > { %1302 = vrot.lane.b32.xlu1 %v1301_v38, %s9580_s9 }
 0x1c7   : > { %1311 = vrot.lane.b32.xlu0 %v1310_v42, %s7178_s10  ;;  %s9538_s10 = smov 16  }
 0x1c8   : > { %1342 = vrot.lane.b32.xlu1 %v1042_v11, %s9559_s6  ;;  %v7516_v11 = vsub.s32 0, %v7421_v33 }
 0x1ca   : > { %9676 = vst [vmem:[#allocation9_spill] sm:$0xff] %v7516_v11  ;;  %v7525_v14 = vrot.slane %v7437_v41, %v7516_v11 }
 0x1cb   : > { %1332 = vrot.lane.b32.xlu0 %v1329_v45, %s7172_s28  ;;  %s9553_s28 = smov 2  }
 0x1cc   : > { %1460 = vrot.lane.b32.xlu1 %v1458_v43, %s9563_s0  ;;  %s9677_s0 = sld [smem:[#allocation34_spill]] }
 0x1cf   : > { %1344 = vrot.lane.b32.xlu0 %v1341_v49, %s9559_s6  ;;  %s9681_s6 = smov 49  }
 0x1d0   : > { %1429 = vrot.lane.b32.xlu1 %v1427_v46, %s7180_s1  ;;  %s9561_s1 = smov 1  }
 0x1d2   : > { %v7572_v45 = vld [vmem:[%s9677_s0] sm:$0xff] }
 0x1d3   : > { %1476 = vrot.lane.b32.xlu0 %v6752_v51, %s7181_s30  ;;  %v2440_v46 = vrot.slane %v7572_v45, %v7431_v39 }
 0x1d4   : > { %1398 = vrot.lane.b32.xlu1 %v1396_v52, %s7182_s2  ;;  %s9549_s2 = smov 112  }
 0x1d7   : > { %1445 = vrot.lane.b32.xlu0 %v1443_v54, %s9538_s10  ;;  %s9675_s10 = sld [smem:[#allocation31_spill]] }
 0x1d8   : > { %1366 = vrot.lane.b32.xlu1 %v1364_v56, %s9561_s1  ;;  %s9684_s1 = smov 17  }
 0x1db   : > { %1414 = vrot.lane.b32.xlu0 %v1412_v57, %s9547_s4  ;;  %s9557_s4 = smov 111  }
 0x1dd   : > { %v7490_v60 = vld [vmem:[%s9675_s10] sm:$0xff]  ;;  %v7580_v49 = vld [vmem:[%s9675_s10 + $0x8] sm:$0xff] }
 0x1de   : > { %6981 = vmatprep.mubr.msk.f32.mxu0 %vm9603_vm3, %v7490_v60 }
 0x1df   : > { %1383 = vrot.lane.b32.xlu0 %v1381_v59, %s9553_s28  ;;  %s9567_s28 = smov 126  }
 0x22a   : > { %v7494_v61 = vpop.permute.xlu1 %1330 }
 0x22d   : > { %v7496_v62 = vpop.permute.xlu0 %1320 }
 0x22e   : > { %v7498_v63 = vpop.permute.xlu1 %1318 }
 0x231   : > { %v1276_v0 = vpop.permute.xlu0 %1275 }
 0x232   : > { %1279 = vst.msk [vmem:[#allocation2] sm:$0xf] %vm1278_vm12, %v1276_v0  ;;  %v1294_v1 = vpop.permute.xlu1 %1293 }
 0x235   : > { %v1285_v2 = vpop.permute.xlu0 %1284 }
 0x236   : > { %1288 = vst.msk [vmem:[#allocation2 - $0x1] sm:$0x1e] %vm1287_vm13, %v1285_v2  ;;  %v1303_v4 = vpop.permute.xlu1 %1302 }
 0x237   : > { %1297 = vst.msk [vmem:[#allocation2 - $0x2] sm:$0x3c] %vm1296_vm14, %v1294_v1 }
 0x238   : > { %1306 = vst.msk [vmem:[#allocation2 - $0x3] sm:$0x78] %vm1305_vm15, %v1303_v4 }
 0x239   : > { %v1312_v5 = vpop.permute.xlu0 %1311 }
 0x23a   : > { %1315 = vst.msk [vmem:[#allocation2 - $0x4] sm:$0xf0] %vm1314_vm1, %v1312_v5  ;;  %v1343_v6 = vpop.permute.xlu1 %1342 }
 0x23b   : > { %1325 = vst.msk [vmem:[#allocation2 - $0x5] sm:$0xe0] %vm1324_vm4, %v7498_v63 }
 0x23c   : > { %1327 = vst.msk [vmem:[#allocation2 + $0x3] sm:$0x1] %vm1326_vm5, %v7496_v62 }
 0x23d   : > { %1337 = vst.msk [vmem:[#allocation2 - $0x6] sm:$0xc0] %vm1336_vm6, %v7494_v61  ;;  %v1333_v7 = vpop.permute.xlu0 %1332 }
 0x23e   : > { %1349 = vst.msk [vmem:[#allocation2 - $0x7] sm:$0x80] %vm1348_vm11, %v1343_v6  ;;  %v7513_v8 = vpop.permute.xlu1 %1460 }
 0x23f   : > { %1339 = vst.msk [vmem:[#allocation2 + $0x2] sm:$0x3] %vm1338_vm10, %v1333_v7 }
 0x241   : > { %v1345_v10 = vpop.permute.xlu0 %1344 }
 0x242   : > { %1351 = vst.msk [vmem:[#allocation2 + $0x1] sm:$0x7] %vm1350_vm2, %v1345_v10  ;;  %v7519_v12 = vpop.permute.xlu1 %1429 }
 0x245   : > { %v7521_v13 = vpop.permute.xlu0 %1476 }
 0x246   : > { %v7530_v26 = vpop.permute.xlu1 %1398 }
 0x249   : > { %v1352_v15 = vld [vmem:[#allocation2] sm:$0xf]  ;;  %v7527_v18 = vpop.permute.xlu0 %1445 }
 0x24a   : > { %v1360_v16 = vld [vmem:[#allocation2] sm:$0xf]  ;;  %v1357_v22 = vmul.f32 %v7525_v14, %v1352_v15  ;;  %v7551_v35 = vpop.permute.xlu1 %1366 }
 0x24b   : > { %v1377_v17 = vld [vmem:[#allocation2] sm:$0xf]  ;;  %v1369_v41 = vmul.f32 %v7551_v35, %v1360_v16  ;;  %v6767_v16 = vld [vmem:[%s9677_s0 + $0x10] ss:$0 sm:$0xff] }
 0x24c   : > { %v1392_v19 = vld [vmem:[#allocation2] sm:$0xf]  ;;  %1359 = vst.msk [vmem:[#allocation4] sm:$0xf] %vm9582_vm8, %v1357_v22 }
 0x24d   : > { %v1408_v20 = vld [vmem:[#allocation2] sm:$0xf]  ;;  %v7538_v30 = vpop.permute.xlu0 %1414  ;;  %v1401_v40 = vmul.f32 %v7530_v26, %v1392_v19  ;;  %v1371_v43 = vrot.slane %v1369_v41, 4  ;;  %v2355_v19 = vrot.slane %v7572_v45, %v7444_v44 }
 0x24e   : > { %v1423_v21 = vld [vmem:[#allocation2] sm:$0xf]  ;;  %v1417_v31 = vmul.f32 %v7538_v30, %v1408_v20 }
 0x24f   : > { %v1439_v23 = vld [vmem:[#allocation2] sm:$0xf]  ;;  %v1432_v34 = vmul.f32 %v7519_v12, %v1423_v21  ;;  %v1403_v42 = vrot.slane %v1401_v40, 4 }
 0x250   : > { %v1454_v24 = vld [vmem:[#allocation2] sm:$0xf]  ;;  %v1448_v28 = vmul.f32 %v7527_v18, %v1439_v23 }
 0x251   : > { %v1470_v25 = vld [vmem:[#allocation2] sm:$0xf]  ;;  %v1463_v29 = vmul.f32 %v7513_v8, %v1454_v24  ;;  %v7553_v36 = vpop.permute.xlu0 %1383  ;;  %v1434_v38 = vrot.slane %v1432_v34, 4 }
 0x252   : > { %3489 = vst.msk [vmem:[#allocation2] sm:$0xf] %vm1278_vm12, %v1276_v0  ;;  %v1479_v27 = vmul.f32 %v7521_v13, %v1470_v25  ;;  %1450 = vrot.lane.b32.xlu0 %v1448_v28, %s9549_s2  ;;  %s9555_s2 = smov 119   ;;  %v1386_v37 = vmul.f32 %v7553_v36, %v1377_v17  ;;  %v6768_v17 = vld [vmem:[%s9677_s0 + $0x18] ss:$0 sm:$0xff] }
 0x253   : > { %3490 = vst.msk [vmem:[#allocation2 - $0x1] sm:$0x1e] %vm1287_vm13, %v1285_v2  ;;  %v1465_v32 = vrot.slane %v1463_v29, 4 }
 0x254   : > { %3491 = vst.msk [vmem:[#allocation2 - $0x2] sm:$0x3c] %vm1296_vm14, %v1294_v1  ;;  %1481 = vrot.lane.b32.xlu1 %v1479_v27, %s9551_s29  ;;  %s9565_s29 = smov 118  }
 0x255   : > { %3492 = vst.msk [vmem:[#allocation2 - $0x3] sm:$0x78] %vm1305_vm15, %v1303_v4 }
 0x256   : > { %3493 = vst.msk [vmem:[#allocation2 - $0x4] sm:$0xf0] %vm1314_vm1, %v1312_v5  ;;  %1419 = vrot.lane.b32.xlu0 %v1417_v31, %s9555_s2  ;;  %s9569_s2 = smov 120  }
 0x257   : > { %3494 = vst.msk [vmem:[#allocation2 - $0x5] sm:$0xe0] %vm1324_vm4, %v7498_v63 }
 0x258   : > { %3495 = vst.msk [vmem:[#allocation2 + $0x3] sm:$0x1] %vm1326_vm5, %v7496_v62  ;;  %1466 = vrot.lane.b32.xlu1 %v1465_v32, %s9557_s4  ;;  %s9571_s4 = smov 127   ;;  %vm9602_vm5 = vcmask 293888  }
 0x259   : > { %3496 = vst.msk [vmem:[#allocation2 - $0x6] sm:$0xc0] %vm1336_vm6, %v7494_v61  ;;  %vm853_vm6 = vcmask 277504  }
 0x25a   : > { %3497 = vst.msk [vmem:[#allocation2 + $0x2] sm:$0x3] %vm1338_vm10, %v1333_v7  ;;  %1388 = vrot.lane.b32.xlu0 %v1386_v37, %s9567_s28  ;;  %s9678_s28 = sld [smem:[#allocation35_spill]]  ;;  %vm9680_vm10 = vcmask 1043459  }
 0x25b   : > { %3498 = vst.msk [vmem:[#allocation2 - $0x7] sm:$0x80] %vm1348_vm11, %v1343_v6  ;;  %vm9682_vm11 = vmmov %vm9680_vm10 }
 0x25c   : > { %3499 = vst.msk [vmem:[#allocation2 + $0x1] sm:$0x7] %vm1350_vm2, %v1345_v10  ;;  %1435 = vrot.lane.b32.xlu1 %v1434_v38, %s9565_s29  ;;  %vm9577_vm2 = vcmask 523268   ;;  %v7619_v10 = vld [vmem:[%s9677_s0 + $0x8] sm:$0xff]  ;;  %vm9683_vm12 = vmmov %vm9680_vm10  ;;  %s9718_s0 = smov 95  }
 0x25d   : > { %v2444_v15 = vrot.slane %v7619_v10, %v7431_v39  ;;  %v2359_v39 = vrot.slane %v7619_v10, %v7444_v44  ;;  %854 = vst.msk [vmem:[#allocation3 + $0x10] sm:$0xff] %vm853_vm6, %v9605_v3  ;;  %vm9685_vm13 = vmmov %vm9680_vm10 }
 0x25e   : > { %1372 = vrot.lane.b32.xlu0 %v1371_v43, %s9571_s4  ;;  %vm9686_vm14 = vmmov %vm9680_vm10  ;;  %s9690_s4 = smov 65  }
 0x25f   : > { %vm9687_vm15 = vmmov %vm9680_vm10 }
 0x260   : > { %1404 = vrot.lane.b32.xlu1 %v1403_v42, %s9569_s2  ;;  %v1485_v5 = vld [vmem:[%s9678_s28] sm:$0xf]  ;;  %s7194_s2 = smov 34   ;;  %s9584_s28 = smov 113   ;;  %vm9689_vm1 = vmmov %vm9680_vm10 }
 0x261   : > { %vm9691_vm4 = vmmov %vm9689_vm1 }
 0x262   : > { %2449 = vrot.lane.b32.xlu0 %v2444_v15, %s9580_s9 }
 0x264   : > { %2447 = vrot.lane.b32.xlu1 %v2440_v46, %s9580_s9 }
 0x266   : > { %2493 = vrot.lane.b32.xlu0 %v6768_v17, %s7194_s2 }
 0x268   : > { %2491 = vrot.lane.b32.xlu1 %v6767_v16, %s7194_s2  ;;  %s9679_s2 = sld [smem:[#allocation26_spill]] }
 0x26a   : > { %2364 = vrot.lane.b32.xlu0 %v2359_v39, %s7181_s30 }
 0x26c   : > { %2362 = vrot.lane.b32.xlu1 %v2355_v19, %s7181_s30  ;;  %s7196_s30 = smov 32  }
 0x26e   : > { %s7672_s29 = scalar_lea.vmem %s9679_s2, %s6825_s8  ;;  %s9688_s8 = smov 1  }
 0x26f   : > { %s9578_s2 = smov 81  }
 0x275   : > { %v6970_v48 = vpop.f32.mrf.mxu0 }
 0x276   : > { %6979 = vmatprep.subr.mxu0 %v6970_v48 }
 0x277   : > { %v1653_v51 = vpop.f32.mrf.mxu0  ;;  %6980 = vmatpush3.msra.mxu0 %v6970_v48 }
 0x278   : > { %6982 = vmatmul.mubr.msk.f32.vlgmr.msra.gmra.mxu0 %vm9603_vm3, %v7580_v49 }
 0x279   : > { %v6973_v52 = vpop.f32.mrf.mxu0  ;;  %6991 = vmatprep.mubr.msk.f32.mxu0 %vm9603_vm3, %v7490_v60 }
 0x27a   : > { %6989 = vmatprep.subr.mxu0 %v6973_v52 }
 0x27b   : > { %6990 = vmatpush3.msra.mxu0 %v6973_v52  ;;  %v1663_v7 = vpop.f32.mrf.mxu0 }
 0x27c   : > { %6992 = vmatmul.mubr.msk.f32.vlgmr.msra.gmra.mxu0 %vm9603_vm3, %v7580_v49  ;;  %6994 = vmatprep.subr.mxu0 %v7397_v9 }
 0x27d   : > { %6995 = vmatpush3.msra.mxu0 %v7397_v9 }
 0x2c4   : > { %v1451_v56 = vpop.permute.xlu0 %1450 }
 0x2c5   : > { %1453 = vst.msk [vmem:[#allocation4 + $0x30] sm:$0xf] %vm9582_vm8, %v1451_v56 }
 0x2c6   : > { %v1482_v54 = vpop.permute.xlu1 %1481 }
 0x2c7   : > { %1484 = vst.msk [vmem:[#allocation4 + $0x40] sm:$0xf] %vm9582_vm8, %v1482_v54 }
 0x2c8   : > { %v1420_v59 = vpop.permute.xlu0 %1419 }
 0x2c9   : > { %1422 = vst.msk [vmem:[#allocation4 + $0x20] sm:$0xf] %vm9582_vm8, %v1420_v59 }
 0x2ca   : > { %v1467_v57 = vpop.permute.xlu1 %1466 }
 0x2cb   : > { %1469 = vst.msk [vmem:[#allocation4 + $0x30] sm:$0xf0] %vm9577_vm2, %v1467_v57 }
 0x2cc   : > { %v1389_v62 = vpop.permute.xlu0 %1388 }
 0x2cd   : > { %1391 = vst.msk [vmem:[#allocation4 + $0x10] sm:$0xf] %vm9582_vm8, %v1389_v62  ;;  %v864_v62 = vld [vmem:[%s7672_s29 + $0x8] sm:$0xff]  ;;  %vm2410_vm8 = vcmask 261120  }
 0x2ce   : > { %v1436_v61 = vpop.permute.xlu1 %1435  ;;  %v1490_v63 = vld [vmem:[#allocation4 + $0x40] sm:$0xf] }
 0x2cf   : > { %1438 = vst.msk [vmem:[#allocation4 + $0x20] sm:$0xf0] %vm9577_vm2, %v1436_v61  ;;  %6954 = vmatpush3.msk.msra.mxu1 %vm888_vm0, %v1490_v63  ;;  %v863_v61 = vld [vmem:[%s7672_s29] sm:$0xff] }
 0x2d0   : > { %6955 = vmatprep.subr.mxu1 %v9605_v3  ;;  %v1373_v0 = vpop.permute.xlu0 %1372  ;;  %6996 = vmatprep.mubr.msk.f32.mxu0 %vm9603_vm3, %v863_v61  ;;  %v2403_v61 = vrot.slane %v7619_v10, %v7458_v50 }
 0x2d1   : > { %1376 = vst.msk [vmem:[#allocation4] sm:$0xf0] %vm9577_vm2, %v1373_v0  ;;  %6997 = vmatmul.mubr.msk.f32.vlgmr.msra.gmra.mxu0 %vm9603_vm3, %v864_v62 }
 0x2d2   : > { %v1405_v9 = vpop.permute.xlu1 %1404  ;;  %v1489_v1 = vld [vmem:[#allocation4 + $0x30] sm:$0xff] }
 0x2d3   : > { %1407 = vst.msk [vmem:[#allocation4 + $0x10] sm:$0xf0] %vm9577_vm2, %v1405_v9  ;;  %6956 = vmatpush3.msra.mxu1 %v1489_v1  ;;  %vm9583_vm2 = vcmask 1044360  }
 0x2d4   : > { %6957 = vmatprep.subr.mxu1 %v9605_v3 }
 0x2d6   : > { %v1488_v2 = vld [vmem:[#allocation4 + $0x20] sm:$0xff] }
 0x2d7   : > { %6958 = vmatpush3.msra.mxu1 %v1488_v2 }
 0x2d8   : > { %6959 = vmatprep.subr.mxu1 %v9605_v3  ;;  %v1486_v6 = vld [vmem:[#allocation4] sm:$0xff] }
 0x2da   : > { %v1487_v4 = vld [vmem:[#allocation4 + $0x10] sm:$0xff] }
 0x2db   : > { %6960 = vmatpush3.msra.mxu1 %v1487_v4 }
 0x2dc   : > { %6961 = vmatprep.subr.mxu1 %v9605_v3 }
 0x2dd   : > { %6962 = vmatpush3.msra.mxu1 %v1486_v6 }
 0x2de   : > { %6964 = vmatmul.mubr.msk.f32.vlgmr.msra.gmra.mxu1 %vm9602_vm5, %v1485_v5  ;;  %6974 = vmatprep.subr.mxu1 %v1653_v51 }
 0x2df   : > { %6975 = vmatpush3.msra.mxu1 %v1653_v51  ;;  %6976 = vmatprep.mubr.msk.f32.mxu1 %vm9603_vm3, %v7490_v60 }
 0x2e0   : > { %6984 = vmatprep.subr.mxu1 %v1663_v7 }
 0x2e2   : > { %6977 = vmatmul.mubr.msk.f32.vlgmr.msra.gmra.mxu1 %vm9603_vm3, %v7580_v49 }
 0x2e3   : > { %6985 = vmatpush3.msra.mxu1 %v1663_v7  ;;  %6986 = vmatprep.mubr.msk.f32.mxu1 %vm9603_vm3, %v7490_v60 }
 0x2e6   : > { %6987 = vmatmul.mubr.msk.f32.vlgmr.msra.gmra.mxu1 %vm9603_vm3, %v7580_v49 }
 0x2e7   : > { %2608 = vmatprep.mubr.f32.mxu1 %v9605_v3 }
 0x338   : > { %v7636_v20 = vpop.f32.mrf.mxu0 }
 0x339   : > { %v2101_v25 = vrot.slane %v7636_v20, 1  ;;  %v2080_v31 = vrot.slane %v7636_v20, 7  ;;  %v2143_v42 = vrot.slane %v7636_v20, 5  ;;  %v2155_v1 = vrot.slane %v7636_v20, 6 }
 0x33a   : > { %v7638_v21 = vpop.f32.mrf.mxu0  ;;  %v2111_v16 = vrot.slane %v7636_v20, 2 }
 0x33b   : > { %v2005_v38 = vrot.slane %v7638_v21, 1 }
 0x33c   : > { %v7644_v24 = vpop.f32.mrf.mxu0 }
 0x33d   : > { %v2104_v29 = vrot.slane %v7644_v24, 7  ;;  %v2084_v4 = vrot.slane %v7644_v24, 5  ;;  %v2147_v19 = vrot.slane %v7644_v24, 3 }
 0x33e   : > { %v7654_v32 = vpop.f32.mrf.mxu0 }
 0x33f   : > { %v2008_v56 = vrot.slane %v7654_v32, 7 }
 0x39e   : > { %v7640_v22 = vpop.f32.mrf.mxu1 }
 0x3a0   : > { %v6965_v23 = vpop.f32.mrf.mxu1 }
 0x3a2   : > { %v7647_v27 = vpop.f32.mrf.mxu1 }
 0x3a3   : > { %v2100_v44 = vrot.slane %v7647_v27, 2  ;;  %v2142_v41 = vrot.slane %v7647_v27, 6  ;;  %v2081_v57 = vsel %vm1267_vm7, %v2080_v31, %v7647_v27  ;;  %v2090_v59 = vrot.slane %v7647_v27, 1  ;;  %v866_v31 = vld [vmem:[%s7672_s29 + $0x18] sm:$0xff] }
 0x3a4   : > { %v7650_v28 = vpop.f32.mrf.mxu1  ;;  %v2154_v6 = vrot.slane %v7647_v27, 7  ;;  %v2110_v23 = vrot.slane %v7647_v27, 3 }
 0x3a5   : > { %v2102_v34 = vsel %vm1267_vm7, %v2101_v25, %v2100_v44  ;;  %v2004_v37 = vrot.slane %v7650_v28, 2  ;;  %v2144_v5 = vsel %vm1267_vm7, %v2143_v42, %v2142_v41  ;;  %v2091_v39 = vsel %vm1267_vm7, %v7636_v20, %v2090_v59 }
 0x3a6   : > { %v7659_v40 = vpop.f32.mrf.mxu1  ;;  %v2121_v42 = vrot.slane %v7636_v20, 3  ;;  %v2064_v59 = vrot.slane %v7650_v28, 7 }
 0x3a7   : > { %v2103_v43 = vsel %vm1270_vm9, %v7659_v40, %v2102_v34  ;;  %v2006_v46 = vsel %vm1267_vm7, %v2005_v38, %v2004_v37  ;;  %v2082_v48 = vrot.slane %v7659_v40, 6  ;;  %v2145_v51 = vrot.slane %v7659_v40, 4 }
 0x3a8   : > { %v7674_v52 = vpop.f32.mrf.mxu1  ;;  %v2105_v54 = vsel %vm9680_vm10, %v2104_v29, %v2103_v43  ;;  %v2092_v0 = vrot.slane %v7659_v40, 7  ;;  %v2157_v15 = vrot.slane %v7659_v40, 5  ;;  %v2113_v44 = vrot.slane %v7659_v40, 1  ;;  %v865_v29 = vld [vmem:[%s7672_s29 + $0x10] sm:$0xff]  ;;  %vm9692_vm10 = vmmov %vm9689_vm1  ;;  %s9575_s29 = smov 97  }
 0x3a9   : > { %2106 = vrot.lane.b32.xlu1 %v2105_v54, %s9681_s6  ;;  %v2007_v63 = vsel %vm1270_vm9, %v7674_v52, %v2006_v46  ;;  %v2083_v9 = vsel %vm1270_vm9, %v2082_v48, %v2081_v57  ;;  %v2146_v7 = vsel %vm1270_vm9, %v2145_v51, %v2144_v5  ;;  %v2094_v37 = vrot.slane %v7644_v24, 6  ;;  %6999 = vmatprep.mubr.msk.f32.mxu0 %vm9603_vm3, %v865_v29 }
 0x3aa   : > { %v2009_v2 = vsel %vm9682_vm11, %v2008_v56, %v2007_v63  ;;  %v2085_v17 = vsel %vm9683_vm12, %v2084_v4, %v2083_v9  ;;  %v2093_v25 = vsel %vm1270_vm9, %v2092_v0, %v2091_v39  ;;  %v2148_v34 = vsel %vm9685_vm13, %v2147_v19, %v2146_v7  ;;  %7000 = vmatmul.mubr.msk.f32.gmra.mxu0 %vm9603_vm3, %v866_v31  ;;  %vm9693_vm11 = vmmov %vm9689_vm1 }
 0x3ab   : > { %2010 = vrot.lane.b32.xlu0 %v2009_v2, %s9681_s6  ;;  %v2156_v38 = vsel %vm1267_vm7, %v2155_v1, %v2154_v6  ;;  %v2095_v43 = vsel %vm9686_vm14, %v2094_v37, %v2093_v25  ;;  %v2159_v46 = vrot.slane %v7644_v24, 4  ;;  %v2112_v48 = vsel %vm1267_vm7, %v2111_v16, %v2110_v23  ;;  %7004 = vmatprep.mubr.msk.f32.mxu0 %vm9603_vm3, %v7490_v60  ;;  %vm9694_vm12 = vmmov %vm9689_vm1 }
 0x3ac   : > { %v2158_v41 = vsel %vm1270_vm9, %v2157_v15, %v2156_v38  ;;  %v2120_v51 = vrot.slane %v7647_v27, 4  ;;  %v2114_v54 = vsel %vm1270_vm9, %v2113_v44, %v2112_v48  ;;  %v2123_v56 = vrot.slane %v7659_v40, 2  ;;  %vm9695_vm13 = vmmov %vm9689_vm1 }
 0x3ad   : > { %2086 = vrot.lane.b32.xlu1 %v2085_v17, %s9684_s1  ;;  %v2160_v57 = vsel %vm9687_vm15, %v2159_v46, %v2158_v41  ;;  %v2067_v62 = vrot.slane %v7674_v52, 5  ;;  %v2132_v63 = vrot.slane %v7636_v20, 4  ;;  %v2115_v9 = vsel %vm9689_vm1, %v7644_v24, %v2114_v54  ;;  %vm9696_vm14 = vmmov %vm9689_vm1 }
 0x3ae   : > { %v2122_v0 = vsel %vm1267_vm7, %v2121_v42, %v2120_v51  ;;  %v2065_v1 = vrot.slane %v7638_v21, 6  ;;  %v2131_v2 = vrot.slane %v7647_v27, 5  ;;  %v2134_v5 = vrot.slane %v7659_v40, 3  ;;  %vm9697_vm15 = vmmov %vm9689_vm1 }
 0x3af   : > { %2149 = vrot.lane.b32.xlu0 %v2148_v34, %s9584_s28  ;;  %v2124_v4 = vsel %vm1270_vm9, %v2123_v56, %v2122_v0  ;;  %v2125_v6 = vrot.slane %v7644_v24, 1  ;;  %v1982_v20 = vrot.slane %v7638_v21, 7  ;;  %v1984_v16 = vrot.slane %v7674_v52, 6 }
 0x3b0   : > { %v2066_v7 = vsel %vm1267_vm7, %v2065_v1, %v2064_v59  ;;  %v2069_v17 = vrot.slane %v7654_v32, 4  ;;  %v2133_v19 = vsel %vm1267_vm7, %v2132_v63, %v2131_v2  ;;  %v2050_v40 = vrot.slane %v7650_v28, 6 }
 0x3b1   : > { %2096 = vrot.lane.b32.xlu1 %v2095_v43, %s9580_s9  ;;  %v2068_v15 = vsel %vm1270_vm9, %v2067_v62, %v2066_v7  ;;  %v2126_v27 = vsel %vm9691_vm4, %v2125_v6, %v2124_v4  ;;  %v2135_v39 = vsel %vm1270_vm9, %v2134_v5, %v2133_v19  ;;  %v2051_v23 = vrot.slane %v7638_v21, 5  ;;  %vm9698_vm4 = vmmov %vm9689_vm1 }
 0x3b2   : > { %v2053_v25 = vrot.slane %v7674_v52, 4  ;;  %v2070_v44 = vsel %vm9692_vm10, %v2069_v17, %v2068_v15  ;;  %v2136_v29 = vrot.slane %v7644_v24, 2  ;;  %v1983_v31 = vsel %vm1267_vm7, %v1982_v20, %v7650_v28 }
 0x3b3   : > { %2161 = vrot.lane.b32.xlu0 %v2160_v57, %s9688_s8  ;;  %v1993_v34 = vrot.slane %v7650_v28, 1  ;;  %v1985_v37 = vsel %vm1270_vm9, %v1984_v16, %v1983_v31  ;;  %v1995_v38 = vrot.slane %v7674_v52, 7  ;;  %v1986_v42 = vrot.slane %v7654_v32, 5  ;;  %v7832_v31 = vpop.permute.xlu0 %2449 }
 0x3b4   : > { %v2137_v41 = vsel %vm9693_vm11, %v2136_v29, %v2135_v39  ;;  %v2052_v43 = vsel %vm1267_vm7, %v2051_v23, %v2050_v40  ;;  %v2055_v48 = vrot.slane %v7654_v32, 3  ;;  %v2015_v54 = vrot.slane %v7650_v28, 3  ;;  %v7830_v29 = vpop.permute.xlu1 %2447 }
 0x3b5   : > { %2116 = vrot.lane.b32.xlu1 %v2115_v9, %s9690_s4  ;;  %v2054_v24 = vsel %vm1270_vm9, %v2053_v25, %v2052_v43  ;;  %v1987_v46 = vsel %vm9694_vm12, %v1986_v42, %v1985_v37  ;;  %v1994_v51 = vsel %vm1267_vm7, %v7638_v21, %v1993_v34  ;;  %v2018_v57 = vrot.slane %v7674_v52, 1 }
 0x3b6   : > { %v1996_v56 = vsel %vm1270_vm9, %v1995_v38, %v1994_v51  ;;  %v2056_v59 = vsel %vm9695_vm13, %v2055_v48, %v2054_v24  ;;  %v2016_v62 = vrot.slane %v7638_v21, 2  ;;  %v2038_v63 = vrot.slane %v7650_v28, 5 }
 0x3b7   : > { %2408 = vrot.lane.b32.xlu0 %v2403_v61, %s7196_s30  ;;  %v1997_v61 = vrot.slane %v7654_v32, 6  ;;  %v2399_v9 = vrot.slane %v7572_v45, %v7458_v50  ;;  %v2041_v0 = vrot.slane %v7674_v52, 3  ;;  %v2039_v4 = vrot.slane %v7638_v21, 4 }
 0x3b8   : > { %v2017_v2 = vsel %vm1267_vm7, %v2016_v62, %v2015_v54  ;;  %v2026_v5 = vrot.slane %v7650_v28, 4  ;;  %v2029_v7 = vrot.slane %v7674_v52, 2  ;;  %v2027_v50 = vrot.slane %v7638_v21, 3  ;;  %v7834_v34 = vpop.permute.xlu1 %2491 }
 0x3b9   : > { %2127 = vrot.lane.b32.xlu1 %v2126_v27, %s9578_s2  ;;  %v1998_v1 = vsel %vm9696_vm14, %v1997_v61, %v1996_v56  ;;  %v2019_v6 = vsel %vm1270_vm9, %v2018_v57, %v2017_v2  ;;  %v2040_v20 = vsel %vm1267_vm7, %v2039_v4, %v2038_v63  ;;  %v2043_v27 = vrot.slane %v7654_v32, 2 }
 0x3ba   : > { %v2042_v15 = vsel %vm1270_vm9, %v2041_v0, %v2040_v20  ;;  %v2020_v16 = vsel %vm9697_vm15, %v7654_v32, %v2019_v6  ;;  %v2028_v28 = vsel %vm1267_vm7, %v2027_v50, %v2026_v5  ;;  %v2031_v19 = vrot.slane %v7654_v32, 1 }
 0x3bb   : > { %2071 = vrot.lane.b32.xlu0 %v2070_v44, %s9688_s8  ;;  %v2030_v17 = vsel %vm1270_vm9, %v2029_v7, %v2028_v28  ;;  %v2044_v52 = vsel %vm9689_vm1, %v2043_v27, %v2042_v15  ;;  %v2270_v21 = vrot.slane %v7572_v45, %v7452_v47  ;;  %v2274_v39 = vrot.slane %v7619_v10, %v7452_v47 }
 0x3bc   : > { %v2032_v40 = vsel %vm9698_vm4, %v2031_v19, %v2030_v17  ;;  %v2314_v23 = vrot.slane %v7572_v45, %v7472_v55  ;;  %v2318_v32 = vrot.slane %v7619_v10, %v7472_v55  ;;  %v2185_v25 = vrot.slane %v7572_v45, %v7466_v53  ;;  %v7838_v37 = vpop.permute.xlu1 %2362 }
 0x3bd   : > { %2138 = vrot.lane.b32.xlu1 %v2137_v41, %s9575_s29  ;;  %v2189_v47 = vrot.slane %v7619_v10, %v7466_v53  ;;  %v2229_v44 = vrot.slane %v7572_v45, %v7480_v58  ;;  %v2233_v55 = vrot.slane %v7619_v10, %v7480_v58  ;;  %v7836_v53 = vpop.permute.xlu0 %2493  ;;  %vm2062_vm10 = vcmask 3072  }
 0x3be   : > { %vm2074_vm11 = vcmask 134152   ;;  %vm1991_vm12 = vcmask 265352   ;;  %vm2002_vm13 = vcmask 396552   ;;  %vm2013_vm14 = vcmask 527752  }
 0x3bf   : > { %1988 = vrot.lane.b32.xlu0 %v1987_v46, %s9684_s1  ;;  %vm2024_vm15 = vcmask 658952   ;;  %vm2036_vm1 = vcmask 790152   ;;  %vm9586_vm4 = vcmask 921352   ;;  %v7871_v20 = vrot.slane %v7619_v10, %v7516_v11 }
 0x3c0   : > { %v7881_v28 = vrot.slane %v7572_v45, %v7516_v11 }
 0x3c1   : > { %2057 = vrot.lane.b32.xlu1 %v2056_v59, %s9584_s28  ;;  %v7840_v38 = vpop.permute.xlu0 %2364  ;;  %s9592_s28 = smov 95  }
 0x3c3   : > { %1999 = vrot.lane.b32.xlu0 %v1998_v1, %s9580_s9  ;;  %s9707_s9 = smov 126  }
 0x3c5   : > { %2406 = vrot.lane.b32.xlu1 %v2399_v9, %s7196_s30  ;;  %s9699_s30 = smov 16  }
 0x3c7   : > { %2021 = vrot.lane.b32.xlu0 %v2020_v16, %s9690_s4 }
 0x3c9   : > { %2045 = vrot.lane.b32.xlu1 %v2044_v52, %s9575_s29  ;;  %s9587_s29 = smov 94  }
 0x3cb   : > { %2033 = vrot.lane.b32.xlu0 %v2032_v40, %s9578_s2  ;;  %s9704_s2 = smov 111  }
 0x3cd   : > { %2277 = vrot.lane.b32.xlu1 %v2270_v21, %s9699_s30 }
 0x3cf   : > { %2279 = vrot.lane.b32.xlu0 %v2274_v39, %s9699_s30  ;;  %s9700_s30 = smov 2  }
 0x3d1   : > { %2321 = vrot.lane.b32.xlu1 %v2314_v23, %s9684_s1 }
 0x3d3   : > { %2323 = vrot.lane.b32.xlu0 %v2318_v32, %s9684_s1 }
 0x3d5   : > { %2192 = vrot.lane.b32.xlu1 %v2185_v25, %s9688_s8 }
 0x3d7   : > { %2194 = vrot.lane.b32.xlu0 %v2189_v47, %s9688_s8 }
 0x3d9   : > { %2236 = vrot.lane.b32.xlu1 %v2229_v44, %s9700_s30 }
 0x3db   : > { %2238 = vrot.lane.b32.xlu0 %v2233_v55, %s9700_s30  ;;  %s9589_s30 = smov 96  }
 0x41b   : > { %v2107_v41 = vpop.permute.xlu1 %2106 }
 0x41d   : > { %v2011_v42 = vpop.permute.xlu0 %2010 }
 0x41f   : > { %v2087_v43 = vpop.permute.xlu1 %2086 }
 0x421   : > { %v2150_v58 = vpop.permute.xlu0 %2149 }
 0x422   : > { %2153 = vst.msk [vmem:[#allocation3 + $0x10] sm:$0xf] %vm2062_vm10, %v2150_v58 }
 0x423   : > { %v2097_v24 = vpop.permute.xlu1 %2096 }
 0x425   : > { %v2162_v46 = vpop.permute.xlu0 %2161 }
 0x426   : > { %2164 = vst.msk [vmem:[#allocation3 + $0x10] sm:$0xf] %vm2074_vm11, %v2162_v46 }
 0x427   : > { %v2117_v48 = vpop.permute.xlu1 %2116 }
 0x429   : > { %v7844_v51 = vpop.permute.xlu0 %2408 }
 0x42b   : > { %v2128_v54 = vpop.permute.xlu1 %2127 }
 0x42d   : > { %v2072_v56 = vpop.permute.xlu0 %2071  ;;  %v2395_v57 = vld [vmem:[#allocation3 + $0x10] sm:$0xf] }
 0x42e   : > { %v2480_v59 = vld [vmem:[#allocation3 + $0x10] sm:$0xf]  ;;  %v2417_v61 = vmul.f32 %v7844_v51, %v2395_v57 }
 0x42f   : > { %v2501_v62 = vmul.f32 %v7836_v53, %v2480_v59  ;;  %v2139_v63 = vpop.permute.xlu1 %2138  ;;  %v2310_v52 = vld [vmem:[#allocation3 + $0x10] sm:$0xf] }
 0x430   : > { %2425 = vrot.lane.b32.xlu1 %v2417_v61, %s9589_s30  ;;  %v2436_v25 = vld [vmem:[#allocation3 + $0x10] sm:$0xf] }
 0x431   : > { %2509 = vrot.lane.b32.xlu0 %v2501_v62, %s9587_s29  ;;  %v1989_v9 = vpop.permute.xlu0 %1988  ;;  %v2266_v62 = vld [vmem:[#allocation3 + $0x10] sm:$0xf]  ;;  %s9710_s29 = smov 110  }
 0x432   : > { %1992 = vst.msk [vmem:[#allocation3] sm:$0xf] %vm1991_vm12, %v1989_v9 }
 0x433   : > { %v2058_v0 = vpop.permute.xlu1 %2057 }
 0x434   : > { %2063 = vst.msk [vmem:[#allocation3 + $0x8] sm:$0xf] %vm2062_vm10, %v2058_v0 }
 0x435   : > { %2075 = vst.msk [vmem:[#allocation3 + $0x8] sm:$0xf] %vm2074_vm11, %v2072_v56  ;;  %v2000_v1 = vpop.permute.xlu0 %1999 }
 0x436   : > { %2089 = vst.msk [vmem:[#allocation3 + $0x8] sm:$0xf] %vm1991_vm12, %v2087_v43  ;;  %v2458_v43 = vmul.f32 %v7832_v31, %v2436_v25 }
 0x437   : > { %2003 = vst.msk [vmem:[#allocation3] sm:$0xf] %vm2002_vm13, %v2000_v1  ;;  %2099 = vst.msk [vmem:[#allocation3 + $0x8] sm:$0xf] %vm2002_vm13, %v2097_v24  ;;  %v7856_v2 = vpop.permute.xlu1 %2406  ;;  %v2351_v24 = vld [vmem:[#allocation3 + $0x10] sm:$0xf] }
 0x438   : > { %2014 = vst.msk [vmem:[#allocation3] sm:$0xf] %vm2013_vm14, %v2011_v42  ;;  %2109 = vst.msk [vmem:[#allocation3 + $0x8] sm:$0xf] %vm2013_vm14, %v2107_v41  ;;  %v2225_v41 = vld [vmem:[#allocation3 + $0x10] sm:$0xf]  ;;  %v2373_v56 = vmul.f32 %v7840_v38, %v2351_v24  ;;  %v7908_v57 = vsel %vm2410_vm8, %v7856_v2, %v7844_v51 }
 0x439   : > { %2119 = vst.msk [vmem:[#allocation3 + $0x8] sm:$0xf] %vm2024_vm15, %v2117_v48  ;;  %v2022_v4 = vpop.permute.xlu0 %2021  ;;  %9708 = vst [vmem:[#allocation15_spill] sm:$0xff] %v7908_v57  ;;  %vm2451_vm8 = vcmask 269312  }
 0x43a   : > { %2025 = vst.msk [vmem:[#allocation3] sm:$0xf] %vm2024_vm15, %v2022_v4 }
 0x43b   : > { %2130 = vst.msk [vmem:[#allocation3 + $0x8] sm:$0xf] %vm2036_vm1, %v2128_v54  ;;  %v2046_v5 = vpop.permute.xlu1 %2045  ;;  %v2464_v54 = vrot.slane %v2458_v43, 4 }
 0x43c   : > { %2141 = vst.msk [vmem:[#allocation3 + $0x8] sm:$0xf] %vm9586_vm4, %v2139_v63  ;;  %v2379_v63 = vrot.slane %v2373_v56, 4 }
 0x43d   : > { %2152 = vst.msk [vmem:[#allocation3 + $0x8] sm:$0xf] %vm9583_vm2, %v2150_v58  ;;  %v2034_v6 = vpop.permute.xlu0 %2033 }
 0x43e   : > { %2037 = vst.msk [vmem:[#allocation3] sm:$0xf] %vm2036_vm1, %v2034_v6 }
 0x43f   : > { %2049 = vst.msk [vmem:[#allocation3] sm:$0xf] %vm9586_vm4, %v2046_v5  ;;  %v7867_v7 = vpop.permute.xlu1 %2277  ;;  %vm2240_vm4 = vcmask 15360  }
 0x440   : > { %9701 = vst [vmem:[#allocation10_spill] sm:$0xff] %v7867_v7  ;;  %2061 = vst.msk [vmem:[#allocation3] sm:$0xf] %vm9583_vm2, %v2058_v0  ;;  %vm9591_vm2 = vcmask 138240  }
 0x441   : > { %v7874_v50 = vpop.permute.xlu0 %2279 }
 0x442   : > { %v2288_v9 = vmul.f32 %v7874_v50, %v2266_v62 }
 0x443   : > { %v7876_v16 = vpop.permute.xlu1 %2321 }
 0x444   : > { %v2166_v15 = vld [vmem:[#allocation3 + $0x8] sm:$0xf]  ;;  %v2294_v6 = vrot.slane %v2288_v9, 4 }
 0x445   : > { %v2176_v27 = vmul.f32 %v7871_v20, %v2166_v15  ;;  %v7883_v17 = vpop.permute.xlu0 %2323  ;;  %v2394_v48 = vld [vmem:[#allocation3 + $0x8] sm:$0xf] }
 0x446   : > { %9702 = vst [vmem:[#allocation11_spill] sm:$0xff] %v7883_v17  ;;  %v2332_v19 = vmul.f32 %v7883_v17, %v2310_v52  ;;  %v2416_v59 = vmul.f32 %v7908_v57, %v2394_v48  ;;  %v7915_v61 = vsel %vm9591_vm2, %v7876_v16, %v7883_v17  ;;  %v2309_v0 = vld [vmem:[#allocation3 + $0x8] sm:$0xf]  ;;  %v7928_v52 = vsel %vm2451_vm8, %v7830_v29, %v7832_v31 }
 0x447   : > { %2178 = vst [vmem:[#allocation4 + $0x8] sm:$0xf] %v2176_v27  ;;  %v2165_v10 = vld [vmem:[#allocation3] sm:$0xf]  ;;  %v7886_v21 = vpop.permute.xlu1 %2192  ;;  %9709 = vst [vmem:[#allocation16_spill] sm:$0xff] %v7915_v61  ;;  %v2331_v1 = vmul.f32 %v7915_v61, %v2309_v0  ;;  %vm2366_vm2 = vcmask 146432  }
 0x448   : > { %9703 = vst [vmem:[#allocation12_spill] sm:$0xff] %v7886_v21  ;;  %v2393_v40 = vld [vmem:[#allocation3] sm:$0xf]  ;;  %2340 = vrot.lane.b32.xlu1 %v2332_v19, %s9704_s2  ;;  %v2175_v45 = vmul.f32 %v7881_v28, %v2165_v10  ;;  %v2435_v5 = vld [vmem:[#allocation3 + $0x8] sm:$0xf]  ;;  %9712 = vst [vmem:[#allocation18_spill] sm:$0xff] %v7928_v52 }
 0x449   : > { %v2415_v39 = vmul.f32 %v7856_v2, %v2393_v40  ;;  %v7890_v23 = vpop.permute.xlu0 %2194  ;;  %v2308_v32 = vld [vmem:[#allocation3] sm:$0xf]  ;;  %v2224_v15 = vld [vmem:[#allocation3 + $0x8] sm:$0xf]  ;;  %v2457_v10 = vmul.f32 %v7928_v52, %v2435_v5  ;;  %vm9598_vm8 = vcmask 908288  }
 0x44a   : > { %9705 = vst [vmem:[#allocation13_spill] sm:$0xff] %v7890_v23  ;;  %2177 = vst [vmem:[#allocation4] sm:$0xf] %v2175_v45  ;;  %v2330_v47 = vmul.f32 %v7876_v16, %v2308_v32  ;;  %v2223_v58 = vld [vmem:[#allocation3] sm:$0xf]  ;;  %v7937_v45 = vsel %vm2366_vm2, %v7838_v37, %v7840_v38  ;;  %vm9596_vm2 = vcmask 7168  }
 0x44b   : > { %2421 = vrot.lane.b32.xlu0 %v2415_v39, %s9589_s30  ;;  %v7895_v44 = vpop.permute.xlu1 %2236  ;;  %v2478_v27 = vld [vmem:[#allocation3] sm:$0xf]  ;;  %v2350_v40 = vld [vmem:[#allocation3 + $0x8] sm:$0xf]  ;;  %9714 = vst [vmem:[#allocation19_spill] sm:$0xff] %v7937_v45 }
 0x44c   : > { %v2245_v46 = vmul.f32 %v7895_v44, %v2223_v58  ;;  %v2499_v39 = vmul.f32 %v7834_v34, %v2478_v27  ;;  %v2479_v32 = vld [vmem:[#allocation3 + $0x8] sm:$0xf]  ;;  %v2434_v25 = vld [vmem:[#allocation3] sm:$0xf] }
 0x44d   : > { %v7897_v55 = vpop.permute.xlu0 %2238  ;;  %v2265_v43 = vld [vmem:[#allocation3 + $0x8] sm:$0xf]  ;;  %v2349_v48 = vld [vmem:[#allocation3] sm:$0xf] }
 0x44e   : > { %9706 = vst [vmem:[#allocation14_spill] sm:$0xff] %v7897_v55  ;;  %v2247_v42 = vmul.f32 %v7897_v55, %v2225_v41  ;;  %v7923_v4 = vsel %vm2240_vm4, %v7895_v44, %v7897_v55  ;;  %vm2281_vm4 = vcmask 130048   ;;  %v2372_v41 = vmul.f32 %v7937_v45, %v2350_v40  ;;  %v2180_v9 = vld [vmem:[#allocation3 + $0x8] sm:$0xf]  ;;  %v2264_v0 = vld [vmem:[#allocation3] sm:$0xf] }
 0x44f   : > { %2336 = vrot.lane.b32.xlu0 %v2330_v47, %s9704_s2  ;;  %9711 = vst [vmem:[#allocation17_spill] sm:$0xff] %v7923_v4  ;;  %v2246_v19 = vmul.f32 %v7923_v4, %v2224_v15  ;;  %v2463_v47 = vrot.slane %v2457_v10, 4  ;;  %v7948_v58 = vsel %vm2281_vm4, %v7867_v7, %v7874_v50  ;;  %v2286_v27 = vmul.f32 %v7867_v7, %v2264_v0 }
 0x450   : > { %2255 = vrot.lane.b32.xlu1 %v2247_v42, %s9707_s9  ;;  %v7944_v42 = vsel %vm853_vm6, %v7834_v34, %v7836_v53  ;;  %9717 = vst [vmem:[#allocation21_spill] sm:$0xff] %v7948_v58  ;;  %v2287_v56 = vmul.f32 %v7948_v58, %v2265_v43  ;;  %vm9597_vm6 = vcmask 785408   ;;  %vm9599_vm4 = vcmask 1031168  }
 0x451   : > { %9716 = vst [vmem:[#allocation20_spill] sm:$0xff] %v7944_v42  ;;  %v2500_v24 = vmul.f32 %v7944_v42, %v2479_v32  ;;  %v2181_v32 = vld [vmem:[#allocation3 + $0x10] sm:$0xf] }
 0x453   : > { %2251 = vrot.lane.b32.xlu0 %v2245_v46, %s9707_s9  ;;  %v2456_v46 = vmul.f32 %v7830_v29, %v2434_v25  ;;  %v2292_v25 = vrot.slane %v2286_v27, 4 }
 0x454   : > { %2469 = vrot.lane.b32.xlu1 %v2464_v54, %s9592_s28  ;;  %s9715_s28 = smov 94   ;;  %v2378_v54 = vrot.slane %v2372_v41, 4 }
 0x455   : > { %v2462_v62 = vrot.slane %v2456_v46, 4 }
 0x457   : > { %2423 = vrot.lane.b32.xlu0 %v2416_v59, %s9589_s30  ;;  %s9713_s30 = smov 112   ;;  %v7958_v59 = vsel %vm9596_vm2, %v7886_v21, %v7890_v23  ;;  %vm9600_vm2 = vcmask 777216  }
 0x458   : > { %2384 = vrot.lane.b32.xlu1 %v2379_v63, %s9710_s29  ;;  %9719 = vst [vmem:[#allocation22_spill] sm:$0xff] %v7958_v59  ;;  %v2371_v63 = vmul.f32 %v7838_v37, %v2349_v48  ;;  %v2202_v5 = vmul.f32 %v7958_v59, %v2180_v9 }
 0x45a   : > { %v2377_v15 = vrot.slane %v2371_v63, 4  ;;  %v2208_v10 = vrot.slane %v2202_v5, 4 }
 0x45b   : > { %2338 = vrot.lane.b32.xlu0 %v2331_v1, %s9704_s2  ;;  %v2293_v1 = vrot.slane %v2287_v56, 4 }
 0x45c   : > { %2299 = vrot.lane.b32.xlu1 %v2294_v6, %s9713_s30  ;;  %v2179_v6 = vld [vmem:[#allocation3] sm:$0xf] }
 0x45d   : > { %v2201_v40 = vmul.f32 %v7886_v21, %v2179_v6 }
 0x45f   : > { %2253 = vrot.lane.b32.xlu0 %v2246_v19, %s9707_s9  ;;  %v7966_v19 = vpop.f32.mrf.mxu0  ;;  %v2207_v43 = vrot.slane %v2201_v40, 4 }
 0x460   : > { %2505 = vrot.lane.b32.xlu1 %v2499_v39, %s9715_s28 }
 0x461   : > { %v2696_v39 = vpop.f32.mrf.mxu0 }
 0x462   : > { %7002 = vmatprep.subr.mxu0 %v2696_v39 }
 0x463   : > { %2467 = vrot.lane.b32.xlu0 %v2463_v47, %s9718_s0  ;;  %v2203_v47 = vmul.f32 %v7890_v23, %v2181_v32  ;;  %7003 = vmatpush3.msra.mxu0 %v2696_v39 }
 0x464   : > { %2507 = vrot.lane.b32.xlu1 %v2500_v24, %s9715_s28  ;;  %7005 = vmatmul.mubr.msk.f32.vlgmr.msra.gmra.mxu0 %vm9603_vm3, %v7580_v49 }
 0x465   : > { %7014 = vmatprep.mubr.msk.f32.mxu0 %vm9603_vm3, %v7490_v60  ;;  %v2209_v46 = vrot.slane %v2203_v47, 4 }
 0x467   : > { %2382 = vrot.lane.b32.xlu0 %v2378_v54, %s9710_s29 }
 0x468   : > { %2465 = vrot.lane.b32.xlu1 %v2462_v62, %s9718_s0 }
 0x46a   : > { %v7972_v41 = vpop.f32.mrf.mxu0 }
 0x46b   : > { %2297 = vrot.lane.b32.xlu0 %v2293_v1, %s9713_s30 }
 0x46c   : > { %2380 = vrot.lane.b32.xlu1 %v2377_v15, %s9710_s29  ;;  %v2706_v24 = vpop.f32.mrf.mxu0 }
 0x46d   : > { %7012 = vmatprep.subr.mxu0 %v2706_v24 }
 0x46e   : > { %7013 = vmatpush3.msra.mxu0 %v2706_v24 }
 0x46f   : > { %2212 = vrot.lane.b32.xlu0 %v2208_v10, %s9720_s5  ;;  %7015 = vmatmul.mubr.msk.f32.vlgmr.msra.gmra.mxu0 %vm9603_vm3, %v7580_v49 }
 0x470   : > { %2295 = vrot.lane.b32.xlu1 %v2292_v25, %s9713_s30  ;;  %3475 = vmatprep.mubr.f32.mxu0 %v9605_v3 }
 0x473   : > { %2210 = vrot.lane.b32.xlu0 %v2207_v43, %s9720_s5 }
 0x474   : > { %2214 = vrot.lane.b32.xlu1 %v2209_v46, %s9720_s5 }
 0x4a2   : > { %v2426_v54 = vpop.permute.xlu1 %2425 }
 0x4a3   : > { %v2510_v48 = vpop.permute.xlu0 %2509 }
 0x4ba   : > { %v2341_v62 = vpop.permute.xlu1 %2340 }
 0x4bd   : > { %v2422_v56 = vpop.permute.xlu0 %2421 }
 0x4c1   : > { %v2337_v63 = vpop.permute.xlu0 %2336 }
 0x4c2   : > { %v2256_v9 = vpop.permute.xlu1 %2255 }
 0x4c5   : > { %v2252_v60 = vpop.permute.xlu0 %2251 }
 0x4c6   : > { %v2470_v0 = vpop.permute.xlu1 %2469 }
 0x4c9   : > { %v2424_v1 = vpop.permute.xlu0 %2423 }
 0x4ca   : > { %v2428_v5 = vsel %vm9597_vm6, %v2422_v56, %v2424_v1  ;;  %v2429_v6 = vsel %vm9597_vm6, %v2424_v1, %v2426_v54  ;;  %v2385_v15 = vpop.permute.xlu1 %2384  ;;  %vm2511_vm6 = vcmask 769024  }
 0x4cb   : > { %2432 = vst [vmem:[#allocation4 + $0x30] sm:$0xf] %v2428_v5  ;;  %2433 = vst [vmem:[#allocation4 + $0x38] sm:$0xf] %v2429_v6 }
 0x4cd   : > { %v2339_v27 = vpop.permute.xlu0 %2338 }
 0x4ce   : > { %v2343_v10 = vsel %vm9598_vm8, %v2337_v63, %v2339_v27  ;;  %v2344_v40 = vsel %vm9598_vm8, %v2339_v27, %v2341_v62  ;;  %v2300_v39 = vpop.permute.xlu1 %2299  ;;  %vm2386_vm8 = vcmask 900096  }
 0x4cf   : > { %2347 = vst [vmem:[#allocation4 + $0x20] sm:$0xf] %v2343_v10  ;;  %2348 = vst [vmem:[#allocation4 + $0x28] sm:$0xf] %v2344_v40 }
 0x4d1   : > { %v2254_v32 = vpop.permute.xlu0 %2253 }
 0x4d2   : > { %v2258_v25 = vsel %vm9599_vm4, %v2252_v60, %v2254_v32  ;;  %v2259_v47 = vsel %vm9599_vm4, %v2254_v32, %v2256_v9  ;;  %v2506_v43 = vpop.permute.xlu1 %2505  ;;  %vm9616_vm4 = vcmask 916480  }
 0x4d3   : > { %2262 = vst [vmem:[#allocation4 + $0x10] sm:$0xf] %v2258_v25  ;;  %2263 = vst [vmem:[#allocation4 + $0x18] sm:$0xf] %v2259_v47 }
 0x4d5   : > { %v2468_v24 = vpop.permute.xlu0 %2467 }
 0x4d6   : > { %v2473_v46 = vsel %vm9600_vm2, %v2468_v24, %v2470_v0  ;;  %v2508_v54 = vpop.permute.xlu1 %2507 }
 0x4d7   : > { %2477 = vst [vmem:[#allocation4 + $0x38] sm:$0xf0] %v2473_v46  ;;  %v2512_v56 = vsel %vm2511_vm6, %v2506_v43, %v2508_v54  ;;  %v2513_v62 = vsel %vm2511_vm6, %v2508_v54, %v2510_v48 }
 0x4d8   : > { %2516 = vst [vmem:[#allocation4 + $0x40] sm:$0xf] %v2512_v56  ;;  %2517 = vst [vmem:[#allocation4 + $0x48] sm:$0xf] %v2513_v62 }
 0x4d9   : > { %v2383_v63 = vpop.permute.xlu0 %2382 }
 0x4da   : > { %v2388_v9 = vsel %vm2386_vm8, %v2383_v63, %v2385_v15  ;;  %v2466_v60 = vpop.permute.xlu1 %2465 }
 0x4db   : > { %2392 = vst [vmem:[#allocation4 + $0x28] sm:$0xf0] %v2388_v9  ;;  %v2472_v1 = vsel %vm9600_vm2, %v2466_v60, %v2468_v24  ;;  %vm9604_vm2 = vcmask 1039360   ;;  %v2518_v60 = vld [vmem:[%s9721_s12] sm:$0xf]  ;;  %s9744_s12 = smov 96  }
 0x4dc   : > { %2476 = vst [vmem:[#allocation4 + $0x30] sm:$0xf0] %v2472_v1 }
 0x4dd   : > { %v2298_v5 = vpop.permute.xlu0 %2297 }
 0x4de   : > { %v2303_v0 = vsel %vm9616_vm4, %v2298_v5, %v2300_v39  ;;  %v2381_v6 = vpop.permute.xlu1 %2380  ;;  %v2526_v15 = vld [vmem:[#allocation4 + $0x38] sm:$0xff] }
 0x4df   : > { %2307 = vst [vmem:[#allocation4 + $0x18] sm:$0xf0] %v2303_v0  ;;  %v2387_v27 = vsel %vm2386_vm8, %v2381_v6, %v2383_v63  ;;  %v2528_v10 = vld [vmem:[#allocation4 + $0x48] sm:$0xf]  ;;  %v2527_v48 = vld [vmem:[#allocation4 + $0x40] sm:$0xf] }
 0x4e0   : > { %2391 = vst [vmem:[#allocation4 + $0x20] sm:$0xf0] %v2387_v27  ;;  %6769 = vmatprep.subr.msk.mxu1 %vm888_vm0, %v2528_v10 }
 0x4e1   : > { %v2213_v40 = vpop.permute.xlu0 %2212  ;;  %6770 = vmatpush1.msk.msra.mxu1 %vm888_vm0, %v2527_v48 }
 0x4e2   : > { %v2296_v32 = vpop.permute.xlu1 %2295  ;;  %2568 = vmatprep.subr.mxu1 %v2526_v15  ;;  %v2524_v43 = vld [vmem:[#allocation4 + $0x28] sm:$0xff] }
 0x4e3   : > { %v2302_v25 = vsel %vm9616_vm4, %v2296_v32, %v2298_v5  ;;  %v2525_v47 = vld [vmem:[#allocation4 + $0x30] sm:$0xff] }
 0x4e4   : > { %2306 = vst [vmem:[#allocation4 + $0x10] sm:$0xf0] %v2302_v25  ;;  %2569 = vmatpush1.msra.mxu1 %v2525_v47  ;;  %v7161_v5 = vld [vmem:[%s9675_s10] sm:$0xff] }
 0x4e5   : > { %v2211_v39 = vpop.permute.xlu0 %2210  ;;  %2570 = vmatprep.subr.mxu1 %v2524_v43 }
 0x4e6   : > { %v2217_v24 = vsel %vm9604_vm2, %v2211_v39, %v2213_v40  ;;  %v2215_v46 = vpop.permute.xlu1 %2214  ;;  %v2522_v62 = vld [vmem:[#allocation4 + $0x18] sm:$0xff] }
 0x4e7   : > { %2221 = vst [vmem:[#allocation4] sm:$0xf0] %v2217_v24  ;;  %v2218_v54 = vsel %vm9604_vm2, %v2213_v40, %v2215_v46  ;;  %v2523_v56 = vld [vmem:[#allocation4 + $0x20] sm:$0xff] }
 0x4e8   : > { %2222 = vst [vmem:[#allocation4 + $0x8] sm:$0xf0] %v2218_v54  ;;  %2571 = vmatpush1.msra.mxu1 %v2523_v56 }
 0x4e9   : > { %2572 = vmatprep.subr.mxu1 %v2522_v62 }
 0x4eb   : > { %v2521_v63 = vld [vmem:[#allocation4 + $0x10] sm:$0xff] }
 0x4ec   : > { %2573 = vmatpush1.msra.mxu1 %v2521_v63 }
 0x4ee   : > { %v2519_v1 = vld [vmem:[#allocation4] sm:$0xff] }
 0x4ef   : > { %v2520_v9 = vld [vmem:[#allocation4 + $0x8] sm:$0xff] }
 0x4f0   : > { %2574 = vmatprep.subr.mxu1 %v2520_v9 }
 0x4f1   : > { %2575 = vmatpush1.msra.mxu1 %v2519_v1 }
 0x4f2   : > { %6771 = vmatmul.mubr.msk.f32.vlgmr.msra.gmra.mxu1 %vm9602_vm5, %v2518_v60  ;;  %7007 = vmatprep.subr.mxu1 %v7966_v19  ;;  %vm9722_vm5 = vmmov 0  }
 0x4f3   : > { %7008 = vmatpush3.msra.mxu1 %v7966_v19  ;;  %7009 = vmatprep.mubr.msk.f32.mxu1 %vm9603_vm3, %v7161_v5 }
 0x4f4   : > { %7017 = vmatprep.subr.mxu1 %v7972_v41 }
 0x4f6   : > { %7010 = vmatmul.mubr.msk.f32.vlgmr.msra.gmra.mxu1 %vm9603_vm3, %v7580_v49 }
 0x4f7   : > { %7018 = vmatpush3.msra.mxu1 %v7972_v41  ;;  %7019 = vmatprep.mubr.msk.f32.mxu1 %vm9603_vm3, %v7161_v5 }
 0x4f8   : > { %7022 = vmatprep.subr.mxu1 %v9605_v3 }
 0x4fa   : > { %7020 = vmatmul.mubr.msk.f32.vlgmr.msra.gmra.mxu1 %vm9603_vm3, %v7580_v49  ;;  %vm9725_vm3 = vcmask 1043459  }
 0x4fb   : > { %7032 = vmatprep.mubr.msk.f32.mxu1 %vm9722_vm5, %v9605_v3  ;;  %vm9726_vm2 = vmmov %vm9725_vm3 }
 0x4fc   : > { %vm9733_vm4 = vmmov %vm9726_vm2 }
 0x524   : > { %v8022_v19 = vpop.f32.mrf.mxu0 }
 0x525   : > { %v3144_v49 = vrot.slane %v8022_v19, 3  ;;  %v3124_v9 = vrot.slane %v8022_v19, 1 }
 0x526   : > { %v8024_v0 = vpop.f32.mrf.mxu0 }
 0x527   : > { %v3055_v47 = vrot.slane %v8024_v0, 3  ;;  %v3087_v63 = vrot.slane %v8024_v0, 6 }
 0x52f   : > { %v8028_v27 = vpop.f32.mrf.mxu0 }
 0x530   : > { %v3147_v40 = vrot.slane %v8028_v27, 1  ;;  %v3116_v62 = vrot.slane %v8028_v27, 6 }
 0x531   : > { %v8034_v48 = vpop.f32.mrf.mxu0 }
 0x532   : > { %v3058_v24 = vrot.slane %v8034_v48, 1 }
 0x5b2   : > { %v8026_v6 = vpop.f32.mrf.mxu1 }
 0x5b3   : > { %9723 = vst [vmem:[#allocation23_spill] sm:$0xff] %v8026_v6  ;;  %v3154_v6 = vrot.slane %v8022_v19, 4 }
 0x5b4   : > { %v8030_v10 = vpop.f32.mrf.mxu1 }
 0x5b5   : > { %9724 = vst [vmem:[#allocation24_spill] sm:$0xff] %v8030_v10 }
 0x5b6   : > { %v8032_v41 = vpop.f32.mrf.mxu1 }
 0x5b7   : > { %v3145_v15 = vrot.slane %v8032_v41, 2  ;;  %v3114_v32 = vrot.slane %v8032_v41, 7  ;;  %v3135_v10 = vrot.slane %v8032_v41, 1 }
 0x5b8   : > { %v8040_v25 = vpop.f32.mrf.mxu1 }
 0x5b9   : > { %v3146_v39 = vsel %vm1267_vm7, %v3145_v15, %v3144_v49  ;;  %v3056_v43 = vrot.slane %v8040_v25, 2  ;;  %v3088_v46 = vrot.slane %v8040_v25, 5  ;;  %v3115_v5 = vsel %vm1267_vm7, %v3114_v32, %v8022_v19 }
 0x5ba   : > { %v8047_v54 = vpop.f32.mrf.mxu1  ;;  %v3148_v56 = vsel %vm1270_vm9, %v3147_v40, %v3146_v39  ;;  %v3117_v32 = vsel %vm1270_vm9, %v3116_v62, %v3115_v5 }
 0x5bb   : > { %v3149_v60 = vsel %vm9725_vm3, %v8047_v54, %v3148_v56  ;;  %v3057_v1 = vsel %vm1267_vm7, %v3056_v43, %v3055_v47  ;;  %v3118_v49 = vrot.slane %v8047_v54, 5  ;;  %v3089_v3 = vsel %vm1267_vm7, %v3088_v46, %v3087_v63  ;;  %vm9727_vm3 = vmmov %vm9726_vm2 }
 0x5bc   : > { %3150 = vrot.lane.b32.xlu0 %v3149_v60, %s9690_s4  ;;  %v8060_v15 = vpop.f32.mrf.mxu1  ;;  %v3059_v40 = vsel %vm1270_vm9, %v3058_v24, %v3057_v1  ;;  %v3025_v47 = vrot.slane %v8040_v25, 7  ;;  %v3090_v43 = vrot.slane %v8034_v48, 4  ;;  %v3126_v60 = vrot.slane %v8028_v27, 7 }
 0x5bd   : > { %v3060_v39 = vsel %vm9726_vm2, %v8060_v15, %v3059_v40  ;;  %v3092_v56 = vrot.slane %v8060_v15, 3  ;;  %v3119_v24 = vsel %vm9727_vm3, %v3118_v49, %v3117_v32  ;;  %v3125_v1 = vsel %vm1267_vm7, %v8032_v41, %v3124_v9  ;;  %vm9729_vm3 = vmmov %vm9726_vm2 }
 0x5be   : > { %3061 = vrot.lane.b32.xlu1 %v3060_v39, %s9690_s4  ;;  %v3128_v46 = vrot.slane %v8047_v54, 6  ;;  %v3091_v63 = vsel %vm1270_vm9, %v3090_v43, %v3089_v3  ;;  %v3134_v40 = vrot.slane %v8022_v19, 2  ;;  %v3026_v5 = vsel %vm1267_vm7, %v3025_v47, %v8024_v0 }
 0x5bf   : > { %v3093_v62 = vsel %vm9726_vm2, %v3092_v56, %v3091_v63  ;;  %v3029_v39 = vrot.slane %v8060_v15, 5  ;;  %v3035_v49 = vrot.slane %v8024_v0, 1  ;;  %v3127_v9 = vsel %vm1270_vm9, %v3126_v60, %v3125_v1 }
 0x5c0   : > { %3120 = vrot.lane.b32.xlu0 %v3119_v24, %s9684_s1  ;;  %v3027_v32 = vrot.slane %v8034_v48, 6  ;;  %v3136_v24 = vsel %vm1267_vm7, %v3135_v10, %v3134_v40  ;;  %v3138_v3 = vrot.slane %v8047_v54, 7  ;;  %v3129_v43 = vsel %vm9729_vm3, %v3128_v46, %v3127_v9  ;;  %vm9731_vm3 = vmmov %vm9726_vm2 }
 0x5c1   : > { %v3037_v56 = vrot.slane %v8034_v48, 7  ;;  %v3099_v47 = vrot.slane %v8024_v0, 7  ;;  %v3100_v63 = vrot.slane %v8040_v25, 6  ;;  %v3036_v60 = vsel %vm1267_vm7, %v8040_v25, %v3035_v49 }
 0x5c2   : > { %3094 = vrot.lane.b32.xlu1 %v3093_v62, %s9728_s24  ;;  %v3028_v62 = vsel %vm1270_vm9, %v3027_v32, %v3026_v5  ;;  %v3039_v1 = vrot.slane %v8060_v15, 6  ;;  %v3045_v10 = vrot.slane %v8024_v0, 2  ;;  %v3137_v46 = vsel %vm1270_vm9, %v8028_v27, %v3136_v24 }
 0x5c3   : > { %v3030_v40 = vsel %vm9726_vm2, %v3029_v39, %v3028_v62  ;;  %v3046_v9 = vrot.slane %v8040_v25, 1  ;;  %v3139_v5 = vsel %vm9731_vm3, %v3138_v3, %v3137_v46  ;;  %v3155_v32 = vrot.slane %v8032_v41, 3  ;;  %vm9732_vm3 = vmmov %vm9726_vm2 }
 0x5c4   : > { %3130 = vrot.lane.b32.xlu0 %v3129_v43, %s9730_s25  ;;  %v3188_v49 = vrot.slane %v8022_v19, 7  ;;  %v3191_v43 = vrot.slane %v8028_v27, 5  ;;  %v3038_v11 = vsel %vm1270_vm9, %v3037_v56, %v3036_v60  ;;  %v3101_v39 = vsel %vm1267_vm7, %v3100_v63, %v3099_v47 }
 0x5c5   : > { %v3104_v24 = vrot.slane %v8060_v15, 4  ;;  %v3189_v62 = vrot.slane %v8032_v41, 6  ;;  %v3102_v3 = vrot.slane %v8034_v48, 5  ;;  %v3065_v46 = vrot.slane %v8024_v0, 4 }
 0x5c6   : > { %3031 = vrot.lane.b32.xlu1 %v3030_v40, %s9684_s1  ;;  %v3040_v40 = vsel %vm9726_vm2, %v3039_v1, %v3038_v11  ;;  %v3193_v33 = vrot.slane %v8047_v54, 4  ;;  %v3047_v23 = vsel %vm1267_vm7, %v3046_v9, %v3045_v10  ;;  %v3049_v56 = vrot.slane %v8060_v15, 7 }
 0x5c7   : > { %v3066_v47 = vrot.slane %v8040_v25, 3  ;;  %v3190_v63 = vsel %vm1267_vm7, %v3189_v62, %v3188_v49  ;;  %v3103_v60 = vsel %vm1270_vm9, %v3102_v3, %v3101_v39  ;;  %v3157_v11 = vrot.slane %v8028_v27, 2 }
 0x5c8   : > { %3140 = vrot.lane.b32.xlu0 %v3139_v5, %s9681_s6  ;;  %v3166_v1 = vrot.slane %v8032_v41, 4  ;;  %v3192_v5 = vsel %vm1270_vm9, %v3191_v43, %v3190_v63  ;;  %v3105_v55 = vsel %vm9732_vm3, %v3104_v24, %v3103_v60  ;;  %v3156_v10 = vsel %vm1267_vm7, %v3155_v32, %v3154_v6  ;;  %vm9734_vm3 = vmmov %vm9726_vm2 }
 0x5c9   : > { %v3159_v9 = vrot.slane %v8047_v54, 1  ;;  %v8132_v17 = vsel %vm9726_vm2, %v3193_v33, %v3192_v5  ;;  %v3048_v49 = vsel %vm1270_vm9, %v8034_v48, %v3047_v23  ;;  %v3165_v39 = vrot.slane %v8022_v19, 5  ;;  %v3556_v5 = vld [vmem:[#allocation2] sm:$0xf] }
 0x5ca   : > { %3041 = vrot.lane.b32.xlu1 %v3040_v40, %s9730_s25  ;;  %v3050_v62 = vsel %vm9733_vm4, %v3049_v56, %v3048_v49  ;;  %v3067_v43 = vsel %vm1267_vm7, %v3066_v47, %v3065_v46  ;;  %v3070_v24 = vrot.slane %v8060_v15, 1  ;;  %v3077_v6 = vrot.slane %v8040_v25, 4  ;;  %vm9736_vm4 = vmmov %vm9726_vm2 }
 0x5cb   : > { %v3158_v33 = vsel %vm1270_vm9, %v3157_v11, %v3156_v10  ;;  %v3068_v32 = vrot.slane %v8034_v48, 2  ;;  %v3167_v40 = vsel %vm1267_vm7, %v3166_v1, %v3165_v39  ;;  %v3170_v3 = vrot.slane %v8047_v54, 2 }
 0x5cc   : > { %3106 = vrot.lane.b32.xlu0 %v3105_v55, %s9688_s8  ;;  %v3168_v55 = vrot.slane %v8028_v27, 3  ;;  %v3160_v23 = vsel %vm9734_vm3, %v3159_v9, %v3158_v33  ;;  %v3076_v46 = vrot.slane %v8024_v0, 5  ;;  %v3081_v63 = vrot.slane %v8060_v15, 2  ;;  %v3548_v9 = vld [vmem:[#allocation2] sm:$0xf]  ;;  %vm9738_vm3 = vmmov %vm9726_vm2 }
 0x5cd   : > { %v3069_v25 = vsel %vm1270_vm9, %v3068_v32, %v3067_v43  ;;  %v3177_v60 = vrot.slane %v8032_v41, 5  ;;  %v3079_v1 = vrot.slane %v8034_v48, 3  ;;  %v3176_v10 = vrot.slane %v8022_v19, 6 }
 0x5ce   : > { %3051 = vrot.lane.b32.xlu1 %v3050_v62, %s9681_s6  ;;  %v3071_v56 = vsel %vm9736_vm4, %v3070_v24, %v3069_v25  ;;  %v3078_v47 = vsel %vm1267_vm7, %v3077_v6, %v3076_v46  ;;  %v3169_v11 = vsel %vm1270_vm9, %v3168_v55, %v3167_v40  ;;  %v3179_v15 = vrot.slane %v8028_v27, 4  ;;  %vm9739_vm4 = vmmov %vm9726_vm2  ;;  %v3541_v6 = vld [vmem:[#allocation2] sm:$0xf] }
 0x5cf   : > { %v3171_v0 = vsel %vm9726_vm2, %v3170_v3, %v3169_v11  ;;  %v3080_v49 = vsel %vm1270_vm9, %v3079_v1, %v3078_v47  ;;  %v3178_v39 = vsel %vm1267_vm7, %v3177_v60, %v3176_v10  ;;  %v3181_v62 = vrot.slane %v8047_v54, 3 }
 0x5d0   : > { %3161 = vrot.lane.b32.xlu0 %v3160_v23, %s9735_s26  ;;  %v3082_v41 = vsel %vm9738_vm3, %v3081_v63, %v3080_v49  ;;  %v3557_v48 = vmul.f32 %v3556_v5, %v7521_v13  ;;  %v3549_v43 = vmul.f32 %v3548_v9, %v7513_v8  ;;  %v3180_v19 = vsel %vm1270_vm9, %v3179_v15, %v3178_v39 }
 0x5d1   : > { %v3182_v24 = vsel %vm9739_vm4, %v3181_v62, %v3180_v19  ;;  %v3542_v54 = vmul.f32 %v3541_v6, %v7527_v18  ;;  %v7202_v33 = vmov 0   ;;  %vm9740_vm2 = vcmask 921352  }
 0x5d2   : > { %3072 = vrot.lane.b32.xlu1 %v3071_v56, %s9735_s26  ;;  %v3551_v27 = vrot.slane %v3549_v43, 4  ;;  %7156 = vset.pattern.permute.xlu0 %v7202_v33  ;;  %vm9753_vm3 = vcmask 1031168   ;;  %vm9754_vm4 = vcmask 777216  }
 0x5d3   : > { %7157 = vset.pattern.permute.xlu1 %v7202_v33 }
 0x5d4   : > { %3172 = vrot.lane.b32.xlu0 %v3171_v0, %s9737_s27 }
 0x5d6   : > { %3083 = vrot.lane.b32.xlu1 %v3082_v41, %s9737_s27  ;;  %s9766_s27 = sld [smem:[#allocation27_spill]] }
 0x5d8   : > { %3559 = vrot.lane.b32.xlu0 %v3557_v48, %s9710_s29 }
 0x5da   : > { %3183 = vrot.lane.b32.xlu1 %v3182_v24, %s9728_s24 }
 0x5dc   : > { %3552 = vrot.lane.b32.xlu0 %v3551_v27, %s9704_s2 }
 0x5de   : > { %3544 = vrot.lane.b32.xlu1 %v3542_v54, %s9713_s30 }
 0x62e   : > { %v3151_v32 = vpop.permute.xlu0 %3150 }
 0x630   : > { %v3062_v55 = vpop.permute.xlu1 %3061 }
 0x632   : > { %v3121_v23 = vpop.permute.xlu0 %3120 }
 0x634   : > { %v3095_v40 = vpop.permute.xlu1 %3094 }
 0x635   : > { %3098 = vst.msk [vmem:[#allocation3 + $0x8] sm:$0xf] %vm2062_vm10, %v3095_v40 }
 0x636   : > { %v3131_v3 = vpop.permute.xlu0 %3130 }
 0x638   : > { %v3032_v46 = vpop.permute.xlu1 %3031 }
 0x639   : > { %3034 = vst.msk [vmem:[#allocation3] sm:$0xf] %vm1991_vm12, %v3032_v46 }
 0x63a   : > { %v3141_v25 = vpop.permute.xlu0 %3140 }
 0x63c   : > { %v3042_v56 = vpop.permute.xlu1 %3041 }
 0x63d   : > { %3044 = vst.msk [vmem:[#allocation3] sm:$0xf] %vm2002_vm13, %v3042_v56 }
 0x63e   : > { %v3107_v47 = vpop.permute.xlu0 %3106 }
 0x63f   : > { %3109 = vst.msk [vmem:[#allocation3 + $0x8] sm:$0xf] %vm2074_vm11, %v3107_v47 }
 0x640   : > { %3123 = vst.msk [vmem:[#allocation3 + $0x8] sm:$0xf] %vm1991_vm12, %v3121_v23  ;;  %v3052_v63 = vpop.permute.xlu1 %3051  ;;  %vm9741_vm12 = vmmov %vm9740_vm2 }
 0x641   : > { %3133 = vst.msk [vmem:[#allocation3 + $0x8] sm:$0xf] %vm2002_vm13, %v3131_v3  ;;  %vm9742_vm13 = vcmask 1044360  }
 0x642   : > { %3054 = vst.msk [vmem:[#allocation3] sm:$0xf] %vm2013_vm14, %v3052_v63  ;;  %3143 = vst.msk [vmem:[#allocation3 + $0x8] sm:$0xf] %vm2013_vm14, %v3141_v25  ;;  %v3162_v60 = vpop.permute.xlu0 %3161 }
 0x643   : > { %3064 = vst.msk [vmem:[#allocation3] sm:$0xf] %vm2024_vm15, %v3062_v55  ;;  %3153 = vst.msk [vmem:[#allocation3 + $0x8] sm:$0xf] %vm2024_vm15, %v3151_v32  ;;  %vm9751_vm15 = vcmask 908288  }
 0x644   : > { %3164 = vst.msk [vmem:[#allocation3 + $0x8] sm:$0xf] %vm2036_vm1, %v3162_v60  ;;  %v3073_v11 = vpop.permute.xlu1 %3072  ;;  %vm9743_vm14 = vmmov %vm9742_vm13 }
 0x645   : > { %3075 = vst.msk [vmem:[#allocation3] sm:$0xf] %vm2036_vm1, %v3073_v11  ;;  %vm9752_vm1 = vcmask 519168  }
 0x646   : > { %v3173_v1 = vpop.permute.xlu0 %3172 }
 0x647   : > { %3175 = vst.msk [vmem:[#allocation3 + $0x8] sm:$0xf] %vm9740_vm2, %v3173_v1  ;;  %vm9756_vm2 = vcmask 916480  }
 0x648   : > { %v3084_v0 = vpop.permute.xlu1 %3083 }
 0x649   : > { %3086 = vst.msk [vmem:[#allocation3] sm:$0xf] %vm9741_vm12, %v3084_v0  ;;  %vm9757_vm12 = vmmov %vm9752_vm1 }
 0x64a   : > { %3097 = vst.msk [vmem:[#allocation3] sm:$0xf] %vm9742_vm13, %v3095_v40  ;;  %vm9758_vm13 = vcmask 523268  }
 0x64c   : > { %v3184_v5 = vpop.permute.xlu1 %3183 }
 0x64d   : > { %3186 = vst.msk [vmem:[#allocation3 + $0x8] sm:$0xf] %vm9743_vm14, %v3184_v5  ;;  %vm9759_vm14 = vcmask 1039360  }
 0x64e   : > { %3187 = vst.msk [vmem:[#allocation3 + $0x10] sm:$0xf] %vm2062_vm10, %v3184_v5  ;;  %vm9750_vm10 = vcmask 785408  }
 0x651   : > { %v3364_v10 = vld [vmem:[#allocation3] sm:$0xf] }
 0x652   : > { %v3367_v9 = vmul.f32 %v3364_v10, %v7834_v34  ;;  %v3319_v49 = vld [vmem:[#allocation3] sm:$0xf] }
 0x653   : > { %v3199_v15 = vld [vmem:[#allocation3] sm:$0xf]  ;;  %v3322_v48 = vmul.f32 %v3319_v49, %v7856_v2 }
 0x654   : > { %3373 = vrot.lane.b32.xlu0 %v3367_v9, %s9715_s28  ;;  %v3365_v41 = vld [vmem:[#allocation3 + $0x8] sm:$0xf]  ;;  %v3201_v39 = vmul.f32 %v3199_v15, %v7881_v28  ;;  %v3274_v19 = vld [vmem:[#allocation3] sm:$0xf] }
 0x655   : > { %v3368_v62 = vmul.f32 %v3365_v41, %v7944_v42  ;;  %v3320_v43 = vld [vmem:[#allocation3 + $0x8] sm:$0xf]  ;;  %v3277_v54 = vmul.f32 %v3274_v19, %v7876_v16  ;;  %v3229_v32 = vld [vmem:[#allocation3] sm:$0xf] }
 0x656   : > { %3203 = vst [vmem:[#allocation4] sm:$0xf] %v3201_v39  ;;  %v3200_v24 = vld [vmem:[#allocation3 + $0x8] sm:$0xf]  ;;  %v3323_v27 = vmul.f32 %v3320_v43, %v7908_v57  ;;  %v3340_v55 = vld [vmem:[#allocation3] sm:$0xf]  ;;  %v3232_v40 = vmul.f32 %v3229_v32, %v7895_v44 }
 0x657   : > { %3375 = vrot.lane.b32.xlu1 %v3368_v62, %s9715_s28  ;;  %v3202_v6 = vmul.f32 %v3200_v24, %v7871_v20  ;;  %v3275_v33 = vld [vmem:[#allocation3 + $0x8] sm:$0xf]  ;;  %v3343_v46 = vmul.f32 %v3340_v55, %v7830_v29  ;;  %v3295_v56 = vld [vmem:[#allocation3] sm:$0xf]  ;;  %v3533_v24 = vld [vmem:[#allocation2] sm:$0xf] }
 0x658   : > { %3328 = vrot.lane.b32.xlu0 %v3322_v48, %s9744_s12  ;;  %v3278_v23 = vmul.f32 %v3275_v33, %v7915_v61  ;;  %v3230_v3 = vld [vmem:[#allocation3 + $0x8] sm:$0xf]  ;;  %v3298_v11 = vmul.f32 %v3295_v56, %v7838_v37  ;;  %v3250_v0 = vld [vmem:[#allocation3] sm:$0xf]  ;;  %v3534_v33 = vmul.f32 %v3533_v24, %v7519_v12  ;;  %v3518_v32 = vld [vmem:[#allocation2] sm:$0xf] }
 0x659   : > { %3204 = vst [vmem:[#allocation4 + $0x8] sm:$0xf] %v3202_v6  ;;  %v3341_v25 = vld [vmem:[#allocation3 + $0x8] sm:$0xf]  ;;  %v3233_v47 = vmul.f32 %v3230_v3, %v7923_v4  ;;  %v3349_v60 = vrot.slane %v3343_v46, 4  ;;  %v3253_v49 = vmul.f32 %v3250_v0, %v7867_v7  ;;  %v3519_v3 = vmul.f32 %v3518_v32, %v7530_v26 }
 0x65a   : > { %v3344_v63 = vmul.f32 %v3341_v25, %v7928_v52  ;;  %v3296_v1 = vld [vmem:[#allocation3 + $0x8] sm:$0xf]  ;;  %v3304_v9 = vrot.slane %v3298_v11, 4  ;;  %v3205_v41 = vld [vmem:[#allocation3] sm:$0xf] }
 0x65b   : > { %3330 = vrot.lane.b32.xlu1 %v3323_v27, %s9744_s12  ;;  %v3299_v10 = vmul.f32 %v3296_v1, %v7937_v45  ;;  %v3251_v15 = vld [vmem:[#allocation3 + $0x8] sm:$0xf]  ;;  %v3259_v48 = vrot.slane %v3253_v49, 4  ;;  %v3208_v43 = vmul.f32 %v3205_v41, %v7886_v21  ;;  %v3521_v25 = vrot.slane %v3519_v3, 4  ;;  %v3511_v56 = vld [vmem:[#allocation2] sm:$0xf] }
 0x65c   : > { %3283 = vrot.lane.b32.xlu0 %v3277_v54, %s9704_s2  ;;  %v3350_v5 = vrot.slane %v3344_v63, 4  ;;  %v3254_v62 = vmul.f32 %v3251_v15, %v7948_v58  ;;  %v3206_v19 = vld [vmem:[#allocation3 + $0x8] sm:$0xf]  ;;  %v3512_v63 = vmul.f32 %v3511_v56, %v7553_v36  ;;  %v3569_v0 = vld [vmem:[%s9749_s17] sm:$0xf]  ;;  %v9755_v3 = vmov 0.0  }
 0x65d   : > { %v3305_v39 = vrot.slane %v3299_v10, 4  ;;  %v3209_v27 = vmul.f32 %v3206_v19, %v7958_v59  ;;  %v3214_v54 = vrot.slane %v3208_v43, 4  ;;  %s9933_s17 = sld [smem:[#allocation7_spill]] }
 0x65e   : > { %v3260_v6 = vrot.slane %v3254_v62, 4 }
 0x65f   : > { %3285 = vrot.lane.b32.xlu1 %v3278_v23, %s9704_s2  ;;  %v3215_v55 = vrot.slane %v3209_v27, 4  ;;  %v3536_v23 = vrot.slane %v3534_v33, 4 }
 0x660   : > { %3238 = vrot.lane.b32.xlu0 %v3232_v40, %s9707_s9  ;;  %v3526_v40 = vld [vmem:[#allocation2] sm:$0xf] }
 0x661   : > { %v3527_v46 = vmul.f32 %v3526_v40, %v7538_v30 }
 0x663   : > { %3240 = vrot.lane.b32.xlu1 %v3233_v47, %s9707_s9  ;;  %v3503_v47 = vld [vmem:[#allocation2] sm:$0xf] }
 0x664   : > { %3352 = vrot.lane.b32.xlu0 %v3349_v60, %s9718_s0  ;;  %v1491_v60 = vld [vmem:[%s9748_s11] sm:$0xf]  ;;  %v3504_v11 = vmul.f32 %v3503_v47, %v7551_v35  ;;  %s838_s11 = scalar_lea.vmem %s9766_s27, %s6736_s13  ;;  %s7204_s13 = smov 104  }
 0x665   : > { %s7207_s27 = smov 72  }
 0x666   : > { %v3506_v1 = vrot.slane %v3504_v11, 4 }
 0x667   : > { %3354 = vrot.lane.b32.xlu1 %v3350_v5, %s9718_s0  ;;  %v3560_v5 = vpop.permute.xlu0 %3559 }
 0x668   : > { %3307 = vrot.lane.b32.xlu0 %v3304_v9, %s9710_s29  ;;  %v3545_v9 = vpop.permute.xlu1 %3544 }
 0x66b   : > { %3309 = vrot.lane.b32.xlu1 %v3305_v39, %s9710_s29  ;;  %v3553_v10 = vpop.permute.xlu0 %3552 }
 0x66c   : > { %3262 = vrot.lane.b32.xlu0 %v3259_v48, %s9713_s30 }
 0x66f   : > { %3264 = vrot.lane.b32.xlu1 %v3260_v6, %s9713_s30 }
 0x670   : > { %3217 = vrot.lane.b32.xlu0 %v3214_v54, %s9720_s5 }
 0x673   : > { %3219 = vrot.lane.b32.xlu1 %v3215_v55, %s9720_s5 }
 0x674   : > { %3537 = vrot.lane.b32.xlu0 %v3536_v23, %s9745_s22 }
 0x677   : > { %3529 = vrot.lane.b32.xlu1 %v3527_v46, %s9746_s23 }
 0x678   : > { %3522 = vrot.lane.b32.xlu0 %v3521_v25, %s9747_s18 }
 0x67b   : > { %3514 = vrot.lane.b32.xlu1 %v3512_v63, %s9707_s9 }
 0x67c   : > { %1494 = vperm.xlu0 %7156, %v1491_v60  }
 0x67f   : > { %3507 = vrot.lane.b32.xlu1 %v3506_v1, %s9720_s5 }
 0x683   : > { %3572 = vperm.xlu1 %7157, %v3569_v0  }
 0x687   : > { %3195 = vrot.lane.b32.xlu1 %v8132_v17, %s9688_s8 }
 0x6c6   : > { %v3374_v49 = vpop.permute.xlu0 %3373 }
 0x6c9   : > { %v8246_v15 = vpop.permute.xlu1 %3375 }
 0x6ca   : > { %v3379_v41 = vsel %vm2511_vm6, %v3374_v49, %v8246_v15  ;;  %v3329_v39 = vpop.permute.xlu0 %3328 }
 0x6cb   : > { %3383 = vst [vmem:[#allocation4 + $0x40] sm:$0xf] %v3379_v41 }
 0x6cd   : > { %v8250_v62 = vpop.permute.xlu1 %3330 }
 0x6ce   : > { %v3334_v48 = vsel %vm9750_vm10, %v3329_v39, %v8250_v62  ;;  %v3284_v43 = vpop.permute.xlu0 %3283  ;;  %vm9760_vm10 = vmmov %vm9758_vm13 }
 0x6cf   : > { %3338 = vst [vmem:[#allocation4 + $0x30] sm:$0xf] %v3334_v48  ;;  %v3500_v48 = vld [vmem:[#allocation2] sm:$0xf] }
 0x6d1   : > { %v8254_v19 = vpop.permute.xlu1 %3285 }
 0x6d2   : > { %v8256_v17 = vld [vmem:[#allocation4 + $0x40] sm:$0xf]  ;;  %v3289_v24 = vsel %vm9751_vm15, %v3284_v43, %v8254_v19  ;;  %v3239_v6 = vpop.permute.xlu0 %3238  ;;  %vm9761_vm15 = vmmov %vm9752_vm1 }
 0x6d3   : > { %3562 = vst.msk [vmem:[#allocation4 + $0x40] sm:$0xf] %vm9752_vm1, %v3560_v5  ;;  %3293 = vst [vmem:[#allocation4 + $0x20] sm:$0xf] %v3289_v24  ;;  %v3501_v24 = vmul.f32 %v3500_v48, %v7525_v14 }
 0x6d4   : > { %vm9762_vm1 = vmmov %vm9760_vm10 }
 0x6d5   : > { %v8261_v27 = vpop.permute.xlu1 %3240 }
 0x6d6   : > { %v3244_v54 = vsel %vm9753_vm3, %v3239_v6, %v8261_v27  ;;  %v3353_v33 = vpop.permute.xlu0 %3352  ;;  %vm9763_vm3 = vmmov %vm9757_vm12 }
 0x6d7   : > { %3248 = vst [vmem:[#allocation4 + $0x10] sm:$0xf] %v3244_v54 }
 0x6d9   : > { %v8265_v32 = vpop.permute.xlu1 %3354 }
 0x6da   : > { %v3358_v55 = vsel %vm9754_vm4, %v3353_v33, %v8265_v32  ;;  %v3308_v23 = vpop.permute.xlu0 %3307  ;;  %v3568_v40 = vld [vmem:[#allocation4 + $0x40] sm:$0xf]  ;;  %vm9764_vm4 = vmmov %vm9763_vm3 }
 0x6db   : > { %3362 = vst [vmem:[#allocation4 + $0x30] sm:$0xf0] %v3358_v55  ;;  %7023 = vmatpush3.msk.msra.mxu1 %vm888_vm0, %v3568_v40 }
 0x6dc   : > { %7024 = vmatprep.subr.mxu1 %v9755_v3 }
 0x6dd   : > { %v8271_v46 = vpop.permute.xlu1 %3309 }
 0x6de   : > { %v3313_v25 = vsel %vm2386_vm8, %v3308_v23, %v8271_v46  ;;  %v3263_v56 = vpop.permute.xlu0 %3262  ;;  %v867_v23 = vld [vmem:[%s838_s11] sm:$0xf]  ;;  %s9922_s11 = sld [smem:[#allocation42_spill]] }
 0x6df   : > { %3317 = vst [vmem:[#allocation4 + $0x20] sm:$0xf0] %v3313_v25 }
 0x6e1   : > { %v8275_v47 = vpop.permute.xlu1 %3264 }
 0x6e2   : > { %v8277_v63 = vld [vmem:[#allocation4 + $0x30] sm:$0xff]  ;;  %v3268_v60 = vsel %vm9756_vm2, %v3263_v56, %v8275_v47  ;;  %v3218_v11 = vpop.permute.xlu0 %3217  ;;  %vm9765_vm2 = vmmov %vm9762_vm1  ;;  %v3563_v56 = vld [vmem:[%s9523_s16] sm:$0xf] }
 0x6e3   : > { %3547 = vst.msk [vmem:[#allocation4 + $0x30] sm:$0xf] %vm9757_vm12, %v3545_v9  ;;  %3272 = vst [vmem:[#allocation4 + $0x10] sm:$0xf0] %v3268_v60  ;;  %vm9767_vm12 = vcmask 293888  }
 0x6e4   : > { %3555 = vst.msk [vmem:[#allocation4 + $0x30] sm:$0xf0] %vm9758_vm13, %v3553_v10  ;;  %vm9769_vm13 = vmmov %vm9763_vm3 }
 0x6e5   : > { %v8283_v1 = vpop.permute.xlu1 %3219 }
 0x6e6   : > { %v3223_v0 = vsel %vm9759_vm14, %v3218_v11, %v8283_v1  ;;  %v3538_v5 = vpop.permute.xlu0 %3537  ;;  %v8287_v49 = vld [vmem:[#allocation4 + $0x20] sm:$0xff]  ;;  %vm9770_vm14 = vcmask 777216  }
 0x6e7   : > { %3227 = vst [vmem:[#allocation4] sm:$0xf0] %v3223_v0  ;;  %3540 = vst.msk [vmem:[#allocation4 + $0x20] sm:$0xf0] %vm9760_vm10, %v3538_v5  ;;  %vm9771_vm10 = vcmask 916480  }
 0x6e9   : > { %v3530_v41 = vpop.permute.xlu1 %3529 }
 0x6ea   : > { %3532 = vst.msk [vmem:[#allocation4 + $0x20] sm:$0xf] %vm9761_vm15, %v3530_v41  ;;  %v3523_v39 = vpop.permute.xlu0 %3522  ;;  %v8291_v9 = vld [vmem:[#allocation4 + $0x10] sm:$0xff]  ;;  %vm9775_vm15 = vmmov %vm9763_vm3 }
 0x6eb   : > { %v3567_v10 = vld [vmem:[#allocation4 + $0x30] sm:$0xff]  ;;  %3525 = vst.msk [vmem:[#allocation4 + $0x10] sm:$0xf0] %vm9762_vm1, %v3523_v39 }
 0x6ec   : > { %7025 = vmatpush3.msra.mxu1 %v3567_v10 }
 0x6ed   : > { %7026 = vmatprep.subr.mxu1 %v9755_v3  ;;  %v3515_v43 = vpop.permute.xlu1 %3514 }
 0x6ee   : > { %3517 = vst.msk [vmem:[#allocation4 + $0x10] sm:$0xf] %vm9763_vm3, %v3515_v43  ;;  %v8297_v6 = vld [vmem:[#allocation4] sm:$0xff]  ;;  %vm9776_vm3 = vcmask 785408  }
 0x6ef   : > { %3502 = vst.msk [vmem:[#allocation4] sm:$0xf] %vm9764_vm4, %v3501_v24  ;;  %vm9777_vm4 = vcmask 908288  }
 0x6f1   : > { %v3508_v54 = vpop.permute.xlu1 %3507  ;;  %v3566_v33 = vld [vmem:[#allocation4 + $0x20] sm:$0xff] }
 0x6f2   : > { %3510 = vst.msk [vmem:[#allocation4] sm:$0xf0] %vm9765_vm2, %v3508_v54  ;;  %7027 = vmatpush3.msra.mxu1 %v3566_v33  ;;  %vm9778_vm2 = vcmask 1031168  }
 0x6f3   : > { %7028 = vmatprep.subr.mxu1 %v9755_v3 }
 0x6f5   : > { %v3565_v55 = vld [vmem:[#allocation4 + $0x10] sm:$0xff] }
 0x6f6   : > { %7029 = vmatpush3.msra.mxu1 %v3565_v55 }
 0x6f7   : > { %v1495_v40 = vpop.permute.xlu0 %1494  ;;  %7030 = vmatprep.subr.mxu1 %v9755_v3 }
 0x6f8   : > { %v1571_v25 = vadd.f32 %v7640_v22, %v1495_v40 }
 0x6f9   : > { %v3564_v60 = vld [vmem:[#allocation4] sm:$0xff] }
 0x6fa   : > { %v1574_v11 = vmul.f32 %v1571_v25, %v867_v23  ;;  %7031 = vmatpush3.msra.mxu1 %v3564_v60 }
 0x6fb   : > { %7033 = vmatmul.mubr.msk.f32.vlgmr.msra.gmra.mxu1 %vm9767_vm12, %v3563_v56  ;;  %vm9779_vm12 = vmmov %vm9762_vm1 }
 0x6fc   : > { %3652 = vrot.lane.b32.xlu0 %v1574_v11, %s9768_s3 }
 0x6fe   : > { %v3573_v0 = vpop.permute.xlu1 %3572 }
 0x702   : > { %v3196_v5 = vpop.permute.xlu1 %3195 }
 0x703   : > { %3198 = vst.msk [vmem:[#allocation3 + $0x10] sm:$0xf] %vm2074_vm11, %v3196_v5  ;;  %vm3655_vm11 = vcmask 592968  }
 0x70a   : > { %v3366_v41 = vld [vmem:[#allocation3 + $0x10] sm:$0xf] }
 0x70b   : > { %v3342_v39 = vld [vmem:[#allocation3 + $0x10] sm:$0xf]  ;;  %v3369_v10 = vmul.f32 %v3366_v41, %v7836_v53 }
 0x70c   : > { %v3345_v22 = vmul.f32 %v3342_v39, %v7832_v31  ;;  %v3297_v48 = vld [vmem:[#allocation3 + $0x10] sm:$0xf] }
 0x70d   : > { %3377 = vrot.lane.b32.xlu0 %v3369_v10, %s9715_s28  ;;  %v3300_v24 = vmul.f32 %v3297_v48, %v7840_v38  ;;  %v3252_v54 = vld [vmem:[#allocation3 + $0x10] sm:$0xf] }
 0x70e   : > { %v3351_v43 = vrot.slane %v3345_v22, 4  ;;  %v3255_v55 = vmul.f32 %v3252_v54, %v7874_v50 }
 0x70f   : > { %v3306_v33 = vrot.slane %v3300_v24, 4 }
 0x710   : > { %v3261_v23 = vrot.slane %v3255_v55, 4 }
 0x711   : > { %3356 = vrot.lane.b32.xlu0 %v3351_v43, %s9718_s0 }
 0x715   : > { %3311 = vrot.lane.b32.xlu0 %v3306_v33, %s9710_s29 }
 0x719   : > { %3266 = vrot.lane.b32.xlu0 %v3261_v23, %s9713_s30 }
 0x76e   : > { %v3653_v40 = vpop.permute.xlu0 %3652 }
 0x76f   : > { %3656 = vst.msk [vmem:[#allocation2] sm:$0xf] %vm3655_vm11, %v3653_v40 }
 0x776   : > { %v3657_v25 = vld [vmem:[#allocation2] sm:$0xf] }
 0x777   : > { %v3658_v56 = vmul.f32 %v3657_v25, %v7525_v14  ;;  %v3713_v60 = vld [vmem:[#allocation2] sm:$0xf]  ;;  %v3321_v25 = vld [vmem:[#allocation3 + $0x10] sm:$0xf] }
 0x778   : > { %v3705_v11 = vld [vmem:[#allocation2] sm:$0xf]  ;;  %v3714_v5 = vmul.f32 %v3713_v60, %v7521_v13  ;;  %v9772_v60 = vld [vmem:[#allocation11_spill] sm:$0xff] }
 0x779   : > { %v3706_v41 = vmul.f32 %v3705_v11, %v7513_v8  ;;  %3659 = vst.msk [vmem:[#allocation4] sm:$0xf] %vm9769_vm13, %v3658_v56  ;;  %v3276_v56 = vld [vmem:[#allocation3 + $0x10] sm:$0xf] }
 0x77a   : > { %3716 = vrot.lane.b32.xlu0 %v3714_v5, %s9710_s29  ;;  %v3279_v11 = vmul.f32 %v3276_v56, %v9772_v60  ;;  %v3231_v5 = vld [vmem:[#allocation3 + $0x10] sm:$0xf] }
 0x77b   : > { %v3708_v39 = vrot.slane %v3706_v41, 4  ;;  %v9773_v41 = vld [vmem:[#allocation14_spill] sm:$0xff] }
 0x77e   : > { %3709 = vrot.lane.b32.xlu0 %v3708_v39, %s9704_s2  ;;  %v9774_v39 = vld [vmem:[#allocation13_spill] sm:$0xff] }
 0x77f   : > { %v3378_v10 = vpop.permute.xlu0 %3377 }
 0x780   : > { %v3380_v22 = vsel %vm2511_vm6, %v8246_v15, %v3378_v10 }
 0x781   : > { %3384 = vst [vmem:[#allocation4 + $0x48] sm:$0xf] %v3380_v22  ;;  %v3698_v22 = vld [vmem:[#allocation2] sm:$0xf] }
 0x783   : > { %v3357_v48 = vpop.permute.xlu0 %3356 }
 0x784   : > { %v3359_v43 = vsel %vm9770_vm14, %v8265_v32, %v3357_v48  ;;  %v3699_v48 = vmul.f32 %v3698_v22, %v7527_v18  ;;  %vm9781_vm14 = vcmask 293888  }
 0x785   : > { %3363 = vst [vmem:[#allocation4 + $0x38] sm:$0xf0] %v3359_v43 }
 0x787   : > { %v3312_v24 = vpop.permute.xlu0 %3311 }
 0x788   : > { %v3314_v54 = vsel %vm2386_vm8, %v8271_v46, %v3312_v24  ;;  %v3395_v33 = vld [vmem:[#allocation4 + $0x48] sm:$0xf]  ;;  %v3324_v46 = vmul.f32 %v3321_v25, %v7844_v51 }
 0x789   : > { %3318 = vst [vmem:[#allocation4 + $0x28] sm:$0xf0] %v3314_v54  ;;  %6784 = vmatprep.subr.msk.mxu0 %vm888_vm0, %v3395_v33  ;;  %v8353_v54 = vld [vmem:[#allocation2] sm:$0xf] }
 0x78a   : > { %6785 = vmatpush1.msk.msra.mxu0 %vm888_vm0, %v8256_v17  ;;  %v3207_v17 = vld [vmem:[#allocation3 + $0x10] sm:$0xf]  ;;  %v8355_v33 = vld [vmem:[#allocation2] sm:$0xf] }
 0x78b   : > { %v3267_v55 = vpop.permute.xlu0 %3266  ;;  %v3210_v10 = vmul.f32 %v3207_v17, %v9774_v39 }
 0x78c   : > { %v3269_v15 = vsel %vm9771_vm10, %v8275_v47, %v3267_v55  ;;  %v3234_v47 = vmul.f32 %v3231_v5, %v9773_v41  ;;  %v8357_v55 = vld [vmem:[#allocation2] sm:$0xf]  ;;  %vm9783_vm10 = vmmov %vm9762_vm1 }
 0x78d   : > { %3273 = vst [vmem:[#allocation4 + $0x18] sm:$0xf0] %v3269_v15  ;;  %v8359_v15 = vld [vmem:[#allocation2] sm:$0xf] }
 0x7bb   : > { %v3647_v23 = vpop.f32.mrf.mxu1 }
 0x7bc   : > { %v3648_v40 = vadd.f32 %v3647_v23, %v3573_v0  ;;  %v3216_v0 = vrot.slane %v3210_v10, 4  ;;  %v3690_v23 = vld [vmem:[#allocation2] sm:$0xf] }
 0x7bd   : > { %v7034_v32 = vpop.f32.mrf.mxu1 }
 0x7be   : > { %3721 = vrot.lane.b32.xlu1 %v3648_v40, %s9768_s3  ;;  %s9936_s3 = sld [smem:[#allocation41_spill]] }
 0x7c2   : > { %3332 = vrot.lane.b32.xlu1 %v3324_v46, %s9744_s12 }
 0x7c6   : > { %3287 = vrot.lane.b32.xlu1 %v3279_v11, %s9704_s2 }
 0x7ca   : > { %3242 = vrot.lane.b32.xlu1 %v3234_v47, %s9707_s9 }
 0x7ce   : > { %3221 = vrot.lane.b32.xlu1 %v3216_v0, %s9720_s5 }
 0x7d2   : > { %3701 = vrot.lane.b32.xlu1 %v3699_v48, %s9713_s30 }
 0x7ec   : > { %v3717_v43 = vpop.permute.xlu0 %3716 }
 0x7ed   : > { %3719 = vst.msk [vmem:[#allocation4 + $0x40] sm:$0xf] %vm9775_vm15, %v3717_v43 }
 0x7f0   : > { %v3710_v24 = vpop.permute.xlu0 %3709 }
 0x7f1   : > { %3712 = vst.msk [vmem:[#allocation4 + $0x30] sm:$0xf0] %vm9762_vm1, %v3710_v24 }
 0x830   : > { %v3722_v40 = vpop.permute.xlu1 %3721 }
 0x831   : > { %3724 = vst.msk [vmem:[#allocation2] sm:$0xf] %vm3655_vm11, %v3722_v40  ;;  %vm9780_vm11 = vcmask 1039360  }
 0x834   : > { %v3333_v32 = vpop.permute.xlu1 %3332 }
 0x835   : > { %v3335_v25 = vsel %vm9776_vm3, %v8250_v62, %v3333_v32 }
 0x836   : > { %3339 = vst [vmem:[#allocation4 + $0x38] sm:$0xf] %v3335_v25 }
 0x838   : > { %v3288_v46 = vpop.permute.xlu1 %3287  ;;  %v3776_v56 = vld [vmem:[#allocation2] sm:$0xf] }
 0x839   : > { %v3783_v11 = vld [vmem:[#allocation2] sm:$0xf]  ;;  %v3290_v5 = vsel %vm9777_vm4, %v8254_v19, %v3288_v46  ;;  %v3777_v17 = vmul.f32 %v3776_v56, %v7513_v8  ;;  %vm9786_vm4 = vmmov %vm9762_vm1 }
 0x83a   : > { %v3784_v47 = vmul.f32 %v3783_v11, %v7521_v13  ;;  %v3768_v10 = vld [vmem:[#allocation2] sm:$0xf]  ;;  %3294 = vst [vmem:[#allocation4 + $0x28] sm:$0xf] %v3290_v5 }
 0x83b   : > { %v3761_v0 = vld [vmem:[#allocation2] sm:$0xf]  ;;  %3779 = vrot.lane.b32.xlu0 %v3777_v17, %s9704_s2  ;;  %v3769_v48 = vmul.f32 %v3768_v10, %v7527_v18 }
 0x83c   : > { %v3786_v22 = vrot.slane %v3784_v47, 4  ;;  %v3725_v62 = vld [vmem:[#allocation2] sm:$0xf]  ;;  %v3243_v43 = vpop.permute.xlu1 %3242  ;;  %v3762_v13 = vmul.f32 %v3761_v0, %v7519_v12 }
 0x83d   : > { %v3753_v24 = vld [vmem:[#allocation2] sm:$0xf]  ;;  %v3726_v40 = vmul.f32 %v3725_v62, %v7525_v14  ;;  %v3245_v19 = vsel %vm9778_vm2, %v8261_v27, %v3243_v43  ;;  %v3393_v8 = vld [vmem:[#allocation4 + $0x38] sm:$0xff]  ;;  %v3771_v18 = vrot.slane %v3769_v48, 4  ;;  %v3676_v43 = vmul.f32 %v8357_v55, %v7530_v26 }
 0x83e   : > { %3787 = vrot.lane.b32.xlu1 %v3786_v22, %s9710_s29  ;;  %3249 = vst [vmem:[#allocation4 + $0x18] sm:$0xf] %v3245_v19  ;;  %3435 = vmatprep.subr.mxu0 %v3393_v8  ;;  %v3746_v32 = vld [vmem:[#allocation2] sm:$0xf]  ;;  %v3754_v46 = vmul.f32 %v3753_v24, %v7538_v30  ;;  %v3691_v22 = vmul.f32 %v3690_v23, %v7519_v12 }
 0x83f   : > { %v3728_v25 = vrot.slane %v3726_v40, 4  ;;  %3764 = vrot.lane.b32.xlu0 %v3762_v13, %s9745_s22  ;;  %3436 = vmatpush1.msra.mxu0 %v8277_v63  ;;  %v3738_v56 = vld [vmem:[#allocation2] sm:$0xf]  ;;  %v3747_v5 = vmul.f32 %v3746_v32, %v7530_v26  ;;  %v3684_v12 = vmul.f32 %v8359_v15, %v7538_v30  ;;  %v3669_v26 = vmul.f32 %v8355_v33, %v7553_v36 }
 0x840   : > { %v3222_v14 = vpop.permute.xlu1 %3221  ;;  %v3731_v17 = vld [vmem:[#allocation2] sm:$0xf]  ;;  %v3756_v63 = vrot.slane %v3754_v46, 4  ;;  %v3739_v47 = vmul.f32 %v3738_v56, %v7553_v36  ;;  %v3693_v62 = vrot.slane %v3691_v22, 4 }
 0x841   : > { %3730 = vst.msk [vmem:[#allocation4 + $0x40] sm:$0xf0] %vm9779_vm12, %v3728_v25  ;;  %v3224_v27 = vsel %vm9780_vm11, %v8283_v1, %v3222_v14  ;;  %v3391_v11 = vld [vmem:[#allocation4 + $0x28] sm:$0xff]  ;;  %v3732_v0 = vmul.f32 %v3731_v17, %v7551_v35  ;;  %vm9788_vm12 = vmmov %vm9762_vm1 }
 0x842   : > { %3772 = vrot.lane.b32.xlu1 %v3771_v18, %s9713_s30  ;;  %3228 = vst [vmem:[#allocation4 + $0x8] sm:$0xf0] %v3224_v27  ;;  %3437 = vmatprep.subr.mxu0 %v3391_v11  ;;  %v3741_v48 = vrot.slane %v3739_v47, 4  ;;  %v3385_v24 = vld [vmem:[%s9521_s14] sm:$0xf]  ;;  %vm9789_vm11 = vmmov %vm9762_vm1 }
 0x843   : > { %3749 = vrot.lane.b32.xlu0 %v3747_v5, %s9747_s18  ;;  %3438 = vmatpush1.msra.mxu0 %v8287_v49  ;;  %v3801_v30 = vld [vmem:[%s9528_s21] sm:$0xff] }
 0x844   : > { %v3702_v10 = vpop.permute.xlu1 %3701  ;;  %v3791_v47 = vld [vmem:[%s9527_s20] sm:$0xff] }
 0x845   : > { %3704 = vst.msk [vmem:[#allocation4 + $0x30] sm:$0xf] %vm9769_vm13, %v3702_v10  ;;  %v3389_v1 = vld [vmem:[#allocation4 + $0x18] sm:$0xff] }
 0x846   : > { %3757 = vrot.lane.b32.xlu1 %v3756_v63, %s9746_s23  ;;  %3439 = vmatprep.subr.mxu0 %v3389_v1  ;;  %v7203_v1 = vmov 1966171168  }
 0x847   : > { %3734 = vrot.lane.b32.xlu0 %v3732_v0, %s9720_s5  ;;  %3440 = vmatpush1.msra.mxu0 %v8291_v9  ;;  %v3678_v9 = vrot.slane %v3676_v43, 4  ;;  %v3884_v0 = vunpack.c.l.s4 %v7203_v1 }
 0x848   : > { %v3796_v27 = vld [vmem:[#allocation4 + $0x40] sm:$0xff] }
 0x849   : > { %v3387_v49 = vld [vmem:[#allocation4 + $0x8] sm:$0xff] }
 0x84a   : > { %3742 = vrot.lane.b32.xlu1 %v3741_v48, %s9707_s9  ;;  %3441 = vmatprep.subr.mxu0 %v3387_v49  ;;  %v3885_v48 = vunpack.c.0.s8 %v3884_v0 }
 0x84b   : > { %3694 = vrot.lane.b32.xlu0 %v3693_v62, %s9745_s22  ;;  %3442 = vmatpush1.msra.mxu0 %v8297_v6  ;;  %v3661_v6 = vmul.f32 %v8353_v54, %v7551_v35  ;;  %v9796_v62 = vld [vmem:[#allocation8_spill] sm:$0xff] }
 0x84c   : > { %7035 = vmatprep.subr.mxu0 %v9755_v3  ;;  %6786 = vmatmul.mubr.msk.f32.vlgmr.msra.gmra.mxu0 %vm9781_vm14, %v3385_v24  ;;  %vm9791_vm14 = vmmov %vm9762_vm1  ;;  %v3795_v5 = vld [vmem:[#allocation4 + $0x30] sm:$0xff]  ;;  %v3888_v43 = vsub.s32 %v3885_v48, %v9796_v62 }
 0x84d   : > { %7053 = vmatprep.mubr.msk.f32.mxu0 %vm9722_vm5, %v9755_v3  ;;  %v3663_v55 = vrot.slane %v3661_v6, 4  ;;  %vm9782_vm5 = vmmov %vm9769_vm13 }
 0x84e   : > { %3686 = vrot.lane.b32.xlu1 %v3684_v12, %s9746_s23  ;;  %vm9784_vm15 = vmmov %vm9782_vm5  ;;  %s6826_s23 = sshll.u32 %s9933_s17, 3 }
 0x84f   : > { %3679 = vrot.lane.b32.xlu0 %v3678_v9, %s9747_s18  ;;  %vm9785_vm3 = vmmov %vm9782_vm5 }
 0x850   : > { %vm9787_vm2 = vmmov %vm9785_vm3 }
 0x851   : > { %vm9790_vm13 = vmmov %vm9787_vm2 }
 0x852   : > { %3671 = vrot.lane.b32.xlu1 %v3669_v26, %s9707_s9 }
 0x853   : > { %3804 = vperm.xlu0 %7156, %v3801_v30  }
 0x856   : > { %3664 = vrot.lane.b32.xlu1 %v3663_v55, %s9720_s5 }
 0x8ad   : > { %v3780_v15 = vpop.permute.xlu0 %3779 }
 0x8ae   : > { %3782 = vst.msk [vmem:[#allocation4 + $0x80] sm:$0xf] %vm9782_vm5, %v3780_v15  ;;  %vm9792_vm5 = vmmov %vm9787_vm2 }
 0x8b0   : > { %v3788_v23 = vpop.permute.xlu1 %3787 }
 0x8b1   : > { %3790 = vst.msk [vmem:[#allocation4 + $0x80] sm:$0xf0] %vm9783_vm10, %v3788_v23  ;;  %v3765_v36 = vpop.permute.xlu0 %3764  ;;  %vm9793_vm10 = vmmov %vm9762_vm1 }
 0x8b2   : > { %3767 = vst.msk [vmem:[#allocation4 + $0x70] sm:$0xf] %vm9784_vm15, %v3765_v36  ;;  %vm3807_vm15 = vcmask 588800  }
 0x8b4   : > { %v3773_v35 = vpop.permute.xlu1 %3772 }
 0x8b5   : > { %3775 = vst.msk [vmem:[#allocation4 + $0x70] sm:$0xf0] %vm9762_vm1, %v3773_v35  ;;  %v3750_v54 = vpop.permute.xlu0 %3749  ;;  %vm3939_vm1 = vcmask 57344  }
 0x8b6   : > { %3752 = vst.msk [vmem:[#allocation4 + $0x60] sm:$0xf] %vm9785_vm3, %v3750_v54  ;;  %vm9798_vm3 = vcmask 64512  }
 0x8b8   : > { %v3758_v33 = vpop.permute.xlu1 %3757  ;;  %v3800_v40 = vld [vmem:[#allocation4 + $0x80] sm:$0xff] }
 0x8b9   : > { %3760 = vst.msk [vmem:[#allocation4 + $0x60] sm:$0xf0] %vm9786_vm4, %v3758_v33  ;;  %7036 = vmatpush3.msra.mxu0 %v3800_v40  ;;  %v3735_v19 = vpop.permute.xlu0 %3734  ;;  %v9797_v40 = vld [vmem:[#allocation9_spill] sm:$0xff]  ;;  %vm9799_vm4 = vmmov %vm9798_vm3 }
 0x8ba   : > { %7037 = vmatprep.subr.mxu0 %v9755_v3  ;;  %3737 = vst.msk [vmem:[#allocation4 + $0x50] sm:$0xf] %vm9787_vm2, %v3735_v19  ;;  %vm9800_vm2 = vmmov %vm9798_vm3 }
 0x8bc   : > { %v3743_v8 = vpop.permute.xlu1 %3742  ;;  %v3799_v13 = vld [vmem:[#allocation4 + $0x70] sm:$0xff] }
 0x8bd   : > { %3745 = vst.msk [vmem:[#allocation4 + $0x50] sm:$0xf0] %vm9788_vm12, %v3743_v8  ;;  %7038 = vmatpush3.msra.mxu0 %v3799_v13  ;;  %v3695_v32 = vpop.permute.xlu0 %3694  ;;  %vm9801_vm12 = vmmov %vm9800_vm2 }
 0x8be   : > { %7039 = vmatprep.subr.mxu0 %v9755_v3  ;;  %3697 = vst.msk [vmem:[#allocation4 + $0x20] sm:$0xf0] %vm9789_vm11, %v3695_v32  ;;  %vm9802_vm11 = vmmov %vm9800_vm2 }
 0x8c0   : > { %v3687_v25 = vpop.permute.xlu1 %3686  ;;  %v3798_v18 = vld [vmem:[#allocation4 + $0x60] sm:$0xff] }
 0x8c1   : > { %3689 = vst.msk [vmem:[#allocation4 + $0x20] sm:$0xf] %vm9790_vm13, %v3687_v25  ;;  %7040 = vmatpush3.msra.mxu0 %v3798_v18  ;;  %v3680_v46 = vpop.permute.xlu0 %3679  ;;  %vm9803_vm13 = vmmov %vm9800_vm2 }
 0x8c2   : > { %7041 = vmatprep.subr.mxu0 %v9755_v3  ;;  %3682 = vst.msk [vmem:[#allocation4 + $0x10] sm:$0xf0] %vm9791_vm14, %v3680_v46  ;;  %v4214_v46 = vld [vmem:[%s9672_s7] sm:$0xff]  ;;  %vm9804_vm14 = vmmov %vm9800_vm2 }
 0x8c3   : > { %7056 = vmatprep.subr.mxu1 %v4214_v46 }
 0x8c4   : > { %v3672_v14 = vpop.permute.xlu1 %3671  ;;  %v3797_v56 = vld [vmem:[#allocation4 + $0x50] sm:$0xff]  ;;  %7057 = vmatpush3.msra.mxu1 %v4214_v46 }
 0x8c5   : > { %3674 = vst.msk [vmem:[#allocation4 + $0x10] sm:$0xf] %vm9792_vm5, %v3672_v14  ;;  %7042 = vmatpush3.msra.mxu0 %v3797_v56  ;;  %vm9805_vm5 = vmmov %vm9800_vm2 }
 0x8c6   : > { %7043 = vmatprep.subr.mxu0 %v9755_v3 }
 0x8c7   : > { %7044 = vmatpush3.msra.mxu0 %v3796_v27 }
 0x8c8   : > { %7045 = vmatprep.subr.mxu0 %v9755_v3  ;;  %v3665_v11 = vpop.permute.xlu1 %3664  ;;  %v3794_v17 = vld [vmem:[#allocation4 + $0x20] sm:$0xff] }
 0x8c9   : > { %3667 = vst.msk [vmem:[#allocation4] sm:$0xf0] %vm9793_vm10, %v3665_v11  ;;  %7046 = vmatpush3.msra.mxu0 %v3795_v5  ;;  %vm9806_vm10 = vmmov %vm9800_vm2 }
 0x8ca   : > { %7047 = vmatprep.subr.mxu0 %v9755_v3 }
 0x8cb   : > { %7048 = vmatpush3.msra.mxu0 %v3794_v17 }
 0x8cc   : > { %7049 = vmatprep.subr.mxu0 %v9755_v3  ;;  %v3793_v63 = vld [vmem:[#allocation4 + $0x10] sm:$0xff] }
 0x8cd   : > { %7050 = vmatpush3.msra.mxu0 %v3793_v63 }
 0x8ce   : > { %7051 = vmatprep.subr.mxu0 %v9755_v3  ;;  %v3805_v24 = vpop.permute.xlu0 %3804 }
 0x8d0   : > { %v3792_v10 = vld [vmem:[#allocation4] sm:$0xff] }
 0x8d1   : > { %7052 = vmatpush3.msra.mxu0 %v3792_v10 }
 0x8d2   : > { %7054 = vmatmul.mubr.msk.f32.vlgmr.msra.gmra.mxu0 %vm3807_vm15, %v3791_v47 }
 0x90c   : > { %v8442_v22 = vpop.f32.mrf.mxu0 }
 0x90d   : > { %9794 = vst [vmem:[#allocation11_spill] sm:$0xff] %v8442_v22 }
 0x90e   : > { %v8444_v49 = vpop.f32.mrf.mxu0 }
 0x90f   : > { %9795 = vst [vmem:[#allocation14_spill] sm:$0xff] %v8444_v49 }
 0x992   : > { %v3877_v12 = vpop.f32.mrf.mxu0 }
 0x993   : > { %v3878_v9 = vadd.f32 %v3877_v12, %v3805_v24 }
 0x994   : > { %v7055_v26 = vpop.f32.mrf.mxu0 }
 0x995   : > { %v3882_v6 = vcombine.high %v3878_v9, %v3878_v9  ;;  %v3889_v30 = vrot.slane %v3878_v9, %v3888_v43 }
 0x997   : > { %v3896_v55 = vrot.slane %v3882_v6, %v3888_v43  ;;  %v3897_v15 = vcombine.high %v3889_v30, %v3889_v30  ;;  %v3905_v23 = vrot.slane %v3889_v30, %v3888_v43 }
 0x999   : > { %v3898_v36 = vcombine.high %v3896_v55, %v3896_v55  ;;  %v3912_v35 = vrot.slane %v3896_v55, %v3888_v43  ;;  %v3919_v54 = vrot.slane %v3897_v15, %v3888_v43  ;;  %v3927_v33 = vcombine.high %v3905_v23, %v3905_v23  ;;  %3940 = vst.msk [vmem:[#allocation5] sm:$0x1] %vm3939_vm1, %v3905_v23 }
 0x99a   : > { %v3951_v19 = vrot.slane %v3905_v23, %v9797_v40 }
 0x99b   : > { %v3926_v8 = vrot.slane %v3898_v36, %v3888_v43  ;;  %v8449_v13 = vcombine.high %v3912_v35, %v3912_v35  ;;  %v3929_v32 = vcombine.high %v3919_v54, %v3919_v54  ;;  %3941 = vst.msk [vmem:[#allocation5 + $0x8] sm:$0x1] %vm3939_vm1, %v3919_v54  ;;  %3942 = vst.msk [vmem:[#allocation5 + $0x10] sm:$0x1] %vm3939_vm1, %v3927_v33 }
 0x99c   : > { %3944 = vst.msk [vmem:[#allocation5 + $0x20] sm:$0x1] %vm3939_vm1, %v3912_v35  ;;  %4012 = vrot.lane.b32.xlu0 %v3951_v19, %s9713_s30  ;;  %3980 = vrot.lane.b32.xlu1 %v3951_v19, %s9747_s18  ;;  %v3955_v18 = vrot.slane %v3919_v54, %v9797_v40  ;;  %v3959_v14 = vrot.slane %v3927_v33, %v9797_v40 }
 0x99d   : > { %v8456_v25 = vcombine.high %v3926_v8, %v3926_v8  ;;  %3943 = vst.msk [vmem:[#allocation5 + $0x18] sm:$0x1] %vm3939_vm1, %v3929_v32  ;;  %3945 = vst.msk [vmem:[#allocation5 + $0x28] sm:$0x1] %vm3939_vm1, %v3926_v8  ;;  %v3967_v56 = vrot.slane %v3912_v35, %v9797_v40  ;;  %v3963_v27 = vrot.slane %v3929_v32, %v9797_v40 }
 0x99e   : > { %3946 = vst.msk [vmem:[#allocation5 + $0x30] sm:$0x1] %vm3939_vm1, %v8449_v13  ;;  %v3971_v11 = vrot.slane %v3926_v8, %v9797_v40  ;;  %v3975_v5 = vrot.slane %v8449_v13, %v9797_v40 }
 0x99f   : > { %3947 = vst.msk [vmem:[#allocation5 + $0x38] sm:$0x1] %vm3939_vm1, %v8456_v25  ;;  %v3979_v17 = vrot.slane %v8456_v25, %v9797_v40 }
 0x9a0   : > { %4076 = vrot.lane.b32.xlu0 %v3951_v19, %s9744_s12  ;;  %4044 = vrot.lane.b32.xlu1 %v3951_v19, %s7204_s13 }
 0x9a4   : > { %4140 = vrot.lane.b32.xlu0 %v3951_v19, %s7205_s15  ;;  %4108 = vrot.lane.b32.xlu1 %v3951_v19, %s7206_s19 }
 0x9a8   : > { %4172 = vrot.lane.b32.xlu1 %v3951_v19, %s7207_s27  ;;  %3982 = vrot.lane.b32.xlu0 %v3955_v18, %s9747_s18 }
 0x9ac   : > { %4014 = vrot.lane.b32.xlu1 %v3955_v18, %s9713_s30  ;;  %4046 = vrot.lane.b32.xlu0 %v3955_v18, %s7204_s13 }
 0x9b0   : > { %4078 = vrot.lane.b32.xlu1 %v3955_v18, %s9744_s12  ;;  %4110 = vrot.lane.b32.xlu0 %v3955_v18, %s7206_s19 }
 0x9b4   : > { %4142 = vrot.lane.b32.xlu1 %v3955_v18, %s7205_s15  ;;  %4174 = vrot.lane.b32.xlu0 %v3955_v18, %s7207_s27 }
 0x9b8   : > { %3984 = vrot.lane.b32.xlu1 %v3959_v14, %s9747_s18  ;;  %4016 = vrot.lane.b32.xlu0 %v3959_v14, %s9713_s30 }
 0x9bc   : > { %4048 = vrot.lane.b32.xlu1 %v3959_v14, %s7204_s13  ;;  %4080 = vrot.lane.b32.xlu0 %v3959_v14, %s9744_s12 }
 0x9c0   : > { %4112 = vrot.lane.b32.xlu1 %v3959_v14, %s7206_s19  ;;  %4144 = vrot.lane.b32.xlu0 %v3959_v14, %s7205_s15 }
 0x9c4   : > { %4176 = vrot.lane.b32.xlu1 %v3959_v14, %s7207_s27  ;;  %4020 = vrot.lane.b32.xlu0 %v3967_v56, %s9713_s30 }
 0x9c8   : > { %4084 = vrot.lane.b32.xlu0 %v3967_v56, %s9744_s12  ;;  %3988 = vrot.lane.b32.xlu1 %v3967_v56, %s9747_s18 }
 0x9cc   : > { %4148 = vrot.lane.b32.xlu0 %v3967_v56, %s7205_s15  ;;  %4052 = vrot.lane.b32.xlu1 %v3967_v56, %s7204_s13 }
 0x9d0   : > { %3986 = vrot.lane.b32.xlu0 %v3963_v27, %s9747_s18  ;;  %4116 = vrot.lane.b32.xlu1 %v3967_v56, %s7206_s19 }
 0x9d4   : > { %4050 = vrot.lane.b32.xlu0 %v3963_v27, %s7204_s13  ;;  %4180 = vrot.lane.b32.xlu1 %v3967_v56, %s7207_s27 }
 0x9d8   : > { %4114 = vrot.lane.b32.xlu0 %v3963_v27, %s7206_s19  ;;  %4018 = vrot.lane.b32.xlu1 %v3963_v27, %s9713_s30 }
 0x9dc   : > { %4178 = vrot.lane.b32.xlu0 %v3963_v27, %s7207_s27  ;;  %4082 = vrot.lane.b32.xlu1 %v3963_v27, %s9744_s12 }
 0x9e0   : > { %4146 = vrot.lane.b32.xlu1 %v3963_v27, %s7205_s15  ;;  %3990 = vrot.lane.b32.xlu0 %v3971_v11, %s9747_s18 }
 0x9e4   : > { %4022 = vrot.lane.b32.xlu1 %v3971_v11, %s9713_s30  ;;  %4054 = vrot.lane.b32.xlu0 %v3971_v11, %s7204_s13 }
 0x9e8   : > { %4086 = vrot.lane.b32.xlu1 %v3971_v11, %s9744_s12  ;;  %4118 = vrot.lane.b32.xlu0 %v3971_v11, %s7206_s19 }
 0x9ec   : > { %4150 = vrot.lane.b32.xlu1 %v3971_v11, %s7205_s15  ;;  %4182 = vrot.lane.b32.xlu0 %v3971_v11, %s7207_s27 }
 0x9f0   : > { %3992 = vrot.lane.b32.xlu1 %v3975_v5, %s9747_s18  ;;  %4024 = vrot.lane.b32.xlu0 %v3975_v5, %s9713_s30 }
 0x9f4   : > { %4056 = vrot.lane.b32.xlu1 %v3975_v5, %s7204_s13  ;;  %4088 = vrot.lane.b32.xlu0 %v3975_v5, %s9744_s12 }
 0x9f8   : > { %4120 = vrot.lane.b32.xlu1 %v3975_v5, %s7206_s19  ;;  %4152 = vrot.lane.b32.xlu0 %v3975_v5, %s7205_s15 }
 0x9fc   : > { %4184 = vrot.lane.b32.xlu1 %v3975_v5, %s7207_s27  ;;  %3994 = vrot.lane.b32.xlu0 %v3979_v17, %s9747_s18  ;;  %s9971_s18 = sld [smem:[#allocation43_spill]] }
 0xa00   : > { %4026 = vrot.lane.b32.xlu1 %v3979_v17, %s9713_s30  ;;  %4058 = vrot.lane.b32.xlu0 %v3979_v17, %s7204_s13  ;;  %s9952_s13 = sld [smem:[#allocation44_spill]] }
 0xa04   : > { %4090 = vrot.lane.b32.xlu1 %v3979_v17, %s9744_s12  ;;  %4122 = vrot.lane.b32.xlu0 %v3979_v17, %s7206_s19 }
 0xa08   : > { %4154 = vrot.lane.b32.xlu1 %v3979_v17, %s7205_s15  ;;  %4186 = vrot.lane.b32.xlu0 %v3979_v17, %s7207_s27  ;;  %s9921_s15 = sld [smem:[#allocation38_spill]] }
 0xa0e   : > { %v4013_v63 = vpop.permute.xlu0 %4012  ;;  %v3981_v47 = vpop.permute.xlu1 %3980 }
 0xa0f   : > { %4036 = vst.msk [vmem:[#allocation5 + $0x2] sm:$0x1] %vm3939_vm1, %v4013_v63  ;;  %4004 = vst.msk [vmem:[#allocation5 + $0x1] sm:$0x1] %vm3939_vm1, %v3981_v47 }
 0xa12   : > { %v4077_v10 = vpop.permute.xlu0 %4076  ;;  %v4045_v1 = vpop.permute.xlu1 %4044 }
 0xa13   : > { %4100 = vst.msk [vmem:[#allocation5 + $0x4] sm:$0x1] %vm3939_vm1, %v4077_v10  ;;  %4068 = vst.msk [vmem:[#allocation5 + $0x3] sm:$0x1] %vm3939_vm1, %v4045_v1 }
 0xa16   : > { %v4141_v0 = vpop.permute.xlu0 %4140  ;;  %v4109_v48 = vpop.permute.xlu1 %4108 }
 0xa17   : > { %4164 = vst.msk [vmem:[#allocation5 + $0x6] sm:$0x1] %vm3939_vm1, %v4141_v0  ;;  %4132 = vst.msk [vmem:[#allocation5 + $0x5] sm:$0x1] %vm3939_vm1, %v4109_v48 }
 0xa1a   : > { %v4173_v62 = vpop.permute.xlu1 %4172  ;;  %v3983_v43 = vpop.permute.xlu0 %3982 }
 0xa1b   : > { %4196 = vst.msk [vmem:[#allocation5 + $0x7] sm:$0x1] %vm3939_vm1, %v4173_v62  ;;  %4005 = vst.msk [vmem:[#allocation5 + $0x9] sm:$0x1] %vm3939_vm1, %v3983_v43 }
 0xa1e   : > { %v4015_v24 = vpop.permute.xlu1 %4014  ;;  %v4047_v12 = vpop.permute.xlu0 %4046 }
 0xa1f   : > { %4037 = vst.msk [vmem:[#allocation5 + $0xa] sm:$0x1] %vm3939_vm1, %v4015_v24  ;;  %4069 = vst.msk [vmem:[#allocation5 + $0xb] sm:$0x1] %vm3939_vm1, %v4047_v12 }
 0xa22   : > { %v4079_v9 = vpop.permute.xlu1 %4078  ;;  %v4111_v26 = vpop.permute.xlu0 %4110  ;;  %v4204_v6 = vld [vmem:[#allocation5] sm:$0xff] }
 0xa23   : > { %4101 = vst.msk [vmem:[#allocation5 + $0xc] sm:$0x1] %vm3939_vm1, %v4079_v9  ;;  %4133 = vst.msk [vmem:[#allocation5 + $0xd] sm:$0x1] %vm3939_vm1, %v4111_v26  ;;  %7058 = vmatprep.mubr.msk.f32.mxu1 %vm9798_vm3, %v4204_v6 }
 0xa24   : > { %vm9807_vm3 = vmmov %vm9800_vm2 }
 0xa26   : > { %v4143_v30 = vpop.permute.xlu1 %4142  ;;  %v4175_v55 = vpop.permute.xlu0 %4174 }
 0xa27   : > { %4165 = vst.msk [vmem:[#allocation5 + $0xe] sm:$0x1] %vm3939_vm1, %v4143_v30  ;;  %4197 = vst.msk [vmem:[#allocation5 + $0xf] sm:$0x1] %vm3939_vm1, %v4175_v55 }
 0xa2a   : > { %v3985_v15 = vpop.permute.xlu1 %3984  ;;  %v4017_v23 = vpop.permute.xlu0 %4016 }
 0xa2b   : > { %4006 = vst.msk [vmem:[#allocation5 + $0x11] sm:$0x1] %vm3939_vm1, %v3985_v15  ;;  %4038 = vst.msk [vmem:[#allocation5 + $0x12] sm:$0x1] %vm3939_vm1, %v4017_v23 }
 0xa2e   : > { %v4049_v36 = vpop.permute.xlu1 %4048  ;;  %v4081_v35 = vpop.permute.xlu0 %4080  ;;  %v4205_v54 = vld [vmem:[#allocation5 + $0x8] sm:$0xff] }
 0xa2f   : > { %4070 = vst.msk [vmem:[#allocation5 + $0x13] sm:$0x1] %vm3939_vm1, %v4049_v36  ;;  %4102 = vst.msk [vmem:[#allocation5 + $0x14] sm:$0x1] %vm3939_vm1, %v4081_v35  ;;  %7059 = vmatmul.mubr.msk.f32.vlgmr.msra.gmra.mxu1 %vm9799_vm4, %v4205_v54 }
 0xa32   : > { %v4113_v33 = vpop.permute.xlu1 %4112  ;;  %v4145_v40 = vpop.permute.xlu0 %4144 }
 0xa33   : > { %4134 = vst.msk [vmem:[#allocation5 + $0x15] sm:$0x1] %vm3939_vm1, %v4113_v33  ;;  %4166 = vst.msk [vmem:[#allocation5 + $0x16] sm:$0x1] %vm3939_vm1, %v4145_v40 }
 0xa36   : > { %v4177_v19 = vpop.permute.xlu1 %4176  ;;  %v4021_v8 = vpop.permute.xlu0 %4020 }
 0xa37   : > { %4198 = vst.msk [vmem:[#allocation5 + $0x17] sm:$0x1] %vm3939_vm1, %v4177_v19  ;;  %4040 = vst.msk [vmem:[#allocation5 + $0x22] sm:$0x1] %vm3939_vm1, %v4021_v8 }
 0xa3a   : > { %v4085_v13 = vpop.permute.xlu0 %4084  ;;  %v3989_v32 = vpop.permute.xlu1 %3988 }
 0xa3b   : > { %4104 = vst.msk [vmem:[#allocation5 + $0x24] sm:$0x1] %vm3939_vm1, %v4085_v13  ;;  %4008 = vst.msk [vmem:[#allocation5 + $0x21] sm:$0x1] %vm3939_vm1, %v3989_v32 }
 0xa3e   : > { %v4149_v25 = vpop.permute.xlu0 %4148  ;;  %v4053_v18 = vpop.permute.xlu1 %4052  ;;  %v4206_v46 = vld [vmem:[#allocation5 + $0x10] sm:$0xff] }
 0xa3f   : > { %4168 = vst.msk [vmem:[#allocation5 + $0x26] sm:$0x1] %vm3939_vm1, %v4149_v25  ;;  %4072 = vst.msk [vmem:[#allocation5 + $0x23] sm:$0x1] %vm3939_vm1, %v4053_v18  ;;  %7061 = vmatprep.mubr.msk.f32.mxu1 %vm9800_vm2, %v4206_v46 }
 0xa42   : > { %v3987_v14 = vpop.permute.xlu0 %3986  ;;  %v4117_v56 = vpop.permute.xlu1 %4116 }
 0xa43   : > { %4007 = vst.msk [vmem:[#allocation5 + $0x19] sm:$0x1] %vm3939_vm1, %v3987_v14  ;;  %4136 = vst.msk [vmem:[#allocation5 + $0x25] sm:$0x1] %vm3939_vm1, %v4117_v56  ;;  %v4212_v14 = vld [vmem:[%s9675_s10] sm:$0xff] }
 0xa44   : > { %7077 = vmatprep.mubr.msk.f32.mxu0 %vm9806_vm10, %v4212_v14 }
 0xa46   : > { %v4051_v27 = vpop.permute.xlu0 %4050  ;;  %v4181_v11 = vpop.permute.xlu1 %4180 }
 0xa47   : > { %4071 = vst.msk [vmem:[#allocation5 + $0x1b] sm:$0x1] %vm3939_vm1, %v4051_v27  ;;  %4200 = vst.msk [vmem:[#allocation5 + $0x27] sm:$0x1] %vm3939_vm1, %v4181_v11  ;;  %v4213_v27 = vld [vmem:[%s9675_s10 + $0x8] sm:$0xff] }
 0xa4a   : > { %v4115_v5 = vpop.permute.xlu0 %4114  ;;  %v4019_v17 = vpop.permute.xlu1 %4018 }
 0xa4b   : > { %4135 = vst.msk [vmem:[#allocation5 + $0x1d] sm:$0x1] %vm3939_vm1, %v4115_v5  ;;  %4039 = vst.msk [vmem:[#allocation5 + $0x1a] sm:$0x1] %vm3939_vm1, %v4019_v17 }
 0xa4e   : > { %v4179_v63 = vpop.permute.xlu0 %4178  ;;  %v4083_v47 = vpop.permute.xlu1 %4082  ;;  %v4208_v12 = vld [vmem:[#allocation5 + $0x20] sm:$0xff] }
 0xa4f   : > { %4199 = vst.msk [vmem:[#allocation5 + $0x1f] sm:$0x1] %vm3939_vm1, %v4179_v63  ;;  %4103 = vst.msk [vmem:[#allocation5 + $0x1c] sm:$0x1] %vm3939_vm1, %v4083_v47 }
 0xa52   : > { %v4147_v10 = vpop.permute.xlu1 %4146  ;;  %v3991_v1 = vpop.permute.xlu0 %3990 }
 0xa53   : > { %4167 = vst.msk [vmem:[#allocation5 + $0x1e] sm:$0x1] %vm3939_vm1, %v4147_v10  ;;  %4009 = vst.msk [vmem:[#allocation5 + $0x29] sm:$0x1] %vm3939_vm1, %v3991_v1 }
 0xa56   : > { %v4023_v0 = vpop.permute.xlu1 %4022  ;;  %v4055_v48 = vpop.permute.xlu0 %4054 }
 0xa57   : > { %4041 = vst.msk [vmem:[#allocation5 + $0x2a] sm:$0x1] %vm3939_vm1, %v4023_v0  ;;  %4073 = vst.msk [vmem:[#allocation5 + $0x2b] sm:$0x1] %vm3939_vm1, %v4055_v48 }
 0xa5a   : > { %v4087_v62 = vpop.permute.xlu1 %4086  ;;  %v4119_v43 = vpop.permute.xlu0 %4118  ;;  %v4207_v24 = vld [vmem:[#allocation5 + $0x18] sm:$0xff] }
 0xa5b   : > { %4105 = vst.msk [vmem:[#allocation5 + $0x2c] sm:$0x1] %vm3939_vm1, %v4087_v62  ;;  %4137 = vst.msk [vmem:[#allocation5 + $0x2d] sm:$0x1] %vm3939_vm1, %v4119_v43  ;;  %7062 = vmatmul.mubr.msk.f32.gmra.mxu1 %vm9801_vm12, %v4207_v24 }
 0xa5c   : > { %7064 = vmatprep.mubr.msk.f32.mxu1 %vm9802_vm11, %v4208_v12 }
 0xa5e   : > { %v4151_v9 = vpop.permute.xlu1 %4150  ;;  %v4183_v26 = vpop.permute.xlu0 %4182 }
 0xa5f   : > { %4169 = vst.msk [vmem:[#allocation5 + $0x2e] sm:$0x1] %vm3939_vm1, %v4151_v9  ;;  %4201 = vst.msk [vmem:[#allocation5 + $0x2f] sm:$0x1] %vm3939_vm1, %v4183_v26 }
 0xa62   : > { %v3993_v6 = vpop.permute.xlu1 %3992  ;;  %v4025_v30 = vpop.permute.xlu0 %4024 }
 0xa63   : > { %4010 = vst.msk [vmem:[#allocation5 + $0x31] sm:$0x1] %vm3939_vm1, %v3993_v6  ;;  %4042 = vst.msk [vmem:[#allocation5 + $0x32] sm:$0x1] %vm3939_vm1, %v4025_v30 }
 0xa66   : > { %v4057_v55 = vpop.permute.xlu1 %4056  ;;  %v4089_v15 = vpop.permute.xlu0 %4088  ;;  %v4209_v23 = vld [vmem:[#allocation5 + $0x28] sm:$0xff] }
 0xa67   : > { %4074 = vst.msk [vmem:[#allocation5 + $0x33] sm:$0x1] %vm3939_vm1, %v4057_v55  ;;  %4106 = vst.msk [vmem:[#allocation5 + $0x34] sm:$0x1] %vm3939_vm1, %v4089_v15  ;;  %7065 = vmatmul.mubr.msk.f32.gmra.mxu1 %vm9803_vm13, %v4209_v23 }
 0xa6a   : > { %v4121_v36 = vpop.permute.xlu1 %4120  ;;  %v4153_v35 = vpop.permute.xlu0 %4152 }
 0xa6b   : > { %4138 = vst.msk [vmem:[#allocation5 + $0x35] sm:$0x1] %vm3939_vm1, %v4121_v36  ;;  %4170 = vst.msk [vmem:[#allocation5 + $0x36] sm:$0x1] %vm3939_vm1, %v4153_v35 }
 0xa6e   : > { %v4185_v54 = vpop.permute.xlu1 %4184  ;;  %v3995_v33 = vpop.permute.xlu0 %3994 }
 0xa6f   : > { %4202 = vst.msk [vmem:[#allocation5 + $0x37] sm:$0x1] %vm3939_vm1, %v4185_v54  ;;  %4011 = vst.msk [vmem:[#allocation5 + $0x39] sm:$0x1] %vm3939_vm1, %v3995_v33 }
 0xa72   : > { %v4027_v40 = vpop.permute.xlu1 %4026  ;;  %v4059_v19 = vpop.permute.xlu0 %4058 }
 0xa73   : > { %4043 = vst.msk [vmem:[#allocation5 + $0x3a] sm:$0x1] %vm3939_vm1, %v4027_v40  ;;  %4075 = vst.msk [vmem:[#allocation5 + $0x3b] sm:$0x1] %vm3939_vm1, %v4059_v19 }
 0xa76   : > { %v4091_v8 = vpop.permute.xlu1 %4090  ;;  %v4123_v13 = vpop.permute.xlu0 %4122  ;;  %v4210_v32 = vld [vmem:[#allocation5 + $0x30] sm:$0xff] }
 0xa77   : > { %4107 = vst.msk [vmem:[#allocation5 + $0x3c] sm:$0x1] %vm3939_vm1, %v4091_v8  ;;  %4139 = vst.msk [vmem:[#allocation5 + $0x3d] sm:$0x1] %vm3939_vm1, %v4123_v13  ;;  %7067 = vmatprep.mubr.msk.f32.mxu1 %vm9804_vm14, %v4210_v32 }
 0xa7a   : > { %v4155_v25 = vpop.permute.xlu1 %4154  ;;  %v4187_v18 = vpop.permute.xlu0 %4186 }
 0xa7b   : > { %4171 = vst.msk [vmem:[#allocation5 + $0x3e] sm:$0x1] %vm3939_vm1, %v4155_v25  ;;  %4203 = vst.msk [vmem:[#allocation5 + $0x3f] sm:$0x1] %vm3939_vm1, %v4187_v18 }
 0xa7c   : > { %vm9808_vm1 = vmmov %vm9800_vm2 }
 0xa7d   : > { %vm9809_vm4 = vmmov %vm9808_vm1 }
 0xa7e   : > { %vm9810_vm2 = vmmov %vm9808_vm1 }
 0xa7f   : > { %vm9811_vm12 = vmmov %vm9808_vm1 }
 0xa80   : > { %vm9812_vm11 = vmmov %vm9808_vm1 }
 0xa81   : > { %vm9813_vm13 = vmmov %vm9808_vm1 }
 0xa82   : > { %v4211_v46 = vld [vmem:[#allocation5 + $0x38] sm:$0xff]  ;;  %vm9814_vm14 = vmmov %vm9808_vm1 }
 0xa83   : > { %7068 = vmatmul.mubr.msk.f32.gmra.mxu1 %vm9805_vm5, %v4211_v46  ;;  %vm9815_vm5 = vmmov %vm9808_vm1 }
 0xa84   : > { %7072 = vmatprep.mubr.msk.f32.mxu1 %vm9807_vm3, %v4212_v14  ;;  %vm9816_vm10 = vmmov %vm9808_vm1 }
 0xa85   : > { %vm9817_vm3 = vmmov %vm9808_vm1 }
 0xaef   : > { %v7060_v56 = vpop.f32.mrf.mxu1 }
 0xaf0   : > { %7075 = vmatprep.subr.mxu0 %v7060_v56 }
 0xaf1   : > { %v4305_v11 = vpop.f32.mrf.mxu1  ;;  %7076 = vmatpush3.msra.mxu0 %v7060_v56 }
 0xaf2   : > { %7070 = vmatprep.subr.mxu1 %v4305_v11  ;;  %7078 = vmatmul.mubr.msk.f32.vlgmr.msra.gmra.mxu0 %vm9808_vm1, %v4213_v27 }
 0xaf3   : > { %7071 = vmatpush3.msra.mxu1 %v4305_v11  ;;  %7087 = vmatprep.mubr.msk.f32.mxu0 %vm9809_vm4, %v4212_v14  ;;  %vm9818_vm4 = vmmov %vm9808_vm1 }
 0xaf4   : > { %7073 = vmatmul.mubr.msk.f32.vlgmr.msra.gmra.mxu1 %vm9810_vm2, %v4213_v27  ;;  %vm9819_vm2 = vmmov %vm9808_vm1 }
 0xaf5   : > { %7082 = vmatprep.mubr.msk.f32.mxu1 %vm9811_vm12, %v4212_v14  ;;  %vm9820_vm12 = vmmov %vm9808_vm1 }
 0xb1b   : > { %v7063_v5 = vpop.f32.mrf.mxu1 }
 0xb1c   : > { %7085 = vmatprep.subr.mxu0 %v7063_v5 }
 0xb1d   : > { %v4315_v17 = vpop.f32.mrf.mxu1  ;;  %7086 = vmatpush3.msra.mxu0 %v7063_v5 }
 0xb1e   : > { %7080 = vmatprep.subr.mxu1 %v4315_v17  ;;  %7088 = vmatmul.mubr.msk.f32.vlgmr.msra.gmra.mxu0 %vm9812_vm11, %v4213_v27 }
 0xb1f   : > { %7081 = vmatpush3.msra.mxu1 %v4315_v17  ;;  %7097 = vmatprep.mubr.msk.f32.mxu0 %vm9813_vm13, %v4212_v14 }
 0xb20   : > { %7083 = vmatmul.mubr.msk.f32.vlgmr.msra.gmra.mxu1 %vm9814_vm14, %v4213_v27 }
 0xb21   : > { %7092 = vmatprep.mubr.msk.f32.mxu1 %vm9815_vm5, %v4212_v14 }
 0xb27   : > { %v7066_v63 = vpop.f32.mrf.mxu1 }
 0xb28   : > { %7095 = vmatprep.subr.mxu0 %v7066_v63 }
 0xb29   : > { %v4325_v47 = vpop.f32.mrf.mxu1  ;;  %7096 = vmatpush3.msra.mxu0 %v7066_v63 }
 0xb2a   : > { %7090 = vmatprep.subr.mxu1 %v4325_v47  ;;  %7098 = vmatmul.mubr.msk.f32.vlgmr.msra.gmra.mxu0 %vm9816_vm10, %v4213_v27 }
 0xb2b   : > { %7091 = vmatpush3.msra.mxu1 %v4325_v47  ;;  %7107 = vmatprep.mubr.msk.f32.mxu0 %vm9817_vm3, %v4212_v14 }
 0xb2c   : > { %7093 = vmatmul.mubr.msk.f32.vlgmr.msra.gmra.mxu1 %vm9808_vm1, %v4213_v27 }
 0xb2d   : > { %7102 = vmatprep.mubr.msk.f32.mxu1 %vm9818_vm4, %v4212_v14 }
 0xb43   : > { %v7069_v10 = vpop.f32.mrf.mxu1 }
 0xb44   : > { %7105 = vmatprep.subr.mxu0 %v7069_v10 }
 0xb45   : > { %v4335_v1 = vpop.f32.mrf.mxu1  ;;  %7106 = vmatpush3.msra.mxu0 %v7069_v10 }
 0xb46   : > { %7100 = vmatprep.subr.mxu1 %v4335_v1  ;;  %7108 = vmatmul.mubr.msk.f32.vlgmr.msra.gmra.mxu0 %vm9819_vm2, %v4213_v27 }
 0xb47   : > { %7101 = vmatpush3.msra.mxu1 %v4335_v1  ;;  %6093 = vmatprep.mubr.f32.mxu0 %v9755_v3 }
 0xb48   : > { %7103 = vmatmul.mubr.msk.f32.vlgmr.msra.gmra.mxu1 %vm9820_vm12, %v4213_v27  ;;  %vm9831_vm12 = vcmask 1044484  }
 0xb49   : > { %5530 = vmatprep.mubr.f32.mxu1 %v9755_v3 }
 0xbb2   : > { %v7079_v48 = vpop.f32.mrf.mxu0 }
 0xbb3   : > { %v5119_v62 = vrot.slane %v7079_v48, 7  ;;  %v5156_v43 = vrot.slane %v7079_v48, 1  ;;  %v5174_v24 = vrot.slane %v7079_v48, 2  ;;  %v5192_v12 = vrot.slane %v7079_v48, 3 }
 0xbb4   : > { %v7074_v0 = vpop.f32.mrf.mxu1  ;;  %v5210_v9 = vrot.slane %v7079_v48, 4  ;;  %v5228_v30 = vrot.slane %v7079_v48, 5  ;;  %v5247_v55 = vrot.slane %v7079_v48, 6  ;;  %v4491_v33 = vpop.f32.mrf.mxu0 }
 0xbb5   : > { %v5137_v26 = vrot.slane %v7074_v0, 1  ;;  %v5155_v6 = vrot.slane %v7074_v0, 2  ;;  %v5173_v15 = vrot.slane %v7074_v0, 3  ;;  %v5191_v23 = vrot.slane %v7074_v0, 4 }
 0xbb6   : > { %v5209_v36 = vrot.slane %v7074_v0, 5  ;;  %v5227_v35 = vrot.slane %v7074_v0, 6  ;;  %v4416_v54 = vpop.f32.mrf.mxu1  ;;  %v4958_v8 = vrot.slane %v4491_v33, 7  ;;  %v5073_v13 = vrot.slane %v4491_v33, 5 }
 0xbb7   : > { %v4977_v40 = vrot.slane %v4416_v54, 1  ;;  %v5072_v19 = vrot.slane %v4416_v54, 6  ;;  %v4996_v32 = vrot.slane %v4416_v54, 2  ;;  %v5092_v25 = vrot.slane %v4416_v54, 7 }
 0xbb8   : > { %v4997_v18 = vrot.slane %v4491_v33, 1  ;;  %v5093_v46 = vrot.slane %v4491_v33, 6  ;;  %v5015_v14 = vrot.slane %v4416_v54, 3  ;;  %v5034_v56 = vrot.slane %v4416_v54, 4 }
 0xbb9   : > { %v5016_v27 = vrot.slane %v4491_v33, 2  ;;  %v5035_v11 = vrot.slane %v4491_v33, 3  ;;  %v5246_v5 = vrot.slane %v7074_v0, 7  ;;  %v5053_v17 = vrot.slane %v4416_v54, 5 }
 0xbba   : > { %v5054_v63 = vrot.slane %v4491_v33, 4  ;;  %v5229_v47 = vsel %vm1267_vm7, %v5228_v30, %v5227_v35  ;;  %v5074_v1 = vsel %vm1267_vm7, %v5073_v13, %v5072_v19  ;;  %v5120_v49 = vsel %vm1267_vm7, %v5119_v62, %v7074_v0 }
 0xbbb   : > { %v4959_v22 = vsel %vm1267_vm7, %v4958_v8, %v4416_v54  ;;  %v5138_v3 = vsel %vm1267_vm7, %v7079_v48, %v5137_v26  ;;  %v5094_v39 = vsel %vm1267_vm7, %v5093_v46, %v5092_v25  ;;  %v4978_v21 = vsel %vm1267_vm7, %v4491_v33, %v4977_v40 }
 0xbbc   : > { %v5157_v59 = vsel %vm1267_vm7, %v5156_v43, %v5155_v6  ;;  %v4998_v4 = vsel %vm1267_vm7, %v4997_v18, %v4996_v32  ;;  %v5175_v30 = vsel %vm1267_vm7, %v5174_v24, %v5173_v15  ;;  %v5017_v35 = vsel %vm1267_vm7, %v5016_v27, %v5015_v14 }
 0xbbd   : > { %v5193_v0 = vsel %vm1267_vm7, %v5192_v12, %v5191_v23  ;;  %v8635_v62 = vsel %vm1267_vm7, %v5035_v11, %v5034_v56  ;;  %v8639_v26 = vsel %vm1267_vm7, %v5210_v9, %v5209_v36  ;;  %v8642_v43 = vsel %vm1267_vm7, %v5247_v55, %v5246_v5 }
 0xbbe   : > { %v8645_v6 = vsel %vm1267_vm7, %v5054_v63, %v5053_v17  ;;  %vm9821_vm7 = vcmask 1043459  }
 0xbbf   : > { %vm9822_vm11 = vmmov %vm9821_vm7 }
 0xbc0   : > { %vm9823_vm13 = vmmov %vm9821_vm7 }
 0xbc1   : > { %vm9824_vm14 = vmmov %vm9821_vm7 }
 0xbc2   : > { %vm9825_vm5 = vmmov %vm9821_vm7 }
 0xbc3   : > { %vm9826_vm10 = vmmov %vm9825_vm5 }
 0xbc4   : > { %vm9827_vm3 = vmmov %vm9825_vm5 }
 0xbc5   : > { %vm9828_vm1 = vmmov %vm9827_vm3 }
 0xbc6   : > { %vm9829_vm4 = vmmov %vm9828_vm1 }
 0xbc7   : > { %vm9830_vm2 = vmmov %vm9828_vm1 }
 0xbde   : > { %v8629_v58 = vpop.f32.mrf.mxu0 }
 0xbdf   : > { %v5232_v48 = vrot.slane %v8629_v58, 3  ;;  %v5123_v15 = vrot.slane %v8629_v58, 5  ;;  %v5141_v23 = vrot.slane %v8629_v58, 6  ;;  %v5159_v36 = vrot.slane %v8629_v58, 7 }
 0xbe0   : > { %v8619_v10 = vpop.f32.mrf.mxu1  ;;  %v8657_v40 = vpop.f32.mrf.mxu0  ;;  %v5196_v13 = vrot.slane %v8629_v58, 1 }
 0xbe1   : > { %v5230_v24 = vrot.slane %v8619_v10, 4  ;;  %v5121_v12 = vrot.slane %v8619_v10, 6  ;;  %v5139_v55 = vrot.slane %v8619_v10, 7  ;;  %v5077_v25 = vrot.slane %v8657_v40, 3 }
 0xbe2   : > { %v8647_v54 = vpop.f32.mrf.mxu1  ;;  %v5097_v18 = vrot.slane %v8657_v40, 4  ;;  %v4962_v46 = vrot.slane %v8657_v40, 5  ;;  %v4981_v11 = vrot.slane %v8657_v40, 6  ;;  %v5158_v5 = vsel %vm1270_vm9, %v8619_v10, %v5157_v59 }
 0xbe3   : > { %v5075_v33 = vrot.slane %v8647_v54, 4  ;;  %v5095_v9 = vrot.slane %v8647_v54, 5  ;;  %v4960_v19 = vrot.slane %v8647_v54, 6  ;;  %v4979_v8 = vrot.slane %v8647_v54, 7 }
 0xbe4   : > { %v5231_v56 = vsel %vm1270_vm9, %v5230_v24, %v5229_v47  ;;  %v5122_v27 = vsel %vm1270_vm9, %v5121_v12, %v5120_v49  ;;  %v5140_v32 = vsel %vm1270_vm9, %v5139_v55, %v5138_v3  ;;  %v5000_v61 = vrot.slane %v8657_v40, 7 }
 0xbe5   : > { %v5076_v17 = vsel %vm1270_vm9, %v5075_v33, %v5074_v1  ;;  %v5096_v63 = vsel %vm1270_vm9, %v5095_v9, %v5094_v39  ;;  %v4961_v45 = vsel %vm1270_vm9, %v4960_v19, %v4959_v22  ;;  %v4980_v14 = vsel %vm1270_vm9, %v4979_v8, %v4978_v21 }
 0xbe6   : > { %v4999_v49 = vsel %vm1270_vm9, %v8647_v54, %v4998_v4  ;;  %v5176_v47 = vrot.slane %v8619_v10, 1  ;;  %v5233_v59 = vsel %vm9821_vm7, %v5232_v48, %v5231_v56  ;;  %v5124_v1 = vsel %vm9822_vm11, %v5123_v15, %v5122_v27  ;;  %vm9832_vm7 = vmmov %vm9828_vm1 }
 0xbe7   : > { %v5018_v39 = vrot.slane %v8647_v54, 1  ;;  %v5194_v3 = vrot.slane %v8619_v10, 2  ;;  %v5078_v22 = vsel %vm9823_vm13, %v5077_v25, %v5076_v17  ;;  %v5098_v21 = vsel %vm9824_vm14, %v5097_v18, %v5096_v63  ;;  %vm9833_vm11 = vmmov %vm9828_vm1 }
 0xbe8   : > { %v5142_v4 = vsel %vm9825_vm5, %v5141_v23, %v5140_v32  ;;  %v8693_v33 = vsel %vm9826_vm10, %v5159_v36, %v5158_v5  ;;  %v4963_v9 = vsel %vm9827_vm3, %v4962_v46, %v4961_v45  ;;  %v4982_v48 = vsel %vm9828_vm1, %v4981_v11, %v4980_v14  ;;  %vm9834_vm13 = vmmov %vm9831_vm12 }
 0xbe9   : > { %v8698_v15 = vsel %vm9829_vm4, %v5000_v61, %v4999_v49  ;;  %v5177_v8 = vsel %vm1270_vm9, %v5176_v47, %v5175_v30  ;;  %v5019_v45 = vsel %vm1270_vm9, %v5018_v39, %v5017_v35  ;;  %v5195_v18 = vsel %vm1270_vm9, %v5194_v3, %v5193_v0  ;;  %vm9835_vm14 = vmmov %vm9831_vm12 }
 0xbea   : > { %v8687_v12 = vpop.f32.mrf.mxu0  ;;  %v8721_v35 = vsel %vm9830_vm2, %v8629_v58, %v5177_v8  ;;  %v8728_v49 = vsel %vm9832_vm7, %v8657_v40, %v5019_v45  ;;  %v8731_v47 = vsel %vm9833_vm11, %v5196_v13, %v5195_v18  ;;  %vm9836_vm5 = vmmov %vm9831_vm12  ;;  %vm9837_vm10 = vcmask 1045509  }
 0xbeb   : > { %v5236_v14 = vrot.slane %v8687_v12, 1  ;;  %v5127_v56 = vrot.slane %v8687_v12, 3  ;;  %v5145_v11 = vrot.slane %v8687_v12, 4  ;;  %vm9838_vm3 = vcmask 1046534   ;;  %vm9839_vm1 = vmmov %vm9836_vm5 }
 0xbec   : > { %v8681_v24 = vpop.f32.mrf.mxu1  ;;  %v8711_v46 = vpop.f32.mrf.mxu0  ;;  %vm9840_vm4 = vcmask 1047559   ;;  %vm9841_vm2 = vmmov %vm9837_vm10 }
 0xbed   : > { %v5234_v19 = vrot.slane %v8681_v24, 2  ;;  %v5125_v36 = vrot.slane %v8681_v24, 4  ;;  %v5143_v27 = vrot.slane %v8681_v24, 5  ;;  %v5081_v3 = vrot.slane %v8711_v46, 1  ;;  %vm9843_vm7 = vmmov %vm9841_vm2 }
 0xbee   : > { %v8705_v32 = vpop.f32.mrf.mxu1  ;;  %v5101_v8 = vrot.slane %v8711_v46, 2  ;;  %v4966_v23 = vrot.slane %v8711_v46, 3  ;;  %vm9844_vm11 = vmmov %vm9838_vm3 }
 0xbef   : > { %v5079_v30 = vrot.slane %v8705_v32, 2  ;;  %v5235_v17 = vsel %vm9831_vm12, %v5234_v19, %v5233_v59  ;;  %v5099_v63 = vrot.slane %v8705_v32, 3  ;;  %v5126_v61 = vsel %vm9834_vm13, %v5125_v36, %v5124_v1  ;;  %vm9842_vm12 = vmmov %vm9841_vm2 }
 0xbf0   : > { %v4964_v45 = vrot.slane %v8705_v32, 4  ;;  %v5144_v25 = vsel %vm9836_vm5, %v5143_v27, %v5142_v4  ;;  %v5237_v0 = vsel %vm9837_vm10, %v5236_v14, %v5235_v17  ;;  %v4983_v5 = vrot.slane %v8705_v32, 5  ;;  %vm9845_vm13 = vmmov %vm9839_vm1 }
 0xbf1   : > { %v5080_v19 = vsel %vm9835_vm14, %v5079_v30, %v5078_v22  ;;  %v4985_v1 = vrot.slane %v8711_v46, 4  ;;  %v5161_v36 = vrot.slane %v8681_v24, 6  ;;  %v5100_v30 = vsel %vm9839_vm1, %v5099_v63, %v5098_v21  ;;  %vm9846_vm14 = vmmov %vm9840_vm4 }
 0xbf2   : > { %v5082_v14 = vsel %vm9841_vm2, %v5081_v3, %v5080_v19  ;;  %v5128_v17 = vsel %vm9842_vm12, %v5127_v56, %v5126_v61  ;;  %v5146_v52 = vsel %vm9843_vm7, %v5145_v11, %v5144_v25  ;;  %v4965_v21 = vsel %vm9845_vm13, %v4964_v45, %v4963_v9  ;;  %vm9847_vm5 = vmmov %vm9841_vm2 }
 0xbf3   : > { %vm9848_vm10 = vmmov %vm9839_vm1  ;;  %v5002_v61 = vrot.slane %v8705_v32, 6  ;;  %v5021_v19 = vrot.slane %v8705_v32, 7 }
 0xbf4   : > { %v4984_v3 = vsel %vm9848_vm10, %v4983_v5, %v4982_v48  ;;  %vm9849_vm1 = vmmov %vm9838_vm3  ;;  %v5179_v5 = vrot.slane %v8681_v24, 7 }
 0xbf5   : > { %vm9851_vm2 = vmmov %vm9846_vm14 }
 0xbf6   : > { %vm9852_vm12 = vmmov %vm9847_vm5 }
 0xbf7   : > { %v4967_v48 = vsel %vm9852_vm12, %v4966_v23, %v4965_v21  ;;  %vm9853_vm7 = vmmov %vm9849_vm1  ;;  %v5004_v23 = vrot.slane %v8711_v46, 5 }
 0xbf8   : > { %vm9855_vm13 = vmmov %vm9851_vm2 }
 0xc06   : > { %v8733_v39 = vpop.f32.mrf.mxu0 }
 0xc07   : > { %v5239_v59 = vrot.slane %v8733_v39, 7 }
 0xc08   : > { %v8743_v13 = vpop.f32.mrf.mxu1  ;;  %v8745_v18 = vpop.f32.mrf.mxu0 }
 0xc09   : > { %v5238_v55 = vsel %vm9838_vm3, %v8743_v13, %v5237_v0  ;;  %v5084_v22 = vrot.slane %v8745_v18, 7  ;;  %v5129_v4 = vrot.slane %v8743_v13, 2  ;;  %v5147_v56 = vrot.slane %v8743_v13, 3 }
 0xc0a   : > { %v8756_v27 = vpop.f32.mrf.mxu1  ;;  %v5240_v57 = vsel %vm9840_vm4, %v5239_v59, %v5238_v55  ;;  %v5102_v55 = vsel %vm9847_vm5, %v5101_v8, %v5100_v30  ;;  %vm9850_vm4 = vmmov %vm9848_vm10  ;;  %v5131_v8 = vrot.slane %v8733_v39, 1  ;;  %v4970_v45 = vrot.slane %v8745_v18, 1 }
 0xc0b   : > { %5241 = vrot.lane.b32.xlu0 %v5240_v57, %s9728_s24  ;;  %v5083_v0 = vsel %vm9844_vm11, %v8756_v27, %v5082_v14  ;;  %v5103_v42 = vrot.slane %v8756_v27, 1  ;;  %v4968_v63 = vrot.slane %v8756_v27, 2  ;;  %v5130_v25 = vsel %vm9849_vm1, %v5129_v4, %v5128_v17  ;;  %vm9854_vm11 = vmmov %vm9847_vm5 }
 0xc0c   : > { %v5085_v7 = vsel %vm9846_vm14, %v5084_v22, %v5083_v0  ;;  %v5162_v9 = vsel %vm9850_vm4, %v5161_v36, %v8693_v33  ;;  %v4987_v59 = vrot.slane %v8756_v27, 3  ;;  %v5132_v33 = vsel %vm9855_vm13, %v5131_v8, %v5130_v25  ;;  %vm9856_vm14 = vmmov %vm9850_vm4 }
 0xc0d   : > { %5086 = vrot.lane.b32.xlu1 %v5085_v7, %s9728_s24  ;;  %v5104_v57 = vsel %vm9838_vm3, %v5103_v42, %v5102_v55  ;;  %v4969_v7 = vsel %vm9853_vm7, %v4968_v63, %v4967_v48  ;;  %v4986_v42 = vsel %vm9854_vm11, %v4985_v1, %v4984_v3  ;;  %v5003_v36 = vsel %vm9856_vm14, %v5002_v61, %v8698_v15  ;;  %vm9857_vm5 = vmmov %vm9849_vm1 }
 0xc0e   : > { %v5105_v11 = vsel %vm9851_vm2, %v8745_v18, %v5104_v57  ;;  %v5148_v22 = vsel %vm9857_vm5, %v5147_v56, %v5146_v52  ;;  %v5165_v30 = vrot.slane %v8743_v13, 4  ;;  %v5023_v1 = vrot.slane %v8711_v46, 6  ;;  %vm9858_vm10 = vmmov %vm9851_vm2 }
 0xc0f   : > { %5106 = vrot.lane.b32.xlu0 %v5105_v11, %s9688_s8  ;;  %v5199_v4 = vrot.slane %v8687_v12, 7  ;;  %v4971_v14 = vsel %vm9858_vm10, %v4970_v45, %v4969_v7  ;;  %v5149_v17 = vrot.slane %v8733_v39, 2  ;;  %vm9859_vm3 = vmmov %vm9850_vm4  ;;  %v9860_v15 = vrot.slane %v8647_v54, 2 }
 0xc10   : > { %v5180_v0 = vsel %vm9859_vm3, %v5179_v5, %v8721_v35  ;;  %v4988_v52 = vsel %vm9849_vm1, %v4987_v59, %v4986_v42  ;;  %v5006_v63 = vrot.slane %v8756_v27, 4  ;;  %vm9861_vm4 = vmmov %vm9859_vm3  ;;  %v4989_v61 = vrot.slane %v8745_v18, 2 }
 0xc11   : > { %5133 = vrot.lane.b32.xlu1 %v5132_v33, %s9684_s1  ;;  %v5038_v21 = vsel %vm1270_vm9, %v9860_v15, %v8635_v62  ;;  %v5022_v55 = vsel %vm9861_vm4, %v5021_v19, %v8728_v49  ;;  %vm9862_vm2 = vmmov %vm9859_vm3  ;;  %v9864_v57 = vrot.slane %v8687_v12, 5  ;;  %v9868_v49 = vrot.slane %v8687_v12, 6 }
 0xc12   : > { %v5198_v3 = vsel %vm9862_vm2, %v8681_v24, %v8731_v47  ;;  %vm9863_vm12 = vmmov %vm9858_vm10  ;;  %v5183_v47 = vrot.slane %v8743_v13, 5  ;;  %v9870_v8 = vrot.slane %v8657_v40, 1  ;;  %vm9871_vm5 = vcmask 1043459  }
 0xc13   : > { %4972 = vrot.lane.b32.xlu0 %v4971_v14, %s9684_s1  ;;  %v5150_v35 = vsel %vm9863_vm12, %v5149_v17, %v5148_v22  ;;  %vm9865_vm7 = vmmov %vm9854_vm11  ;;  %v4990_v5 = vsel %vm9858_vm10, %v4989_v61, %v4988_v52  ;;  %v5025_v19 = vrot.slane %v8756_v27, 5  ;;  %v9875_v33 = vrot.slane %v8619_v10, 3 }
 0xc14   : > { %v5164_v62 = vsel %vm9865_vm7, %v9864_v57, %v5162_v9  ;;  %vm9866_vm11 = vmmov %vm9865_vm7  ;;  %v5040_v48 = vsel %vm9871_vm5, %v9870_v8, %v5038_v21  ;;  %v5167_v9 = vrot.slane %v8733_v39, 3  ;;  %v5008_v22 = vrot.slane %v8745_v18, 3 }
 0xc15   : > { %v5005_v25 = vsel %vm9866_vm11, %v5004_v23, %v5003_v36  ;;  %5151 = vrot.lane.b32.xlu1 %v5150_v35, %s9730_s25  ;;  %vm9867_vm13 = vmmov %vm9849_vm1  ;;  %v5213_v45 = vsel %vm1270_vm9, %v9875_v33, %v8639_v26  ;;  %v5056_v36 = vrot.slane %v8647_v54, 3  ;;  %vm9877_vm12 = vcmask 1044484  }
 0xc16   : > { %v5166_v56 = vsel %vm9867_vm13, %v5165_v30, %v5164_v62  ;;  %vm9869_vm14 = vmmov %vm9865_vm7  ;;  %v5041_v30 = vsel %vm9877_vm12, %v8705_v32, %v5040_v48  ;;  %v5201_v14 = vrot.slane %v8743_v13, 6  ;;  %v5216_v17 = vrot.slane %v8681_v24, 1 }
 0xc17   : > { %v5182_v11 = vsel %vm9869_vm14, %v9868_v49, %v5180_v0  ;;  %vm9872_vm3 = vmmov %vm9865_vm7  ;;  %4991 = vrot.lane.b32.xlu0 %v4990_v5, %s9730_s25  ;;  %v9879_v26 = vrot.slane %v8619_v10, 5  ;;  %v5185_v15 = vrot.slane %v8733_v39, 4  ;;  %v9881_v21 = vrot.slane %v8629_v58, 2  ;;  %s9920_s25 = sld [smem:[#allocation39_spill]] }
 0xc18   : > { %v5024_v7 = vsel %vm9872_vm3, %v5023_v1, %v5022_v55  ;;  %vm9873_vm1 = vmmov %vm9872_vm3  ;;  %v5042_v1 = vrot.slane %v8711_v46, 7  ;;  %v5253_v10 = vrot.slane %v8681_v24, 3  ;;  %v5027_v61 = vrot.slane %v8745_v18, 4 }
 0xc19   : > { %v5200_v42 = vsel %vm9873_vm1, %v5199_v4, %v5198_v3  ;;  %vm9874_vm4 = vmmov %vm9867_vm13  ;;  %v5250_v54 = vsel %vm1270_vm9, %v9879_v26, %v8642_v43  ;;  %v5044_v3 = vrot.slane %v8756_v27, 6  ;;  %v5057_v43 = vsel %vm1270_vm9, %v5056_v36, %v8645_v6 }
 0xc1a   : > { %v5007_v59 = vsel %vm9874_vm4, %v5006_v63, %v5005_v25  ;;  %vm9876_vm2 = vmmov %vm9858_vm10  ;;  %v5058_v63 = vrot.slane %v8657_v40, 2  ;;  %v9885_v57 = vrot.slane %v8629_v58, 4  ;;  %v5255_v40 = vrot.slane %v8687_v12, 2 }
 0xc1b   : > { %v5168_v23 = vsel %vm9876_vm2, %v5167_v9, %v5166_v56  ;;  %vm9878_vm7 = vmmov %vm9874_vm4  ;;  %v5219_v24 = vrot.slane %v8743_v13, 7  ;;  %v5060_v6 = vrot.slane %v8705_v32, 1  ;;  %v5257_v5 = vrot.slane %v8743_v13, 1 }
 0xc1c   : > { %5169 = vrot.lane.b32.xlu1 %v5168_v23, %s9681_s6  ;;  %v5184_v4 = vsel %vm9878_vm7, %v5183_v47, %v5182_v11  ;;  %vm9880_vm11 = vmmov %vm9876_vm2  ;;  %v5203_v11 = vrot.slane %v8733_v39, 5  ;;  %v5046_v32 = vrot.slane %v8745_v18, 5 }
 0xc1d   : > { %v5009_v0 = vsel %vm9880_vm11, %v5008_v22, %v5007_v59  ;;  %vm9882_vm13 = vmmov %vm9871_vm5 }
 0xc1e   : > { %v5215_v52 = vsel %vm9882_vm13, %v9881_v21, %v5213_v45  ;;  %5010 = vrot.lane.b32.xlu0 %v5009_v0, %s9681_s6  ;;  %vm9883_vm14 = vmmov %vm9874_vm4  ;;  %s9896_s6 = smov 81   ;;  %v5221_v45 = vrot.slane %v8733_v39, 6 }
 0xc1f   : > { %v5026_v55 = vsel %vm9883_vm14, %v5025_v19, %v5024_v7  ;;  %vm9884_vm5 = vmmov %vm9876_vm2  ;;  %v5063_v19 = vrot.slane %v8756_v27, 7 }
 0xc20   : > { %v5186_v35 = vsel %vm9884_vm5, %v5185_v15, %v5184_v4  ;;  %vm9886_vm10 = vmmov %vm9882_vm13 }
 0xc21   : > { %v5252_v62 = vsel %vm9886_vm10, %v9885_v57, %v5250_v54  ;;  %5187 = vrot.lane.b32.xlu1 %v5186_v35, %s9690_s4  ;;  %vm9887_vm3 = vmmov %vm9874_vm4  ;;  %vm9890_vm4 = vcmask 1045509  }
 0xc22   : > { %v5202_v25 = vsel %vm9887_vm3, %v5201_v14, %v5200_v42  ;;  %vm9888_vm1 = vmmov %vm9877_vm12  ;;  %v5043_v58 = vsel %vm9890_vm4, %v5042_v1, %v5041_v30  ;;  %v5065_v30 = vrot.slane %v8745_v18, 6 }
 0xc23   : > { %v5217_v56 = vsel %vm9888_vm1, %v5216_v17, %v5215_v52  ;;  %vm9889_vm9 = vmmov %vm9876_vm2 }
 0xc24   : > { %v5028_v49 = vsel %vm9889_vm9, %v5027_v61, %v5026_v55  ;;  %vm9891_vm2 = vmmov %vm9886_vm10 }
 0xc25   : > { %v5059_v47 = vsel %vm9891_vm2, %v5058_v63, %v5057_v43  ;;  %5029 = vrot.lane.b32.xlu0 %v5028_v49, %s9690_s4  ;;  %vm9892_vm12 = vmmov %vm9887_vm3  ;;  %s9903_s4 = smov 97  }
 0xc26   : > { %v5045_v8 = vsel %vm9892_vm12, %v5044_v3, %v5043_v58  ;;  %vm9893_vm7 = vmmov %vm9888_vm1 }
 0xc27   : > { %v5254_v48 = vsel %vm9893_vm7, %v5253_v10, %v5252_v62  ;;  %vm9894_vm11 = vmmov %vm9884_vm5 }
 0xc28   : > { %v5204_v9 = vsel %vm9894_vm11, %v5203_v11, %v5202_v25  ;;  %vm9895_vm13 = vmmov %vm9890_vm4  ;;  %vm9907_vm11 = vcmask 7168  }
 0xc29   : > { %v5218_v7 = vsel %vm9895_vm13, %v8687_v12, %v5217_v56  ;;  %5205 = vrot.lane.b32.xlu1 %v5204_v9, %s9896_s6  ;;  %vm9897_vm14 = vmmov %vm9887_vm3  ;;  %vm5109_vm13 = vcmask 138248  }
 0xc2a   : > { %v5220_v42 = vsel %vm9897_vm14, %v5219_v24, %v5218_v7  ;;  %vm9898_vm5 = vmmov %vm9888_vm1 }
 0xc2b   : > { %v5061_v59 = vsel %vm9898_vm5, %v5060_v6, %v5059_v47  ;;  %vm9899_vm10 = vmmov %vm9889_vm9  ;;  %v5222_v12 = vsel %vm9889_vm9, %v5221_v45, %v5220_v42  ;;  %vm4975_vm5 = vcmask 269448   ;;  %v9910_v42 = vld [vmem:[#allocation20_spill] sm:$0xff]  ;;  %v9912_v45 = vld [vmem:[#allocation15_spill] sm:$0xff] }
 0xc2c   : > { %v5047_v33 = vsel %vm9899_vm10, %v5046_v32, %v5045_v8  ;;  %vm9900_vm3 = vmmov %vm9890_vm4  ;;  %vm4994_vm10 = vcmask 400648   ;;  %v9909_v32 = vld [vmem:[#allocation10_spill] sm:$0xff] }
 0xc2d   : > { %v5256_v13 = vsel %vm9900_vm3, %v5255_v40, %v5254_v48  ;;  %5048 = vrot.lane.b32.xlu0 %v5047_v33, %s9896_s6  ;;  %vm9901_vm1 = vmmov %vm9892_vm12  ;;  %5223 = vrot.lane.b32.xlu1 %v5222_v12, %s9903_s4 }
 0xc2e   : > { %v5258_v36 = vsel %vm9901_vm1, %v5257_v5, %v5256_v13  ;;  %vm9902_vm4 = vmmov %vm9900_vm3  ;;  %vm5013_vm3 = vcmask 531848  }
 0xc2f   : > { %v5062_v23 = vsel %vm9902_vm4, %v8711_v46, %v5061_v59  ;;  %vm9904_vm2 = vmmov %vm9901_vm1  ;;  %vm5032_vm1 = vcmask 663048   ;;  %vm5070_vm4 = vcmask 925448  }
 0xc30   : > { %v5064_v22 = vsel %vm9904_vm2, %v5063_v19, %v5062_v23  ;;  %vm9905_vm12 = vmmov %vm9889_vm9  ;;  %vm5089_vm2 = vcmask 1048456   ;;  %v9911_v19 = vld [vmem:[#allocation18_spill] sm:$0xff]  ;;  %v9914_v23 = vld [vmem:[#allocation16_spill] sm:$0xff] }
 0xc31   : > { %v5259_v27 = vsel %vm9905_vm12, %v8733_v39, %v5258_v36  ;;  %vm9906_vm7 = vmmov %vm9889_vm9  ;;  %vm5051_vm9 = vcmask 794248   ;;  %v9913_v36 = vld [vmem:[#allocation19_spill] sm:$0xff]  ;;  %vm9923_vm12 = vcmask 777216  }
 0xc32   : > { %5260 = vrot.lane.b32.xlu0 %v5259_v27, %s9688_s8  ;;  %v5066_v1 = vsel %vm9906_vm7, %v5065_v30, %v5064_v22  ;;  %vm9908_vm14 = vmmov %vm9907_vm11  ;;  %v9915_v27 = vld [vmem:[#allocation21_spill] sm:$0xff]  ;;  %s9937_s8 = sld [smem:[#allocation28_spill]] }
 0xc33   : > { %5067 = vrot.lane.b32.xlu1 %v5066_v1, %s9903_s4  ;;  %v9916_v1 = vld [vmem:[#allocation17_spill] sm:$0xff]  ;;  %vm9924_vm7 = vmmov %vm9923_vm12 }
 0xc38   : > { %s843_s24 = scalar_lea.vmem %s9937_s8, %s6826_s23 }
 0xc7d   : > { %v5242_v4 = vpop.permute.xlu0 %5241 }
 0xc7e   : > { %5245 = vst.msk [vmem:[#allocation3 + $0x10] sm:$0xff] %vm9907_vm11, %v5242_v4  ;;  %vm9925_vm11 = vcmask 785408  }
 0xc7f   : > { %v5087_v14 = vpop.permute.xlu1 %5086 }
 0xc80   : > { %5091 = vst.msk [vmem:[#allocation3 + $0x8] sm:$0xff] %vm9908_vm14, %v5087_v14  ;;  %vm9927_vm14 = vcmask 908288  }
 0xc81   : > { %v5107_v46 = vpop.permute.xlu0 %5106 }
 0xc82   : > { %5110 = vst.msk [vmem:[#allocation3 + $0x8] sm:$0xff] %vm5109_vm13, %v5107_v46 }
 0xc83   : > { %v5134_v39 = vpop.permute.xlu1 %5133 }
 0xc84   : > { %5136 = vst.msk [vmem:[#allocation3 + $0x8] sm:$0xff] %vm4975_vm5, %v5134_v39  ;;  %v9918_v39 = vld [vmem:[#allocation12_spill] sm:$0xff] }
 0xc85   : > { %v4973_v18 = vpop.permute.xlu0 %4972 }
 0xc86   : > { %4976 = vst.msk [vmem:[#allocation3] sm:$0xff] %vm4975_vm5, %v4973_v18  ;;  %vm9928_vm5 = vmmov %vm9927_vm14 }
 0xc87   : > { %v5152_v17 = vpop.permute.xlu1 %5151 }
 0xc88   : > { %5154 = vst.msk [vmem:[#allocation3 + $0x8] sm:$0xff] %vm4994_vm10, %v5152_v17  ;;  %v9919_v17 = vld [vmem:[#allocation13_spill] sm:$0xff] }
 0xc89   : > { %v4992_v26 = vpop.permute.xlu0 %4991 }
 0xc8a   : > { %4995 = vst.msk [vmem:[#allocation3] sm:$0xff] %vm4994_vm10, %v4992_v26  ;;  %vm9929_vm10 = vcmask 916480  }
 0xc8e   : > { %v5170_v54 = vpop.permute.xlu1 %5169 }
 0xc8f   : > { %5172 = vst.msk [vmem:[#allocation3 + $0x8] sm:$0xff] %vm5013_vm3, %v5170_v54  ;;  %v3396_v54 = vld [vmem:[%s9920_s25] sm:$0xf] }
 0xc90   : > { %v5011_v0 = vpop.permute.xlu0 %5010 }
 0xc91   : > { %5014 = vst.msk [vmem:[#allocation3] sm:$0xff] %vm5013_vm3, %v5011_v0  ;;  %v2529_v0 = vld [vmem:[%s9921_s15] sm:$0xf]  ;;  %vm9930_vm3 = vmmov %vm9929_vm10 }
 0xc93   : > { %v5188_v15 = vpop.permute.xlu1 %5187 }
 0xc94   : > { %5190 = vst.msk [vmem:[#allocation3 + $0x8] sm:$0xff] %vm5032_vm1, %v5188_v15  ;;  %v5457_v15 = vld [vmem:[%s9922_s11] sm:$0xff] }
 0xc97   : > { %v5030_v21 = vpop.permute.xlu0 %5029 }
 0xc98   : > { %5033 = vst.msk [vmem:[#allocation3] sm:$0xff] %vm5032_vm1, %v5030_v21  ;;  %vm9931_vm1 = vcmask 1031168  }
 0xc9b   : > { %v5206_v52 = vpop.permute.xlu1 %5205 }
 0xc9c   : > { %5208 = vst.msk [vmem:[#allocation3 + $0x8] sm:$0xff] %vm5051_vm9, %v5206_v52 }
 0xc9f   : > { %v5049_v63 = vpop.permute.xlu0 %5048  ;;  %v5224_v55 = vpop.permute.xlu1 %5223 }
 0xca0   : > { %5052 = vst.msk [vmem:[#allocation3] sm:$0xff] %vm5051_vm9, %v5049_v63  ;;  %vm9932_vm9 = vmmov %vm9931_vm1 }
 0xca1   : > { %5226 = vst.msk [vmem:[#allocation3 + $0x8] sm:$0xff] %vm5070_vm4, %v5224_v55 }
 0xca2   : > { %5244 = vst.msk [vmem:[#allocation3 + $0x8] sm:$0xff] %vm5089_vm2, %v5242_v4 }
 0xca4   : > { %v5261_v3 = vpop.permute.xlu0 %5260 }
 0xca5   : > { %5263 = vst.msk [vmem:[#allocation3 + $0x10] sm:$0xff] %vm5109_vm13, %v5261_v3  ;;  %v5068_v10 = vpop.permute.xlu1 %5067  ;;  %vm9926_vm13 = vmmov %vm9925_vm11 }
 0xca6   : > { %5071 = vst.msk [vmem:[#allocation3] sm:$0xff] %vm5070_vm4, %v5068_v10  ;;  %vm9934_vm4 = vcmask 1039360  }
 0xca7   : > { %5090 = vst.msk [vmem:[#allocation3] sm:$0xff] %vm5089_vm2, %v5087_v14  ;;  %v9917_v14 = vld [vmem:[#allocation22_spill] sm:$0xff]  ;;  %vm9935_vm2 = vmmov %vm9934_vm4 }
 0xca9   : > { %v5265_v43 = vld [vmem:[#allocation3 + $0x8] sm:$0xff] }
 0xcaa   : > { %v8914_v35 = vmul.f32 %v5265_v43, %v7871_v20  ;;  %v5421_v59 = vmul.f32 %v5265_v43, %v9910_v42  ;;  %v5400_v33 = vmul.f32 %v5265_v43, %v9911_v19  ;;  %v5379_v13 = vmul.f32 %v5265_v43, %v9912_v45 }
 0xcab   : > { %v5358_v12 = vmul.f32 %v5265_v43, %v9913_v36  ;;  %v5337_v22 = vmul.f32 %v5265_v43, %v9914_v23  ;;  %v5316_v30 = vmul.f32 %v5265_v43, %v9915_v27  ;;  %v5295_v4 = vmul.f32 %v5265_v43, %v9916_v1 }
 0xcac   : > { %v5419_v61 = vld [vmem:[#allocation3 + $0x10] sm:$0xff]  ;;  %5269 = vst [vmem:[#allocation4 + $0x8] sm:$0xff] %v8914_v35  ;;  %v5274_v46 = vmul.f32 %v5265_v43, %v9917_v14 }
 0xcad   : > { %v5422_v57 = vmul.f32 %v5419_v61, %v7836_v53  ;;  %v5401_v62 = vmul.f32 %v5419_v61, %v7832_v31  ;;  %v5380_v56 = vmul.f32 %v5419_v61, %v7844_v51  ;;  %v5359_v24 = vmul.f32 %v5419_v61, %v7840_v38 }
 0xcae   : > { %v5264_v40 = vld [vmem:[#allocation3] sm:$0xff]  ;;  %v5338_v6 = vmul.f32 %v5419_v61, %v9772_v60  ;;  %v5317_v49 = vmul.f32 %v5419_v61, %v7874_v50  ;;  %v5296_v58 = vmul.f32 %v5419_v61, %v9773_v41  ;;  %v5275_v26 = vmul.f32 %v5419_v61, %v9919_v17 }
 0xcaf   : > { %5430 = vrot.lane.b32.xlu0 %v5422_v57, %s9715_s28  ;;  %5409 = vrot.lane.b32.xlu1 %v5401_v62, %s9718_s0  ;;  %v8922_v25 = vmul.f32 %v5264_v40, %v7881_v28  ;;  %v5420_v11 = vmul.f32 %v5264_v40, %v7834_v34  ;;  %v5378_v47 = vmul.f32 %v5264_v40, %v7856_v2 }
 0xcb0   : > { %v5399_v8 = vmul.f32 %v5264_v40, %v7830_v29  ;;  %v5336_v48 = vmul.f32 %v5264_v40, %v7876_v16  ;;  %v5357_v5 = vmul.f32 %v5264_v40, %v7838_v37  ;;  %v5294_v9 = vmul.f32 %v5264_v40, %v7895_v44 }
 0xcb1   : > { %5268 = vst [vmem:[#allocation4] sm:$0xff] %v8922_v25  ;;  %v5315_v7 = vmul.f32 %v5264_v40, %v9909_v32  ;;  %v5273_v18 = vmul.f32 %v5264_v40, %v9918_v39 }
 0xcb3   : > { %5388 = vrot.lane.b32.xlu0 %v5380_v56, %s9744_s12  ;;  %5367 = vrot.lane.b32.xlu1 %v5359_v24, %s9710_s29 }
 0xcb7   : > { %5346 = vrot.lane.b32.xlu0 %v5338_v6, %s9704_s2  ;;  %5325 = vrot.lane.b32.xlu1 %v5317_v49, %s9713_s30 }
 0xcbb   : > { %5426 = vrot.lane.b32.xlu1 %v5420_v11, %s9715_s28  ;;  %5304 = vrot.lane.b32.xlu0 %v5296_v58, %s9707_s9 }
 0xcbf   : > { %5384 = vrot.lane.b32.xlu1 %v5378_v47, %s9744_s12  ;;  %5405 = vrot.lane.b32.xlu0 %v5399_v8, %s9718_s0 }
 0xcc3   : > { %5342 = vrot.lane.b32.xlu1 %v5336_v48, %s9704_s2  ;;  %5363 = vrot.lane.b32.xlu0 %v5357_v5, %s9710_s29 }
 0xcc7   : > { %5300 = vrot.lane.b32.xlu1 %v5294_v9, %s9707_s9  ;;  %5321 = vrot.lane.b32.xlu0 %v5315_v7, %s9713_s30 }
 0xccb   : > { %5428 = vrot.lane.b32.xlu1 %v5421_v59, %s9715_s28  ;;  %5407 = vrot.lane.b32.xlu0 %v5400_v33, %s9718_s0 }
 0xccf   : > { %5386 = vrot.lane.b32.xlu1 %v5379_v13, %s9744_s12  ;;  %5365 = vrot.lane.b32.xlu0 %v5358_v12, %s9710_s29 }
 0xcd3   : > { %5344 = vrot.lane.b32.xlu1 %v5337_v22, %s9704_s2  ;;  %5323 = vrot.lane.b32.xlu0 %v5316_v30, %s9713_s30 }
 0xcd7   : > { %5302 = vrot.lane.b32.xlu1 %v5295_v4, %s9707_s9  ;;  %5281 = vrot.lane.b32.xlu0 %v5274_v46, %s9720_s5 }
 0xcdb   : > { %5279 = vrot.lane.b32.xlu0 %v5273_v18, %s9720_s5  ;;  %5283 = vrot.lane.b32.xlu1 %v5275_v26, %s9720_s5 }
 0xcdf   : > { %3399 = vperm.xlu0 %7156, %v3396_v54   ;;  %2532 = vperm.xlu1 %7157, %v2529_v0  }
 0xce3   : > { %5460 = vperm.xlu1 %7157, %v5457_v15  }
 0xd21   : > { %v5431_v21 = vpop.permute.xlu0 %5430  ;;  %v5410_v52 = vpop.permute.xlu1 %5409 }
 0xd25   : > { %v5389_v63 = vpop.permute.xlu0 %5388  ;;  %v5368_v55 = vpop.permute.xlu1 %5367 }
 0xd29   : > { %v5347_v3 = vpop.permute.xlu0 %5346  ;;  %v5326_v10 = vpop.permute.xlu1 %5325 }
 0xd2d   : > { %v5427_v43 = vpop.permute.xlu1 %5426  ;;  %v5305_v61 = vpop.permute.xlu0 %5304 }
 0xd31   : > { %v5385_v57 = vpop.permute.xlu1 %5384  ;;  %v5406_v62 = vpop.permute.xlu0 %5405 }
 0xd35   : > { %v5343_v40 = vpop.permute.xlu1 %5342  ;;  %v5364_v56 = vpop.permute.xlu0 %5363 }
 0xd39   : > { %v5301_v24 = vpop.permute.xlu1 %5300  ;;  %v5322_v6 = vpop.permute.xlu0 %5321 }
 0xd3d   : > { %v5429_v49 = vpop.permute.xlu1 %5428  ;;  %v5408_v11 = vpop.permute.xlu0 %5407 }
 0xd3e   : > { %v5432_v58 = vsel %vm2511_vm6, %v5427_v43, %v5429_v49  ;;  %v5433_v47 = vsel %vm2511_vm6, %v5429_v49, %v5431_v21  ;;  %v5411_v8 = vsel %vm9923_vm12, %v5406_v62, %v5408_v11  ;;  %v5412_v48 = vsel %vm9924_vm7, %v5408_v11, %v5410_v52  ;;  %v868_v43 = vld [vmem:[%s843_s24] sm:$0xff] }
 0xd3f   : > { %5436 = vst [vmem:[#allocation4 + $0x80] sm:$0xff] %v5432_v58  ;;  %5437 = vst [vmem:[#allocation4 + $0x88] sm:$0xff] %v5433_v47  ;;  %5480 = vmatprep.subr.mxu1 %v5433_v47  ;;  %v3485_v62 = vcombine.high %v868_v43, %v868_v43  ;;  %vm5550_vm12 = vcmask 134144   ;;  %vm9943_vm7 = vcmask 138240  }
 0xd40   : > { %5415 = vst [vmem:[#allocation4 + $0x70] sm:$0xff] %v5411_v8  ;;  %5416 = vst [vmem:[#allocation4 + $0x78] sm:$0xff] %v5412_v48  ;;  %5481 = vmatpush1.msra.mxu1 %v5432_v58 }
 0xd41   : > { %v5387_v5 = vpop.permute.xlu1 %5386  ;;  %v5366_v9 = vpop.permute.xlu0 %5365  ;;  %5482 = vmatprep.subr.mxu1 %v5412_v48 }
 0xd42   : > { %v5390_v7 = vsel %vm9925_vm11, %v5385_v57, %v5387_v5  ;;  %v5391_v59 = vsel %vm9926_vm13, %v5387_v5, %v5389_v63  ;;  %v5369_v33 = vsel %vm2386_vm8, %v5364_v56, %v5366_v9  ;;  %v5370_v13 = vsel %vm2386_vm8, %v5366_v9, %v5368_v55  ;;  %5483 = vmatpush1.msra.mxu1 %v5411_v8  ;;  %vm9944_vm13 = vmmov %vm9943_vm7 }
 0xd43   : > { %5394 = vst [vmem:[#allocation4 + $0x60] sm:$0xff] %v5390_v7  ;;  %5395 = vst [vmem:[#allocation4 + $0x68] sm:$0xff] %v5391_v59  ;;  %5484 = vmatprep.subr.mxu1 %v5391_v59  ;;  %vm5748_vm11 = vcmask 1047688  }
 0xd44   : > { %5373 = vst [vmem:[#allocation4 + $0x50] sm:$0xff] %v5369_v33  ;;  %5374 = vst [vmem:[#allocation4 + $0x58] sm:$0xff] %v5370_v13  ;;  %5485 = vmatpush1.msra.mxu1 %v5390_v7 }
 0xd45   : > { %v5345_v12 = vpop.permute.xlu1 %5344  ;;  %v5324_v22 = vpop.permute.xlu0 %5323  ;;  %5486 = vmatprep.subr.mxu1 %v5370_v13 }
 0xd46   : > { %v5348_v30 = vsel %vm9927_vm14, %v5343_v40, %v5345_v12  ;;  %v5349_v4 = vsel %vm9928_vm5, %v5345_v12, %v5347_v3  ;;  %v5327_v46 = vsel %vm9929_vm10, %v5322_v6, %v5324_v22  ;;  %v5328_v18 = vsel %vm9930_vm3, %v5324_v22, %v5326_v10  ;;  %5487 = vmatpush1.msra.mxu1 %v5369_v33  ;;  %v5438_v3 = vld [vmem:[%s9936_s3] sm:$0xff]  ;;  %v9939_v40 = vld [vmem:[#allocation11_spill] sm:$0xff]  ;;  %vm9945_vm14 = vmmov %vm9943_vm7 }
 0xd47   : > { %5352 = vst [vmem:[#allocation4 + $0x40] sm:$0xff] %v5348_v30  ;;  %5353 = vst [vmem:[#allocation4 + $0x48] sm:$0xff] %v5349_v4  ;;  %5488 = vmatprep.subr.mxu1 %v5349_v4  ;;  %v9938_v10 = vmov 0.0   ;;  %v9941_v6 = vld [vmem:[#allocation23_spill] sm:$0xff]  ;;  %vm9946_vm5 = vcmask 785408   ;;  %vm9947_vm10 = vcmask 777216  }
 0xd48   : > { %5331 = vst [vmem:[#allocation4 + $0x30] sm:$0xff] %v5327_v46  ;;  %5332 = vst [vmem:[#allocation4 + $0x38] sm:$0xff] %v5328_v18  ;;  %5489 = vmatpush1.msra.mxu1 %v5348_v30 }
 0xd49   : > { %v5303_v26 = vpop.permute.xlu1 %5302  ;;  %v5282_v54 = vpop.permute.xlu0 %5281  ;;  %5490 = vmatprep.subr.mxu1 %v5328_v18  ;;  %vm9948_vm3 = vmmov %vm9946_vm5 }
 0xd4a   : > { %v5306_v0 = vsel %vm9931_vm1, %v5301_v24, %v5303_v26  ;;  %v5307_v15 = vsel %vm9932_vm9, %v5303_v26, %v5305_v61  ;;  %5491 = vmatpush1.msra.mxu1 %v5327_v46  ;;  %v9940_v24 = vld [vmem:[#allocation14_spill] sm:$0xff]  ;;  %vm9949_vm1 = vmmov %vm9947_vm10  ;;  %vm9950_vm9 = vcmask 908288  }
 0xd4b   : > { %5310 = vst [vmem:[#allocation4 + $0x20] sm:$0xff] %v5306_v0  ;;  %5311 = vst [vmem:[#allocation4 + $0x28] sm:$0xff] %v5307_v15  ;;  %5492 = vmatprep.subr.mxu1 %v5307_v15 }
 0xd4c   : > { %5493 = vmatpush1.msra.mxu1 %v5306_v0 }
 0xd4d   : > { %v5280_v21 = vpop.permute.xlu0 %5279  ;;  %v5284_v52 = vpop.permute.xlu1 %5283 }
 0xd4e   : > { %v5285_v63 = vsel %vm9934_vm4, %v5280_v21, %v5282_v54  ;;  %v5286_v55 = vsel %vm9935_vm2, %v5282_v54, %v5284_v52  ;;  %vm9951_vm4 = vmmov %vm9950_vm9 }
 0xd4f   : > { %5289 = vst [vmem:[#allocation4 + $0x10] sm:$0xff] %v5285_v63  ;;  %5290 = vst [vmem:[#allocation4 + $0x18] sm:$0xff] %v5286_v55  ;;  %5494 = vmatprep.subr.mxu1 %v5286_v55 }
 0xd50   : > { %5495 = vmatpush1.msra.mxu1 %v5285_v63  ;;  %vm9953_vm2 = vmmov %vm9949_vm1 }
 0xd51   : > { %5496 = vmatprep.subr.mxu1 %v8914_v35 }
 0xd52   : > { %5497 = vmatpush1.msra.mxu1 %v8922_v25  ;;  %v9942_v25 = vld [vmem:[#allocation24_spill] sm:$0xff] }
 0xd53   : > { %6814 = vmatmul.mubr.msk.f32.vlgmr.msra.gmra.mxu1 %vm3807_vm15, %v5438_v3  ;;  %vm5547_vm15 = vcmask 1043592  }
 0xd54   : > { %6624 = vmatprep.mubr.f32.mxu1 %v9938_v10 }
 0xd5a   : > { %v3400_v61 = vpop.permute.xlu0 %3399  ;;  %v2533_v57 = vpop.permute.xlu1 %2532 }
 0xd5b   : > { %v3478_v56 = vadd.f32 %v9939_v40, %v3400_v61  ;;  %v3480_v35 = vadd.f32 %v9940_v24, %v3400_v61  ;;  %v2611_v49 = vadd.f32 %v9941_v6, %v2533_v57  ;;  %v2613_v11 = vadd.f32 %v9942_v25, %v2533_v57 }
 0xd5d   : > { %v3482_v58 = vmul.f32 %v3478_v56, %v2611_v49  ;;  %v3483_v47 = vmul.f32 %v3480_v35, %v2613_v11 }
 0xd5e   : > { %v5461_v5 = vpop.permute.xlu1 %5460 }
 0xd5f   : > { %v3488_v8 = vmul.f32 %v3485_v62, %v3483_v47  ;;  %v3487_v48 = vmul.f32 %v3482_v58, %v868_v43 }
 0xd61   : > { %5541 = vrot.lane.b32.xlu1 %v3488_v8, %s9684_s1  ;;  %5539 = vrot.lane.b32.xlu0 %v3487_v48, %s9684_s1 }
 0xdd3   : > { %v5540_v9 = vpop.permute.xlu0 %5539  ;;  %v5542_v7 = vpop.permute.xlu1 %5541 }
 0xdd4   : > { %5548 = vst.msk [vmem:[#allocation3] sm:$0xf] %vm5547_vm15, %v5540_v9  ;;  %v5543_v59 = vsel %vm9943_vm7, %v5540_v9, %v5542_v7  ;;  %vm9954_vm7 = vmmov %vm9949_vm1 }
 0xdd5   : > { %5551 = vst.msk [vmem:[#allocation3 + $0x10] sm:$0xf] %vm5550_vm12, %v5542_v7  ;;  %5549 = vst [vmem:[#allocation3 + $0x8] sm:$0xf] %v5543_v59 }
 0xddb   : > { %v5552_v33 = vld [vmem:[#allocation3] sm:$0xf] }
 0xddc   : > { %v5553_v13 = vld [vmem:[#allocation3 + $0x8] sm:$0xf]  ;;  %v5554_v12 = vmul.f32 %v5552_v33, %v7881_v28  ;;  %v5719_v54 = vld [vmem:[#allocation3 + $0x10] sm:$0xf]  ;;  %v5717_v15 = vld [vmem:[#allocation3] sm:$0xf] }
 0xddd   : > { %v5555_v22 = vmul.f32 %v5553_v13, %v7871_v20  ;;  %v5718_v18 = vld [vmem:[#allocation3 + $0x8] sm:$0xf]  ;;  %v5722_v21 = vmul.f32 %v5719_v54, %v7836_v53  ;;  %v5720_v55 = vmul.f32 %v5717_v15, %v7834_v34  ;;  %v5674_v3 = vld [vmem:[#allocation3 + $0x10] sm:$0xf]  ;;  %v5693_v56 = vld [vmem:[#allocation3] sm:$0xf] }
 0xdde   : > { %5556 = vst [vmem:[#allocation4] sm:$0xf] %v5554_v12  ;;  %v5721_v0 = vmul.f32 %v5718_v18, %v9910_v42  ;;  %v5673_v52 = vld [vmem:[#allocation3 + $0x8] sm:$0xf]  ;;  %v5695_v43 = vld [vmem:[#allocation3 + $0x10] sm:$0xf]  ;;  %v5677_v62 = vmul.f32 %v5674_v3, %v7844_v51  ;;  %v5696_v49 = vmul.f32 %v5693_v56, %v7830_v29 }
 0xddf   : > { %5557 = vst [vmem:[#allocation4 + $0x8] sm:$0xf] %v5555_v22  ;;  %v5694_v63 = vld [vmem:[#allocation3 + $0x8] sm:$0xf]  ;;  %v5676_v61 = vmul.f32 %v5673_v52, %v9912_v45  ;;  %v5698_v40 = vmul.f32 %v5695_v43, %v7832_v31  ;;  %v5672_v35 = vld [vmem:[#allocation3] sm:$0xf] }
 0xde0   : > { %v5697_v57 = vmul.f32 %v5694_v63, %v9911_v19  ;;  %v5675_v25 = vmul.f32 %v5672_v35, %v7856_v2  ;;  %v5628_v11 = vld [vmem:[#allocation3 + $0x8] sm:$0xf]  ;;  %v5702_v47 = vrot.slane %v5696_v49, 4  ;;  %v5629_v8 = vld [vmem:[#allocation3 + $0x10] sm:$0xf] }
 0xde1   : > { %v5704_v6 = vrot.slane %v5698_v40, 4  ;;  %v5649_v58 = vld [vmem:[#allocation3 + $0x8] sm:$0xf]  ;;  %v5650_v48 = vld [vmem:[#allocation3 + $0x10] sm:$0xf]  ;;  %v5632_v7 = vmul.f32 %v5629_v8, %v9772_v60 }
 0xde2   : > { %v5703_v24 = vrot.slane %v5697_v57, 4  ;;  %v5652_v9 = vmul.f32 %v5649_v58, %v9913_v36  ;;  %v5653_v59 = vmul.f32 %v5650_v48, %v7840_v38  ;;  %v5648_v33 = vld [vmem:[#allocation3] sm:$0xf]  ;;  %v9059_v52 = vld [vmem:[#allocation3 + $0x10] sm:$0xf] }
 0xde3   : > { %v5627_v12 = vld [vmem:[#allocation3] sm:$0xf]  ;;  %v9061_v63 = vld [vmem:[#allocation3 + $0x10] sm:$0xf] }
 0xde4   : > { %v5658_v13 = vrot.slane %v5652_v9, 4  ;;  %v5659_v22 = vrot.slane %v5653_v59, 4  ;;  %v9052_v54 = vld [vmem:[#allocation3] sm:$0xf] }
 0xde5   : > { %v9056_v15 = vld [vmem:[#allocation3] sm:$0xf] }
 0xe13   : > { %v5532_v30 = vpop.f32.mrf.mxu1 }
 0xe14   : > { %v5533_v4 = vadd.f32 %v5532_v30, %v5461_v5  ;;  %v5651_v30 = vmul.f32 %v5648_v33, %v7838_v37 }
 0xe15   : > { %v5534_v46 = vpop.f32.mrf.mxu1 }
 0xe16   : > { %v5535_v26 = vadd.f32 %v5534_v46, %v5461_v5  ;;  %5740 = vrot.lane.b32.xlu0 %v5533_v4, %s9684_s1  ;;  %v5631_v5 = vmul.f32 %v5628_v11, %v9914_v23  ;;  %v5630_v4 = vmul.f32 %v5627_v12, %v7876_v16  ;;  %v5583_v46 = vld [vmem:[#allocation3 + $0x8] sm:$0xf]  ;;  %v5657_v18 = vrot.slane %v5651_v30, 4 }
 0xe18   : > { %5742 = vrot.lane.b32.xlu1 %v5535_v26, %s9684_s1  ;;  %v5586_v26 = vmul.f32 %v5583_v46, %v9916_v1 }
 0xe1a   : > { %5728 = vrot.lane.b32.xlu0 %v5721_v0, %s9715_s28  ;;  %v9054_v0 = vld [vmem:[#allocation3] sm:$0xf] }
 0xe1c   : > { %5730 = vrot.lane.b32.xlu1 %v5722_v21, %s9715_s28 }
 0xe1e   : > { %5726 = vrot.lane.b32.xlu0 %v5720_v55, %s9715_s28  ;;  %v9063_v55 = vld [vmem:[#allocation3 + $0x10] sm:$0xf] }
 0xe20   : > { %5683 = vrot.lane.b32.xlu1 %v5676_v61, %s9744_s12 }
 0xe22   : > { %5685 = vrot.lane.b32.xlu0 %v5677_v62, %s9744_s12 }
 0xe24   : > { %5707 = vrot.lane.b32.xlu1 %v5703_v24, %s9718_s0 }
 0xe26   : > { %5709 = vrot.lane.b32.xlu0 %v5704_v6, %s9718_s0 }
 0xe28   : > { %5681 = vrot.lane.b32.xlu1 %v5675_v25, %s9744_s12 }
 0xe2a   : > { %5705 = vrot.lane.b32.xlu0 %v5702_v47, %s9718_s0 }
 0xe2c   : > { %5638 = vrot.lane.b32.xlu1 %v5631_v5, %s9704_s2 }
 0xe2e   : > { %5640 = vrot.lane.b32.xlu0 %v5632_v7, %s9704_s2 }
 0xe30   : > { %5662 = vrot.lane.b32.xlu1 %v5658_v13, %s9710_s29 }
 0xe32   : > { %5664 = vrot.lane.b32.xlu0 %v5659_v22, %s9710_s29 }
 0xe34   : > { %5636 = vrot.lane.b32.xlu1 %v5630_v4, %s9704_s2 }
 0xe36   : > { %5660 = vrot.lane.b32.xlu0 %v5657_v18, %s9710_s29 }
 0xe38   : > { %5593 = vrot.lane.b32.xlu1 %v5586_v26, %s9707_s9 }
 0xe88   : > { %v5741_v21 = vpop.permute.xlu0 %5740 }
 0xe89   : > { %5749 = vst.msk [vmem:[#allocation3] sm:$0xff] %vm5748_vm11, %v5741_v21 }
 0xe8a   : > { %v5743_v3 = vpop.permute.xlu1 %5742 }
 0xe8b   : > { %5751 = vst.msk [vmem:[#allocation3 + $0x10] sm:$0xff] %vm9944_vm13, %v5743_v3  ;;  %v9071_v6 = vsel %vm9945_vm14, %v5741_v21, %v5743_v3  ;;  %vm9955_vm13 = vmmov %vm9948_vm3 }
 0xe8c   : > { %v5729_v43 = vpop.permute.xlu0 %5728  ;;  %v5755_v5 = vmul.f32 %v9071_v6, %v7871_v20  ;;  %vm9956_vm14 = vmmov %vm9948_vm3 }
 0xe8e   : > { %v5731_v61 = vpop.permute.xlu1 %5730  ;;  %v5759_v30 = vrot.slane %v5755_v5, 4 }
 0xe8f   : > { %v5733_v57 = vsel %vm2511_vm6, %v5729_v43, %v5731_v61 }
 0xe90   : > { %5737 = vst [vmem:[#allocation4 + $0x48] sm:$0xf] %v5733_v57  ;;  %v5727_v62 = vpop.permute.xlu0 %5726  ;;  %v5948_v40 = vld [vmem:[#allocation3] sm:$0xff]  ;;  %5765 = vst [vmem:[#allocation4 + $0x58] ss:$-12 sps:$4 sm:$0xff] %v5759_v30  }
 0xe91   : > { %v5732_v56 = vsel %vm2511_vm6, %v5727_v62, %v5729_v43  ;;  %v5951_v24 = vmul.f32 %v5948_v40, %v7834_v34  ;;  %v5925_v35 = vmul.f32 %v5948_v40, %v7830_v29  ;;  %v5899_v58 = vmul.f32 %v5948_v40, %v7856_v2 }
 0xe92   : > { %5736 = vst [vmem:[#allocation4 + $0x40] sm:$0xf] %v5732_v56  ;;  %v5684_v49 = vpop.permute.xlu1 %5683  ;;  %v5873_v47 = vmul.f32 %v5948_v40, %v7838_v37  ;;  %v5847_v33 = vmul.f32 %v5948_v40, %v7876_v16  ;;  %v5821_v13 = vmul.f32 %v5948_v40, %v9909_v32  ;;  %v5795_v46 = vmul.f32 %v5948_v40, %v7895_v44  ;;  %v5950_v57 = vld [vmem:[#allocation3 + $0x10] sm:$0xff] }
 0xe93   : > { %v5957_v25 = vrot.slane %v5951_v24, 4  ;;  %v5931_v11 = vrot.slane %v5925_v35, 4  ;;  %v5905_v7 = vrot.slane %v5899_v58, 4  ;;  %v5754_v18 = vmul.f32 %v5948_v40, %v7881_v28 }
 0xe94   : > { %v5686_v8 = vpop.permute.xlu0 %5685  ;;  %v5879_v59 = vrot.slane %v5873_v47, 4  ;;  %v5853_v21 = vrot.slane %v5847_v33, 4  ;;  %v5827_v3 = vrot.slane %v5821_v13, 4  ;;  %v5769_v43 = vmul.f32 %v5948_v40, %v9918_v39 }
 0xe95   : > { %v5688_v48 = vsel %vm9946_vm5, %v5684_v49, %v5686_v8  ;;  %5960 = vrot.lane.b32.xlu0 %v5957_v25, %s9715_s28  ;;  %5934 = vrot.lane.b32.xlu1 %v5931_v11, %s9718_s0  ;;  %v5758_v62 = vrot.slane %v5754_v18, 4  ;;  %v5801_v35 = vrot.slane %v5795_v46, 4  ;;  %v5953_v25 = vmul.f32 %v5950_v57, %v7836_v53  ;;  %vm9957_vm5 = vmmov %vm9951_vm4 }
 0xe96   : > { %5692 = vst [vmem:[#allocation4 + $0x38] sm:$0xf] %v5688_v48  ;;  %v5708_v9 = vpop.permute.xlu1 %5707  ;;  %v5927_v40 = vmul.f32 %v5950_v57, %v7832_v31  ;;  %v5901_v5 = vmul.f32 %v5950_v57, %v7844_v51  ;;  %v5849_v13 = vmul.f32 %v5950_v57, %v9772_v60 }
 0xe97   : > { %5764 = vst [vmem:[#allocation4 + $0x50] ss:$-12 sps:$4 sm:$0xff] %v5758_v62   ;;  %v5959_v8 = vrot.slane %v5953_v25, 4  ;;  %v5874_v25 = vmul.f32 %v9071_v6, %v9913_v36 }
 0xe98   : > { %v5710_v12 = vpop.permute.xlu0 %5709  ;;  %v5933_v48 = vrot.slane %v5927_v40, 4 }
 0xe99   : > { %v5712_v22 = vsel %vm9947_vm10, %v5708_v9, %v5710_v12  ;;  %5908 = vrot.lane.b32.xlu0 %v5905_v7, %s9744_s12  ;;  %5882 = vrot.lane.b32.xlu1 %v5879_v59, %s9710_s29  ;;  %vm9958_vm10 = vmmov %vm9951_vm4 }
 0xe9a   : > { %5716 = vst [vmem:[#allocation4 + $0x38] sm:$0xf0] %v5712_v22  ;;  %v5682_v4 = vpop.permute.xlu1 %5681  ;;  %v5907_v22 = vrot.slane %v5901_v5, 4  ;;  %v5796_v5 = vmul.f32 %v9071_v6, %v9916_v1 }
 0xe9b   : > { %v5687_v26 = vsel %vm9948_vm3, %v5682_v4, %v5684_v49  ;;  %v5775_v49 = vrot.slane %v5769_v43, 4  ;;  %v5823_v4 = vmul.f32 %v5950_v57, %v7874_v50  ;;  %v5771_v43 = vmul.f32 %v5950_v57, %v9919_v17 }
 0xe9c   : > { %5691 = vst [vmem:[#allocation4 + $0x30] sm:$0xf] %v5687_v26  ;;  %v5706_v61 = vpop.permute.xlu0 %5705  ;;  %v5855_v26 = vrot.slane %v5849_v13, 4  ;;  %vm9959_vm3 = vcmask 916480  }
 0xe9d   : > { %v5711_v56 = vsel %vm9949_vm1, %v5706_v61, %v5708_v9  ;;  %5856 = vrot.lane.b32.xlu0 %v5853_v21, %s9704_s2  ;;  %5830 = vrot.lane.b32.xlu1 %v5827_v3, %s9713_s30  ;;  %v5875_v9 = vmul.f32 %v5950_v57, %v7840_v38  ;;  %v5829_v21 = vrot.slane %v5823_v4, 4  ;;  %v5797_v3 = vmul.f32 %v5950_v57, %v9773_v41  ;;  %vm9960_vm1 = vmmov %vm9959_vm3 }
 0xe9e   : > { %5715 = vst [vmem:[#allocation4 + $0x30] sm:$0xf0] %v5711_v56  ;;  %v5639_v24 = vpop.permute.xlu1 %5638  ;;  %v5777_v62 = vrot.slane %v5771_v43, 4  ;;  %v5952_v56 = vmul.f32 %v9071_v6, %v9910_v42  ;;  %v5900_v57 = vmul.f32 %v9071_v6, %v9912_v45  ;;  %v6005_v43 = vld [vmem:[%s9952_s13 + $0x8] sm:$0xf] }
 0xe9f   : > { %v5881_v30 = vrot.slane %v5875_v9, 4  ;;  %v5803_v61 = vrot.slane %v5797_v3, 4  ;;  %v5770_v9 = vmul.f32 %v9071_v6, %v9917_v14  ;;  %v5561_v3 = vmul.f32 %v9052_v54, %v9918_v39 }
 0xea0   : > { %v5641_v11 = vpop.permute.xlu0 %5640  ;;  %v5906_v40 = vrot.slane %v5900_v57, 4 }
 0xea1   : > { %v5643_v58 = vsel %vm9950_vm9, %v5639_v24, %v5641_v11  ;;  %5804 = vrot.lane.b32.xlu0 %v5801_v35, %s9707_s9  ;;  %5778 = vrot.lane.b32.xlu1 %v5775_v49, %s9720_s5  ;;  %v5958_v35 = vrot.slane %v5952_v56, 4  ;;  %v5880_v11 = vrot.slane %v5874_v25, 4  ;;  %vm9961_vm9 = vcmask 1031168  }
 0xea2   : > { %5647 = vst [vmem:[#allocation4 + $0x28] sm:$0xf] %v5643_v58  ;;  %v5663_v47 = vpop.permute.xlu1 %5662  ;;  %v5848_v58 = vmul.f32 %v9071_v6, %v9914_v23 }
 0xea4   : > { %v5665_v7 = vpop.permute.xlu0 %5664 }
 0xea5   : > { %v5667_v59 = vsel %vm2386_vm8, %v5663_v47, %v5665_v7  ;;  %5964 = vrot.lane.b32.xlu1 %v5959_v8, %s9715_s28  ;;  %5938 = vrot.lane.b32.xlu0 %v5933_v48, %s9718_s0  ;;  %v5854_v8 = vrot.slane %v5848_v58, 4  ;;  %v5604_v7 = vld [vmem:[#allocation3 + $0x8] sm:$0xf] }
 0xea6   : > { %5671 = vst [vmem:[#allocation4 + $0x28] sm:$0xf0] %v5667_v59  ;;  %v5637_v33 = vpop.permute.xlu1 %5636  ;;  %v5802_v59 = vrot.slane %v5796_v5, 4  ;;  %v5607_v13 = vmul.f32 %v5604_v7, %v9915_v27 }
 0xea7   : > { %v5642_v12 = vsel %vm9951_vm4, %v5637_v33, %v5639_v24  ;;  %v5926_v24 = vmul.f32 %v9071_v6, %v9911_v19  ;;  %v5776_v33 = vrot.slane %v5770_v9, 4  ;;  %vm9962_vm4 = vmmov %vm9961_vm9 }
 0xea8   : > { %5646 = vst [vmem:[#allocation4 + $0x20] sm:$0xf] %v5642_v12  ;;  %v5661_v46 = vpop.permute.xlu0 %5660  ;;  %v5587_v12 = vmul.f32 %v9061_v63, %v9773_v41 }
 0xea9   : > { %v5666_v18 = vsel %vm2386_vm8, %v5661_v46, %v5663_v47  ;;  %5912 = vrot.lane.b32.xlu1 %v5907_v22, %s9744_s12  ;;  %5886 = vrot.lane.b32.xlu0 %v5881_v30, %s9710_s29  ;;  %v5932_v49 = vrot.slane %v5926_v24, 4  ;;  %v5822_v47 = vmul.f32 %v9071_v6, %v9915_v27  ;;  %v5613_v22 = vrot.slane %v5607_v13, 4  ;;  %v5559_v30 = vld [vmem:[#allocation3 + $0x8] sm:$0xf] }
 0xeaa   : > { %5670 = vst [vmem:[#allocation4 + $0x20] sm:$0xf0] %v5666_v18  ;;  %v5608_v6 = vmul.f32 %v9063_v55, %v7874_v50  ;;  %v5585_v46 = vmul.f32 %v9054_v0, %v7895_v44  ;;  %v5606_v18 = vmul.f32 %v9056_v15, %v9909_v32  ;;  %v5567_v15 = vrot.slane %v5561_v3, 4  ;;  %v9166_v54 = vpop.permute.xlu1 %5593 }
 0xeab   : > { %v5828_v48 = vrot.slane %v5822_v47, 4 }
 0xeac   : > { %v5614_v4 = vrot.slane %v5608_v6, 4  ;;  %v5612_v63 = vrot.slane %v5606_v18, 4 }
 0xead   : > { %5860 = vrot.lane.b32.xlu1 %v5855_v26, %s9704_s2  ;;  %5834 = vrot.lane.b32.xlu0 %v5829_v21, %s9713_s30  ;;  %v5562_v26 = vmul.f32 %v5559_v30, %v9917_v14  ;;  %v5563_v21 = vmul.f32 %v9059_v52, %v9919_v17  ;;  %v6004_v52 = vld [vmem:[%s9952_s13] sm:$0xff] }
 0xeaf   : > { %v5568_v55 = vrot.slane %v5562_v26, 4  ;;  %v5569_v0 = vrot.slane %v5563_v21, 4 }
 0xeb1   : > { %5808 = vrot.lane.b32.xlu1 %v5803_v61, %s9707_s9  ;;  %5782 = vrot.lane.b32.xlu0 %v5777_v62, %s9720_s5 }
 0xeb5   : > { %5962 = vrot.lane.b32.xlu0 %v5958_v35, %s9715_s28  ;;  %5936 = vrot.lane.b32.xlu1 %v5932_v49, %s9718_s0 }
 0xeb9   : > { %5910 = vrot.lane.b32.xlu0 %v5906_v40, %s9744_s12  ;;  %5884 = vrot.lane.b32.xlu1 %v5880_v11, %s9710_s29 }
 0xebd   : > { %5858 = vrot.lane.b32.xlu0 %v5854_v8, %s9704_s2  ;;  %5832 = vrot.lane.b32.xlu1 %v5828_v48, %s9713_s30 }
 0xec1   : > { %5806 = vrot.lane.b32.xlu0 %v5802_v59, %s9707_s9  ;;  %5780 = vrot.lane.b32.xlu1 %v5776_v33, %s9720_s5 }
 0xec5   : > { %5595 = vrot.lane.b32.xlu0 %v5587_v12, %s9707_s9  ;;  %5617 = vrot.lane.b32.xlu1 %v5613_v22, %s9713_s30 }
 0xec9   : > { %5619 = vrot.lane.b32.xlu0 %v5614_v4, %s9713_s30  ;;  %5591 = vrot.lane.b32.xlu1 %v5585_v46, %s9707_s9 }
 0xecd   : > { %5615 = vrot.lane.b32.xlu0 %v5612_v63, %s9713_s30  ;;  %5572 = vrot.lane.b32.xlu1 %v5568_v55, %s9720_s5 }
 0xed1   : > { %5574 = vrot.lane.b32.xlu0 %v5569_v0, %s9720_s5  ;;  %5570 = vrot.lane.b32.xlu1 %v5567_v15, %s9720_s5 }
 0xed5   : > { %6013 = vperm.xlu0 %7156, %v6005_v43   ;;  %6008 = vperm.xlu1 %7157, %v6004_v52  }
 0xf07   : > { %v5961_v61 = vpop.permute.xlu0 %5960  ;;  %v5935_v62 = vpop.permute.xlu1 %5934 }
 0xf0b   : > { %v5909_v56 = vpop.permute.xlu0 %5908  ;;  %v5883_v24 = vpop.permute.xlu1 %5882 }
 0xf0f   : > { %v5857_v35 = vpop.permute.xlu0 %5856  ;;  %v5831_v49 = vpop.permute.xlu1 %5830 }
 0xf13   : > { %v5805_v57 = vpop.permute.xlu0 %5804  ;;  %v5779_v25 = vpop.permute.xlu1 %5778 }
 0xf17   : > { %v5939_v40 = vpop.permute.xlu0 %5938  ;;  %v5965_v11 = vpop.permute.xlu1 %5964 }
 0xf1b   : > { %v5887_v58 = vpop.permute.xlu0 %5886  ;;  %v5913_v47 = vpop.permute.xlu1 %5912 }
 0xf1f   : > { %v5835_v8 = vpop.permute.xlu0 %5834  ;;  %v5861_v48 = vpop.permute.xlu1 %5860 }
 0xf23   : > { %v5783_v5 = vpop.permute.xlu0 %5782  ;;  %v5809_v9 = vpop.permute.xlu1 %5808 }
 0xf27   : > { %v5963_v7 = vpop.permute.xlu0 %5962  ;;  %v5937_v59 = vpop.permute.xlu1 %5936 }
 0xf28   : > { %v5966_v33 = vsel %vm2511_vm6, %v5961_v61, %v5963_v7  ;;  %v5967_v13 = vsel %vm2511_vm6, %v5963_v7, %v5965_v11  ;;  %v5940_v12 = vsel %vm9953_vm2, %v5935_v62, %v5937_v59  ;;  %v5941_v22 = vsel %vm9954_vm7, %v5937_v59, %v5939_v40 }
 0xf29   : > { %5970 = vst [vmem:[#allocation4 + $0xd0] ss:$-12 sps:$4 sm:$0xff] %v5966_v33   ;;  %5971 = vst [vmem:[#allocation4 + $0xd8] ss:$-12 sps:$4 sm:$0xff] %v5967_v13   ;;  %vm9963_vm2 = vcmask 1039360  }
 0xf2a   : > { %5944 = vst [vmem:[#allocation4 + $0xc0] ss:$-12 sps:$4 sm:$0xff] %v5940_v12   ;;  %5945 = vst [vmem:[#allocation4 + $0xc8] ss:$-12 sps:$4 sm:$0xff] %v5941_v22  }
 0xf2b   : > { %v5911_v6 = vpop.permute.xlu0 %5910  ;;  %v5885_v30 = vpop.permute.xlu1 %5884  ;;  %vm9964_vm7 = vmmov %vm9963_vm2 }
 0xf2c   : > { %v5914_v4 = vsel %vm9955_vm13, %v5909_v56, %v5911_v6  ;;  %v5915_v46 = vsel %vm9956_vm14, %v5911_v6, %v5913_v47  ;;  %v5888_v18 = vsel %vm2386_vm8, %v5883_v24, %v5885_v30  ;;  %v5889_v26 = vsel %vm2386_vm8, %v5885_v30, %v5887_v58  ;;  %vm9965_vm13 = vmmov %vm9962_vm4 }
 0xf2d   : > { %5918 = vst [vmem:[#allocation4 + $0xb0] ss:$-12 sps:$4 sm:$0xff] %v5914_v4   ;;  %5919 = vst [vmem:[#allocation4 + $0xb8] ss:$-12 sps:$4 sm:$0xff] %v5915_v46  }
 0xf2e   : > { %5892 = vst [vmem:[#allocation4 + $0xa0] ss:$-12 sps:$4 sm:$0xff] %v5888_v18   ;;  %5893 = vst [vmem:[#allocation4 + $0xa8] ss:$-12 sps:$4 sm:$0xff] %v5889_v26  }
 0xf2f   : > { %v5859_v63 = vpop.permute.xlu0 %5858  ;;  %v5833_v55 = vpop.permute.xlu1 %5832  ;;  %vm9966_vm14 = vmmov %vm9960_vm1 }
 0xf30   : > { %v5862_v21 = vsel %vm9957_vm5, %v5857_v35, %v5859_v63  ;;  %v5863_v3 = vsel %vm9958_vm10, %v5859_v63, %v5861_v48  ;;  %v5836_v0 = vsel %vm9959_vm3, %v5831_v49, %v5833_v55  ;;  %v5837_v15 = vsel %vm9960_vm1, %v5833_v55, %v5835_v8  ;;  %v6003_v43 = vld [vmem:[#allocation4 + $0xd8] sm:$0xf]  ;;  %v6002_v52 = vld [vmem:[#allocation4 + $0xd0] sm:$0xf]  ;;  %vm9967_vm5 = vmmov %vm9962_vm4 }
 0xf31   : > { %5866 = vst [vmem:[#allocation4 + $0x90] ss:$-12 sps:$4 sm:$0xff] %v5862_v21   ;;  %5867 = vst [vmem:[#allocation4 + $0x98] ss:$-12 sps:$4 sm:$0xff] %v5863_v3   ;;  %6815 = vmatprep.subr.msk.mxu0 %vm888_vm0, %v6003_v43  ;;  %v6001_v61 = vld [vmem:[#allocation4 + $0xc8] sm:$0xff]  ;;  %v6000_v24 = vld [vmem:[#allocation4 + $0xc0] sm:$0xff] }
 0xf32   : > { %5840 = vst [vmem:[#allocation4 + $0x80] ss:$-12 sps:$4 sm:$0xff] %v5836_v0   ;;  %5841 = vst [vmem:[#allocation4 + $0x88] ss:$-12 sps:$4 sm:$0xff] %v5837_v15   ;;  %6816 = vmatpush1.msk.msra.mxu0 %vm888_vm0, %v6002_v52  ;;  %v5984_v43 = vld [vmem:[#allocation4 + $0x40] sm:$0xff] }
 0xf33   : > { %v5807_v62 = vpop.permute.xlu0 %5806  ;;  %6035 = vmatprep.subr.mxu0 %v6001_v61  ;;  %v5781_v56 = vpop.permute.xlu1 %5780  ;;  %vm9968_vm10 = vmmov %vm9960_vm1 }
 0xf34   : > { %v5810_v35 = vsel %vm9961_vm9, %v5805_v57, %v5807_v62  ;;  %v5811_v49 = vsel %vm9962_vm4, %v5807_v62, %v5809_v9  ;;  %v5784_v40 = vsel %vm9963_vm2, %v5779_v25, %v5781_v56  ;;  %v5785_v11 = vsel %vm9964_vm7, %v5781_v56, %v5783_v5  ;;  %6036 = vmatpush1.msra.mxu0 %v6000_v24  ;;  %v5999_v58 = vld [vmem:[#allocation4 + $0xb8] sm:$0xff]  ;;  %v5998_v47 = vld [vmem:[#allocation4 + $0xb0] sm:$0xff]  ;;  %vm9969_vm3 = vmmov %vm9963_vm2 }
 0xf35   : > { %5814 = vst [vmem:[#allocation4 + $0x70] ss:$-12 sps:$4 sm:$0xff] %v5810_v35   ;;  %5815 = vst [vmem:[#allocation4 + $0x78] ss:$-12 sps:$4 sm:$0xff] %v5811_v49   ;;  %6037 = vmatprep.subr.mxu0 %v5999_v58  ;;  %v5997_v8 = vld [vmem:[#allocation4 + $0xa8] sm:$0xff]  ;;  %v5996_v57 = vld [vmem:[#allocation4 + $0xa0] sm:$0xff] }
 0xf36   : > { %5788 = vst [vmem:[#allocation4 + $0x60] ss:$-12 sps:$4 sm:$0xff] %v5784_v40   ;;  %5789 = vst [vmem:[#allocation4 + $0x68] ss:$-12 sps:$4 sm:$0xff] %v5785_v11   ;;  %6038 = vmatpush1.msra.mxu0 %v5998_v47  ;;  %v5983_v62 = vld [vmem:[#allocation4 + $0x38] sm:$0xff]  ;;  %v5982_v56 = vld [vmem:[#allocation4 + $0x30] sm:$0xff] }
 0xf37   : > { %v5596_v48 = vpop.permute.xlu0 %5595  ;;  %6039 = vmatprep.subr.mxu0 %v5997_v8  ;;  %v5618_v7 = vpop.permute.xlu1 %5617  ;;  %vm9970_vm1 = vmmov %vm9963_vm2  ;;  %v5981_v24 = vld [vmem:[#allocation4 + $0x28] sm:$0xff]  ;;  %v5980_v35 = vld [vmem:[#allocation4 + $0x20] sm:$0xff]  ;;  %vm6016_vm9 = vcmask 883712   ;;  %vm857_vm4 = vcmask 273408   ;;  %vm9972_vm2 = vcmask 138240  }
 0xf38   : > { %v5598_v9 = vsel %vm9965_vm13, %v9166_v54, %v5596_v48  ;;  %6040 = vmatpush1.msra.mxu0 %v5996_v57  ;;  %v5995_v25 = vld [vmem:[#allocation4 + $0x98] sm:$0xff]  ;;  %v5994_v5 = vld [vmem:[#allocation4 + $0x90] sm:$0xff]  ;;  %858 = vst.msk [vmem:[#allocation3 + $0x28] sm:$0xf] %vm857_vm4, %v9938_v10  ;;  %vm9973_vm7 = vmmov %vm9972_vm2 }
 0xf39   : > { %5602 = vst [vmem:[#allocation4 + $0x18] sm:$0xf] %v5598_v9  ;;  %6041 = vmatprep.subr.mxu0 %v5995_v25  ;;  %v5993_v59 = vld [vmem:[#allocation4 + $0x88] sm:$0xff]  ;;  %v5992_v12 = vld [vmem:[#allocation4 + $0x80] sm:$0xff]  ;;  %v5975_v8 = vld [vmem:[%s9971_s18 + $0x8] sm:$0xf] }
 0xf3a   : > { %6042 = vmatpush1.msra.mxu0 %v5994_v5  ;;  %v5974_v47 = vld [vmem:[%s9971_s18] sm:$0xff]  ;;  %vm9974_vm13 = vmmov %vm9972_vm2 }
 0xf3b   : > { %v5620_v33 = vpop.permute.xlu0 %5619  ;;  %6043 = vmatprep.subr.mxu0 %v5993_v59  ;;  %v5592_v13 = vpop.permute.xlu1 %5591 }
 0xf3c   : > { %v5622_v22 = vsel %vm9966_vm14, %v5618_v7, %v5620_v33  ;;  %v5597_v6 = vsel %vm9967_vm5, %v5592_v13, %v9166_v54  ;;  %6044 = vmatpush1.msra.mxu0 %v5992_v12  ;;  %v5991_v30 = vld [vmem:[#allocation4 + $0x78] sm:$0xff]  ;;  %v5990_v4 = vld [vmem:[#allocation4 + $0x70] sm:$0xff]  ;;  %v5985_v54 = vld [vmem:[#allocation4 + $0x48] sm:$0xff] }
 0xf3d   : > { %5626 = vst [vmem:[#allocation4 + $0x18] sm:$0xf0] %v5622_v22  ;;  %5601 = vst [vmem:[#allocation4 + $0x10] sm:$0xf] %v5597_v6  ;;  %6045 = vmatprep.subr.mxu0 %v5991_v30  ;;  %v5989_v46 = vld [vmem:[#allocation4 + $0x68] sm:$0xff]  ;;  %v5988_v63 = vld [vmem:[#allocation4 + $0x60] sm:$0xff] }
 0xf3e   : > { %6046 = vmatpush1.msra.mxu0 %v5990_v4  ;;  %v5987_v21 = vld [vmem:[#allocation4 + $0x58] sm:$0xff]  ;;  %v5986_v3 = vld [vmem:[#allocation4 + $0x50] sm:$0xff] }
 0xf3f   : > { %v5616_v18 = vpop.permute.xlu0 %5615  ;;  %6047 = vmatprep.subr.mxu0 %v5989_v46  ;;  %v5573_v26 = vpop.permute.xlu1 %5572 }
 0xf40   : > { %v5621_v55 = vsel %vm9968_vm10, %v5616_v18, %v5618_v7  ;;  %6048 = vmatpush1.msra.mxu0 %v5988_v63  ;;  %vm9980_vm10 = vcmask 777216  }
 0xf41   : > { %5625 = vst [vmem:[#allocation4 + $0x10] sm:$0xf0] %v5621_v55  ;;  %6049 = vmatprep.subr.mxu0 %v5987_v21 }
 0xf42   : > { %6050 = vmatpush1.msra.mxu0 %v5986_v3 }
 0xf43   : > { %v5575_v0 = vpop.permute.xlu0 %5574  ;;  %6051 = vmatprep.subr.mxu0 %v5985_v54  ;;  %v5571_v15 = vpop.permute.xlu1 %5570 }
 0xf44   : > { %v5577_v52 = vsel %vm9969_vm3, %v5573_v26, %v5575_v0  ;;  %v5576_v61 = vsel %vm9970_vm1, %v5571_v15, %v5573_v26  ;;  %6052 = vmatpush1.msra.mxu0 %v5984_v43  ;;  %v5979_v49 = vld [vmem:[#allocation4 + $0x18] sm:$0xff]  ;;  %vm9981_vm3 = vmmov %vm9980_vm10  ;;  %vm9982_vm1 = vcmask 916480  }
 0xf45   : > { %5581 = vst [vmem:[#allocation4 + $0x8] sm:$0xf0] %v5577_v52  ;;  %5580 = vst [vmem:[#allocation4] sm:$0xf0] %v5576_v61  ;;  %6053 = vmatprep.subr.mxu0 %v5983_v62 }
 0xf46   : > { %6054 = vmatpush1.msra.mxu0 %v5982_v56  ;;  %vm9983_vm4 = vmmov %vm9982_vm1 }
 0xf47   : > { %6055 = vmatprep.subr.mxu0 %v5981_v24 }
 0xf48   : > { %6056 = vmatpush1.msra.mxu0 %v5980_v35  ;;  %v5978_v40 = vld [vmem:[#allocation4 + $0x10] sm:$0xff] }
 0xf49   : > { %6057 = vmatprep.subr.mxu0 %v5979_v49 }
 0xf4a   : > { %6058 = vmatpush1.msra.mxu0 %v5978_v40 }
 0xf4c   : > { %v5977_v11 = vld [vmem:[#allocation4 + $0x8] sm:$0xff]  ;;  %v5976_v58 = vld [vmem:[#allocation4] sm:$0xff] }
 0xf4d   : > { %6059 = vmatprep.subr.mxu0 %v5977_v11 }
 0xf4e   : > { %6060 = vmatpush1.msra.mxu0 %v5976_v58 }
 0xf4f   : > { %6817 = vmatmul.mubr.msk.f32.vlgmr.msra.gmra.mxu0 %vm6016_vm9, %v5974_v47 }
 0xf50   : > { %6099 = vmatprep.mubr.f32.mxu0 %v9938_v10  ;;  %v6009_v48 = vpop.permute.xlu1 %6008  ;;  %v6014_v5 = vpop.permute.xlu0 %6013 }
 0xf53   : > { %6818 = vmatmul.mubr.msk.f32.gmra.mxu0 %vm6016_vm9, %v5975_v8 }
0x100f   : > { %v6095_v7 = vpop.f32.mrf.mxu0 }
0x1010   : > { %v6096_v57 = vadd.f32 %v6095_v7, %v6009_v48 }
0x1011   : > { %v6097_v9 = vpop.f32.mrf.mxu0 }
0x1012   : > { %v6098_v25 = vadd.f32 %v6097_v9, %v6009_v48  ;;  %6110 = vrot.lane.b32.xlu0 %v6096_v57, %s9684_s1 }
0x1013   : > { %v6101_v59 = vpop.f32.mrf.mxu0 }
0x1014   : > { %v6102_v33 = vadd.f32 %v6101_v59, %v6014_v5  ;;  %6112 = vrot.lane.b32.xlu1 %v6098_v25, %s9684_s1 }
0x1015   : > { %v6103_v13 = vpop.f32.mrf.mxu0 }
0x1016   : > { %v6104_v12 = vadd.f32 %v6103_v13, %v6014_v5  ;;  %6114 = vrot.lane.b32.xlu0 %v6102_v33, %s9684_s1 }
0x1018   : > { %6116 = vrot.lane.b32.xlu1 %v6104_v12, %s9684_s1 }
0x1084   : > { %v6111_v22 = vpop.permute.xlu0 %6110 }
0x1085   : > { %6126 = vst.msk [vmem:[#allocation3] sm:$0xff] %vm5748_vm11, %v6111_v22  ;;  %vm9978_vm11 = vcmask 908288  }
0x1086   : > { %v6113_v6 = vpop.permute.xlu1 %6112  ;;  %vm9979_vm14 = vmmov %vm9978_vm11 }
0x1087   : > { %v9210_v30 = vsel %vm9972_vm2, %v6111_v22, %v6113_v6  ;;  %6128 = vst.msk [vmem:[#allocation3 + $0x10] sm:$0xff] %vm9973_vm7, %v6113_v6 }
0x1088   : > { %6127 = vst [vmem:[#allocation3 + $0x8] sm:$0xff] %v9210_v30  ;;  %v6115_v4 = vpop.permute.xlu0 %6114  ;;  %v9217_v46 = vmul.f32 %v9210_v30, %v7871_v20  ;;  %v6388_v49 = vmul.f32 %v9210_v30, %v9912_v45  ;;  %v6295_v58 = vmul.f32 %v9210_v30, %v9914_v23  ;;  %v6202_v8 = vmul.f32 %v9210_v30, %v9916_v1 }
0x1089   : > { %6129 = vst.msk [vmem:[#allocation3 + $0x18] sm:$0xf] %vm5547_vm15, %v6115_v4  ;;  %v9311_v22 = vmul.f32 %v9210_v30, %v9911_v19  ;;  %vm9976_vm15 = vcmask 785408  }
0x108a   : > { %v6117_v10 = vpop.permute.xlu1 %6116  ;;  %6141 = vst [vmem:[#allocation4 + $0x8] sm:$0xff] %v9217_v46 }
0x108b   : > { %v6119_v18 = vsel %vm9974_vm13, %v6115_v4, %v6117_v10  ;;  %6131 = vst.msk [vmem:[#allocation3 + $0x28] sm:$0xf] %vm5550_vm12, %v6117_v10  ;;  %v6442_v4 = vrot.slane %v9311_v22, 4  ;;  %v9325_v10 = vmul.f32 %v9210_v30, %v9913_v36  ;;  %vm9977_vm12 = vmmov %vm9976_vm15 }
0x108c   : > { %6130 = vst [vmem:[#allocation3 + $0x20] sm:$0xf] %v6119_v18  ;;  %v9221_v26 = vld [vmem:[#allocation3] sm:$0xff]  ;;  %vm9984_vm2 = vmmov %vm9977_vm12 }
0x108d   : > { %v6480_v63 = vmul.f32 %v9221_v26, %v7834_v34  ;;  %v9233_v3 = vmul.f32 %v9221_v26, %v7830_v29  ;;  %v6387_v15 = vmul.f32 %v9221_v26, %v7856_v2  ;;  %v9244_v62 = vmul.f32 %v9221_v26, %v7881_v28  ;;  %vm9985_vm7 = vmmov %vm9984_vm2 }
0x108e   : > { %v9226_v55 = vld [vmem:[#allocation3 + $0x10] sm:$0xff]  ;;  %v6294_v56 = vmul.f32 %v9221_v26, %v7876_v16  ;;  %v9274_v11 = vmul.f32 %v9221_v26, %v9909_v32  ;;  %vm9986_vm13 = vmmov %vm9978_vm11 }
0x108f   : > { %6492 = vrot.lane.b32.xlu1 %v6480_v63, %s9715_s28  ;;  %v6482_v21 = vmul.f32 %v9226_v55, %v7836_v53  ;;  %v6441_v52 = vrot.slane %v9233_v3, 4  ;;  %6140 = vst [vmem:[#allocation4] sm:$0xff] %v9244_v62  ;;  %v6389_v24 = vmul.f32 %v9226_v55, %v7844_v51  ;;  %v6296_v40 = vmul.f32 %v9226_v55, %v9772_v60 }
0x1090   : > { %v6134_v54 = vld [vmem:[#allocation3 + $0x18] sm:$0xf]  ;;  %v6255_v47 = vrot.slane %v9274_v11, 4  ;;  %v6203_v7 = vmul.f32 %v9226_v55, %v9773_v41  ;;  %v9295_v59 = vmul.f32 %v9226_v55, %v7832_v31  ;;  %v9317_v6 = vmul.f32 %v9226_v55, %v7874_v50 }
0x1091   : > { %v6138_v0 = vmul.f32 %v6134_v54, %v7881_v28  ;;  %6496 = vrot.lane.b32.xlu0 %v6482_v21, %s9715_s28  ;;  %v6481_v28 = vmul.f32 %v9210_v30, %v9910_v42  ;;  %v6384_v48 = vld [vmem:[#allocation3 + $0x18] sm:$0xf]  ;;  %v6349_v21 = vrot.slane %v9325_v10, 4  ;;  %v9337_v54 = vmul.f32 %v9210_v30, %v9915_v27 }
0x1092   : > { %v6477_v57 = vld [vmem:[#allocation3 + $0x18] sm:$0xf]  ;;  %v6390_v9 = vmul.f32 %v6384_v48, %v7856_v2  ;;  %v6443_v12 = vrot.slane %v9295_v59, 4  ;;  %v9303_v2 = vmul.f32 %v9226_v55, %v7840_v38  ;;  %v6257_v18 = vrot.slane %v9317_v6, 4  ;;  %v6386_v63 = vld [vmem:[#allocation3 + $0x28] sm:$0xf] }
0x1093   : > { %6142 = vst [vmem:[#allocation4 + $0x10] sm:$0xf] %v6138_v0  ;;  %v6135_v43 = vld [vmem:[#allocation3 + $0x20] sm:$0xf]  ;;  %6399 = vrot.lane.b32.xlu1 %v6387_v15, %s9744_s12  ;;  %v6291_v25 = vld [vmem:[#allocation3 + $0x18] sm:$0xf]  ;;  %v6483_v5 = vmul.f32 %v6477_v57, %v7834_v34  ;;  %v6392_v0 = vmul.f32 %v6386_v63, %v7844_v51 }
0x1094   : > { %v6139_v61 = vmul.f32 %v6135_v43, %v7871_v20  ;;  %v9257_v20 = vmul.f32 %v9221_v26, %v7838_v37  ;;  %v6297_v33 = vmul.f32 %v6291_v25, %v7876_v16  ;;  %v6198_v13 = vld [vmem:[#allocation3 + $0x18] sm:$0xf]  ;;  %v6350_v16 = vrot.slane %v9303_v2, 4  ;;  %v6293_v15 = vld [vmem:[#allocation3 + $0x28] sm:$0xf] }
0x1095   : > { %6450 = vrot.lane.b32.xlu0 %v6441_v52, %s9718_s0  ;;  %v6204_v34 = vmul.f32 %v6198_v13, %v7895_v44  ;;  %v6256_v43 = vrot.slane %v9337_v54, 4  ;;  %v6147_v59 = vld [vmem:[#allocation3 + $0x18] sm:$0xf] }
0x1096   : > { %6143 = vst [vmem:[#allocation4 + $0x18] sm:$0xf] %v6139_v61  ;;  %v6348_v35 = vrot.slane %v9257_v20, 4  ;;  %v6479_v61 = vld [vmem:[#allocation3 + $0x28] sm:$0xf] }
0x1097   : > { %6306 = vrot.lane.b32.xlu1 %v6294_v56, %s9704_s2  ;;  %v6299_v56 = vmul.f32 %v6293_v15, %v9772_v60  ;;  %v6292_v60 = vld [vmem:[#allocation3 + $0x20] sm:$0xf]  ;;  %v6242_v15 = vld [vmem:[#allocation3 + $0x28] sm:$0xf] }
0x1099   : > { %6403 = vrot.lane.b32.xlu0 %v6389_v24, %s9744_s12  ;;  %v6200_v24 = vld [vmem:[#allocation3 + $0x28] sm:$0xf] }
0x109a   : > { %v6206_v51 = vmul.f32 %v6200_v24, %v9773_v41  ;;  %v6298_v41 = vmul.f32 %v6292_v60, %v9914_v23  ;;  %v6335_v23 = vld [vmem:[#allocation3 + $0x28] sm:$0xf]  ;;  %v6153_v24 = vmul.f32 %v6147_v59, %v9918_v39 }
0x109b   : > { %6494 = vrot.lane.b32.xlu1 %v6481_v28, %s9715_s28  ;;  %v6485_v28 = vmul.f32 %v6479_v61, %v7836_v53  ;;  %v6428_v53 = vld [vmem:[#allocation3 + $0x28] sm:$0xf] }
0x109d   : > { %6357 = vrot.lane.b32.xlu0 %v6348_v35, %s9710_s29 }
0x109f   : > { %6401 = vrot.lane.b32.xlu1 %v6388_v49, %s9744_s12  ;;  %v6426_v49 = vld [vmem:[#allocation3 + $0x18] sm:$0xf] }
0x10a1   : > { %6310 = vrot.lane.b32.xlu0 %v6296_v40, %s9704_s2  ;;  %v6385_v40 = vld [vmem:[#allocation3 + $0x20] sm:$0xf] }
0x10a2   : > { %v6391_v48 = vmul.f32 %v6385_v40, %v9912_v45  ;;  %v6152_v40 = vmul.f32 %v9226_v55, %v9919_v17 }
0x10a3   : > { %6308 = vrot.lane.b32.xlu1 %v6295_v58, %s9704_s2  ;;  %v6478_v58 = vld [vmem:[#allocation3 + $0x20] sm:$0xf] }
0x10a4   : > { %v6484_v57 = vmul.f32 %v6478_v58, %v9910_v42 }
0x10a5   : > { %6264 = vrot.lane.b32.xlu0 %v6255_v47, %s9713_s30 }
0x10a7   : > { %6215 = vrot.lane.b32.xlu1 %v6202_v8, %s9707_s9  ;;  %v6432_v8 = vmul.f32 %v6426_v49, %v7830_v29  ;;  %v6199_v29 = vld [vmem:[#allocation3 + $0x20] sm:$0xf] }
0x10a9   : > { %6217 = vrot.lane.b32.xlu0 %v6203_v7, %s9707_s9  ;;  %v6333_v7 = vld [vmem:[#allocation3 + $0x18] sm:$0xf] }
0x10aa   : > { %v6339_v25 = vmul.f32 %v6333_v7, %v7838_v37  ;;  %v6205_v37 = vmul.f32 %v6199_v29, %v9916_v1  ;;  %v6341_v1 = vmul.f32 %v6335_v23, %v7840_v38  ;;  %v6149_v38 = vld [vmem:[#allocation3 + $0x28] sm:$0xf] }
0x10ab   : > { %6405 = vrot.lane.b32.xlu1 %v6390_v9, %s9744_s12  ;;  %v6444_v9 = vrot.slane %v6432_v8, 4  ;;  %v6155_v49 = vmul.f32 %v6149_v38, %v9919_v17 }
0x10ac   : > { %v6351_v13 = vrot.slane %v6339_v25, 4 }
0x10ad   : > { %6498 = vrot.lane.b32.xlu0 %v6483_v5, %s9715_s28  ;;  %v6240_v5 = vld [vmem:[#allocation3 + $0x18] sm:$0xf]  ;;  %v6445_v45 = vsel %vm888_vm0, %v6441_v52, %v6444_v9  ;;  %v6334_v52 = vld [vmem:[#allocation3 + $0x20] sm:$0xf] }
0x10ae   : > { %v6246_v42 = vmul.f32 %v6240_v5, %v9909_v32  ;;  %v6340_v61 = vmul.f32 %v6334_v52, %v9913_v36  ;;  %v6241_v36 = vld [vmem:[#allocation3 + $0x20] sm:$0xf] }
0x10af   : > { %6312 = vrot.lane.b32.xlu1 %v6297_v33, %s9704_s2  ;;  %v6434_v33 = vmul.f32 %v6428_v53, %v7832_v31  ;;  %v6352_v31 = vsel %vm888_vm0, %v6348_v35, %v6351_v13  ;;  %v6247_v2 = vmul.f32 %v6241_v36, %v9915_v27  ;;  %v6151_v27 = vmul.f32 %v9210_v30, %v9917_v14 }
0x10b1   : > { %6454 = vrot.lane.b32.xlu0 %v6443_v12, %s9718_s0  ;;  %v6448_v63 = vrot.slane %v6434_v33, 4  ;;  %v6260_v58 = vrot.slane %v6247_v2, 4 }
0x10b3   : > { %6219 = vrot.lane.b32.xlu1 %v6204_v34, %s9707_s9  ;;  %v6427_v34 = vld [vmem:[#allocation3 + $0x20] sm:$0xf]  ;;  %v6449_v32 = vsel %vm888_vm0, %v6443_v12, %v6448_v63  ;;  %v6248_v12 = vmul.f32 %v6242_v15, %v7874_v50  ;;  %v6150_v50 = vmul.f32 %v9221_v26, %v9918_v39  ;;  %v6261_v55 = vsel %vm888_vm0, %v6256_v43, %v6260_v58 }
0x10b4   : > { %v6433_v3 = vmul.f32 %v6427_v34, %v9911_v19  ;;  %v6201_v19 = vmul.f32 %v9221_v26, %v7895_v44 }
0x10b5   : > { %6361 = vrot.lane.b32.xlu0 %v6350_v16, %s9710_s29  ;;  %v6162_v26 = vrot.slane %v6150_v50, 4 }
0x10b6   : > { %v6446_v35 = vrot.slane %v6433_v3, 4 }
0x10b7   : > { %6452 = vrot.lane.b32.xlu1 %v6442_v4, %s9718_s0 }
0x10b8   : > { %v6447_v11 = vsel %vm888_vm0, %v6442_v4, %v6446_v35  ;;  %v6165_v4 = vrot.slane %v6153_v24, 4 }
0x10b9   : > { %6268 = vrot.lane.b32.xlu0 %v6257_v18, %s9713_s30 }
0x10ba   : > { %v6166_v10 = vsel %vm888_vm0, %v6162_v26, %v6165_v4 }
0x10bb   : > { %6359 = vrot.lane.b32.xlu1 %v6349_v21, %s9710_s29 }
0x10bd   : > { %6409 = vrot.lane.b32.xlu0 %v6392_v0, %s9744_s12  ;;  %v6258_v0 = vrot.slane %v6246_v42, 4 }
0x10bf   : > { %6266 = vrot.lane.b32.xlu1 %v6256_v43, %s9713_s30  ;;  %v6259_v20 = vsel %vm888_vm0, %v6255_v47, %v6258_v0  ;;  %v6353_v47 = vrot.slane %v6340_v61, 4 }
0x10c1   : > { %6316 = vrot.lane.b32.xlu0 %v6299_v56, %s9704_s2  ;;  %v6355_v56 = vrot.slane %v6341_v1, 4  ;;  %v6354_v22 = vsel %vm888_vm0, %v6349_v21, %v6353_v47  ;;  %v6164_v21 = vrot.slane %v6152_v40, 4 }
0x10c3   : > { %6502 = vrot.lane.b32.xlu1 %v6485_v28, %s9715_s28  ;;  %v6356_v44 = vsel %vm888_vm0, %v6350_v16, %v6355_v56  ;;  %v6262_v28 = vrot.slane %v6248_v12, 4  ;;  %v6148_v16 = vld [vmem:[#allocation3 + $0x20] sm:$0xf] }
0x10c4   : > { %v6154_v8 = vmul.f32 %v6148_v16, %v9917_v14 }
0x10c5   : > { %6223 = vrot.lane.b32.xlu0 %v6206_v51, %s9707_s9  ;;  %v6263_v39 = vsel %vm888_vm0, %v6257_v18, %v6262_v28  ;;  %v6169_v51 = vrot.slane %v6155_v49, 4  ;;  %v6163_v18 = vrot.slane %v6151_v27, 4 }
0x10c6   : > { %v6167_v6 = vrot.slane %v6154_v8, 4 }
0x10c7   : > { %6407 = vrot.lane.b32.xlu1 %v6391_v48, %s9744_s12  ;;  %v6170_v17 = vsel %vm888_vm0, %v6164_v21, %v6169_v51 }
0x10c8   : > { %v6168_v48 = vsel %vm888_vm0, %v6163_v18, %v6167_v6 }
0x10c9   : > { %6500 = vrot.lane.b32.xlu0 %v6484_v57, %s9715_s28  ;;  %s9999_s28 = sld [smem:[#allocation45_spill]] }
0x10cb   : > { %6314 = vrot.lane.b32.xlu1 %v6298_v41, %s9704_s2 }
0x10cd   : > { %6456 = vrot.lane.b32.xlu0 %v6445_v45, %s9718_s0 }
0x10cf   : > { %6221 = vrot.lane.b32.xlu1 %v6205_v37, %s9707_s9 }
0x10d1   : > { %6363 = vrot.lane.b32.xlu0 %v6352_v31, %s9710_s29 }
0x10d3   : > { %6460 = vrot.lane.b32.xlu1 %v6449_v32, %s9718_s0 }
0x10d5   : > { %6270 = vrot.lane.b32.xlu0 %v6259_v20, %s9713_s30 }
0x10d7   : > { %6213 = vrot.lane.b32.xlu1 %v6201_v19, %s9707_s9  ;;  %s9975_s9 = sld [smem:[#allocation46_spill]] }
0x10d9   : > { %6458 = vrot.lane.b32.xlu0 %v6447_v11, %s9718_s0 }
0x10db   : > { %6367 = vrot.lane.b32.xlu1 %v6356_v44, %s9710_s29 }
0x10dd   : > { %6365 = vrot.lane.b32.xlu0 %v6354_v22, %s9710_s29  ;;  %v6545_v14 = vld [vmem:[%s9975_s9] sm:$0xf] }
0x10df   : > { %6274 = vrot.lane.b32.xlu1 %v6263_v39, %s9713_s30 }
0x10e1   : > { %6177 = vrot.lane.b32.xlu0 %v6166_v10, %s9720_s5 }
0x10e3   : > { %6181 = vrot.lane.b32.xlu1 %v6170_v17, %s9720_s5 }
0x10e5   : > { %6272 = vrot.lane.b32.xlu0 %v6261_v55, %s9713_s30  ;;  %s10000_s30 = sld [smem:[#allocation47_spill]] }
0x10e7   : > { %6173 = vrot.lane.b32.xlu1 %v6163_v18, %s9720_s5 }
0x10e9   : > { %6179 = vrot.lane.b32.xlu0 %v6168_v48, %s9720_s5 }
0x10eb   : > { %6171 = vrot.lane.b32.xlu1 %v6162_v26, %s9720_s5  ;;  %s848_s6 = scalar_lea.vmem %s10000_s30, %s6826_s23 }
0x10ed   : > { %6175 = vrot.lane.b32.xlu0 %v6164_v21, %s9720_s5 }
0x10f1   : > { %6548 = vperm.xlu0 %7156, %v6545_v14  }
0x1101   : > { %v6493_v30 = vpop.permute.xlu1 %6492 }
0x1103   : > { %v6497_v54 = vpop.permute.xlu0 %6496 }
0x1105   : > { %v6400_v43 = vpop.permute.xlu1 %6399 }
0x1107   : > { %v6451_v7 = vpop.permute.xlu0 %6450 }
0x1109   : > { %v6307_v60 = vpop.permute.xlu1 %6306 }
0x110b   : > { %v6404_v57 = vpop.permute.xlu0 %6403 }
0x110d   : > { %v6495_v53 = vpop.permute.xlu1 %6494 }
0x110e   : > { %v9432_v9 = vsel %vm2511_vm6, %v6493_v30, %v6495_v53  ;;  %v9435_v25 = vsel %vm2511_vm6, %v6495_v53, %v6497_v54 }
0x110f   : > { %6512 = vst [vmem:[#allocation4 + $0xc0] sm:$0xff] %v9432_v9  ;;  %6513 = vst [vmem:[#allocation4 + $0xc8] sm:$0xff] %v9435_v25  ;;  %v6358_v41 = vpop.permute.xlu0 %6357 }
0x1111   : > { %v6402_v5 = vpop.permute.xlu1 %6401 }
0x1112   : > { %v9440_v29 = vsel %vm9976_vm15, %v6400_v43, %v6402_v5  ;;  %v9443_v33 = vsel %vm9977_vm12, %v6402_v5, %v6404_v57  ;;  %vm9987_vm15 = vmmov %vm9978_vm11 }
0x1113   : > { %6419 = vst [vmem:[#allocation4 + $0x90] sm:$0xff] %v9440_v29  ;;  %6420 = vst [vmem:[#allocation4 + $0x98] sm:$0xff] %v9443_v33  ;;  %v6311_v45 = vpop.permute.xlu0 %6310 }
0x1114   : > { %vm9988_vm12 = vmmov %vm9967_vm5 }
0x1115   : > { %v6309_v13 = vpop.permute.xlu1 %6308 }
0x1116   : > { %v9448_v42 = vsel %vm9978_vm11, %v6307_v60, %v6309_v13  ;;  %v9451_v37 = vsel %vm9979_vm14, %v6309_v13, %v6311_v45  ;;  %vm9989_vm11 = vmmov %vm9967_vm5 }
0x1117   : > { %6326 = vst [vmem:[#allocation4 + $0x60] sm:$0xff] %v9448_v42  ;;  %6327 = vst [vmem:[#allocation4 + $0x68] sm:$0xff] %v9451_v37  ;;  %v6265_v34 = vpop.permute.xlu0 %6264 }
0x1118   : > { %vm9991_vm14 = vmmov %vm9981_vm3 }
0x1119   : > { %v6216_v63 = vpop.permute.xlu1 %6215 }
0x111b   : > { %v6218_v23 = vpop.permute.xlu0 %6217 }
0x111c   : > { %v9456_v31 = vsel %vm9967_vm5, %v6216_v63, %v6218_v23 }
0x111d   : > { %6234 = vst [vmem:[#allocation4 + $0x38] sm:$0xff] %v9456_v31  ;;  %v6406_v0 = vpop.permute.xlu1 %6405 }
0x111f   : > { %v6499_v3 = vpop.permute.xlu0 %6498 }
0x1121   : > { %v6313_v52 = vpop.permute.xlu1 %6312 }
0x1123   : > { %v6455_v32 = vpop.permute.xlu0 %6454 }
0x1125   : > { %v6220_v1 = vpop.permute.xlu1 %6219 }
0x1127   : > { %v6362_v15 = vpop.permute.xlu0 %6361 }
0x1129   : > { %v6453_v20 = vpop.permute.xlu1 %6452 }
0x112a   : > { %v6462_v35 = vsel %vm9980_vm10, %v6451_v7, %v6453_v20  ;;  %v6463_v61 = vsel %vm9981_vm3, %v6453_v20, %v6455_v32  ;;  %vm9995_vm10 = vcmask 1039360  }
0x112b   : > { %6470 = vst [vmem:[#allocation4 + $0xa0] sm:$0xf0] %v6462_v35  ;;  %6471 = vst [vmem:[#allocation4 + $0xa8] sm:$0xf0] %v6463_v61  ;;  %v6269_v19 = vpop.permute.xlu0 %6268  ;;  %v6516_v61 = vld [vmem:[%s9999_s28] sm:$0xf] }
0x112d   : > { %v6360_v59 = vpop.permute.xlu1 %6359 }
0x112e   : > { %v6369_v56 = vsel %vm2386_vm8, %v6358_v41, %v6360_v59  ;;  %v6370_v12 = vsel %vm2386_vm8, %v6360_v59, %v6362_v15 }
0x112f   : > { %6377 = vst [vmem:[#allocation4 + $0x70] sm:$0xf0] %v6369_v56  ;;  %6378 = vst [vmem:[#allocation4 + $0x78] sm:$0xf0] %v6370_v12  ;;  %v6410_v38 = vpop.permute.xlu0 %6409 }
0x1131   : > { %v6267_v11 = vpop.permute.xlu1 %6266 }
0x1132   : > { %v6276_v47 = vsel %vm9982_vm1, %v6265_v34, %v6267_v11  ;;  %v6277_v24 = vsel %vm9983_vm4, %v6267_v11, %v6269_v19 }
0x1133   : > { %6284 = vst [vmem:[#allocation4 + $0x40] sm:$0xf0] %v6276_v47  ;;  %6285 = vst [vmem:[#allocation4 + $0x48] sm:$0xf0] %v6277_v24  ;;  %v6317_v36 = vpop.permute.xlu0 %6316 }
0x1135   : > { %v6503_v44 = vpop.permute.xlu1 %6502 }
0x1137   : > { %v6224_v28 = vpop.permute.xlu0 %6223 }
0x1139   : > { %v6408_v50 = vpop.permute.xlu1 %6407 }
0x113a   : > { %v6413_v49 = vsel %vm9984_vm2, %v6406_v0, %v6408_v50  ;;  %v6414_v22 = vsel %vm9985_vm7, %v6408_v50, %v6410_v38 }
0x113b   : > { %6421 = vst [vmem:[#allocation4 + $0xa0] sm:$0xf] %v6413_v49  ;;  %6422 = vst [vmem:[#allocation4 + $0xa8] sm:$0xf] %v6414_v22  ;;  %v6501_v4 = vpop.permute.xlu0 %6500 }
0x113c   : > { %v6506_v40 = vsel %vm2511_vm6, %v6499_v3, %v6501_v4  ;;  %v6507_v2 = vsel %vm2511_vm6, %v6501_v4, %v6503_v44  ;;  %vm9990_vm6 = vmmov %vm9967_vm5 }
0x113d   : > { %6514 = vst [vmem:[#allocation4 + $0xd0] sm:$0xf] %v6506_v40  ;;  %6515 = vst [vmem:[#allocation4 + $0xd8] sm:$0xf] %v6507_v2  ;;  %v6315_v16 = vpop.permute.xlu1 %6314 }
0x113e   : > { %v6320_v39 = vsel %vm9986_vm13, %v6313_v52, %v6315_v16  ;;  %v6321_v26 = vsel %vm9987_vm15, %v6315_v16, %v6317_v36  ;;  %vm9992_vm5 = vmmov %vm9981_vm3 }
0x113f   : > { %6328 = vst [vmem:[#allocation4 + $0x70] sm:$0xf] %v6320_v39  ;;  %6329 = vst [vmem:[#allocation4 + $0x78] sm:$0xf] %v6321_v26  ;;  %v6457_v51 = vpop.permute.xlu0 %6456 }
0x1140   : > { %vm9996_vm3 = vmmov %vm9995_vm10 }
0x1141   : > { %v6222_v10 = vpop.permute.xlu1 %6221 }
0x1142   : > { %v6227_v21 = vsel %vm9988_vm12, %v6220_v1, %v6222_v10  ;;  %v6228_v58 = vsel %vm9989_vm11, %v6222_v10, %v6224_v28  ;;  %v6538_v7 = vld [vmem:[#allocation4 + $0xa8] sm:$0xff]  ;;  %v6537_v57 = vld [vmem:[#allocation4 + $0xa0] sm:$0xff] }
0x1143   : > { %6235 = vst [vmem:[#allocation4 + $0x40] sm:$0xf] %v6227_v21  ;;  %6236 = vst [vmem:[#allocation4 + $0x48] sm:$0xf] %v6228_v58  ;;  %v6364_v8 = vpop.permute.xlu0 %6363 }
0x1144   : > { %v6544_v27 = vld [vmem:[#allocation4 + $0xd8] sm:$0xf]  ;;  %v6543_v17 = vld [vmem:[#allocation4 + $0xd0] sm:$0xf] }
0x1145   : > { %v6461_v55 = vpop.permute.xlu1 %6460  ;;  %6819 = vmatprep.subr.msk.mxu1 %vm888_vm0, %v6544_v27 }
0x1146   : > { %6820 = vmatpush1.msk.msra.mxu1 %vm888_vm0, %v6543_v17  ;;  %v6532_v5 = vld [vmem:[#allocation4 + $0x78] sm:$0xff]  ;;  %v6531_v13 = vld [vmem:[#allocation4 + $0x70] sm:$0xff]  ;;  %vm9993_vm0 = vmmov %vm9982_vm1 }
0x1147   : > { %6566 = vmatprep.subr.mxu1 %v9435_v25  ;;  %v6271_v6 = vpop.permute.xlu0 %6270  ;;  %vm9997_vm1 = vmmov %vm9996_vm3 }
0x1148   : > { %6567 = vmatpush1.msra.mxu1 %v9432_v9  ;;  %vm9998_vm4 = vmmov %vm9997_vm1 }
0x1149   : > { %v6214_v18 = vpop.permute.xlu1 %6213 }
0x114a   : > { %v6225_v48 = vsel %vm9990_vm6, %v6214_v18, %v6216_v63  ;;  %v6525_v3 = vld [vmem:[#allocation4 + $0x40] sm:$0xff] }
0x114b   : > { %6233 = vst [vmem:[#allocation4 + $0x30] sm:$0xff] %v6225_v48  ;;  %v6459_v14 = vpop.permute.xlu0 %6458 }
0x114c   : > { %v6464_v30 = vsel %vm9991_vm14, %v6457_v51, %v6459_v14  ;;  %v6465_v54 = vsel %vm9992_vm5, %v6459_v14, %v6461_v55 }
0x114d   : > { %6472 = vst [vmem:[#allocation4 + $0xb0] sm:$0xff] %v6464_v30  ;;  %6473 = vst [vmem:[#allocation4 + $0xb8] sm:$0xff] %v6465_v54  ;;  %v6368_v43 = vpop.permute.xlu1 %6367  ;;  %6568 = vmatprep.subr.mxu1 %v6465_v54 }
0x114e   : > { %6569 = vmatpush1.msra.mxu1 %v6464_v30 }
0x114f   : > { %v6366_v60 = vpop.permute.xlu0 %6365  ;;  %6570 = vmatprep.subr.mxu1 %v6538_v7 }
0x1150   : > { %v6371_v53 = vsel %vm2386_vm8, %v6364_v8, %v6366_v60  ;;  %v6372_v9 = vsel %vm2386_vm8, %v6366_v60, %v6368_v43  ;;  %6571 = vmatpush1.msra.mxu1 %v6537_v57  ;;  %vm9994_vm8 = vmmov %vm9993_vm0 }
0x1151   : > { %6379 = vst [vmem:[#allocation4 + $0x80] sm:$0xff] %v6371_v53  ;;  %6380 = vst [vmem:[#allocation4 + $0x88] sm:$0xff] %v6372_v9  ;;  %v6275_v25 = vpop.permute.xlu1 %6274  ;;  %6572 = vmatprep.subr.mxu1 %v9443_v33  ;;  %v6526_v33 = vld [vmem:[#allocation4 + $0x48] sm:$0xff] }
0x1152   : > { %6573 = vmatpush1.msra.mxu1 %v9440_v29 }
0x1153   : > { %v6178_v41 = vpop.permute.xlu0 %6177  ;;  %6574 = vmatprep.subr.mxu1 %v6372_v9 }
0x1154   : > { %6575 = vmatpush1.msra.mxu1 %v6371_v53 }
0x1155   : > { %v6182_v45 = vpop.permute.xlu1 %6181  ;;  %6576 = vmatprep.subr.mxu1 %v6532_v5 }
0x1156   : > { %6577 = vmatpush1.msra.mxu1 %v6531_v13 }
0x1157   : > { %v6273_v34 = vpop.permute.xlu0 %6272  ;;  %6578 = vmatprep.subr.mxu1 %v9451_v37 }
0x1158   : > { %v6278_v63 = vsel %vm9993_vm0, %v6271_v6, %v6273_v34  ;;  %v6279_v23 = vsel %vm9994_vm8, %v6273_v34, %v6275_v25  ;;  %6579 = vmatpush1.msra.mxu1 %v9448_v42 }
0x1159   : > { %6286 = vst [vmem:[#allocation4 + $0x50] sm:$0xff] %v6278_v63  ;;  %6287 = vst [vmem:[#allocation4 + $0x58] sm:$0xff] %v6279_v23  ;;  %v6174_v29 = vpop.permute.xlu1 %6173  ;;  %6580 = vmatprep.subr.mxu1 %v6279_v23 }
0x115a   : > { %6581 = vmatpush1.msra.mxu1 %v6278_v63 }
0x115b   : > { %v6180_v0 = vpop.permute.xlu0 %6179  ;;  %6582 = vmatprep.subr.mxu1 %v6526_v33 }
0x115c   : > { %v6185_v52 = vsel %vm9995_vm10, %v6178_v41, %v6180_v0  ;;  %v6186_v32 = vsel %vm9996_vm3, %v6180_v0, %v6182_v45  ;;  %6583 = vmatpush1.msra.mxu1 %v6525_v3 }
0x115d   : > { %6193 = vst [vmem:[#allocation4 + $0x20] sm:$0xff] %v6185_v52  ;;  %6194 = vst [vmem:[#allocation4 + $0x28] sm:$0xff] %v6186_v32  ;;  %v6172_v37 = vpop.permute.xlu1 %6171  ;;  %6584 = vmatprep.subr.mxu1 %v9456_v31 }
0x115e   : > { %v6183_v42 = vsel %vm9997_vm1, %v6172_v37, %v6174_v29  ;;  %6585 = vmatpush1.msra.mxu1 %v6225_v48 }
0x115f   : > { %6191 = vst [vmem:[#allocation4 + $0x10] sm:$0xf0] %v6183_v42  ;;  %v6176_v1 = vpop.permute.xlu0 %6175  ;;  %6586 = vmatprep.subr.mxu1 %v6186_v32 }
0x1160   : > { %v6184_v15 = vsel %vm9998_vm4, %v6174_v29, %v6176_v1  ;;  %6587 = vmatpush1.msra.mxu1 %v6185_v52 }
0x1161   : > { %6192 = vst [vmem:[#allocation4 + $0x18] sm:$0xf0] %v6184_v15 }
0x1166   : > { %v6519_v35 = vld [vmem:[#allocation4 + $0x10] sm:$0xff] }
0x1168   : > { %v6520_v20 = vld [vmem:[#allocation4 + $0x18] sm:$0xff] }
0x1169   : > { %6588 = vmatprep.subr.mxu1 %v6520_v20 }
0x116a   : > { %6589 = vmatpush1.msra.mxu1 %v6519_v35 }
0x116b   : > { %6590 = vmatprep.subr.mxu1 %v9217_v46 }
0x116c   : > { %6591 = vmatpush1.msra.mxu1 %v9244_v62  ;;  %v6549_v19 = vpop.permute.xlu0 %6548 }
0x116d   : > { %6821 = vmatmul.mubr.msk.f32.vlgmr.msra.gmra.mxu1 %vm6016_vm9, %v6516_v61 }
0x122d   : > { %v6626_v31 = vpop.f32.mrf.mxu1 }
0x122e   : > { %v6627_v56 = vadd.f32 %v6626_v31, %v6549_v19 }
0x122f   : > { %v6628_v59 = vpop.f32.mrf.mxu1 }
0x1230   : > { %v6629_v12 = vadd.f32 %v6628_v59, %v6549_v19 }
0x1232   : > { %v6633_v38 = vcombine.low %v6627_v56, %v6629_v12 }
0x1234   : > { %6635 = vst [vmem:[%s848_s6] sm:$0xff] %v6633_v38 }
0x1235 PF: > { %s10001_s4 = sld [smem:[#allocation6_spill]] }
0x123b   : > { %s36_s27 = sadd.s32 1, %s10001_s4  }
0x123c   : > { %p33_p4 = scmp.ge.s32.totalorder %s36_s27, 4  }
0x123e   :  { %35 = sbr.rel (!%p33_p4) target bundleno = 24 (0x18), region = 163 }

</bundles_post_ra>
